<compile_context>
chip_gen: v5e
topology: v5e:2x2
jax: 0.10.0
libtpu: 0.0.40
codegen_flags: <defaults>
</compile_context>

<pallas_src>
import functools

import jax
import jax.numpy as jnp
from jax import lax
from jax.experimental import pallas as pl
from jax.experimental.pallas import tpu as pltpu  # noqa: F401  (TPU backend assumed)

# ----------------------------- config (small shapes) -----------------------------
B = 2                     # batch
IMG_C, IMG_H, IMG_W = 4, 16, 16
PATCH = 8
N_PATCH = (IMG_H // PATCH) * (IMG_W // PATCH)          # 4
PATCH_DIM = IMG_C * PATCH * PATCH                      # 256
D_ENC = 64                # biomedclip feature_dim == qformer encoder_width
NQ = 8                    # number of Q-Former query tokens
DQ = 32                   # qformer hidden_size
FQ = 64                   # qformer ffn dim
DH = 64                   # biogpt hidden_size (!= DQ => projection exists)
HD, HDD = 4, 16           # decoder heads / head dim
FD = 128                  # decoder ffn dim
VOCAB = 128
T_PROMPT = 4              # prompt length (synthetic token ids)
MAX_NEW = 4               # max_new_tokens (small demo value)
S_PREFIX = NQ + T_PROMPT  # 12
L_MAX = S_PREFIX + MAX_NEW  # 16
BL = B * L_MAX              # 32 (flattened batch*sequence rows)

DTYPE = jnp.float32
MXU_DTYPE = jnp.bfloat16    # MXU operand dtype (f32 accumulation; VPU/EUP stay f32)
NEG_INF = -1e9


# ----------------------------- in-kernel math helpers -----------------------------
def _mxu_dot(a, b):
    """MXU matmul: bf16 operands, f32 accumulation."""
    return jnp.dot(a.astype(MXU_DTYPE), b.astype(MXU_DTYPE),
                   preferred_element_type=jnp.float32)


def _gelu(x):
    # tanh-approximation GELU (VPU/EUP friendly).  PyTorch default is erf-GELU.
    return 0.5 * x * (1.0 + jnp.tanh(0.7978845608028654 * (x + 0.044715 * x * x * x)))


def _layernorm(x, g, b, eps=1e-5):
    mu = jnp.mean(x, axis=-1, keepdims=True)
    var = jnp.mean(jnp.square(x - mu), axis=-1, keepdims=True)
    return (x - mu) * lax.rsqrt(var + eps) * g + b


# ----------------------------- kernel 1: fused image encoder -----------------------------
def _encoder_kernel(patch_ref, w_ref, b_ref, g_ref, beta_ref, o_ref):
    f32 = jnp.float32
    x = patch_ref[...].astype(f32)                                   # (B*NP, PATCH_DIM)
    y = _mxu_dot(x, w_ref[...]) + b_ref[...].astype(f32)             # (B*NP, D_ENC)
    # mean-pool over patches via a (B, B*NP) averaging matrix (stays 2-D, MXU)
    rows = lax.broadcasted_iota(jnp.int32, (B, B * N_PATCH), 0)
    cols = lax.broadcasted_iota(jnp.int32, (B, B * N_PATCH), 1)
    pool = ((cols >= rows * N_PATCH) & (cols < (rows + 1) * N_PATCH)).astype(f32)
    pool = pool * (1.0 / N_PATCH)
    feat = _mxu_dot(pool, y)                                         # (B, D_ENC)
    o_ref[...] = _layernorm(feat, g_ref[...].astype(f32),
                            beta_ref[...].astype(f32)).astype(o_ref.dtype)


def encode_image(p, image):
    # NCHW -> (B*N_PATCH, PATCH_DIM), channel-major flattening of each patch (glue).
    b, c, h, w = image.shape
    x = image.reshape(b, c, h // PATCH, PATCH, w // PATCH, PATCH)
    x = x.transpose(0, 2, 4, 1, 3, 5).reshape(b * N_PATCH, PATCH_DIM)
    return pl.pallas_call(
        _encoder_kernel,
        out_shape=jax.ShapeDtypeStruct((b, D_ENC), DTYPE),
    )(x, p["enc_w"], p["enc_b"], p["enc_ln_g"], p["enc_ln_b"])


# ----------------------------- kernel 2: fused Q-Former + projection -----------------------------
def _qformer_kernel(feat_ref, qt_ref, wv_ref, bv_ref, wo_ref, bo_ref,
                    ln1g_ref, ln1b_ref, w1_ref, b1_ref, w2_ref, b2_ref,
                    ln2g_ref, ln2b_ref, pw_ref, pb_ref, o_ref):
    f32 = jnp.float32
    feat = feat_ref[...].astype(f32)                                 # (B, D_ENC)
    # image_features.unsqueeze(1) => a single key/value token: softmax over one key
    # is identically 1 for every query/head, so cross-attn output == V projection.
    # (Q/K projections cannot affect the result; they are left out of the compute.)
    v = _mxu_dot(feat, wv_ref[...]) + bv_ref[...].astype(f32)        # (B, DQ)
    vo = _mxu_dot(v, wo_ref[...]) + bo_ref[...].astype(f32)          # (B, DQ)

    # replicate learned queries over batch and vo over queries, staying 2-D
    # (row r = b*NQ + n) via selection matmuls.
    rows = lax.broadcasted_iota(jnp.int32, (B * NQ, NQ), 0)
    cols = lax.broadcasted_iota(jnp.int32, (B * NQ, NQ), 1)
    eq = rows == cols
    for bb in range(1, B):
        eq = jnp.logical_or(eq, rows == cols + bb * NQ)
    rep_q = eq.astype(f32)                                           # (B*NQ, NQ)
    q = _mxu_dot(rep_q, qt_ref[...])                                 # (B*NQ, DQ)

    rows2 = lax.broadcasted_iota(jnp.int32, (B * NQ, B), 0)
    cols2 = lax.broadcasted_iota(jnp.int32, (B * NQ, B), 1)
    rep_b = ((rows2 >= cols2 * NQ) & (rows2 < (cols2 + 1) * NQ)).astype(f32)
    attn = _mxu_dot(rep_b, vo)                                       # (B*NQ, DQ)

    x = _layernorm(q + attn, ln1g_ref[...].astype(f32), ln1b_ref[...].astype(f32))
    f = _gelu(_mxu_dot(x, w1_ref[...]) + b1_ref[...].astype(f32))
    f = _mxu_dot(f, w2_ref[...]) + b2_ref[...].astype(f32)
    x = _layernorm(x + f, ln2g_ref[...].astype(f32), ln2b_ref[...].astype(f32))
    # qformer_output -> biogpt_input projection (DQ != DH), fused here
    o_ref[...] = (_mxu_dot(x, pw_ref[...]) + pb_ref[...].astype(f32)).astype(o_ref.dtype)


def qformer_project(p, image_features):
    out = pl.pallas_call(
        _qformer_kernel,
        out_shape=jax.ShapeDtypeStruct((B * NQ, DH), DTYPE),
    )(image_features, p["query_tokens"],
      p["qf_wv"], p["qf_bv"], p["qf_wo"], p["qf_bo"],
      p["qf_ln1_g"], p["qf_ln1_b"], p["qf_w1"], p["qf_b1"],
      p["qf_w2"], p["qf_b2"], p["qf_ln2_g"], p["qf_ln2_b"],
      p["proj_w"], p["proj_b"])
    return out.reshape(B, NQ, DH)


# ----------------------------- kernel 3: fused greedy generation -----------------------------
def _generate_kernel(embs0_ref, pos_ref, static_bias_ref, kpos_ref,
                     lag_ref, lab_ref, wqkv_ref, bqkv_ref, wo_ref, bo_ref,
                     lfg_ref, lfb_ref, w1_ref, b1_ref, w2_ref, b2_ref,
                     lng_ref, lnb_ref, lmw_ref, lmb_ref, temb_ref, out_ref):
    f32 = jnp.float32
    scale = 1.0 / float(HDD) ** 0.5

    pos = pos_ref[...].astype(f32)                    # (BL, DH) positional, batch-tiled
    static_bias = static_bias_ref[...].astype(f32)    # (BL, BL) block-diag + causal
    kpos = kpos_ref[...]                              # (1, BL) key position within batch
    lag = lag_ref[...].astype(f32); lab = lab_ref[...].astype(f32)
    wqkv = wqkv_ref[...]; bqkv = bqkv_ref[...].astype(f32)
    wo = wo_ref[...]; bo = bo_ref[...].astype(f32)
    lfg = lfg_ref[...].astype(f32); lfb = lfb_ref[...].astype(f32)
    w1 = w1_ref[...]; b1 = b1_ref[...].astype(f32)
    w2 = w2_ref[...]; b2 = b2_ref[...].astype(f32)
    lng = lng_ref[...].astype(f32); lnb = lnb_ref[...].astype(f32)
    lm_w = lmw_ref[...]; lm_b = lmb_ref[...].astype(f32)
    tok_emb = temb_ref[...]

    vcol = lax.broadcasted_iota(jnp.int32, (B, VOCAB), 1)
    sel_rows = lax.broadcasted_iota(jnp.int32, (B, BL), 0)   # batch id
    sel_cols = lax.broadcasted_iota(jnp.int32, (B, BL), 1)   # flattened position
    put_rows = lax.broadcasted_iota(jnp.int32, (BL, B), 0)
    put_cols = lax.broadcasted_iota(jnp.int32, (BL, B), 1)
    slot_col = lax.broadcasted_iota(jnp.int32, (1, MAX_NEW), 1)

    def step(i, carry):
        embs, gen = carry
        cur = S_PREFIX + i                            # valid sequence length so far
        h = embs + pos                                # (BL, DH)

        # --- self-attention block (pre-norm), all heads in one pass ---
        xn = _layernorm(h, lag, lab)
        qkv = _mxu_dot(xn, wqkv) + bqkv               # (BL, 3*DH) fused QKV
        bias = static_bias + jnp.where(kpos < cur, 0.0, NEG_INF)     # (BL, BL)
        attn = None
        for hd in range(HD):
            s0, s1 = hd * HDD, (hd + 1) * HDD
            qh = qkv[:, s0:s1]
            kh = qkv[:, DH + s0:DH + s1]
            vh = qkv[:, 2 * DH + s0:2 * DH + s1]
            s = lax.dot_general(qh.astype(MXU_DTYPE), kh.astype(MXU_DTYPE),
                                dimension_numbers=(((1,), (1,)), ((), ())),
                                preferred_element_type=f32)          # q @ k^T, no transpose
            s = s * scale + bias
            s = s - jnp.max(s, axis=-1, keepdims=True)
            e = jnp.exp(s)
            pattn = e * pl.reciprocal(jnp.sum(e, axis=-1, keepdims=True), approx=True)
            oh = _mxu_dot(pattn, vh)                  # (BL, HDD)
            contrib = _mxu_dot(oh, wo[s0:s1, :])      # head-sliced output projection
            attn = contrib if attn is None else attn + contrib
        x = h + attn + bo

        # --- feed-forward block (pre-norm) ---
        xn = _layernorm(x, lfg, lfb)
        ffn = _mxu_dot(_gelu(_mxu_dot(xn, w1) + b1), w2) + b2
        x = x + ffn

        # --- final LN + last-token-only LM head (tied weights) ---
        xn = _layernorm(x, lng, lnb)
        sel = (sel_cols == sel_rows * L_MAX + (cur - 1)).astype(f32)  # (B, BL)
        last_h = _mxu_dot(sel, xn)                    # (B, DH) hidden at position cur-1
        logits = _mxu_dot(last_h, lm_w) + lm_b        # (B, VOCAB) lane-dense (128)

        # greedy argmax over the vocab (first index among maxima)
        mx = jnp.max(logits, axis=-1, keepdims=True)
        idx = jnp.where(logits >= mx, vcol.astype(f32), float(VOCAB))
        next_tok = jnp.min(idx, axis=-1, keepdims=True).astype(jnp.int32)   # (B, 1)

        gen = jnp.where(slot_col == i, next_tok, gen)

        # embed next token (one-hot matmul) and scatter it into row `cur` of each batch
        onehot = (vcol == next_tok).astype(f32)       # (B, VOCAB)
        new_emb = _mxu_dot(onehot, tok_emb)           # (B, DH)
        put = (put_rows == put_cols * L_MAX + cur).astype(f32)              # (BL, B)
        embs = embs + _mxu_dot(put, new_emb)
        return embs, gen

    embs0 = embs0_ref[...].astype(f32)
    gen0 = jnp.zeros((B, MAX_NEW), jnp.int32)
    _, gen = lax.fori_loop(0, MAX_NEW, step, (embs0, gen0), unroll=True)
    out_ref[...] = gen


def generate_greedy(p, query_embeddings, prompt_ids):
    b = query_embeddings.shape[0]
    # embedding lookup of the prompt ids is glue (gather), done once outside kernels
    prompt_embs = p["tok_emb"][prompt_ids]                          # (B, T, DH)
    prefix = jnp.concatenate([query_embeddings, prompt_embs], axis=1).astype(jnp.float32)
    embs0 = (jnp.zeros((b, L_MAX, DH), jnp.float32)
             .at[:, :S_PREFIX].set(prefix)
             .reshape(b * L_MAX, DH))                               # (BL, DH)
    pos2d = jnp.tile(p["pos_emb"], (b, 1)).astype(jnp.float32)      # (BL, DH)

    # static part of the attention bias: block-diagonal over batches + causal
    flat = jnp.arange(b * L_MAX)
    batch_id = flat // L_MAX
    pos_id = flat % L_MAX
    same = batch_id[:, None] == batch_id[None, :]
    causal = pos_id[None, :] <= pos_id[:, None]
    static_bias = jnp.where(same & causal, 0.0, NEG_INF).astype(jnp.float32)  # (BL, BL)
    kpos_row = pos_id[None, :].astype(jnp.int32)                              # (1, BL)

    # fused QKV weights and hoisted tied LM head (computed once per forward, not per step)
    w_qkv = jnp.concatenate([p["dec_wq"], p["dec_wk"], p["dec_wv"]], axis=1)  # (DH, 3DH)
    b_qkv = jnp.concatenate([p["dec_bq"], p["dec_bk"], p["dec_bv"]], axis=1)  # (1, 3DH)
    lm_w = p["tok_emb"].T                                                     # (DH, VOCAB)

    return pl.pallas_call(
        _generate_kernel,
        out_shape=jax.ShapeDtypeStruct((b, MAX_NEW), jnp.int32),
    )(embs0, pos2d, static_bias, kpos_row,
      p["dec_ln_attn_g"], p["dec_ln_attn_b"], w_qkv, b_qkv, p["dec_wo"], p["dec_bo"],
      p["dec_ln_ffn_g"], p["dec_ln_ffn_b"], p["dec_w1"], p["dec_b1"],
      p["dec_w2"], p["dec_b2"], p["dec_ln_f_g"], p["dec_ln_f_b"],
      lm_w, p["lm_b"], p["tok_emb"])


# ----------------------------- parameter init (deterministic) -----------------------------
def _dense(key, shape, scale=0.02):
    return (jax.random.normal(key, shape, dtype=jnp.float32) * scale).astype(DTYPE)


def init_params(key):
    ks = iter(jax.random.split(key, 64))
    p = {}
    # image encoder (BiomedCLIP stand-in)
    p["enc_w"] = _dense(next(ks), (PATCH_DIM, D_ENC))
    p["enc_b"] = jnp.zeros((1, D_ENC), DTYPE)
    p["enc_ln_g"] = jnp.ones((1, D_ENC), DTYPE)
    p["enc_ln_b"] = jnp.zeros((1, D_ENC), DTYPE)
    # Q-Former (wq/wk kept for structural parity; with a single image token they
    # cannot affect the output, so they are not consumed by the fused kernel)
    p["query_tokens"] = _dense(next(ks), (NQ, DQ))
    p["qf_wq"] = _dense(next(ks), (DQ, DQ)); p["qf_bq"] = jnp.zeros((1, DQ), DTYPE)
    p["qf_wk"] = _dense(next(ks), (D_ENC, DQ)); p["qf_bk"] = jnp.zeros((1, DQ), DTYPE)
    p["qf_wv"] = _dense(next(ks), (D_ENC, DQ)); p["qf_bv"] = jnp.zeros((1, DQ), DTYPE)
    p["qf_wo"] = _dense(next(ks), (DQ, DQ)); p["qf_bo"] = jnp.zeros((1, DQ), DTYPE)
    p["qf_ln1_g"] = jnp.ones((1, DQ), DTYPE); p["qf_ln1_b"] = jnp.zeros((1, DQ), DTYPE)
    p["qf_w1"] = _dense(next(ks), (DQ, FQ)); p["qf_b1"] = jnp.zeros((1, FQ), DTYPE)
    p["qf_w2"] = _dense(next(ks), (FQ, DQ)); p["qf_b2"] = jnp.zeros((1, DQ), DTYPE)
    p["qf_ln2_g"] = jnp.ones((1, DQ), DTYPE); p["qf_ln2_b"] = jnp.zeros((1, DQ), DTYPE)
    # qformer_output -> biogpt_input projection (DQ != DH)
    p["proj_w"] = _dense(next(ks), (DQ, DH)); p["proj_b"] = jnp.zeros((1, DH), DTYPE)
    # BioGPT decoder (1 layer, tied LM head)
    p["tok_emb"] = _dense(next(ks), (VOCAB, DH))
    p["pos_emb"] = _dense(next(ks), (L_MAX, DH))
    p["dec_ln_attn_g"] = jnp.ones((1, DH), DTYPE); p["dec_ln_attn_b"] = jnp.zeros((1, DH), DTYPE)
    p["dec_wq"] = _dense(next(ks), (DH, DH)); p["dec_bq"] = jnp.zeros((1, DH), DTYPE)
    p["dec_wk"] = _dense(next(ks), (DH, DH)); p["dec_bk"] = jnp.zeros((1, DH), DTYPE)
    p["dec_wv"] = _dense(next(ks), (DH, DH)); p["dec_bv"] = jnp.zeros((1, DH), DTYPE)
    p["dec_wo"] = _dense(next(ks), (DH, DH)); p["dec_bo"] = jnp.zeros((1, DH), DTYPE)
    p["dec_ln_ffn_g"] = jnp.ones((1, DH), DTYPE); p["dec_ln_ffn_b"] = jnp.zeros((1, DH), DTYPE)
    p["dec_w1"] = _dense(next(ks), (DH, FD)); p["dec_b1"] = jnp.zeros((1, FD), DTYPE)
    p["dec_w2"] = _dense(next(ks), (FD, DH)); p["dec_b2"] = jnp.zeros((1, DH), DTYPE)
    p["dec_ln_f_g"] = jnp.ones((1, DH), DTYPE); p["dec_ln_f_b"] = jnp.zeros((1, DH), DTYPE)
    p["lm_b"] = jnp.zeros((1, VOCAB), DTYPE)
    return p


# ----------------------------- full forward (jitted) -----------------------------
@jax.jit
def xray_report_generator_forward(p, image, prompt_ids):
    image_features = encode_image(p, image)                 # (B, D_ENC)
    # image_features.unsqueeze(1) -> Q-Former -> projection (fused, Sk==1 identity)
    query_embeddings = qformer_project(p, image_features)   # (B, NQ, DH)
    generated_ids = generate_greedy(p, query_embeddings, prompt_ids)
    return generated_ids                                    # (B, MAX_NEW) int32


# ----------------------------- main -----------------------------
if __name__ == "__main__":
    key = jax.random.PRNGKey(0)
    k_param, k_img, k_prompt = jax.random.split(key, 3)
    params = init_params(k_param)
    image = jax.random.normal(k_img, (B, IMG_C, IMG_H, IMG_W), dtype=DTYPE)   # NCHW
    prompt_ids = jax.random.randint(k_prompt, (B, T_PROMPT), 0, VOCAB)        # synthetic prompt ids

    out = xray_report_generator_forward(params, image, prompt_ids)
    out = jax.block_until_ready(out)
    assert out.shape == (B, MAX_NEW), out.shape
    print("KERNEL_OK")
</pallas_src>

<mosaic_0001>
module attributes {stable_mosaic.version = 11 : i64} {
  func.func @_encoder_kernel(%arg0: memref<8x256xf32, #tpu.memory_space<vmem>>, %arg1: memref<256x64xf32, #tpu.memory_space<vmem>>, %arg2: memref<1x64xf32, #tpu.memory_space<vmem>>, %arg3: memref<1x64xf32, #tpu.memory_space<vmem>>, %arg4: memref<1x64xf32, #tpu.memory_space<vmem>>, %arg5: memref<2x64xf32, #tpu.memory_space<vmem>>) attributes {dimension_semantics = [], scalar_prefetch = 0 : i64, scratch_operands = 0 : i64, tpu.core_type = #tpu.core_type<tc>} {
    %c0 = arith.constant 0 : index
    %c0_0 = arith.constant 0 : index
    %0 = vector.load %arg0[%c0, %c0_0] : memref<8x256xf32, #tpu.memory_space<vmem>>, vector<8x256xf32>
    %c0_1 = arith.constant 0 : index
    %c0_2 = arith.constant 0 : index
    %1 = vector.load %arg1[%c0_1, %c0_2] : memref<256x64xf32, #tpu.memory_space<vmem>>, vector<256x64xf32>
    %2 = arith.truncf %0 : vector<8x256xf32> to vector<8x256xbf16>
    %3 = arith.truncf %1 : vector<256x64xf32> to vector<256x64xbf16>
    %cst = arith.constant dense<0.000000e+00> : vector<8x64xf32>
    %4 = tpu.matmul %2, %3, %cst {dimension_numbers = #tpu.dot_dimension_numbers<[1], [0], [0], [1], [0, 0, 1, 1], [], []>} : vector<8x256xbf16>, vector<256x64xbf16>, vector<8x64xf32> -> vector<8x64xf32>
    %c0_3 = arith.constant 0 : index
    %c0_4 = arith.constant 0 : index
    %5 = vector.load %arg2[%c0_3, %c0_4] : memref<1x64xf32, #tpu.memory_space<vmem>>, vector<1x64xf32>
    %6 = vector.broadcast %5 : vector<1x64xf32> to vector<8x64xf32>
    %7 = arith.addf %4, %6 : vector<8x64xf32>
    %8 = tpu.iota {dimensions = array<i32: 0>} : vector<2x8xi32>
    %9 = tpu.iota {dimensions = array<i32: 1>} : vector<2x8xi32>
    %c4_i32 = arith.constant 4 : i32
    %10 = vector.broadcast %c4_i32 : i32 to vector<2x8xi32>
    %11 = arith.muli %8, %10 : vector<2x8xi32>
    %12 = arith.cmpi sge, %9, %11 : vector<2x8xi32>
    %c1_i32 = arith.constant 1 : i32
    %13 = vector.broadcast %c1_i32 : i32 to vector<2x8xi32>
    %14 = arith.addi %8, %13 : vector<2x8xi32>
    %c4_i32_5 = arith.constant 4 : i32
    %15 = vector.broadcast %c4_i32_5 : i32 to vector<2x8xi32>
    %16 = arith.muli %14, %15 : vector<2x8xi32>
    %17 = arith.cmpi slt, %9, %16 : vector<2x8xi32>
    %18 = arith.andi %12, %17 : vector<2x8xi1>
    %19 = arith.extui %18 : vector<2x8xi1> to vector<2x8xi32>
    %20 = arith.sitofp %19 : vector<2x8xi32> to vector<2x8xf32>
    %cst_6 = arith.constant 2.500000e-01 : f32
    %21 = vector.broadcast %cst_6 : f32 to vector<2x8xf32>
    %22 = arith.mulf %20, %21 : vector<2x8xf32>
    %23 = arith.truncf %22 : vector<2x8xf32> to vector<2x8xbf16>
    %24 = arith.truncf %7 : vector<8x64xf32> to vector<8x64xbf16>
    %cst_7 = arith.constant dense<0.000000e+00> : vector<2x64xf32>
    %25 = tpu.matmul %23, %24, %cst_7 {dimension_numbers = #tpu.dot_dimension_numbers<[1], [0], [0], [1], [0, 0, 1, 1], [], []>} : vector<2x8xbf16>, vector<8x64xbf16>, vector<2x64xf32> -> vector<2x64xf32>
    %c0_8 = arith.constant 0 : index
    %c0_9 = arith.constant 0 : index
    %26 = vector.load %arg3[%c0_8, %c0_9] : memref<1x64xf32, #tpu.memory_space<vmem>>, vector<1x64xf32>
    %c0_10 = arith.constant 0 : index
    %c0_11 = arith.constant 0 : index
    %27 = vector.load %arg4[%c0_10, %c0_11] : memref<1x64xf32, #tpu.memory_space<vmem>>, vector<1x64xf32>
    %cst_12 = arith.constant dense<0.000000e+00> : vector<2xf32>
    %28 = vector.multi_reduction <add>, %25, %cst_12 [1] : vector<2x64xf32> to vector<2xf32>
    %29 = vector.shape_cast %28 : vector<2xf32> to vector<2x1xf32>
    %cst_13 = arith.constant 6.400000e+01 : f32
    %30 = vector.broadcast %cst_13 : f32 to vector<2x1xf32>
    %31 = arith.divf %29, %30 : vector<2x1xf32>
    %32 = vector.broadcast %31 : vector<2x1xf32> to vector<2x64xf32>
    %33 = arith.subf %25, %32 : vector<2x64xf32>
    %34 = arith.mulf %33, %33 : vector<2x64xf32>
    %cst_14 = arith.constant dense<0.000000e+00> : vector<2xf32>
    %35 = vector.multi_reduction <add>, %34, %cst_14 [1] : vector<2x64xf32> to vector<2xf32>
    %36 = vector.shape_cast %35 : vector<2xf32> to vector<2x1xf32>
    %cst_15 = arith.constant 6.400000e+01 : f32
    %37 = vector.broadcast %cst_15 : f32 to vector<2x1xf32>
    %38 = arith.divf %36, %37 : vector<2x1xf32>
    %39 = vector.broadcast %31 : vector<2x1xf32> to vector<2x64xf32>
    %40 = arith.subf %25, %39 : vector<2x64xf32>
    %cst_16 = arith.constant 9.99999974E-6 : f32
    %41 = vector.broadcast %cst_16 : f32 to vector<2x1xf32>
    %42 = arith.addf %38, %41 : vector<2x1xf32>
    %43 = math.rsqrt %42 : vector<2x1xf32>
    %44 = vector.broadcast %43 : vector<2x1xf32> to vector<2x64xf32>
    %45 = arith.mulf %40, %44 : vector<2x64xf32>
    %46 = vector.broadcast %26 : vector<1x64xf32> to vector<2x64xf32>
    %47 = arith.mulf %45, %46 : vector<2x64xf32>
    %48 = vector.broadcast %27 : vector<1x64xf32> to vector<2x64xf32>
    %49 = arith.addf %47, %48 : vector<2x64xf32>
    %c0_17 = arith.constant 0 : index
    %c0_18 = arith.constant 0 : index
    %50 = vector.load %arg5[%c0_17, %c0_18] : memref<2x64xf32, #tpu.memory_space<vmem>>, vector<2x64xf32>
    tpu.vector_store %arg5[%c0_17, %c0_18], %49 {strides = array<i32>} : memref<2x64xf32, #tpu.memory_space<vmem>>, vector<2x64xf32>,
    return
  }
}

module attributes {stable_mosaic.version = 11 : i64} {
  func.func @_qformer_kernel(%arg0: memref<2x64xf32, #tpu.memory_space<vmem>>, %arg1: memref<8x32xf32, #tpu.memory_space<vmem>>, %arg2: memref<64x32xf32, #tpu.memory_space<vmem>>, %arg3: memref<1x32xf32, #tpu.memory_space<vmem>>, %arg4: memref<32x32xf32, #tpu.memory_space<vmem>>, %arg5: memref<1x32xf32, #tpu.memory_space<vmem>>, %arg6: memref<1x32xf32, #tpu.memory_space<vmem>>, %arg7: memref<1x32xf32, #tpu.memory_space<vmem>>, %arg8: memref<32x64xf32, #tpu.memory_space<vmem>>, %arg9: memref<1x64xf32, #tpu.memory_space<vmem>>, %arg10: memref<64x32xf32, #tpu.memory_space<vmem>>, %arg11: memref<1x32xf32, #tpu.memory_space<vmem>>, %arg12: memref<1x32xf32, #tpu.memory_space<vmem>>, %arg13: memref<1x32xf32, #tpu.memory_space<vmem>>, %arg14: memref<32x64xf32, #tpu.memory_space<vmem>>, %arg15: memref<1x64xf32, #tpu.memory_space<vmem>>, %arg16: memref<16x64xf32, #tpu.memory_space<vmem>>) attributes {dimension_semantics = [], scalar_prefetch = 0 : i64, scratch_operands = 0 : i64, tpu.core_type = #tpu.core_type<tc>} {
    %c0 = arith.constant 0 : index
    %c0_0 = arith.constant 0 : index
    %0 = vector.load %arg0[%c0, %c0_0] : memref<2x64xf32, #tpu.memory_space<vmem>>, vector<2x64xf32>
    %c0_1 = arith.constant 0 : index
    %c0_2 = arith.constant 0 : index
    %1 = vector.load %arg2[%c0_1, %c0_2] : memref<64x32xf32, #tpu.memory_space<vmem>>, vector<64x32xf32>
    %2 = arith.truncf %0 : vector<2x64xf32> to vector<2x64xbf16>
    %3 = arith.truncf %1 : vector<64x32xf32> to vector<64x32xbf16>
    %cst = arith.constant dense<0.000000e+00> : vector<2x32xf32>
    %4 = tpu.matmul %2, %3, %cst {dimension_numbers = #tpu.dot_dimension_numbers<[1], [0], [0], [1], [0, 0, 1, 1], [], []>} : vector<2x64xbf16>, vector<64x32xbf16>, vector<2x32xf32> -> vector<2x32xf32>
    %c0_3 = arith.constant 0 : index
    %c0_4 = arith.constant 0 : index
    %5 = vector.load %arg3[%c0_3, %c0_4] : memref<1x32xf32, #tpu.memory_space<vmem>>, vector<1x32xf32>
    %6 = vector.broadcast %5 : vector<1x32xf32> to vector<2x32xf32>
    %7 = arith.addf %4, %6 : vector<2x32xf32>
    %c0_5 = arith.constant 0 : index
    %c0_6 = arith.constant 0 : index
    %8 = vector.load %arg4[%c0_5, %c0_6] : memref<32x32xf32, #tpu.memory_space<vmem>>, vector<32x32xf32>
    %9 = arith.truncf %7 : vector<2x32xf32> to vector<2x32xbf16>
    %10 = arith.truncf %8 : vector<32x32xf32> to vector<32x32xbf16>
    %cst_7 = arith.constant dense<0.000000e+00> : vector<2x32xf32>
    %11 = tpu.matmul %9, %10, %cst_7 {dimension_numbers = #tpu.dot_dimension_numbers<[1], [0], [0], [1], [0, 0, 1, 1], [], []>} : vector<2x32xbf16>, vector<32x32xbf16>, vector<2x32xf32> -> vector<2x32xf32>
    %c0_8 = arith.constant 0 : index
    %c0_9 = arith.constant 0 : index
    %12 = vector.load %arg5[%c0_8, %c0_9] : memref<1x32xf32, #tpu.memory_space<vmem>>, vector<1x32xf32>
    %13 = vector.broadcast %12 : vector<1x32xf32> to vector<2x32xf32>
    %14 = arith.addf %11, %13 : vector<2x32xf32>
    %15 = tpu.iota {dimensions = array<i32: 0>} : vector<16x8xi32>
    %16 = tpu.iota {dimensions = array<i32: 1>} : vector<16x8xi32>
    %17 = arith.cmpi eq, %15, %16 : vector<16x8xi32>
    %c8_i32 = arith.constant 8 : i32
    %18 = vector.broadcast %c8_i32 : i32 to vector<16x8xi32>
    %19 = arith.addi %16, %18 : vector<16x8xi32>
    %20 = arith.cmpi eq, %15, %19 : vector<16x8xi32>
    %21 = arith.ori %17, %20 : vector<16x8xi1>
    %22 = arith.extui %21 : vector<16x8xi1> to vector<16x8xi32>
    %23 = arith.sitofp %22 : vector<16x8xi32> to vector<16x8xf32>
    %c0_10 = arith.constant 0 : index
    %c0_11 = arith.constant 0 : index
    %24 = vector.load %arg1[%c0_10, %c0_11] : memref<8x32xf32, #tpu.memory_space<vmem>>, vector<8x32xf32>
    %25 = arith.truncf %23 : vector<16x8xf32> to vector<16x8xbf16>
    %26 = arith.truncf %24 : vector<8x32xf32> to vector<8x32xbf16>
    %cst_12 = arith.constant dense<0.000000e+00> : vector<16x32xf32>
    %27 = tpu.matmul %25, %26, %cst_12 {dimension_numbers = #tpu.dot_dimension_numbers<[1], [0], [0], [1], [0, 0, 1, 1], [], []>} : vector<16x8xbf16>, vector<8x32xbf16>, vector<16x32xf32> -> vector<16x32xf32>
    %28 = tpu.iota {dimensions = array<i32: 0>} : vector<16x2xi32>
    %29 = tpu.iota {dimensions = array<i32: 1>} : vector<16x2xi32>
    %c8_i32_13 = arith.constant 8 : i32
    %30 = vector.broadcast %c8_i32_13 : i32 to vector<16x2xi32>
    %31 = arith.muli %29, %30 : vector<16x2xi32>
    %32 = arith.cmpi sge, %28, %31 : vector<16x2xi32>
    %c1_i32 = arith.constant 1 : i32
    %33 = vector.broadcast %c1_i32 : i32 to vector<16x2xi32>
    %34 = arith.addi %29, %33 : vector<16x2xi32>
    %c8_i32_14 = arith.constant 8 : i32
    %35 = vector.broadcast %c8_i32_14 : i32 to vector<16x2xi32>
    %36 = arith.muli %34, %35 : vector<16x2xi32>
    %37 = arith.cmpi slt, %28, %36 : vector<16x2xi32>
    %38 = arith.andi %32, %37 : vector<16x2xi1>
    %39 = arith.extui %38 : vector<16x2xi1> to vector<16x2xi32>
    %40 = arith.sitofp %39 : vector<16x2xi32> to vector<16x2xf32>
    %41 = arith.truncf %40 : vector<16x2xf32> to vector<16x2xbf16>
    %42 = arith.truncf %14 : vector<2x32xf32> to vector<2x32xbf16>
    %cst_15 = arith.constant dense<0.000000e+00> : vector<16x32xf32>
    %43 = tpu.matmul %41, %42, %cst_15 {dimension_numbers = #tpu.dot_dimension_numbers<[1], [0], [0], [1], [0, 0, 1, 1], [], []>} : vector<16x2xbf16>, vector<2x32xbf16>, vector<16x32xf32> -> vector<16x32xf32>
    %44 = arith.addf %27, %43 : vector<16x32xf32>
    %c0_16 = arith.constant 0 : index
    %c0_17 = arith.constant 0 : index
    %45 = vector.load %arg6[%c0_16, %c0_17] : memref<1x32xf32, #tpu.memory_space<vmem>>, vector<1x32xf32>
    %c0_18 = arith.constant 0 : index
    %c0_19 = arith.constant 0 : index
    %46 = vector.load %arg7[%c0_18, %c0_19] : memref<1x32xf32, #tpu.memory_space<vmem>>, vector<1x32xf32>
    %cst_20 = arith.constant dense<0.000000e+00> : vector<16xf32>
    %47 = vector.multi_reduction <add>, %44, %cst_20 [1] : vector<16x32xf32> to vector<16xf32>
    %48 = vector.shape_cast %47 : vector<16xf32> to vector<16x1xf32>
    %cst_21 = arith.constant 3.200000e+01 : f32
    %49 = vector.broadcast %cst_21 : f32 to vector<16x1xf32>
    %50 = arith.divf %48, %49 : vector<16x1xf32>
    %51 = vector.broadcast %50 : vector<16x1xf32> to vector<16x32xf32>
    %52 = arith.subf %44, %51 : vector<16x32xf32>
    %53 = arith.mulf %52, %52 : vector<16x32xf32>
    %cst_22 = arith.constant dense<0.000000e+00> : vector<16xf32>
    %54 = vector.multi_reduction <add>, %53, %cst_22 [1] : vector<16x32xf32> to vector<16xf32>
    %55 = vector.shape_cast %54 : vector<16xf32> to vector<16x1xf32>
    %cst_23 = arith.constant 3.200000e+01 : f32
    %56 = vector.broadcast %cst_23 : f32 to vector<16x1xf32>
    %57 = arith.divf %55, %56 : vector<16x1xf32>
    %58 = vector.broadcast %50 : vector<16x1xf32> to vector<16x32xf32>
    %59 = arith.subf %44, %58 : vector<16x32xf32>
    %cst_24 = arith.constant 9.99999974E-6 : f32
    %60 = vector.broadcast %cst_24 : f32 to vector<16x1xf32>
    %61 = arith.addf %57, %60 : vector<16x1xf32>
    %62 = math.rsqrt %61 : vector<16x1xf32>
    %63 = vector.broadcast %62 : vector<16x1xf32> to vector<16x32xf32>
    %64 = arith.mulf %59, %63 : vector<16x32xf32>
    %65 = vector.broadcast %45 : vector<1x32xf32> to vector<16x32xf32>
    %66 = arith.mulf %64, %65 : vector<16x32xf32>
    %67 = vector.broadcast %46 : vector<1x32xf32> to vector<16x32xf32>
    %68 = arith.addf %66, %67 : vector<16x32xf32>
    %c0_25 = arith.constant 0 : index
    %c0_26 = arith.constant 0 : index
    %69 = vector.load %arg8[%c0_25, %c0_26] : memref<32x64xf32, #tpu.memory_space<vmem>>, vector<32x64xf32>
    %70 = arith.truncf %68 : vector<16x32xf32> to vector<16x32xbf16>
    %71 = arith.truncf %69 : vector<32x64xf32> to vector<32x64xbf16>
    %cst_27 = arith.constant dense<0.000000e+00> : vector<16x64xf32>
    %72 = tpu.matmul %70, %71, %cst_27 {dimension_numbers = #tpu.dot_dimension_numbers<[1], [0], [0], [1], [0, 0, 1, 1], [], []>} : vector<16x32xbf16>, vector<32x64xbf16>, vector<16x64xf32> -> vector<16x64xf32>
    %c0_28 = arith.constant 0 : index
    %c0_29 = arith.constant 0 : index
    %73 = vector.load %arg9[%c0_28, %c0_29] : memref<1x64xf32, #tpu.memory_space<vmem>>, vector<1x64xf32>
    %74 = vector.broadcast %73 : vector<1x64xf32> to vector<16x64xf32>
    %75 = arith.addf %72, %74 : vector<16x64xf32>
    %cst_30 = arith.constant 5.000000e-01 : f32
    %76 = vector.broadcast %cst_30 : f32 to vector<16x64xf32>
    %77 = arith.mulf %76, %75 : vector<16x64xf32>
    %cst_31 = arith.constant 4.471500e-02 : f32
    %78 = vector.broadcast %cst_31 : f32 to vector<16x64xf32>
    %79 = arith.mulf %78, %75 : vector<16x64xf32>
    %80 = arith.mulf %79, %75 : vector<16x64xf32>
    %81 = arith.mulf %80, %75 : vector<16x64xf32>
    %82 = arith.addf %75, %81 : vector<16x64xf32>
    %cst_32 = arith.constant 0.797884583 : f32
    %83 = vector.broadcast %cst_32 : f32 to vector<16x64xf32>
    %84 = arith.mulf %83, %82 : vector<16x64xf32>
    %85 = math.tanh %84 : vector<16x64xf32>
    %cst_33 = arith.constant 1.000000e+00 : f32
    %86 = vector.broadcast %cst_33 : f32 to vector<16x64xf32>
    %87 = arith.addf %86, %85 : vector<16x64xf32>
    %88 = arith.mulf %77, %87 : vector<16x64xf32>
    %c0_34 = arith.constant 0 : index
    %c0_35 = arith.constant 0 : index
    %89 = vector.load %arg10[%c0_34, %c0_35] : memref<64x32xf32, #tpu.memory_space<vmem>>, vector<64x32xf32>
    %90 = arith.truncf %88 : vector<16x64xf32> to vector<16x64xbf16>
    %91 = arith.truncf %89 : vector<64x32xf32> to vector<64x32xbf16>
    %cst_36 = arith.constant dense<0.000000e+00> : vector<16x32xf32>
    %92 = tpu.matmul %90, %91, %cst_36 {dimension_numbers = #tpu.dot_dimension_numbers<[1], [0], [0], [1], [0, 0, 1, 1], [], []>} : vector<16x64xbf16>, vector<64x32xbf16>, vector<16x32xf32> -> vector<16x32xf32>
    %c0_37 = arith.constant 0 : index
    %c0_38 = arith.constant 0 : index
    %93 = vector.load %arg11[%c0_37, %c0_38] : memref<1x32xf32, #tpu.memory_space<vmem>>, vector<1x32xf32>
    %94 = vector.broadcast %93 : vector<1x32xf32> to vector<16x32xf32>
    %95 = arith.addf %92, %94 : vector<16x32xf32>
    %96 = arith.addf %68, %95 : vector<16x32xf32>
    %c0_39 = arith.constant 0 : index
    %c0_40 = arith.constant 0 : index
    %97 = vector.load %arg12[%c0_39, %c0_40] : memref<1x32xf32, #tpu.memory_space<vmem>>, vector<1x32xf32>
    %c0_41 = arith.constant 0 : index
    %c0_42 = arith.constant 0 : index
    %98 = vector.load %arg13[%c0_41, %c0_42] : memref<1x32xf32, #tpu.memory_space<vmem>>, vector<1x32xf32>
    %cst_43 = arith.constant dense<0.000000e+00> : vector<16xf32>
    %99 = vector.multi_reduction <add>, %96, %cst_43 [1] : vector<16x32xf32> to vector<16xf32>
    %100 = vector.shape_cast %99 : vector<16xf32> to vector<16x1xf32>
    %cst_44 = arith.constant 3.200000e+01 : f32
    %101 = vector.broadcast %cst_44 : f32 to vector<16x1xf32>
    %102 = arith.divf %100, %101 : vector<16x1xf32>
    %103 = vector.broadcast %102 : vector<16x1xf32> to vector<16x32xf32>
    %104 = arith.subf %96, %103 : vector<16x32xf32>
    %105 = arith.mulf %104, %104 : vector<16x32xf32>
    %cst_45 = arith.constant dense<0.000000e+00> : vector<16xf32>
    %106 = vector.multi_reduction <add>, %105, %cst_45 [1] : vector<16x32xf32> to vector<16xf32>
    %107 = vector.shape_cast %106 : vector<16xf32> to vector<16x1xf32>
    %cst_46 = arith.constant 3.200000e+01 : f32
    %108 = vector.broadcast %cst_46 : f32 to vector<16x1xf32>
    %109 = arith.divf %107, %108 : vector<16x1xf32>
    %110 = vector.broadcast %102 : vector<16x1xf32> to vector<16x32xf32>
    %111 = arith.subf %96, %110 : vector<16x32xf32>
    %cst_47 = arith.constant 9.99999974E-6 : f32
    %112 = vector.broadcast %cst_47 : f32 to vector<16x1xf32>
    %113 = arith.addf %109, %112 : vector<16x1xf32>
    %114 = math.rsqrt %113 : vector<16x1xf32>
    %115 = vector.broadcast %114 : vector<16x1xf32> to vector<16x32xf32>
    %116 = arith.mulf %111, %115 : vector<16x32xf32>
    %117 = vector.broadcast %97 : vector<1x32xf32> to vector<16x32xf32>
    %118 = arith.mulf %116, %117 : vector<16x32xf32>
    %119 = vector.broadcast %98 : vector<1x32xf32> to vector<16x32xf32>
    %120 = arith.addf %118, %119 : vector<16x32xf32>
    %c0_48 = arith.constant 0 : index
    %c0_49 = arith.constant 0 : index
    %121 = vector.load %arg14[%c0_48, %c0_49] : memref<32x64xf32, #tpu.memory_space<vmem>>, vector<32x64xf32>
    %122 = arith.truncf %120 : vector<16x32xf32> to vector<16x32xbf16>
    %123 = arith.truncf %121 : vector<32x64xf32> to vector<32x64xbf16>
    %cst_50 = arith.constant dense<0.000000e+00> : vector<16x64xf32>
    %124 = tpu.matmul %122, %123, %cst_50 {dimension_numbers = #tpu.dot_dimension_numbers<[1], [0], [0], [1], [0, 0, 1, 1], [], []>} : vector<16x32xbf16>, vector<32x64xbf16>, vector<16x64xf32> -> vector<16x64xf32>
    %c0_51 = arith.constant 0 : index
    %c0_52 = arith.constant 0 : index
    %125 = vector.load %arg15[%c0_51, %c0_52] : memref<1x64xf32, #tpu.memory_space<vmem>>, vector<1x64xf32>
    %126 = vector.broadcast %125 : vector<1x64xf32> to vector<16x64xf32>
    %127 = arith.addf %124, %126 : vector<16x64xf32>
    %c0_53 = arith.constant 0 : index
    %c0_54 = arith.constant 0 : index
    %128 = vector.load %arg16[%c0_53, %c0_54] : memref<16x64xf32, #tpu.memory_space<vmem>>, vector<16x64xf32>
    tpu.vector_store %arg16[%c0_53, %c0_54], %127 {strides = array<i32>} : memref<16x64xf32, #tpu.memory_space<vmem>>, vector<16x64xf32>,
    return
  }
}

module attributes {stable_mosaic.version = 11 : i64} {
  func.func @_generate_kernel(%arg0: memref<32x64xf32, #tpu.memory_space<vmem>>, %arg1: memref<32x64xf32, #tpu.memory_space<vmem>>, %arg2: memref<32x32xf32, #tpu.memory_space<vmem>>, %arg3: memref<1x32xi32, #tpu.memory_space<vmem>>, %arg4: memref<1x64xf32, #tpu.memory_space<vmem>>, %arg5: memref<1x64xf32, #tpu.memory_space<vmem>>, %arg6: memref<64x192xf32, #tpu.memory_space<vmem>>, %arg7: memref<1x192xf32, #tpu.memory_space<vmem>>, %arg8: memref<64x64xf32, #tpu.memory_space<vmem>>, %arg9: memref<1x64xf32, #tpu.memory_space<vmem>>, %arg10: memref<1x64xf32, #tpu.memory_space<vmem>>, %arg11: memref<1x64xf32, #tpu.memory_space<vmem>>, %arg12: memref<64x128xf32, #tpu.memory_space<vmem>>, %arg13: memref<1x128xf32, #tpu.memory_space<vmem>>, %arg14: memref<128x64xf32, #tpu.memory_space<vmem>>, %arg15: memref<1x64xf32, #tpu.memory_space<vmem>>, %arg16: memref<1x64xf32, #tpu.memory_space<vmem>>, %arg17: memref<1x64xf32, #tpu.memory_space<vmem>>, %arg18: memref<64x128xf32, #tpu.memory_space<vmem>>, %arg19: memref<1x128xf32, #tpu.memory_space<vmem>>, %arg20: memref<128x64xf32, #tpu.memory_space<vmem>>, %arg21: memref<2x4xi32, #tpu.memory_space<vmem>>) attributes {dimension_semantics = [], scalar_prefetch = 0 : i64, scratch_operands = 0 : i64, tpu.core_type = #tpu.core_type<tc>} {
    %c0 = arith.constant 0 : index
    %c0_0 = arith.constant 0 : index
    %0 = vector.load %arg1[%c0, %c0_0] : memref<32x64xf32, #tpu.memory_space<vmem>>, vector<32x64xf32>
    %c0_1 = arith.constant 0 : index
    %c0_2 = arith.constant 0 : index
    %1 = vector.load %arg2[%c0_1, %c0_2] : memref<32x32xf32, #tpu.memory_space<vmem>>, vector<32x32xf32>
    %c0_3 = arith.constant 0 : index
    %c0_4 = arith.constant 0 : index
    %2 = vector.load %arg3[%c0_3, %c0_4] : memref<1x32xi32, #tpu.memory_space<vmem>>, vector<1x32xi32>
    %c0_5 = arith.constant 0 : index
    %c0_6 = arith.constant 0 : index
    %3 = vector.load %arg4[%c0_5, %c0_6] : memref<1x64xf32, #tpu.memory_space<vmem>>, vector<1x64xf32>
    %c0_7 = arith.constant 0 : index
    %c0_8 = arith.constant 0 : index
    %4 = vector.load %arg5[%c0_7, %c0_8] : memref<1x64xf32, #tpu.memory_space<vmem>>, vector<1x64xf32>
    %c0_9 = arith.constant 0 : index
    %c0_10 = arith.constant 0 : index
    %5 = vector.load %arg6[%c0_9, %c0_10] : memref<64x192xf32, #tpu.memory_space<vmem>>, vector<64x192xf32>
    %c0_11 = arith.constant 0 : index
    %c0_12 = arith.constant 0 : index
    %6 = vector.load %arg7[%c0_11, %c0_12] : memref<1x192xf32, #tpu.memory_space<vmem>>, vector<1x192xf32>
    %c0_13 = arith.constant 0 : index
    %c0_14 = arith.constant 0 : index
    %7 = vector.load %arg8[%c0_13, %c0_14] : memref<64x64xf32, #tpu.memory_space<vmem>>, vector<64x64xf32>
    %c0_15 = arith.constant 0 : index
    %c0_16 = arith.constant 0 : index
    %8 = vector.load %arg9[%c0_15, %c0_16] : memref<1x64xf32, #tpu.memory_space<vmem>>, vector<1x64xf32>
    %c0_17 = arith.constant 0 : index
    %c0_18 = arith.constant 0 : index
    %9 = vector.load %arg10[%c0_17, %c0_18] : memref<1x64xf32, #tpu.memory_space<vmem>>, vector<1x64xf32>
    %c0_19 = arith.constant 0 : index
    %c0_20 = arith.constant 0 : index
    %10 = vector.load %arg11[%c0_19, %c0_20] : memref<1x64xf32, #tpu.memory_space<vmem>>, vector<1x64xf32>
    %c0_21 = arith.constant 0 : index
    %c0_22 = arith.constant 0 : index
    %11 = vector.load %arg12[%c0_21, %c0_22] : memref<64x128xf32, #tpu.memory_space<vmem>>, vector<64x128xf32>
    %c0_23 = arith.constant 0 : index
    %c0_24 = arith.constant 0 : index
    %12 = vector.load %arg13[%c0_23, %c0_24] : memref<1x128xf32, #tpu.memory_space<vmem>>, vector<1x128xf32>
    %c0_25 = arith.constant 0 : index
    %c0_26 = arith.constant 0 : index
    %13 = vector.load %arg14[%c0_25, %c0_26] : memref<128x64xf32, #tpu.memory_space<vmem>>, vector<128x64xf32>
    %c0_27 = arith.constant 0 : index
    %c0_28 = arith.constant 0 : index
    %14 = vector.load %arg15[%c0_27, %c0_28] : memref<1x64xf32, #tpu.memory_space<vmem>>, vector<1x64xf32>
    %c0_29 = arith.constant 0 : index
    %c0_30 = arith.constant 0 : index
    %15 = vector.load %arg16[%c0_29, %c0_30] : memref<1x64xf32, #tpu.memory_space<vmem>>, vector<1x64xf32>
    %c0_31 = arith.constant 0 : index
    %c0_32 = arith.constant 0 : index
    %16 = vector.load %arg17[%c0_31, %c0_32] : memref<1x64xf32, #tpu.memory_space<vmem>>, vector<1x64xf32>
    %c0_33 = arith.constant 0 : index
    %c0_34 = arith.constant 0 : index
    %17 = vector.load %arg18[%c0_33, %c0_34] : memref<64x128xf32, #tpu.memory_space<vmem>>, vector<64x128xf32>
    %c0_35 = arith.constant 0 : index
    %c0_36 = arith.constant 0 : index
    %18 = vector.load %arg19[%c0_35, %c0_36] : memref<1x128xf32, #tpu.memory_space<vmem>>, vector<1x128xf32>
    %c0_37 = arith.constant 0 : index
    %c0_38 = arith.constant 0 : index
    %19 = vector.load %arg20[%c0_37, %c0_38] : memref<128x64xf32, #tpu.memory_space<vmem>>, vector<128x64xf32>
    %20 = tpu.iota {dimensions = array<i32: 1>} : vector<2x128xi32>
    %21 = tpu.iota {dimensions = array<i32: 0>} : vector<2x32xi32>
    %22 = tpu.iota {dimensions = array<i32: 1>} : vector<2x32xi32>
    %23 = tpu.iota {dimensions = array<i32: 0>} : vector<32x2xi32>
    %24 = tpu.iota {dimensions = array<i32: 1>} : vector<32x2xi32>
    %25 = tpu.iota {dimensions = array<i32: 1>} : vector<1x4xi32>
    %c0_39 = arith.constant 0 : index
    %c0_40 = arith.constant 0 : index
    %26 = vector.load %arg0[%c0_39, %c0_40] : memref<32x64xf32, #tpu.memory_space<vmem>>, vector<32x64xf32>
    %c0_i32 = arith.constant 0 : i32
    %27 = vector.broadcast %c0_i32 : i32 to vector<2x4xi32>
    %c0_i32_41 = arith.constant 0 : i32
    %c12_i32 = arith.constant 12 : i32
    %28 = arith.addi %c12_i32, %c0_i32_41 : i32
    %29 = arith.addf %26, %0 : vector<32x64xf32>
    %cst = arith.constant dense<0.000000e+00> : vector<32xf32>
    %30 = vector.multi_reduction <add>, %29, %cst [1] : vector<32x64xf32> to vector<32xf32>
    %31 = vector.shape_cast %30 : vector<32xf32> to vector<32x1xf32>
    %cst_42 = arith.constant 6.400000e+01 : f32
    %32 = vector.broadcast %cst_42 : f32 to vector<32x1xf32>
    %33 = arith.divf %31, %32 : vector<32x1xf32>
    %34 = vector.broadcast %33 : vector<32x1xf32> to vector<32x64xf32>
    %35 = arith.subf %29, %34 : vector<32x64xf32>
    %36 = arith.mulf %35, %35 : vector<32x64xf32>
    %cst_43 = arith.constant dense<0.000000e+00> : vector<32xf32>
    %37 = vector.multi_reduction <add>, %36, %cst_43 [1] : vector<32x64xf32> to vector<32xf32>
    %38 = vector.shape_cast %37 : vector<32xf32> to vector<32x1xf32>
    %cst_44 = arith.constant 6.400000e+01 : f32
    %39 = vector.broadcast %cst_44 : f32 to vector<32x1xf32>
    %40 = arith.divf %38, %39 : vector<32x1xf32>
    %41 = vector.broadcast %33 : vector<32x1xf32> to vector<32x64xf32>
    %42 = arith.subf %29, %41 : vector<32x64xf32>
    %cst_45 = arith.constant 9.99999974E-6 : f32
    %43 = vector.broadcast %cst_45 : f32 to vector<32x1xf32>
    %44 = arith.addf %40, %43 : vector<32x1xf32>
    %45 = math.rsqrt %44 : vector<32x1xf32>
    %46 = vector.broadcast %45 : vector<32x1xf32> to vector<32x64xf32>
    %47 = arith.mulf %42, %46 : vector<32x64xf32>
    %48 = vector.broadcast %3 : vector<1x64xf32> to vector<32x64xf32>
    %49 = arith.mulf %47, %48 : vector<32x64xf32>
    %50 = vector.broadcast %4 : vector<1x64xf32> to vector<32x64xf32>
    %51 = arith.addf %49, %50 : vector<32x64xf32>
    %52 = arith.truncf %51 : vector<32x64xf32> to vector<32x64xbf16>
    %53 = arith.truncf %5 : vector<64x192xf32> to vector<64x192xbf16>
    %cst_46 = arith.constant dense<0.000000e+00> : vector<32x192xf32>
    %54 = tpu.matmul %52, %53, %cst_46 {dimension_numbers = #tpu.dot_dimension_numbers<[1], [0], [0], [1], [0, 0, 1, 1], [], []>} : vector<32x64xbf16>, vector<64x192xbf16>, vector<32x192xf32> -> vector<32x192xf32>
    %55 = vector.broadcast %6 : vector<1x192xf32> to vector<32x192xf32>
    %56 = arith.addf %54, %55 : vector<32x192xf32>
    %57 = vector.broadcast %28 : i32 to vector<1x32xi32>
    %58 = arith.cmpi slt, %2, %57 : vector<1x32xi32>
    %cst_47 = arith.constant 0.000000e+00 : f32
    %cst_48 = arith.constant -1.000000e+09 : f32
    %59 = vector.broadcast %cst_47 : f32 to vector<1x32xf32>
    %60 = vector.broadcast %cst_48 : f32 to vector<1x32xf32>
    %61 = arith.select %58, %59, %60 : vector<1x32xi1>, vector<1x32xf32>
    %62 = vector.broadcast %61 : vector<1x32xf32> to vector<32x32xf32>
    %63 = arith.addf %1, %62 : vector<32x32xf32>
    %64 = vector.extract_strided_slice %56 {offsets = [0, 0], sizes = [32, 16], strides = [1, 1]} : vector<32x192xf32> to vector<32x16xf32>
    %65 = vector.extract_strided_slice %56 {offsets = [0, 64], sizes = [32, 16], strides = [1, 1]} : vector<32x192xf32> to vector<32x16xf32>
    %66 = vector.extract_strided_slice %56 {offsets = [0, 128], sizes = [32, 16], strides = [1, 1]} : vector<32x192xf32> to vector<32x16xf32>
    %67 = arith.truncf %64 : vector<32x16xf32> to vector<32x16xbf16>
    %68 = arith.truncf %65 : vector<32x16xf32> to vector<32x16xbf16>
    %cst_49 = arith.constant dense<0.000000e+00> : vector<32x32xf32>
    %69 = tpu.matmul %67, %68, %cst_49 {dimension_numbers = #tpu.dot_dimension_numbers<[1], [1], [0], [0], [0, 0, 1, 0], [], []>} : vector<32x16xbf16>, vector<32x16xbf16>, vector<32x32xf32> -> vector<32x32xf32>
    %cst_50 = arith.constant 2.500000e-01 : f32
    %70 = vector.broadcast %cst_50 : f32 to vector<32x32xf32>
    %71 = arith.mulf %69, %70 : vector<32x32xf32>
    %72 = arith.addf %71, %63 : vector<32x32xf32>
    %cst_51 = arith.constant dense<0xFF800000> : vector<32xf32>
    %73 = vector.multi_reduction <maximumf>, %72, %cst_51 [1] : vector<32x32xf32> to vector<32xf32>
    %74 = vector.shape_cast %73 : vector<32xf32> to vector<32x1xf32>
    %75 = vector.broadcast %74 : vector<32x1xf32> to vector<32x32xf32>
    %76 = arith.subf %72, %75 : vector<32x32xf32>
    %77 = math.exp %76 : vector<32x32xf32>
    %cst_52 = arith.constant dense<0.000000e+00> : vector<32xf32>
    %78 = vector.multi_reduction <add>, %77, %cst_52 [1] : vector<32x32xf32> to vector<32xf32>
    %79 = vector.shape_cast %78 : vector<32xf32> to vector<32x1xf32>
    %80 = tpu.reciprocal %79 {approx = true} : vector<32x1xf32> -> vector<32x1xf32>
    %81 = vector.broadcast %80 : vector<32x1xf32> to vector<32x32xf32>
    %82 = arith.mulf %77, %81 : vector<32x32xf32>
    %83 = arith.truncf %82 : vector<32x32xf32> to vector<32x32xbf16>
    %84 = arith.truncf %66 : vector<32x16xf32> to vector<32x16xbf16>
    %cst_53 = arith.constant dense<0.000000e+00> : vector<32x16xf32>
    %85 = tpu.matmul %83, %84, %cst_53 {dimension_numbers = #tpu.dot_dimension_numbers<[1], [0], [0], [1], [0, 0, 1, 1], [], []>} : vector<32x32xbf16>, vector<32x16xbf16>, vector<32x16xf32> -> vector<32x16xf32>
    %86 = vector.extract_strided_slice %7 {offsets = [0, 0], sizes = [16, 64], strides = [1, 1]} : vector<64x64xf32> to vector<16x64xf32>
    %87 = arith.truncf %85 : vector<32x16xf32> to vector<32x16xbf16>
    %88 = arith.truncf %86 : vector<16x64xf32> to vector<16x64xbf16>
    %cst_54 = arith.constant dense<0.000000e+00> : vector<32x64xf32>
    %89 = tpu.matmul %87, %88, %cst_54 {dimension_numbers = #tpu.dot_dimension_numbers<[1], [0], [0], [1], [0, 0, 1, 1], [], []>} : vector<32x16xbf16>, vector<16x64xbf16>, vector<32x64xf32> -> vector<32x64xf32>
    %90 = vector.extract_strided_slice %56 {offsets = [0, 16], sizes = [32, 16], strides = [1, 1]} : vector<32x192xf32> to vector<32x16xf32>
    %91 = vector.extract_strided_slice %56 {offsets = [0, 80], sizes = [32, 16], strides = [1, 1]} : vector<32x192xf32> to vector<32x16xf32>
    %92 = vector.extract_strided_slice %56 {offsets = [0, 144], sizes = [32, 16], strides = [1, 1]} : vector<32x192xf32> to vector<32x16xf32>
    %93 = arith.truncf %90 : vector<32x16xf32> to vector<32x16xbf16>
    %94 = arith.truncf %91 : vector<32x16xf32> to vector<32x16xbf16>
    %cst_55 = arith.constant dense<0.000000e+00> : vector<32x32xf32>
    %95 = tpu.matmul %93, %94, %cst_55 {dimension_numbers = #tpu.dot_dimension_numbers<[1], [1], [0], [0], [0, 0, 1, 0], [], []>} : vector<32x16xbf16>, vector<32x16xbf16>, vector<32x32xf32> -> vector<32x32xf32>
    %cst_56 = arith.constant 2.500000e-01 : f32
    %96 = vector.broadcast %cst_56 : f32 to vector<32x32xf32>
    %97 = arith.mulf %95, %96 : vector<32x32xf32>
    %98 = arith.addf %97, %63 : vector<32x32xf32>
    %cst_57 = arith.constant dense<0xFF800000> : vector<32xf32>
    %99 = vector.multi_reduction <maximumf>, %98, %cst_57 [1] : vector<32x32xf32> to vector<32xf32>
    %100 = vector.shape_cast %99 : vector<32xf32> to vector<32x1xf32>
    %101 = vector.broadcast %100 : vector<32x1xf32> to vector<32x32xf32>
    %102 = arith.subf %98, %101 : vector<32x32xf32>
    %103 = math.exp %102 : vector<32x32xf32>
    %cst_58 = arith.constant dense<0.000000e+00> : vector<32xf32>
    %104 = vector.multi_reduction <add>, %103, %cst_58 [1] : vector<32x32xf32> to vector<32xf32>
    %105 = vector.shape_cast %104 : vector<32xf32> to vector<32x1xf32>
    %106 = tpu.reciprocal %105 {approx = true} : vector<32x1xf32> -> vector<32x1xf32>
    %107 = vector.broadcast %106 : vector<32x1xf32> to vector<32x32xf32>
    %108 = arith.mulf %103, %107 : vector<32x32xf32>
    %109 = arith.truncf %108 : vector<32x32xf32> to vector<32x32xbf16>
    %110 = arith.truncf %92 : vector<32x16xf32> to vector<32x16xbf16>
    %cst_59 = arith.constant dense<0.000000e+00> : vector<32x16xf32>
    %111 = tpu.matmul %109, %110, %cst_59 {dimension_numbers = #tpu.dot_dimension_numbers<[1], [0], [0], [1], [0, 0, 1, 1], [], []>} : vector<32x32xbf16>, vector<32x16xbf16>, vector<32x16xf32> -> vector<32x16xf32>
    %112 = vector.extract_strided_slice %7 {offsets = [16, 0], sizes = [16, 64], strides = [1, 1]} : vector<64x64xf32> to vector<16x64xf32>
    %113 = arith.truncf %111 : vector<32x16xf32> to vector<32x16xbf16>
    %114 = arith.truncf %112 : vector<16x64xf32> to vector<16x64xbf16>
    %cst_60 = arith.constant dense<0.000000e+00> : vector<32x64xf32>
    %115 = tpu.matmul %113, %114, %cst_60 {dimension_numbers = #tpu.dot_dimension_numbers<[1], [0], [0], [1], [0, 0, 1, 1], [], []>} : vector<32x16xbf16>, vector<16x64xbf16>, vector<32x64xf32> -> vector<32x64xf32>
    %116 = arith.addf %89, %115 : vector<32x64xf32>
    %117 = vector.extract_strided_slice %56 {offsets = [0, 32], sizes = [32, 16], strides = [1, 1]} : vector<32x192xf32> to vector<32x16xf32>
    %118 = vector.extract_strided_slice %56 {offsets = [0, 96], sizes = [32, 16], strides = [1, 1]} : vector<32x192xf32> to vector<32x16xf32>
    %119 = vector.extract_strided_slice %56 {offsets = [0, 160], sizes = [32, 16], strides = [1, 1]} : vector<32x192xf32> to vector<32x16xf32>
    %120 = arith.truncf %117 : vector<32x16xf32> to vector<32x16xbf16>
    %121 = arith.truncf %118 : vector<32x16xf32> to vector<32x16xbf16>
    %cst_61 = arith.constant dense<0.000000e+00> : vector<32x32xf32>
    %122 = tpu.matmul %120, %121, %cst_61 {dimension_numbers = #tpu.dot_dimension_numbers<[1], [1], [0], [0], [0, 0, 1, 0], [], []>} : vector<32x16xbf16>, vector<32x16xbf16>, vector<32x32xf32> -> vector<32x32xf32>
    %cst_62 = arith.constant 2.500000e-01 : f32
    %123 = vector.broadcast %cst_62 : f32 to vector<32x32xf32>
    %124 = arith.mulf %122, %123 : vector<32x32xf32>
    %125 = arith.addf %124, %63 : vector<32x32xf32>
    %cst_63 = arith.constant dense<0xFF800000> : vector<32xf32>
    %126 = vector.multi_reduction <maximumf>, %125, %cst_63 [1] : vector<32x32xf32> to vector<32xf32>
    %127 = vector.shape_cast %126 : vector<32xf32> to vector<32x1xf32>
    %128 = vector.broadcast %127 : vector<32x1xf32> to vector<32x32xf32>
    %129 = arith.subf %125, %128 : vector<32x32xf32>
    %130 = math.exp %129 : vector<32x32xf32>
    %cst_64 = arith.constant dense<0.000000e+00> : vector<32xf32>
    %131 = vector.multi_reduction <add>, %130, %cst_64 [1] : vector<32x32xf32> to vector<32xf32>
    %132 = vector.shape_cast %131 : vector<32xf32> to vector<32x1xf32>
    %133 = tpu.reciprocal %132 {approx = true} : vector<32x1xf32> -> vector<32x1xf32>
    %134 = vector.broadcast %133 : vector<32x1xf32> to vector<32x32xf32>
    %135 = arith.mulf %130, %134 : vector<32x32xf32>
    %136 = arith.truncf %135 : vector<32x32xf32> to vector<32x32xbf16>
    %137 = arith.truncf %119 : vector<32x16xf32> to vector<32x16xbf16>
    %cst_65 = arith.constant dense<0.000000e+00> : vector<32x16xf32>
    %138 = tpu.matmul %136, %137, %cst_65 {dimension_numbers = #tpu.dot_dimension_numbers<[1], [0], [0], [1], [0, 0, 1, 1], [], []>} : vector<32x32xbf16>, vector<32x16xbf16>, vector<32x16xf32> -> vector<32x16xf32>
    %139 = vector.extract_strided_slice %7 {offsets = [32, 0], sizes = [16, 64], strides = [1, 1]} : vector<64x64xf32> to vector<16x64xf32>
    %140 = arith.truncf %138 : vector<32x16xf32> to vector<32x16xbf16>
    %141 = arith.truncf %139 : vector<16x64xf32> to vector<16x64xbf16>
    %cst_66 = arith.constant dense<0.000000e+00> : vector<32x64xf32>
    %142 = tpu.matmul %140, %141, %cst_66 {dimension_numbers = #tpu.dot_dimension_numbers<[1], [0], [0], [1], [0, 0, 1, 1], [], []>} : vector<32x16xbf16>, vector<16x64xbf16>, vector<32x64xf32> -> vector<32x64xf32>
    %143 = arith.addf %116, %142 : vector<32x64xf32>
    %144 = vector.extract_strided_slice %56 {offsets = [0, 48], sizes = [32, 16], strides = [1, 1]} : vector<32x192xf32> to vector<32x16xf32>
    %145 = vector.extract_strided_slice %56 {offsets = [0, 112], sizes = [32, 16], strides = [1, 1]} : vector<32x192xf32> to vector<32x16xf32>
    %146 = vector.extract_strided_slice %56 {offsets = [0, 176], sizes = [32, 16], strides = [1, 1]} : vector<32x192xf32> to vector<32x16xf32>
    %147 = arith.truncf %144 : vector<32x16xf32> to vector<32x16xbf16>
    %148 = arith.truncf %145 : vector<32x16xf32> to vector<32x16xbf16>
    %cst_67 = arith.constant dense<0.000000e+00> : vector<32x32xf32>
    %149 = tpu.matmul %147, %148, %cst_67 {dimension_numbers = #tpu.dot_dimension_numbers<[1], [1], [0], [0], [0, 0, 1, 0], [], []>} : vector<32x16xbf16>, vector<32x16xbf16>, vector<32x32xf32> -> vector<32x32xf32>
    %cst_68 = arith.constant 2.500000e-01 : f32
    %150 = vector.broadcast %cst_68 : f32 to vector<32x32xf32>
    %151 = arith.mulf %149, %150 : vector<32x32xf32>
    %152 = arith.addf %151, %63 : vector<32x32xf32>
    %cst_69 = arith.constant dense<0xFF800000> : vector<32xf32>
    %153 = vector.multi_reduction <maximumf>, %152, %cst_69 [1] : vector<32x32xf32> to vector<32xf32>
    %154 = vector.shape_cast %153 : vector<32xf32> to vector<32x1xf32>
    %155 = vector.broadcast %154 : vector<32x1xf32> to vector<32x32xf32>
    %156 = arith.subf %152, %155 : vector<32x32xf32>
    %157 = math.exp %156 : vector<32x32xf32>
    %cst_70 = arith.constant dense<0.000000e+00> : vector<32xf32>
    %158 = vector.multi_reduction <add>, %157, %cst_70 [1] : vector<32x32xf32> to vector<32xf32>
    %159 = vector.shape_cast %158 : vector<32xf32> to vector<32x1xf32>
    %160 = tpu.reciprocal %159 {approx = true} : vector<32x1xf32> -> vector<32x1xf32>
    %161 = vector.broadcast %160 : vector<32x1xf32> to vector<32x32xf32>
    %162 = arith.mulf %157, %161 : vector<32x32xf32>
    %163 = arith.truncf %162 : vector<32x32xf32> to vector<32x32xbf16>
    %164 = arith.truncf %146 : vector<32x16xf32> to vector<32x16xbf16>
    %cst_71 = arith.constant dense<0.000000e+00> : vector<32x16xf32>
    %165 = tpu.matmul %163, %164, %cst_71 {dimension_numbers = #tpu.dot_dimension_numbers<[1], [0], [0], [1], [0, 0, 1, 1], [], []>} : vector<32x32xbf16>, vector<32x16xbf16>, vector<32x16xf32> -> vector<32x16xf32>
    %166 = vector.extract_strided_slice %7 {offsets = [48, 0], sizes = [16, 64], strides = [1, 1]} : vector<64x64xf32> to vector<16x64xf32>
    %167 = arith.truncf %165 : vector<32x16xf32> to vector<32x16xbf16>
    %168 = arith.truncf %166 : vector<16x64xf32> to vector<16x64xbf16>
    %cst_72 = arith.constant dense<0.000000e+00> : vector<32x64xf32>
    %169 = tpu.matmul %167, %168, %cst_72 {dimension_numbers = #tpu.dot_dimension_numbers<[1], [0], [0], [1], [0, 0, 1, 1], [], []>} : vector<32x16xbf16>, vector<16x64xbf16>, vector<32x64xf32> -> vector<32x64xf32>
    %170 = arith.addf %143, %169 : vector<32x64xf32>
    %171 = arith.addf %29, %170 : vector<32x64xf32>
    %172 = vector.broadcast %8 : vector<1x64xf32> to vector<32x64xf32>
    %173 = arith.addf %171, %172 : vector<32x64xf32>
    %cst_73 = arith.constant dense<0.000000e+00> : vector<32xf32>
    %174 = vector.multi_reduction <add>, %173, %cst_73 [1] : vector<32x64xf32> to vector<32xf32>
    %175 = vector.shape_cast %174 : vector<32xf32> to vector<32x1xf32>
    %cst_74 = arith.constant 6.400000e+01 : f32
    %176 = vector.broadcast %cst_74 : f32 to vector<32x1xf32>
    %177 = arith.divf %175, %176 : vector<32x1xf32>
    %178 = vector.broadcast %177 : vector<32x1xf32> to vector<32x64xf32>
    %179 = arith.subf %173, %178 : vector<32x64xf32>
    %180 = arith.mulf %179, %179 : vector<32x64xf32>
    %cst_75 = arith.constant dense<0.000000e+00> : vector<32xf32>
    %181 = vector.multi_reduction <add>, %180, %cst_75 [1] : vector<32x64xf32> to vector<32xf32>
    %182 = vector.shape_cast %181 : vector<32xf32> to vector<32x1xf32>
    %cst_76 = arith.constant 6.400000e+01 : f32
    %183 = vector.broadcast %cst_76 : f32 to vector<32x1xf32>
    %184 = arith.divf %182, %183 : vector<32x1xf32>
    %185 = vector.broadcast %177 : vector<32x1xf32> to vector<32x64xf32>
    %186 = arith.subf %173, %185 : vector<32x64xf32>
    %cst_77 = arith.constant 9.99999974E-6 : f32
    %187 = vector.broadcast %cst_77 : f32 to vector<32x1xf32>
    %188 = arith.addf %184, %187 : vector<32x1xf32>
    %189 = math.rsqrt %188 : vector<32x1xf32>
    %190 = vector.broadcast %189 : vector<32x1xf32> to vector<32x64xf32>
    %191 = arith.mulf %186, %190 : vector<32x64xf32>
    %192 = vector.broadcast %9 : vector<1x64xf32> to vector<32x64xf32>
    %193 = arith.mulf %191, %192 : vector<32x64xf32>
    %194 = vector.broadcast %10 : vector<1x64xf32> to vector<32x64xf32>
    %195 = arith.addf %193, %194 : vector<32x64xf32>
    %196 = arith.truncf %195 : vector<32x64xf32> to vector<32x64xbf16>
    %197 = arith.truncf %11 : vector<64x128xf32> to vector<64x128xbf16>
    %cst_78 = arith.constant dense<0.000000e+00> : vector<32x128xf32>
    %198 = tpu.matmul %196, %197, %cst_78 {dimension_numbers = #tpu.dot_dimension_numbers<[1], [0], [0], [1], [0, 0, 1, 1], [], []>} : vector<32x64xbf16>, vector<64x128xbf16>, vector<32x128xf32> -> vector<32x128xf32>
    %199 = vector.broadcast %12 : vector<1x128xf32> to vector<32x128xf32>
    %200 = arith.addf %198, %199 : vector<32x128xf32>
    %cst_79 = arith.constant 5.000000e-01 : f32
    %201 = vector.broadcast %cst_79 : f32 to vector<32x128xf32>
    %202 = arith.mulf %201, %200 : vector<32x128xf32>
    %cst_80 = arith.constant 4.471500e-02 : f32
    %203 = vector.broadcast %cst_80 : f32 to vector<32x128xf32>
    %204 = arith.mulf %203, %200 : vector<32x128xf32>
    %205 = arith.mulf %204, %200 : vector<32x128xf32>
    %206 = arith.mulf %205, %200 : vector<32x128xf32>
    %207 = arith.addf %200, %206 : vector<32x128xf32>
    %cst_81 = arith.constant 0.797884583 : f32
    %208 = vector.broadcast %cst_81 : f32 to vector<32x128xf32>
    %209 = arith.mulf %208, %207 : vector<32x128xf32>
    %210 = math.tanh %209 : vector<32x128xf32>
    %cst_82 = arith.constant 1.000000e+00 : f32
    %211 = vector.broadcast %cst_82 : f32 to vector<32x128xf32>
    %212 = arith.addf %211, %210 : vector<32x128xf32>
    %213 = arith.mulf %202, %212 : vector<32x128xf32>
    %214 = arith.truncf %213 : vector<32x128xf32> to vector<32x128xbf16>
    %215 = arith.truncf %13 : vector<128x64xf32> to vector<128x64xbf16>
    %cst_83 = arith.constant dense<0.000000e+00> : vector<32x64xf32>
    %216 = tpu.matmul %214, %215, %cst_83 {dimension_numbers = #tpu.dot_dimension_numbers<[1], [0], [0], [1], [0, 0, 1, 1], [], []>} : vector<32x128xbf16>, vector<128x64xbf16>, vector<32x64xf32> -> vector<32x64xf32>
    %217 = vector.broadcast %14 : vector<1x64xf32> to vector<32x64xf32>
    %218 = arith.addf %216, %217 : vector<32x64xf32>
    %219 = arith.addf %173, %218 : vector<32x64xf32>
    %cst_84 = arith.constant dense<0.000000e+00> : vector<32xf32>
    %220 = vector.multi_reduction <add>, %219, %cst_84 [1] : vector<32x64xf32> to vector<32xf32>
    %221 = vector.shape_cast %220 : vector<32xf32> to vector<32x1xf32>
    %cst_85 = arith.constant 6.400000e+01 : f32
    %222 = vector.broadcast %cst_85 : f32 to vector<32x1xf32>
    %223 = arith.divf %221, %222 : vector<32x1xf32>
    %224 = vector.broadcast %223 : vector<32x1xf32> to vector<32x64xf32>
    %225 = arith.subf %219, %224 : vector<32x64xf32>
    %226 = arith.mulf %225, %225 : vector<32x64xf32>
    %cst_86 = arith.constant dense<0.000000e+00> : vector<32xf32>
    %227 = vector.multi_reduction <add>, %226, %cst_86 [1] : vector<32x64xf32> to vector<32xf32>
    %228 = vector.shape_cast %227 : vector<32xf32> to vector<32x1xf32>
    %cst_87 = arith.constant 6.400000e+01 : f32
    %229 = vector.broadcast %cst_87 : f32 to vector<32x1xf32>
    %230 = arith.divf %228, %229 : vector<32x1xf32>
    %231 = vector.broadcast %223 : vector<32x1xf32> to vector<32x64xf32>
    %232 = arith.subf %219, %231 : vector<32x64xf32>
    %cst_88 = arith.constant 9.99999974E-6 : f32
    %233 = vector.broadcast %cst_88 : f32 to vector<32x1xf32>
    %234 = arith.addf %230, %233 : vector<32x1xf32>
    %235 = math.rsqrt %234 : vector<32x1xf32>
    %236 = vector.broadcast %235 : vector<32x1xf32> to vector<32x64xf32>
    %237 = arith.mulf %232, %236 : vector<32x64xf32>
    %238 = vector.broadcast %15 : vector<1x64xf32> to vector<32x64xf32>
    %239 = arith.mulf %237, %238 : vector<32x64xf32>
    %240 = vector.broadcast %16 : vector<1x64xf32> to vector<32x64xf32>
    %241 = arith.addf %239, %240 : vector<32x64xf32>
    %c16_i32 = arith.constant 16 : i32
    %242 = vector.broadcast %c16_i32 : i32 to vector<2x32xi32>
    %243 = arith.muli %21, %242 : vector<2x32xi32>
    %c1_i32 = arith.constant 1 : i32
    %244 = arith.subi %28, %c1_i32 : i32
    %245 = vector.broadcast %244 : i32 to vector<2x32xi32>
    %246 = arith.addi %243, %245 : vector<2x32xi32>
    %247 = arith.cmpi eq, %22, %246 : vector<2x32xi32>
    %248 = arith.extui %247 : vector<2x32xi1> to vector<2x32xi32>
    %249 = arith.sitofp %248 : vector<2x32xi32> to vector<2x32xf32>
    %250 = arith.truncf %249 : vector<2x32xf32> to vector<2x32xbf16>
    %251 = arith.truncf %241 : vector<32x64xf32> to vector<32x64xbf16>
    %cst_89 = arith.constant dense<0.000000e+00> : vector<2x64xf32>
    %252 = tpu.matmul %250, %251, %cst_89 {dimension_numbers = #tpu.dot_dimension_numbers<[1], [0], [0], [1], [0, 0, 1, 1], [], []>} : vector<2x32xbf16>, vector<32x64xbf16>, vector<2x64xf32> -> vector<2x64xf32>
    %253 = arith.truncf %252 : vector<2x64xf32> to vector<2x64xbf16>
    %254 = arith.truncf %17 : vector<64x128xf32> to vector<64x128xbf16>
    %cst_90 = arith.constant dense<0.000000e+00> : vector<2x128xf32>
    %255 = tpu.matmul %253, %254, %cst_90 {dimension_numbers = #tpu.dot_dimension_numbers<[1], [0], [0], [1], [0, 0, 1, 1], [], []>} : vector<2x64xbf16>, vector<64x128xbf16>, vector<2x128xf32> -> vector<2x128xf32>
    %256 = vector.broadcast %18 : vector<1x128xf32> to vector<2x128xf32>
    %257 = arith.addf %255, %256 : vector<2x128xf32>
    %cst_91 = arith.constant dense<0xFF800000> : vector<2xf32>
    %258 = vector.multi_reduction <maximumf>, %257, %cst_91 [1] : vector<2x128xf32> to vector<2xf32>
    %259 = vector.shape_cast %258 : vector<2xf32> to vector<2x1xf32>
    %260 = vector.broadcast %259 : vector<2x1xf32> to vector<2x128xf32>
    %261 = arith.cmpf oge, %257, %260 : vector<2x128xf32>
    %262 = arith.sitofp %20 : vector<2x128xi32> to vector<2x128xf32>
    %cst_92 = arith.constant 1.280000e+02 : f32
    %263 = vector.broadcast %cst_92 : f32 to vector<2x128xf32>
    %264 = arith.select %261, %262, %263 : vector<2x128xi1>, vector<2x128xf32>
    %cst_93 = arith.constant dense<0x7F800000> : vector<2xf32>
    %265 = vector.multi_reduction <minimumf>, %264, %cst_93 [1] : vector<2x128xf32> to vector<2xf32>
    %266 = vector.shape_cast %265 : vector<2xf32> to vector<2x1xf32>
    %267 = arith.fptosi %266 : vector<2x1xf32> to vector<2x1xi32>
    %268 = vector.broadcast %c0_i32_41 : i32 to vector<1x4xi32>
    %269 = arith.cmpi eq, %25, %268 : vector<1x4xi32>
    %270 = vector.shape_cast %269 : vector<1x4xi1> to vector<1x4xi1>
    %271 = vector.broadcast %270 : vector<1x4xi1> to vector<2x4xi1>
    %272 = vector.shape_cast %267 : vector<2x1xi32> to vector<2x1xi32>
    %273 = vector.broadcast %272 : vector<2x1xi32> to vector<2x4xi32>
    %274 = arith.select %271, %273, %27 : vector<2x4xi1>, vector<2x4xi32>
    %275 = vector.broadcast %267 : vector<2x1xi32> to vector<2x128xi32>
    %276 = arith.cmpi eq, %20, %275 : vector<2x128xi32>
    %277 = arith.extui %276 : vector<2x128xi1> to vector<2x128xi32>
    %278 = arith.sitofp %277 : vector<2x128xi32> to vector<2x128xf32>
    %279 = arith.truncf %278 : vector<2x128xf32> to vector<2x128xbf16>
    %280 = arith.truncf %19 : vector<128x64xf32> to vector<128x64xbf16>
    %cst_94 = arith.constant dense<0.000000e+00> : vector<2x64xf32>
    %281 = tpu.matmul %279, %280, %cst_94 {dimension_numbers = #tpu.dot_dimension_numbers<[1], [0], [0], [1], [0, 0, 1, 1], [], []>} : vector<2x128xbf16>, vector<128x64xbf16>, vector<2x64xf32> -> vector<2x64xf32>
    %c16_i32_95 = arith.constant 16 : i32
    %282 = vector.broadcast %c16_i32_95 : i32 to vector<32x2xi32>
    %283 = arith.muli %24, %282 : vector<32x2xi32>
    %284 = vector.broadcast %28 : i32 to vector<32x2xi32>
    %285 = arith.addi %283, %284 : vector<32x2xi32>
    %286 = arith.cmpi eq, %23, %285 : vector<32x2xi32>
    %287 = arith.extui %286 : vector<32x2xi1> to vector<32x2xi32>
    %288 = arith.sitofp %287 : vector<32x2xi32> to vector<32x2xf32>
    %289 = arith.truncf %288 : vector<32x2xf32> to vector<32x2xbf16>
    %290 = arith.truncf %281 : vector<2x64xf32> to vector<2x64xbf16>
    %cst_96 = arith.constant dense<0.000000e+00> : vector<32x64xf32>
    %291 = tpu.matmul %289, %290, %cst_96 {dimension_numbers = #tpu.dot_dimension_numbers<[1], [0], [0], [1], [0, 0, 1, 1], [], []>} : vector<32x2xbf16>, vector<2x64xbf16>, vector<32x64xf32> -> vector<32x64xf32>
    %292 = arith.addf %26, %291 : vector<32x64xf32>
    %c1_i32_97 = arith.constant 1 : i32
    %c12_i32_98 = arith.constant 12 : i32
    %293 = arith.addi %c12_i32_98, %c1_i32_97 : i32
    %294 = arith.addf %292, %0 : vector<32x64xf32>
    %cst_99 = arith.constant dense<0.000000e+00> : vector<32xf32>
    %295 = vector.multi_reduction <add>, %294, %cst_99 [1] : vector<32x64xf32> to vector<32xf32>
    %296 = vector.shape_cast %295 : vector<32xf32> to vector<32x1xf32>
    %cst_100 = arith.constant 6.400000e+01 : f32
    %297 = vector.broadcast %cst_100 : f32 to vector<32x1xf32>
    %298 = arith.divf %296, %297 : vector<32x1xf32>
    %299 = vector.broadcast %298 : vector<32x1xf32> to vector<32x64xf32>
    %300 = arith.subf %294, %299 : vector<32x64xf32>
    %301 = arith.mulf %300, %300 : vector<32x64xf32>
    %cst_101 = arith.constant dense<0.000000e+00> : vector<32xf32>
    %302 = vector.multi_reduction <add>, %301, %cst_101 [1] : vector<32x64xf32> to vector<32xf32>
    %303 = vector.shape_cast %302 : vector<32xf32> to vector<32x1xf32>
    %cst_102 = arith.constant 6.400000e+01 : f32
    %304 = vector.broadcast %cst_102 : f32 to vector<32x1xf32>
    %305 = arith.divf %303, %304 : vector<32x1xf32>
    %306 = vector.broadcast %298 : vector<32x1xf32> to vector<32x64xf32>
    %307 = arith.subf %294, %306 : vector<32x64xf32>
    %cst_103 = arith.constant 9.99999974E-6 : f32
    %308 = vector.broadcast %cst_103 : f32 to vector<32x1xf32>
    %309 = arith.addf %305, %308 : vector<32x1xf32>
    %310 = math.rsqrt %309 : vector<32x1xf32>
    %311 = vector.broadcast %310 : vector<32x1xf32> to vector<32x64xf32>
    %312 = arith.mulf %307, %311 : vector<32x64xf32>
    %313 = vector.broadcast %3 : vector<1x64xf32> to vector<32x64xf32>
    %314 = arith.mulf %312, %313 : vector<32x64xf32>
    %315 = vector.broadcast %4 : vector<1x64xf32> to vector<32x64xf32>
    %316 = arith.addf %314, %315 : vector<32x64xf32>
    %317 = arith.truncf %316 : vector<32x64xf32> to vector<32x64xbf16>
    %318 = arith.truncf %5 : vector<64x192xf32> to vector<64x192xbf16>
    %cst_104 = arith.constant dense<0.000000e+00> : vector<32x192xf32>
    %319 = tpu.matmul %317, %318, %cst_104 {dimension_numbers = #tpu.dot_dimension_numbers<[1], [0], [0], [1], [0, 0, 1, 1], [], []>} : vector<32x64xbf16>, vector<64x192xbf16>, vector<32x192xf32> -> vector<32x192xf32>
    %320 = vector.broadcast %6 : vector<1x192xf32> to vector<32x192xf32>
    %321 = arith.addf %319, %320 : vector<32x192xf32>
    %322 = vector.broadcast %293 : i32 to vector<1x32xi32>
    %323 = arith.cmpi slt, %2, %322 : vector<1x32xi32>
    %cst_105 = arith.constant 0.000000e+00 : f32
    %cst_106 = arith.constant -1.000000e+09 : f32
    %324 = vector.broadcast %cst_105 : f32 to vector<1x32xf32>
    %325 = vector.broadcast %cst_106 : f32 to vector<1x32xf32>
    %326 = arith.select %323, %324, %325 : vector<1x32xi1>, vector<1x32xf32>
    %327 = vector.broadcast %326 : vector<1x32xf32> to vector<32x32xf32>
    %328 = arith.addf %1, %327 : vector<32x32xf32>
    %329 = vector.extract_strided_slice %321 {offsets = [0, 0], sizes = [32, 16], strides = [1, 1]} : vector<32x192xf32> to vector<32x16xf32>
    %330 = vector.extract_strided_slice %321 {offsets = [0, 64], sizes = [32, 16], strides = [1, 1]} : vector<32x192xf32> to vector<32x16xf32>
    %331 = vector.extract_strided_slice %321 {offsets = [0, 128], sizes = [32, 16], strides = [1, 1]} : vector<32x192xf32> to vector<32x16xf32>
    %332 = arith.truncf %329 : vector<32x16xf32> to vector<32x16xbf16>
    %333 = arith.truncf %330 : vector<32x16xf32> to vector<32x16xbf16>
    %cst_107 = arith.constant dense<0.000000e+00> : vector<32x32xf32>
    %334 = tpu.matmul %332, %333, %cst_107 {dimension_numbers = #tpu.dot_dimension_numbers<[1], [1], [0], [0], [0, 0, 1, 0], [], []>} : vector<32x16xbf16>, vector<32x16xbf16>, vector<32x32xf32> -> vector<32x32xf32>
    %cst_108 = arith.constant 2.500000e-01 : f32
    %335 = vector.broadcast %cst_108 : f32 to vector<32x32xf32>
    %336 = arith.mulf %334, %335 : vector<32x32xf32>
    %337 = arith.addf %336, %328 : vector<32x32xf32>
    %cst_109 = arith.constant dense<0xFF800000> : vector<32xf32>
    %338 = vector.multi_reduction <maximumf>, %337, %cst_109 [1] : vector<32x32xf32> to vector<32xf32>
    %339 = vector.shape_cast %338 : vector<32xf32> to vector<32x1xf32>
    %340 = vector.broadcast %339 : vector<32x1xf32> to vector<32x32xf32>
    %341 = arith.subf %337, %340 : vector<32x32xf32>
    %342 = math.exp %341 : vector<32x32xf32>
    %cst_110 = arith.constant dense<0.000000e+00> : vector<32xf32>
    %343 = vector.multi_reduction <add>, %342, %cst_110 [1] : vector<32x32xf32> to vector<32xf32>
    %344 = vector.shape_cast %343 : vector<32xf32> to vector<32x1xf32>
    %345 = tpu.reciprocal %344 {approx = true} : vector<32x1xf32> -> vector<32x1xf32>
    %346 = vector.broadcast %345 : vector<32x1xf32> to vector<32x32xf32>
    %347 = arith.mulf %342, %346 : vector<32x32xf32>
    %348 = arith.truncf %347 : vector<32x32xf32> to vector<32x32xbf16>
    %349 = arith.truncf %331 : vector<32x16xf32> to vector<32x16xbf16>
    %cst_111 = arith.constant dense<0.000000e+00> : vector<32x16xf32>
    %350 = tpu.matmul %348, %349, %cst_111 {dimension_numbers = #tpu.dot_dimension_numbers<[1], [0], [0], [1], [0, 0, 1, 1], [], []>} : vector<32x32xbf16>, vector<32x16xbf16>, vector<32x16xf32> -> vector<32x16xf32>
    %351 = vector.extract_strided_slice %7 {offsets = [0, 0], sizes = [16, 64], strides = [1, 1]} : vector<64x64xf32> to vector<16x64xf32>
    %352 = arith.truncf %350 : vector<32x16xf32> to vector<32x16xbf16>
    %353 = arith.truncf %351 : vector<16x64xf32> to vector<16x64xbf16>
    %cst_112 = arith.constant dense<0.000000e+00> : vector<32x64xf32>
    %354 = tpu.matmul %352, %353, %cst_112 {dimension_numbers = #tpu.dot_dimension_numbers<[1], [0], [0], [1], [0, 0, 1, 1], [], []>} : vector<32x16xbf16>, vector<16x64xbf16>, vector<32x64xf32> -> vector<32x64xf32>
    %355 = vector.extract_strided_slice %321 {offsets = [0, 16], sizes = [32, 16], strides = [1, 1]} : vector<32x192xf32> to vector<32x16xf32>
    %356 = vector.extract_strided_slice %321 {offsets = [0, 80], sizes = [32, 16], strides = [1, 1]} : vector<32x192xf32> to vector<32x16xf32>
    %357 = vector.extract_strided_slice %321 {offsets = [0, 144], sizes = [32, 16], strides = [1, 1]} : vector<32x192xf32> to vector<32x16xf32>
    %358 = arith.truncf %355 : vector<32x16xf32> to vector<32x16xbf16>
    %359 = arith.truncf %356 : vector<32x16xf32> to vector<32x16xbf16>
    %cst_113 = arith.constant dense<0.000000e+00> : vector<32x32xf32>
    %360 = tpu.matmul %358, %359, %cst_113 {dimension_numbers = #tpu.dot_dimension_numbers<[1], [1], [0], [0], [0, 0, 1, 0], [], []>} : vector<32x16xbf16>, vector<32x16xbf16>, vector<32x32xf32> -> vector<32x32xf32>
    %cst_114 = arith.constant 2.500000e-01 : f32
    %361 = vector.broadcast %cst_114 : f32 to vector<32x32xf32>
    %362 = arith.mulf %360, %361 : vector<32x32xf32>
    %363 = arith.addf %362, %328 : vector<32x32xf32>
    %cst_115 = arith.constant dense<0xFF800000> : vector<32xf32>
    %364 = vector.multi_reduction <maximumf>, %363, %cst_115 [1] : vector<32x32xf32> to vector<32xf32>
    %365 = vector.shape_cast %364 : vector<32xf32> to vector<32x1xf32>
    %366 = vector.broadcast %365 : vector<32x1xf32> to vector<32x32xf32>
    %367 = arith.subf %363, %366 : vector<32x32xf32>
    %368 = math.exp %367 : vector<32x32xf32>
    %cst_116 = arith.constant dense<0.000000e+00> : vector<32xf32>
    %369 = vector.multi_reduction <add>, %368, %cst_116 [1] : vector<32x32xf32> to vector<32xf32>
    %370 = vector.shape_cast %369 : vector<32xf32> to vector<32x1xf32>
    %371 = tpu.reciprocal %370 {approx = true} : vector<32x1xf32> -> vector<32x1xf32>
    %372 = vector.broadcast %371 : vector<32x1xf32> to vector<32x32xf32>
    %373 = arith.mulf %368, %372 : vector<32x32xf32>
    %374 = arith.truncf %373 : vector<32x32xf32> to vector<32x32xbf16>
    %375 = arith.truncf %357 : vector<32x16xf32> to vector<32x16xbf16>
    %cst_117 = arith.constant dense<0.000000e+00> : vector<32x16xf32>
    %376 = tpu.matmul %374, %375, %cst_117 {dimension_numbers = #tpu.dot_dimension_numbers<[1], [0], [0], [1], [0, 0, 1, 1], [], []>} : vector<32x32xbf16>, vector<32x16xbf16>, vector<32x16xf32> -> vector<32x16xf32>
    %377 = vector.extract_strided_slice %7 {offsets = [16, 0], sizes = [16, 64], strides = [1, 1]} : vector<64x64xf32> to vector<16x64xf32>
    %378 = arith.truncf %376 : vector<32x16xf32> to vector<32x16xbf16>
    %379 = arith.truncf %377 : vector<16x64xf32> to vector<16x64xbf16>
    %cst_118 = arith.constant dense<0.000000e+00> : vector<32x64xf32>
    %380 = tpu.matmul %378, %379, %cst_118 {dimension_numbers = #tpu.dot_dimension_numbers<[1], [0], [0], [1], [0, 0, 1, 1], [], []>} : vector<32x16xbf16>, vector<16x64xbf16>, vector<32x64xf32> -> vector<32x64xf32>
    %381 = arith.addf %354, %380 : vector<32x64xf32>
    %382 = vector.extract_strided_slice %321 {offsets = [0, 32], sizes = [32, 16], strides = [1, 1]} : vector<32x192xf32> to vector<32x16xf32>
    %383 = vector.extract_strided_slice %321 {offsets = [0, 96], sizes = [32, 16], strides = [1, 1]} : vector<32x192xf32> to vector<32x16xf32>
    %384 = vector.extract_strided_slice %321 {offsets = [0, 160], sizes = [32, 16], strides = [1, 1]} : vector<32x192xf32> to vector<32x16xf32>
    %385 = arith.truncf %382 : vector<32x16xf32> to vector<32x16xbf16>
    %386 = arith.truncf %383 : vector<32x16xf32> to vector<32x16xbf16>
    %cst_119 = arith.constant dense<0.000000e+00> : vector<32x32xf32>
    %387 = tpu.matmul %385, %386, %cst_119 {dimension_numbers = #tpu.dot_dimension_numbers<[1], [1], [0], [0], [0, 0, 1, 0], [], []>} : vector<32x16xbf16>, vector<32x16xbf16>, vector<32x32xf32> -> vector<32x32xf32>
    %cst_120 = arith.constant 2.500000e-01 : f32
    %388 = vector.broadcast %cst_120 : f32 to vector<32x32xf32>
    %389 = arith.mulf %387, %388 : vector<32x32xf32>
    %390 = arith.addf %389, %328 : vector<32x32xf32>
    %cst_121 = arith.constant dense<0xFF800000> : vector<32xf32>
    %391 = vector.multi_reduction <maximumf>, %390, %cst_121 [1] : vector<32x32xf32> to vector<32xf32>
    %392 = vector.shape_cast %391 : vector<32xf32> to vector<32x1xf32>
    %393 = vector.broadcast %392 : vector<32x1xf32> to vector<32x32xf32>
    %394 = arith.subf %390, %393 : vector<32x32xf32>
    %395 = math.exp %394 : vector<32x32xf32>
    %cst_122 = arith.constant dense<0.000000e+00> : vector<32xf32>
    %396 = vector.multi_reduction <add>, %395, %cst_122 [1] : vector<32x32xf32> to vector<32xf32>
    %397 = vector.shape_cast %396 : vector<32xf32> to vector<32x1xf32>
    %398 = tpu.reciprocal %397 {approx = true} : vector<32x1xf32> -> vector<32x1xf32>
    %399 = vector.broadcast %398 : vector<32x1xf32> to vector<32x32xf32>
    %400 = arith.mulf %395, %399 : vector<32x32xf32>
    %401 = arith.truncf %400 : vector<32x32xf32> to vector<32x32xbf16>
    %402 = arith.truncf %384 : vector<32x16xf32> to vector<32x16xbf16>
    %cst_123 = arith.constant dense<0.000000e+00> : vector<32x16xf32>
    %403 = tpu.matmul %401, %402, %cst_123 {dimension_numbers = #tpu.dot_dimension_numbers<[1], [0], [0], [1], [0, 0, 1, 1], [], []>} : vector<32x32xbf16>, vector<32x16xbf16>, vector<32x16xf32> -> vector<32x16xf32>
    %404 = vector.extract_strided_slice %7 {offsets = [32, 0], sizes = [16, 64], strides = [1, 1]} : vector<64x64xf32> to vector<16x64xf32>
    %405 = arith.truncf %403 : vector<32x16xf32> to vector<32x16xbf16>
    %406 = arith.truncf %404 : vector<16x64xf32> to vector<16x64xbf16>
    %cst_124 = arith.constant dense<0.000000e+00> : vector<32x64xf32>
    %407 = tpu.matmul %405, %406, %cst_124 {dimension_numbers = #tpu.dot_dimension_numbers<[1], [0], [0], [1], [0, 0, 1, 1], [], []>} : vector<32x16xbf16>, vector<16x64xbf16>, vector<32x64xf32> -> vector<32x64xf32>
    %408 = arith.addf %381, %407 : vector<32x64xf32>
    %409 = vector.extract_strided_slice %321 {offsets = [0, 48], sizes = [32, 16], strides = [1, 1]} : vector<32x192xf32> to vector<32x16xf32>
    %410 = vector.extract_strided_slice %321 {offsets = [0, 112], sizes = [32, 16], strides = [1, 1]} : vector<32x192xf32> to vector<32x16xf32>
    %411 = vector.extract_strided_slice %321 {offsets = [0, 176], sizes = [32, 16], strides = [1, 1]} : vector<32x192xf32> to vector<32x16xf32>
    %412 = arith.truncf %409 : vector<32x16xf32> to vector<32x16xbf16>
    %413 = arith.truncf %410 : vector<32x16xf32> to vector<32x16xbf16>
    %cst_125 = arith.constant dense<0.000000e+00> : vector<32x32xf32>
    %414 = tpu.matmul %412, %413, %cst_125 {dimension_numbers = #tpu.dot_dimension_numbers<[1], [1], [0], [0], [0, 0, 1, 0], [], []>} : vector<32x16xbf16>, vector<32x16xbf16>, vector<32x32xf32> -> vector<32x32xf32>
    %cst_126 = arith.constant 2.500000e-01 : f32
    %415 = vector.broadcast %cst_126 : f32 to vector<32x32xf32>
    %416 = arith.mulf %414, %415 : vector<32x32xf32>
    %417 = arith.addf %416, %328 : vector<32x32xf32>
    %cst_127 = arith.constant dense<0xFF800000> : vector<32xf32>
    %418 = vector.multi_reduction <maximumf>, %417, %cst_127 [1] : vector<32x32xf32> to vector<32xf32>
    %419 = vector.shape_cast %418 : vector<32xf32> to vector<32x1xf32>
    %420 = vector.broadcast %419 : vector<32x1xf32> to vector<32x32xf32>
    %421 = arith.subf %417, %420 : vector<32x32xf32>
    %422 = math.exp %421 : vector<32x32xf32>
    %cst_128 = arith.constant dense<0.000000e+00> : vector<32xf32>
    %423 = vector.multi_reduction <add>, %422, %cst_128 [1] : vector<32x32xf32> to vector<32xf32>
    %424 = vector.shape_cast %423 : vector<32xf32> to vector<32x1xf32>
    %425 = tpu.reciprocal %424 {approx = true} : vector<32x1xf32> -> vector<32x1xf32>
    %426 = vector.broadcast %425 : vector<32x1xf32> to vector<32x32xf32>
    %427 = arith.mulf %422, %426 : vector<32x32xf32>
    %428 = arith.truncf %427 : vector<32x32xf32> to vector<32x32xbf16>
    %429 = arith.truncf %411 : vector<32x16xf32> to vector<32x16xbf16>
    %cst_129 = arith.constant dense<0.000000e+00> : vector<32x16xf32>
    %430 = tpu.matmul %428, %429, %cst_129 {dimension_numbers = #tpu.dot_dimension_numbers<[1], [0], [0], [1], [0, 0, 1, 1], [], []>} : vector<32x32xbf16>, vector<32x16xbf16>, vector<32x16xf32> -> vector<32x16xf32>
    %431 = vector.extract_strided_slice %7 {offsets = [48, 0], sizes = [16, 64], strides = [1, 1]} : vector<64x64xf32> to vector<16x64xf32>
    %432 = arith.truncf %430 : vector<32x16xf32> to vector<32x16xbf16>
    %433 = arith.truncf %431 : vector<16x64xf32> to vector<16x64xbf16>
    %cst_130 = arith.constant dense<0.000000e+00> : vector<32x64xf32>
    %434 = tpu.matmul %432, %433, %cst_130 {dimension_numbers = #tpu.dot_dimension_numbers<[1], [0], [0], [1], [0, 0, 1, 1], [], []>} : vector<32x16xbf16>, vector<16x64xbf16>, vector<32x64xf32> -> vector<32x64xf32>
    %435 = arith.addf %408, %434 : vector<32x64xf32>
    %436 = arith.addf %294, %435 : vector<32x64xf32>
    %437 = vector.broadcast %8 : vector<1x64xf32> to vector<32x64xf32>
    %438 = arith.addf %436, %437 : vector<32x64xf32>
    %cst_131 = arith.constant dense<0.000000e+00> : vector<32xf32>
    %439 = vector.multi_reduction <add>, %438, %cst_131 [1] : vector<32x64xf32> to vector<32xf32>
    %440 = vector.shape_cast %439 : vector<32xf32> to vector<32x1xf32>
    %cst_132 = arith.constant 6.400000e+01 : f32
    %441 = vector.broadcast %cst_132 : f32 to vector<32x1xf32>
    %442 = arith.divf %440, %441 : vector<32x1xf32>
    %443 = vector.broadcast %442 : vector<32x1xf32> to vector<32x64xf32>
    %444 = arith.subf %438, %443 : vector<32x64xf32>
    %445 = arith.mulf %444, %444 : vector<32x64xf32>
    %cst_133 = arith.constant dense<0.000000e+00> : vector<32xf32>
    %446 = vector.multi_reduction <add>, %445, %cst_133 [1] : vector<32x64xf32> to vector<32xf32>
    %447 = vector.shape_cast %446 : vector<32xf32> to vector<32x1xf32>
    %cst_134 = arith.constant 6.400000e+01 : f32
    %448 = vector.broadcast %cst_134 : f32 to vector<32x1xf32>
    %449 = arith.divf %447, %448 : vector<32x1xf32>
    %450 = vector.broadcast %442 : vector<32x1xf32> to vector<32x64xf32>
    %451 = arith.subf %438, %450 : vector<32x64xf32>
    %cst_135 = arith.constant 9.99999974E-6 : f32
    %452 = vector.broadcast %cst_135 : f32 to vector<32x1xf32>
    %453 = arith.addf %449, %452 : vector<32x1xf32>
    %454 = math.rsqrt %453 : vector<32x1xf32>
    %455 = vector.broadcast %454 : vector<32x1xf32> to vector<32x64xf32>
    %456 = arith.mulf %451, %455 : vector<32x64xf32>
    %457 = vector.broadcast %9 : vector<1x64xf32> to vector<32x64xf32>
    %458 = arith.mulf %456, %457 : vector<32x64xf32>
    %459 = vector.broadcast %10 : vector<1x64xf32> to vector<32x64xf32>
    %460 = arith.addf %458, %459 : vector<32x64xf32>
    %461 = arith.truncf %460 : vector<32x64xf32> to vector<32x64xbf16>
    %462 = arith.truncf %11 : vector<64x128xf32> to vector<64x128xbf16>
    %cst_136 = arith.constant dense<0.000000e+00> : vector<32x128xf32>
    %463 = tpu.matmul %461, %462, %cst_136 {dimension_numbers = #tpu.dot_dimension_numbers<[1], [0], [0], [1], [0, 0, 1, 1], [], []>} : vector<32x64xbf16>, vector<64x128xbf16>, vector<32x128xf32> -> vector<32x128xf32>
    %464 = vector.broadcast %12 : vector<1x128xf32> to vector<32x128xf32>
    %465 = arith.addf %463, %464 : vector<32x128xf32>
    %cst_137 = arith.constant 5.000000e-01 : f32
    %466 = vector.broadcast %cst_137 : f32 to vector<32x128xf32>
    %467 = arith.mulf %466, %465 : vector<32x128xf32>
    %cst_138 = arith.constant 4.471500e-02 : f32
    %468 = vector.broadcast %cst_138 : f32 to vector<32x128xf32>
    %469 = arith.mulf %468, %465 : vector<32x128xf32>
    %470 = arith.mulf %469, %465 : vector<32x128xf32>
    %471 = arith.mulf %470, %465 : vector<32x128xf32>
    %472 = arith.addf %465, %471 : vector<32x128xf32>
    %cst_139 = arith.constant 0.797884583 : f32
    %473 = vector.broadcast %cst_139 : f32 to vector<32x128xf32>
    %474 = arith.mulf %473, %472 : vector<32x128xf32>
    %475 = math.tanh %474 : vector<32x128xf32>
    %cst_140 = arith.constant 1.000000e+00 : f32
    %476 = vector.broadcast %cst_140 : f32 to vector<32x128xf32>
    %477 = arith.addf %476, %475 : vector<32x128xf32>
    %478 = arith.mulf %467, %477 : vector<32x128xf32>
    %479 = arith.truncf %478 : vector<32x128xf32> to vector<32x128xbf16>
    %480 = arith.truncf %13 : vector<128x64xf32> to vector<128x64xbf16>
    %cst_141 = arith.constant dense<0.000000e+00> : vector<32x64xf32>
    %481 = tpu.matmul %479, %480, %cst_141 {dimension_numbers = #tpu.dot_dimension_numbers<[1], [0], [0], [1], [0, 0, 1, 1], [], []>} : vector<32x128xbf16>, vector<128x64xbf16>, vector<32x64xf32> -> vector<32x64xf32>
    %482 = vector.broadcast %14 : vector<1x64xf32> to vector<32x64xf32>
    %483 = arith.addf %481, %482 : vector<32x64xf32>
    %484 = arith.addf %438, %483 : vector<32x64xf32>
    %cst_142 = arith.constant dense<0.000000e+00> : vector<32xf32>
    %485 = vector.multi_reduction <add>, %484, %cst_142 [1] : vector<32x64xf32> to vector<32xf32>
    %486 = vector.shape_cast %485 : vector<32xf32> to vector<32x1xf32>
    %cst_143 = arith.constant 6.400000e+01 : f32
    %487 = vector.broadcast %cst_143 : f32 to vector<32x1xf32>
    %488 = arith.divf %486, %487 : vector<32x1xf32>
    %489 = vector.broadcast %488 : vector<32x1xf32> to vector<32x64xf32>
    %490 = arith.subf %484, %489 : vector<32x64xf32>
    %491 = arith.mulf %490, %490 : vector<32x64xf32>
    %cst_144 = arith.constant dense<0.000000e+00> : vector<32xf32>
    %492 = vector.multi_reduction <add>, %491, %cst_144 [1] : vector<32x64xf32> to vector<32xf32>
    %493 = vector.shape_cast %492 : vector<32xf32> to vector<32x1xf32>
    %cst_145 = arith.constant 6.400000e+01 : f32
    %494 = vector.broadcast %cst_145 : f32 to vector<32x1xf32>
    %495 = arith.divf %493, %494 : vector<32x1xf32>
    %496 = vector.broadcast %488 : vector<32x1xf32> to vector<32x64xf32>
    %497 = arith.subf %484, %496 : vector<32x64xf32>
    %cst_146 = arith.constant 9.99999974E-6 : f32
    %498 = vector.broadcast %cst_146 : f32 to vector<32x1xf32>
    %499 = arith.addf %495, %498 : vector<32x1xf32>
    %500 = math.rsqrt %499 : vector<32x1xf32>
    %501 = vector.broadcast %500 : vector<32x1xf32> to vector<32x64xf32>
    %502 = arith.mulf %497, %501 : vector<32x64xf32>
    %503 = vector.broadcast %15 : vector<1x64xf32> to vector<32x64xf32>
    %504 = arith.mulf %502, %503 : vector<32x64xf32>
    %505 = vector.broadcast %16 : vector<1x64xf32> to vector<32x64xf32>
    %506 = arith.addf %504, %505 : vector<32x64xf32>
    %c16_i32_147 = arith.constant 16 : i32
    %507 = vector.broadcast %c16_i32_147 : i32 to vector<2x32xi32>
    %508 = arith.muli %21, %507 : vector<2x32xi32>
    %c1_i32_148 = arith.constant 1 : i32
    %509 = arith.subi %293, %c1_i32_148 : i32
    %510 = vector.broadcast %509 : i32 to vector<2x32xi32>
    %511 = arith.addi %508, %510 : vector<2x32xi32>
    %512 = arith.cmpi eq, %22, %511 : vector<2x32xi32>
    %513 = arith.extui %512 : vector<2x32xi1> to vector<2x32xi32>
    %514 = arith.sitofp %513 : vector<2x32xi32> to vector<2x32xf32>
    %515 = arith.truncf %514 : vector<2x32xf32> to vector<2x32xbf16>
    %516 = arith.truncf %506 : vector<32x64xf32> to vector<32x64xbf16>
    %cst_149 = arith.constant dense<0.000000e+00> : vector<2x64xf32>
    %517 = tpu.matmul %515, %516, %cst_149 {dimension_numbers = #tpu.dot_dimension_numbers<[1], [0], [0], [1], [0, 0, 1, 1], [], []>} : vector<2x32xbf16>, vector<32x64xbf16>, vector<2x64xf32> -> vector<2x64xf32>
    %518 = arith.truncf %517 : vector<2x64xf32> to vector<2x64xbf16>
    %519 = arith.truncf %17 : vector<64x128xf32> to vector<64x128xbf16>
    %cst_150 = arith.constant dense<0.000000e+00> : vector<2x128xf32>
    %520 = tpu.matmul %518, %519, %cst_150 {dimension_numbers = #tpu.dot_dimension_numbers<[1], [0], [0], [1], [0, 0, 1, 1], [], []>} : vector<2x64xbf16>, vector<64x128xbf16>, vector<2x128xf32> -> vector<2x128xf32>
    %521 = vector.broadcast %18 : vector<1x128xf32> to vector<2x128xf32>
    %522 = arith.addf %520, %521 : vector<2x128xf32>
    %cst_151 = arith.constant dense<0xFF800000> : vector<2xf32>
    %523 = vector.multi_reduction <maximumf>, %522, %cst_151 [1] : vector<2x128xf32> to vector<2xf32>
    %524 = vector.shape_cast %523 : vector<2xf32> to vector<2x1xf32>
    %525 = vector.broadcast %524 : vector<2x1xf32> to vector<2x128xf32>
    %526 = arith.cmpf oge, %522, %525 : vector<2x128xf32>
    %527 = arith.sitofp %20 : vector<2x128xi32> to vector<2x128xf32>
    %cst_152 = arith.constant 1.280000e+02 : f32
    %528 = vector.broadcast %cst_152 : f32 to vector<2x128xf32>
    %529 = arith.select %526, %527, %528 : vector<2x128xi1>, vector<2x128xf32>
    %cst_153 = arith.constant dense<0x7F800000> : vector<2xf32>
    %530 = vector.multi_reduction <minimumf>, %529, %cst_153 [1] : vector<2x128xf32> to vector<2xf32>
    %531 = vector.shape_cast %530 : vector<2xf32> to vector<2x1xf32>
    %532 = arith.fptosi %531 : vector<2x1xf32> to vector<2x1xi32>
    %533 = vector.broadcast %c1_i32_97 : i32 to vector<1x4xi32>
    %534 = arith.cmpi eq, %25, %533 : vector<1x4xi32>
    %535 = vector.shape_cast %534 : vector<1x4xi1> to vector<1x4xi1>
    %536 = vector.broadcast %535 : vector<1x4xi1> to vector<2x4xi1>
    %537 = vector.shape_cast %532 : vector<2x1xi32> to vector<2x1xi32>
    %538 = vector.broadcast %537 : vector<2x1xi32> to vector<2x4xi32>
    %539 = arith.select %536, %538, %274 : vector<2x4xi1>, vector<2x4xi32>
    %540 = vector.broadcast %532 : vector<2x1xi32> to vector<2x128xi32>
    %541 = arith.cmpi eq, %20, %540 : vector<2x128xi32>
    %542 = arith.extui %541 : vector<2x128xi1> to vector<2x128xi32>
    %543 = arith.sitofp %542 : vector<2x128xi32> to vector<2x128xf32>
    %544 = arith.truncf %543 : vector<2x128xf32> to vector<2x128xbf16>
    %545 = arith.truncf %19 : vector<128x64xf32> to vector<128x64xbf16>
    %cst_154 = arith.constant dense<0.000000e+00> : vector<2x64xf32>
    %546 = tpu.matmul %544, %545, %cst_154 {dimension_numbers = #tpu.dot_dimension_numbers<[1], [0], [0], [1], [0, 0, 1, 1], [], []>} : vector<2x128xbf16>, vector<128x64xbf16>, vector<2x64xf32> -> vector<2x64xf32>
    %c16_i32_155 = arith.constant 16 : i32
    %547 = vector.broadcast %c16_i32_155 : i32 to vector<32x2xi32>
    %548 = arith.muli %24, %547 : vector<32x2xi32>
    %549 = vector.broadcast %293 : i32 to vector<32x2xi32>
    %550 = arith.addi %548, %549 : vector<32x2xi32>
    %551 = arith.cmpi eq, %23, %550 : vector<32x2xi32>
    %552 = arith.extui %551 : vector<32x2xi1> to vector<32x2xi32>
    %553 = arith.sitofp %552 : vector<32x2xi32> to vector<32x2xf32>
    %554 = arith.truncf %553 : vector<32x2xf32> to vector<32x2xbf16>
    %555 = arith.truncf %546 : vector<2x64xf32> to vector<2x64xbf16>
    %cst_156 = arith.constant dense<0.000000e+00> : vector<32x64xf32>
    %556 = tpu.matmul %554, %555, %cst_156 {dimension_numbers = #tpu.dot_dimension_numbers<[1], [0], [0], [1], [0, 0, 1, 1], [], []>} : vector<32x2xbf16>, vector<2x64xbf16>, vector<32x64xf32> -> vector<32x64xf32>
    %557 = arith.addf %292, %556 : vector<32x64xf32>
    %c2_i32 = arith.constant 2 : i32
    %c12_i32_157 = arith.constant 12 : i32
    %558 = arith.addi %c12_i32_157, %c2_i32 : i32
    %559 = arith.addf %557, %0 : vector<32x64xf32>
    %cst_158 = arith.constant dense<0.000000e+00> : vector<32xf32>
    %560 = vector.multi_reduction <add>, %559, %cst_158 [1] : vector<32x64xf32> to vector<32xf32>
    %561 = vector.shape_cast %560 : vector<32xf32> to vector<32x1xf32>
    %cst_159 = arith.constant 6.400000e+01 : f32
    %562 = vector.broadcast %cst_159 : f32 to vector<32x1xf32>
    %563 = arith.divf %561, %562 : vector<32x1xf32>
    %564 = vector.broadcast %563 : vector<32x1xf32> to vector<32x64xf32>
    %565 = arith.subf %559, %564 : vector<32x64xf32>
    %566 = arith.mulf %565, %565 : vector<32x64xf32>
    %cst_160 = arith.constant dense<0.000000e+00> : vector<32xf32>
    %567 = vector.multi_reduction <add>, %566, %cst_160 [1] : vector<32x64xf32> to vector<32xf32>
    %568 = vector.shape_cast %567 : vector<32xf32> to vector<32x1xf32>
    %cst_161 = arith.constant 6.400000e+01 : f32
    %569 = vector.broadcast %cst_161 : f32 to vector<32x1xf32>
    %570 = arith.divf %568, %569 : vector<32x1xf32>
    %571 = vector.broadcast %563 : vector<32x1xf32> to vector<32x64xf32>
    %572 = arith.subf %559, %571 : vector<32x64xf32>
    %cst_162 = arith.constant 9.99999974E-6 : f32
    %573 = vector.broadcast %cst_162 : f32 to vector<32x1xf32>
    %574 = arith.addf %570, %573 : vector<32x1xf32>
    %575 = math.rsqrt %574 : vector<32x1xf32>
    %576 = vector.broadcast %575 : vector<32x1xf32> to vector<32x64xf32>
    %577 = arith.mulf %572, %576 : vector<32x64xf32>
    %578 = vector.broadcast %3 : vector<1x64xf32> to vector<32x64xf32>
    %579 = arith.mulf %577, %578 : vector<32x64xf32>
    %580 = vector.broadcast %4 : vector<1x64xf32> to vector<32x64xf32>
    %581 = arith.addf %579, %580 : vector<32x64xf32>
    %582 = arith.truncf %581 : vector<32x64xf32> to vector<32x64xbf16>
    %583 = arith.truncf %5 : vector<64x192xf32> to vector<64x192xbf16>
    %cst_163 = arith.constant dense<0.000000e+00> : vector<32x192xf32>
    %584 = tpu.matmul %582, %583, %cst_163 {dimension_numbers = #tpu.dot_dimension_numbers<[1], [0], [0], [1], [0, 0, 1, 1], [], []>} : vector<32x64xbf16>, vector<64x192xbf16>, vector<32x192xf32> -> vector<32x192xf32>
    %585 = vector.broadcast %6 : vector<1x192xf32> to vector<32x192xf32>
    %586 = arith.addf %584, %585 : vector<32x192xf32>
    %587 = vector.broadcast %558 : i32 to vector<1x32xi32>
    %588 = arith.cmpi slt, %2, %587 : vector<1x32xi32>
    %cst_164 = arith.constant 0.000000e+00 : f32
    %cst_165 = arith.constant -1.000000e+09 : f32
    %589 = vector.broadcast %cst_164 : f32 to vector<1x32xf32>
    %590 = vector.broadcast %cst_165 : f32 to vector<1x32xf32>
    %591 = arith.select %588, %589, %590 : vector<1x32xi1>, vector<1x32xf32>
    %592 = vector.broadcast %591 : vector<1x32xf32> to vector<32x32xf32>
    %593 = arith.addf %1, %592 : vector<32x32xf32>
    %594 = vector.extract_strided_slice %586 {offsets = [0, 0], sizes = [32, 16], strides = [1, 1]} : vector<32x192xf32> to vector<32x16xf32>
    %595 = vector.extract_strided_slice %586 {offsets = [0, 64], sizes = [32, 16], strides = [1, 1]} : vector<32x192xf32> to vector<32x16xf32>
    %596 = vector.extract_strided_slice %586 {offsets = [0, 128], sizes = [32, 16], strides = [1, 1]} : vector<32x192xf32> to vector<32x16xf32>
    %597 = arith.truncf %594 : vector<32x16xf32> to vector<32x16xbf16>
    %598 = arith.truncf %595 : vector<32x16xf32> to vector<32x16xbf16>
    %cst_166 = arith.constant dense<0.000000e+00> : vector<32x32xf32>
    %599 = tpu.matmul %597, %598, %cst_166 {dimension_numbers = #tpu.dot_dimension_numbers<[1], [1], [0], [0], [0, 0, 1, 0], [], []>} : vector<32x16xbf16>, vector<32x16xbf16>, vector<32x32xf32> -> vector<32x32xf32>
    %cst_167 = arith.constant 2.500000e-01 : f32
    %600 = vector.broadcast %cst_167 : f32 to vector<32x32xf32>
    %601 = arith.mulf %599, %600 : vector<32x32xf32>
    %602 = arith.addf %601, %593 : vector<32x32xf32>
    %cst_168 = arith.constant dense<0xFF800000> : vector<32xf32>
    %603 = vector.multi_reduction <maximumf>, %602, %cst_168 [1] : vector<32x32xf32> to vector<32xf32>
    %604 = vector.shape_cast %603 : vector<32xf32> to vector<32x1xf32>
    %605 = vector.broadcast %604 : vector<32x1xf32> to vector<32x32xf32>
    %606 = arith.subf %602, %605 : vector<32x32xf32>
    %607 = math.exp %606 : vector<32x32xf32>
    %cst_169 = arith.constant dense<0.000000e+00> : vector<32xf32>
    %608 = vector.multi_reduction <add>, %607, %cst_169 [1] : vector<32x32xf32> to vector<32xf32>
    %609 = vector.shape_cast %608 : vector<32xf32> to vector<32x1xf32>
    %610 = tpu.reciprocal %609 {approx = true} : vector<32x1xf32> -> vector<32x1xf32>
    %611 = vector.broadcast %610 : vector<32x1xf32> to vector<32x32xf32>
    %612 = arith.mulf %607, %611 : vector<32x32xf32>
    %613 = arith.truncf %612 : vector<32x32xf32> to vector<32x32xbf16>
    %614 = arith.truncf %596 : vector<32x16xf32> to vector<32x16xbf16>
    %cst_170 = arith.constant dense<0.000000e+00> : vector<32x16xf32>
    %615 = tpu.matmul %613, %614, %cst_170 {dimension_numbers = #tpu.dot_dimension_numbers<[1], [0], [0], [1], [0, 0, 1, 1], [], []>} : vector<32x32xbf16>, vector<32x16xbf16>, vector<32x16xf32> -> vector<32x16xf32>
    %616 = vector.extract_strided_slice %7 {offsets = [0, 0], sizes = [16, 64], strides = [1, 1]} : vector<64x64xf32> to vector<16x64xf32>
    %617 = arith.truncf %615 : vector<32x16xf32> to vector<32x16xbf16>
    %618 = arith.truncf %616 : vector<16x64xf32> to vector<16x64xbf16>
    %cst_171 = arith.constant dense<0.000000e+00> : vector<32x64xf32>
    %619 = tpu.matmul %617, %618, %cst_171 {dimension_numbers = #tpu.dot_dimension_numbers<[1], [0], [0], [1], [0, 0, 1, 1], [], []>} : vector<32x16xbf16>, vector<16x64xbf16>, vector<32x64xf32> -> vector<32x64xf32>
    %620 = vector.extract_strided_slice %586 {offsets = [0, 16], sizes = [32, 16], strides = [1, 1]} : vector<32x192xf32> to vector<32x16xf32>
    %621 = vector.extract_strided_slice %586 {offsets = [0, 80], sizes = [32, 16], strides = [1, 1]} : vector<32x192xf32> to vector<32x16xf32>
    %622 = vector.extract_strided_slice %586 {offsets = [0, 144], sizes = [32, 16], strides = [1, 1]} : vector<32x192xf32> to vector<32x16xf32>
    %623 = arith.truncf %620 : vector<32x16xf32> to vector<32x16xbf16>
    %624 = arith.truncf %621 : vector<32x16xf32> to vector<32x16xbf16>
    %cst_172 = arith.constant dense<0.000000e+00> : vector<32x32xf32>
    %625 = tpu.matmul %623, %624, %cst_172 {dimension_numbers = #tpu.dot_dimension_numbers<[1], [1], [0], [0], [0, 0, 1, 0], [], []>} : vector<32x16xbf16>, vector<32x16xbf16>, vector<32x32xf32> -> vector<32x32xf32>
    %cst_173 = arith.constant 2.500000e-01 : f32
    %626 = vector.broadcast %cst_173 : f32 to vector<32x32xf32>
    %627 = arith.mulf %625, %626 : vector<32x32xf32>
    %628 = arith.addf %627, %593 : vector<32x32xf32>
    %cst_174 = arith.constant dense<0xFF800000> : vector<32xf32>
    %629 = vector.multi_reduction <maximumf>, %628, %cst_174 [1] : vector<32x32xf32> to vector<32xf32>
    %630 = vector.shape_cast %629 : vector<32xf32> to vector<32x1xf32>
    %631 = vector.broadcast %630 : vector<32x1xf32> to vector<32x32xf32>
    %632 = arith.subf %628, %631 : vector<32x32xf32>
    %633 = math.exp %632 : vector<32x32xf32>
    %cst_175 = arith.constant dense<0.000000e+00> : vector<32xf32>
    %634 = vector.multi_reduction <add>, %633, %cst_175 [1] : vector<32x32xf32> to vector<32xf32>
    %635 = vector.shape_cast %634 : vector<32xf32> to vector<32x1xf32>
    %636 = tpu.reciprocal %635 {approx = true} : vector<32x1xf32> -> vector<32x1xf32>
    %637 = vector.broadcast %636 : vector<32x1xf32> to vector<32x32xf32>
    %638 = arith.mulf %633, %637 : vector<32x32xf32>
    %639 = arith.truncf %638 : vector<32x32xf32> to vector<32x32xbf16>
    %640 = arith.truncf %622 : vector<32x16xf32> to vector<32x16xbf16>
    %cst_176 = arith.constant dense<0.000000e+00> : vector<32x16xf32>
    %641 = tpu.matmul %639, %640, %cst_176 {dimension_numbers = #tpu.dot_dimension_numbers<[1], [0], [0], [1], [0, 0, 1, 1], [], []>} : vector<32x32xbf16>, vector<32x16xbf16>, vector<32x16xf32> -> vector<32x16xf32>
    %642 = vector.extract_strided_slice %7 {offsets = [16, 0], sizes = [16, 64], strides = [1, 1]} : vector<64x64xf32> to vector<16x64xf32>
    %643 = arith.truncf %641 : vector<32x16xf32> to vector<32x16xbf16>
    %644 = arith.truncf %642 : vector<16x64xf32> to vector<16x64xbf16>
    %cst_177 = arith.constant dense<0.000000e+00> : vector<32x64xf32>
    %645 = tpu.matmul %643, %644, %cst_177 {dimension_numbers = #tpu.dot_dimension_numbers<[1], [0], [0], [1], [0, 0, 1, 1], [], []>} : vector<32x16xbf16>, vector<16x64xbf16>, vector<32x64xf32> -> vector<32x64xf32>
    %646 = arith.addf %619, %645 : vector<32x64xf32>
    %647 = vector.extract_strided_slice %586 {offsets = [0, 32], sizes = [32, 16], strides = [1, 1]} : vector<32x192xf32> to vector<32x16xf32>
    %648 = vector.extract_strided_slice %586 {offsets = [0, 96], sizes = [32, 16], strides = [1, 1]} : vector<32x192xf32> to vector<32x16xf32>
    %649 = vector.extract_strided_slice %586 {offsets = [0, 160], sizes = [32, 16], strides = [1, 1]} : vector<32x192xf32> to vector<32x16xf32>
    %650 = arith.truncf %647 : vector<32x16xf32> to vector<32x16xbf16>
    %651 = arith.truncf %648 : vector<32x16xf32> to vector<32x16xbf16>
    %cst_178 = arith.constant dense<0.000000e+00> : vector<32x32xf32>
    %652 = tpu.matmul %650, %651, %cst_178 {dimension_numbers = #tpu.dot_dimension_numbers<[1], [1], [0], [0], [0, 0, 1, 0], [], []>} : vector<32x16xbf16>, vector<32x16xbf16>, vector<32x32xf32> -> vector<32x32xf32>
    %cst_179 = arith.constant 2.500000e-01 : f32
    %653 = vector.broadcast %cst_179 : f32 to vector<32x32xf32>
    %654 = arith.mulf %652, %653 : vector<32x32xf32>
    %655 = arith.addf %654, %593 : vector<32x32xf32>
    %cst_180 = arith.constant dense<0xFF800000> : vector<32xf32>
    %656 = vector.multi_reduction <maximumf>, %655, %cst_180 [1] : vector<32x32xf32> to vector<32xf32>
    %657 = vector.shape_cast %656 : vector<32xf32> to vector<32x1xf32>
    %658 = vector.broadcast %657 : vector<32x1xf32> to vector<32x32xf32>
    %659 = arith.subf %655, %658 : vector<32x32xf32>
    %660 = math.exp %659 : vector<32x32xf32>
    %cst_181 = arith.constant dense<0.000000e+00> : vector<32xf32>
    %661 = vector.multi_reduction <add>, %660, %cst_181 [1] : vector<32x32xf32> to vector<32xf32>
    %662 = vector.shape_cast %661 : vector<32xf32> to vector<32x1xf32>
    %663 = tpu.reciprocal %662 {approx = true} : vector<32x1xf32> -> vector<32x1xf32>
    %664 = vector.broadcast %663 : vector<32x1xf32> to vector<32x32xf32>
    %665 = arith.mulf %660, %664 : vector<32x32xf32>
    %666 = arith.truncf %665 : vector<32x32xf32> to vector<32x32xbf16>
    %667 = arith.truncf %649 : vector<32x16xf32> to vector<32x16xbf16>
    %cst_182 = arith.constant dense<0.000000e+00> : vector<32x16xf32>
    %668 = tpu.matmul %666, %667, %cst_182 {dimension_numbers = #tpu.dot_dimension_numbers<[1], [0], [0], [1], [0, 0, 1, 1], [], []>} : vector<32x32xbf16>, vector<32x16xbf16>, vector<32x16xf32> -> vector<32x16xf32>
    %669 = vector.extract_strided_slice %7 {offsets = [32, 0], sizes = [16, 64], strides = [1, 1]} : vector<64x64xf32> to vector<16x64xf32>
    %670 = arith.truncf %668 : vector<32x16xf32> to vector<32x16xbf16>
    %671 = arith.truncf %669 : vector<16x64xf32> to vector<16x64xbf16>
    %cst_183 = arith.constant dense<0.000000e+00> : vector<32x64xf32>
    %672 = tpu.matmul %670, %671, %cst_183 {dimension_numbers = #tpu.dot_dimension_numbers<[1], [0], [0], [1], [0, 0, 1, 1], [], []>} : vector<32x16xbf16>, vector<16x64xbf16>, vector<32x64xf32> -> vector<32x64xf32>
    %673 = arith.addf %646, %672 : vector<32x64xf32>
    %674 = vector.extract_strided_slice %586 {offsets = [0, 48], sizes = [32, 16], strides = [1, 1]} : vector<32x192xf32> to vector<32x16xf32>
    %675 = vector.extract_strided_slice %586 {offsets = [0, 112], sizes = [32, 16], strides = [1, 1]} : vector<32x192xf32> to vector<32x16xf32>
    %676 = vector.extract_strided_slice %586 {offsets = [0, 176], sizes = [32, 16], strides = [1, 1]} : vector<32x192xf32> to vector<32x16xf32>
    %677 = arith.truncf %674 : vector<32x16xf32> to vector<32x16xbf16>
    %678 = arith.truncf %675 : vector<32x16xf32> to vector<32x16xbf16>
    %cst_184 = arith.constant dense<0.000000e+00> : vector<32x32xf32>
    %679 = tpu.matmul %677, %678, %cst_184 {dimension_numbers = #tpu.dot_dimension_numbers<[1], [1], [0], [0], [0, 0, 1, 0], [], []>} : vector<32x16xbf16>, vector<32x16xbf16>, vector<32x32xf32> -> vector<32x32xf32>
    %cst_185 = arith.constant 2.500000e-01 : f32
    %680 = vector.broadcast %cst_185 : f32 to vector<32x32xf32>
    %681 = arith.mulf %679, %680 : vector<32x32xf32>
    %682 = arith.addf %681, %593 : vector<32x32xf32>
    %cst_186 = arith.constant dense<0xFF800000> : vector<32xf32>
    %683 = vector.multi_reduction <maximumf>, %682, %cst_186 [1] : vector<32x32xf32> to vector<32xf32>
    %684 = vector.shape_cast %683 : vector<32xf32> to vector<32x1xf32>
    %685 = vector.broadcast %684 : vector<32x1xf32> to vector<32x32xf32>
    %686 = arith.subf %682, %685 : vector<32x32xf32>
    %687 = math.exp %686 : vector<32x32xf32>
    %cst_187 = arith.constant dense<0.000000e+00> : vector<32xf32>
    %688 = vector.multi_reduction <add>, %687, %cst_187 [1] : vector<32x32xf32> to vector<32xf32>
    %689 = vector.shape_cast %688 : vector<32xf32> to vector<32x1xf32>
    %690 = tpu.reciprocal %689 {approx = true} : vector<32x1xf32> -> vector<32x1xf32>
    %691 = vector.broadcast %690 : vector<32x1xf32> to vector<32x32xf32>
    %692 = arith.mulf %687, %691 : vector<32x32xf32>
    %693 = arith.truncf %692 : vector<32x32xf32> to vector<32x32xbf16>
    %694 = arith.truncf %676 : vector<32x16xf32> to vector<32x16xbf16>
    %cst_188 = arith.constant dense<0.000000e+00> : vector<32x16xf32>
    %695 = tpu.matmul %693, %694, %cst_188 {dimension_numbers = #tpu.dot_dimension_numbers<[1], [0], [0], [1], [0, 0, 1, 1], [], []>} : vector<32x32xbf16>, vector<32x16xbf16>, vector<32x16xf32> -> vector<32x16xf32>
    %696 = vector.extract_strided_slice %7 {offsets = [48, 0], sizes = [16, 64], strides = [1, 1]} : vector<64x64xf32> to vector<16x64xf32>
    %697 = arith.truncf %695 : vector<32x16xf32> to vector<32x16xbf16>
    %698 = arith.truncf %696 : vector<16x64xf32> to vector<16x64xbf16>
    %cst_189 = arith.constant dense<0.000000e+00> : vector<32x64xf32>
    %699 = tpu.matmul %697, %698, %cst_189 {dimension_numbers = #tpu.dot_dimension_numbers<[1], [0], [0], [1], [0, 0, 1, 1], [], []>} : vector<32x16xbf16>, vector<16x64xbf16>, vector<32x64xf32> -> vector<32x64xf32>
    %700 = arith.addf %673, %699 : vector<32x64xf32>
    %701 = arith.addf %559, %700 : vector<32x64xf32>
    %702 = vector.broadcast %8 : vector<1x64xf32> to vector<32x64xf32>
    %703 = arith.addf %701, %702 : vector<32x64xf32>
    %cst_190 = arith.constant dense<0.000000e+00> : vector<32xf32>
    %704 = vector.multi_reduction <add>, %703, %cst_190 [1] : vector<32x64xf32> to vector<32xf32>
    %705 = vector.shape_cast %704 : vector<32xf32> to vector<32x1xf32>
    %cst_191 = arith.constant 6.400000e+01 : f32
    %706 = vector.broadcast %cst_191 : f32 to vector<32x1xf32>
    %707 = arith.divf %705, %706 : vector<32x1xf32>
    %708 = vector.broadcast %707 : vector<32x1xf32> to vector<32x64xf32>
    %709 = arith.subf %703, %708 : vector<32x64xf32>
    %710 = arith.mulf %709, %709 : vector<32x64xf32>
    %cst_192 = arith.constant dense<0.000000e+00> : vector<32xf32>
    %711 = vector.multi_reduction <add>, %710, %cst_192 [1] : vector<32x64xf32> to vector<32xf32>
    %712 = vector.shape_cast %711 : vector<32xf32> to vector<32x1xf32>
    %cst_193 = arith.constant 6.400000e+01 : f32
    %713 = vector.broadcast %cst_193 : f32 to vector<32x1xf32>
    %714 = arith.divf %712, %713 : vector<32x1xf32>
    %715 = vector.broadcast %707 : vector<32x1xf32> to vector<32x64xf32>
    %716 = arith.subf %703, %715 : vector<32x64xf32>
    %cst_194 = arith.constant 9.99999974E-6 : f32
    %717 = vector.broadcast %cst_194 : f32 to vector<32x1xf32>
    %718 = arith.addf %714, %717 : vector<32x1xf32>
    %719 = math.rsqrt %718 : vector<32x1xf32>
    %720 = vector.broadcast %719 : vector<32x1xf32> to vector<32x64xf32>
    %721 = arith.mulf %716, %720 : vector<32x64xf32>
    %722 = vector.broadcast %9 : vector<1x64xf32> to vector<32x64xf32>
    %723 = arith.mulf %721, %722 : vector<32x64xf32>
    %724 = vector.broadcast %10 : vector<1x64xf32> to vector<32x64xf32>
    %725 = arith.addf %723, %724 : vector<32x64xf32>
    %726 = arith.truncf %725 : vector<32x64xf32> to vector<32x64xbf16>
    %727 = arith.truncf %11 : vector<64x128xf32> to vector<64x128xbf16>
    %cst_195 = arith.constant dense<0.000000e+00> : vector<32x128xf32>
    %728 = tpu.matmul %726, %727, %cst_195 {dimension_numbers = #tpu.dot_dimension_numbers<[1], [0], [0], [1], [0, 0, 1, 1], [], []>} : vector<32x64xbf16>, vector<64x128xbf16>, vector<32x128xf32> -> vector<32x128xf32>
    %729 = vector.broadcast %12 : vector<1x128xf32> to vector<32x128xf32>
    %730 = arith.addf %728, %729 : vector<32x128xf32>
    %cst_196 = arith.constant 5.000000e-01 : f32
    %731 = vector.broadcast %cst_196 : f32 to vector<32x128xf32>
    %732 = arith.mulf %731, %730 : vector<32x128xf32>
    %cst_197 = arith.constant 4.471500e-02 : f32
    %733 = vector.broadcast %cst_197 : f32 to vector<32x128xf32>
    %734 = arith.mulf %733, %730 : vector<32x128xf32>
    %735 = arith.mulf %734, %730 : vector<32x128xf32>
    %736 = arith.mulf %735, %730 : vector<32x128xf32>
    %737 = arith.addf %730, %736 : vector<32x128xf32>
    %cst_198 = arith.constant 0.797884583 : f32
    %738 = vector.broadcast %cst_198 : f32 to vector<32x128xf32>
    %739 = arith.mulf %738, %737 : vector<32x128xf32>
    %740 = math.tanh %739 : vector<32x128xf32>
    %cst_199 = arith.constant 1.000000e+00 : f32
    %741 = vector.broadcast %cst_199 : f32 to vector<32x128xf32>
    %742 = arith.addf %741, %740 : vector<32x128xf32>
    %743 = arith.mulf %732, %742 : vector<32x128xf32>
    %744 = arith.truncf %743 : vector<32x128xf32> to vector<32x128xbf16>
    %745 = arith.truncf %13 : vector<128x64xf32> to vector<128x64xbf16>
    %cst_200 = arith.constant dense<0.000000e+00> : vector<32x64xf32>
    %746 = tpu.matmul %744, %745, %cst_200 {dimension_numbers = #tpu.dot_dimension_numbers<[1], [0], [0], [1], [0, 0, 1, 1], [], []>} : vector<32x128xbf16>, vector<128x64xbf16>, vector<32x64xf32> -> vector<32x64xf32>
    %747 = vector.broadcast %14 : vector<1x64xf32> to vector<32x64xf32>
    %748 = arith.addf %746, %747 : vector<32x64xf32>
    %749 = arith.addf %703, %748 : vector<32x64xf32>
    %cst_201 = arith.constant dense<0.000000e+00> : vector<32xf32>
    %750 = vector.multi_reduction <add>, %749, %cst_201 [1] : vector<32x64xf32> to vector<32xf32>
    %751 = vector.shape_cast %750 : vector<32xf32> to vector<32x1xf32>
    %cst_202 = arith.constant 6.400000e+01 : f32
    %752 = vector.broadcast %cst_202 : f32 to vector<32x1xf32>
    %753 = arith.divf %751, %752 : vector<32x1xf32>
    %754 = vector.broadcast %753 : vector<32x1xf32> to vector<32x64xf32>
    %755 = arith.subf %749, %754 : vector<32x64xf32>
    %756 = arith.mulf %755, %755 : vector<32x64xf32>
    %cst_203 = arith.constant dense<0.000000e+00> : vector<32xf32>
    %757 = vector.multi_reduction <add>, %756, %cst_203 [1] : vector<32x64xf32> to vector<32xf32>
    %758 = vector.shape_cast %757 : vector<32xf32> to vector<32x1xf32>
    %cst_204 = arith.constant 6.400000e+01 : f32
    %759 = vector.broadcast %cst_204 : f32 to vector<32x1xf32>
    %760 = arith.divf %758, %759 : vector<32x1xf32>
    %761 = vector.broadcast %753 : vector<32x1xf32> to vector<32x64xf32>
    %762 = arith.subf %749, %761 : vector<32x64xf32>
    %cst_205 = arith.constant 9.99999974E-6 : f32
    %763 = vector.broadcast %cst_205 : f32 to vector<32x1xf32>
    %764 = arith.addf %760, %763 : vector<32x1xf32>
    %765 = math.rsqrt %764 : vector<32x1xf32>
    %766 = vector.broadcast %765 : vector<32x1xf32> to vector<32x64xf32>
    %767 = arith.mulf %762, %766 : vector<32x64xf32>
    %768 = vector.broadcast %15 : vector<1x64xf32> to vector<32x64xf32>
    %769 = arith.mulf %767, %768 : vector<32x64xf32>
    %770 = vector.broadcast %16 : vector<1x64xf32> to vector<32x64xf32>
    %771 = arith.addf %769, %770 : vector<32x64xf32>
    %c16_i32_206 = arith.constant 16 : i32
    %772 = vector.broadcast %c16_i32_206 : i32 to vector<2x32xi32>
    %773 = arith.muli %21, %772 : vector<2x32xi32>
    %c1_i32_207 = arith.constant 1 : i32
    %774 = arith.subi %558, %c1_i32_207 : i32
    %775 = vector.broadcast %774 : i32 to vector<2x32xi32>
    %776 = arith.addi %773, %775 : vector<2x32xi32>
    %777 = arith.cmpi eq, %22, %776 : vector<2x32xi32>
    %778 = arith.extui %777 : vector<2x32xi1> to vector<2x32xi32>
    %779 = arith.sitofp %778 : vector<2x32xi32> to vector<2x32xf32>
    %780 = arith.truncf %779 : vector<2x32xf32> to vector<2x32xbf16>
    %781 = arith.truncf %771 : vector<32x64xf32> to vector<32x64xbf16>
    %cst_208 = arith.constant dense<0.000000e+00> : vector<2x64xf32>
    %782 = tpu.matmul %780, %781, %cst_208 {dimension_numbers = #tpu.dot_dimension_numbers<[1], [0], [0], [1], [0, 0, 1, 1], [], []>} : vector<2x32xbf16>, vector<32x64xbf16>, vector<2x64xf32> -> vector<2x64xf32>
    %783 = arith.truncf %782 : vector<2x64xf32> to vector<2x64xbf16>
    %784 = arith.truncf %17 : vector<64x128xf32> to vector<64x128xbf16>
    %cst_209 = arith.constant dense<0.000000e+00> : vector<2x128xf32>
    %785 = tpu.matmul %783, %784, %cst_209 {dimension_numbers = #tpu.dot_dimension_numbers<[1], [0], [0], [1], [0, 0, 1, 1], [], []>} : vector<2x64xbf16>, vector<64x128xbf16>, vector<2x128xf32> -> vector<2x128xf32>
    %786 = vector.broadcast %18 : vector<1x128xf32> to vector<2x128xf32>
    %787 = arith.addf %785, %786 : vector<2x128xf32>
    %cst_210 = arith.constant dense<0xFF800000> : vector<2xf32>
    %788 = vector.multi_reduction <maximumf>, %787, %cst_210 [1] : vector<2x128xf32> to vector<2xf32>
    %789 = vector.shape_cast %788 : vector<2xf32> to vector<2x1xf32>
    %790 = vector.broadcast %789 : vector<2x1xf32> to vector<2x128xf32>
    %791 = arith.cmpf oge, %787, %790 : vector<2x128xf32>
    %792 = arith.sitofp %20 : vector<2x128xi32> to vector<2x128xf32>
    %cst_211 = arith.constant 1.280000e+02 : f32
    %793 = vector.broadcast %cst_211 : f32 to vector<2x128xf32>
    %794 = arith.select %791, %792, %793 : vector<2x128xi1>, vector<2x128xf32>
    %cst_212 = arith.constant dense<0x7F800000> : vector<2xf32>
    %795 = vector.multi_reduction <minimumf>, %794, %cst_212 [1] : vector<2x128xf32> to vector<2xf32>
    %796 = vector.shape_cast %795 : vector<2xf32> to vector<2x1xf32>
    %797 = arith.fptosi %796 : vector<2x1xf32> to vector<2x1xi32>
    %798 = vector.broadcast %c2_i32 : i32 to vector<1x4xi32>
    %799 = arith.cmpi eq, %25, %798 : vector<1x4xi32>
    %800 = vector.shape_cast %799 : vector<1x4xi1> to vector<1x4xi1>
    %801 = vector.broadcast %800 : vector<1x4xi1> to vector<2x4xi1>
    %802 = vector.shape_cast %797 : vector<2x1xi32> to vector<2x1xi32>
    %803 = vector.broadcast %802 : vector<2x1xi32> to vector<2x4xi32>
    %804 = arith.select %801, %803, %539 : vector<2x4xi1>, vector<2x4xi32>
    %805 = vector.broadcast %797 : vector<2x1xi32> to vector<2x128xi32>
    %806 = arith.cmpi eq, %20, %805 : vector<2x128xi32>
    %807 = arith.extui %806 : vector<2x128xi1> to vector<2x128xi32>
    %808 = arith.sitofp %807 : vector<2x128xi32> to vector<2x128xf32>
    %809 = arith.truncf %808 : vector<2x128xf32> to vector<2x128xbf16>
    %810 = arith.truncf %19 : vector<128x64xf32> to vector<128x64xbf16>
    %cst_213 = arith.constant dense<0.000000e+00> : vector<2x64xf32>
    %811 = tpu.matmul %809, %810, %cst_213 {dimension_numbers = #tpu.dot_dimension_numbers<[1], [0], [0], [1], [0, 0, 1, 1], [], []>} : vector<2x128xbf16>, vector<128x64xbf16>, vector<2x64xf32> -> vector<2x64xf32>
    %c16_i32_214 = arith.constant 16 : i32
    %812 = vector.broadcast %c16_i32_214 : i32 to vector<32x2xi32>
    %813 = arith.muli %24, %812 : vector<32x2xi32>
    %814 = vector.broadcast %558 : i32 to vector<32x2xi32>
    %815 = arith.addi %813, %814 : vector<32x2xi32>
    %816 = arith.cmpi eq, %23, %815 : vector<32x2xi32>
    %817 = arith.extui %816 : vector<32x2xi1> to vector<32x2xi32>
    %818 = arith.sitofp %817 : vector<32x2xi32> to vector<32x2xf32>
    %819 = arith.truncf %818 : vector<32x2xf32> to vector<32x2xbf16>
    %820 = arith.truncf %811 : vector<2x64xf32> to vector<2x64xbf16>
    %cst_215 = arith.constant dense<0.000000e+00> : vector<32x64xf32>
    %821 = tpu.matmul %819, %820, %cst_215 {dimension_numbers = #tpu.dot_dimension_numbers<[1], [0], [0], [1], [0, 0, 1, 1], [], []>} : vector<32x2xbf16>, vector<2x64xbf16>, vector<32x64xf32> -> vector<32x64xf32>
    %822 = arith.addf %557, %821 : vector<32x64xf32>
    %c3_i32 = arith.constant 3 : i32
    %c12_i32_216 = arith.constant 12 : i32
    %823 = arith.addi %c12_i32_216, %c3_i32 : i32
    %824 = arith.addf %822, %0 : vector<32x64xf32>
    %cst_217 = arith.constant dense<0.000000e+00> : vector<32xf32>
    %825 = vector.multi_reduction <add>, %824, %cst_217 [1] : vector<32x64xf32> to vector<32xf32>
    %826 = vector.shape_cast %825 : vector<32xf32> to vector<32x1xf32>
    %cst_218 = arith.constant 6.400000e+01 : f32
    %827 = vector.broadcast %cst_218 : f32 to vector<32x1xf32>
    %828 = arith.divf %826, %827 : vector<32x1xf32>
    %829 = vector.broadcast %828 : vector<32x1xf32> to vector<32x64xf32>
    %830 = arith.subf %824, %829 : vector<32x64xf32>
    %831 = arith.mulf %830, %830 : vector<32x64xf32>
    %cst_219 = arith.constant dense<0.000000e+00> : vector<32xf32>
    %832 = vector.multi_reduction <add>, %831, %cst_219 [1] : vector<32x64xf32> to vector<32xf32>
    %833 = vector.shape_cast %832 : vector<32xf32> to vector<32x1xf32>
    %cst_220 = arith.constant 6.400000e+01 : f32
    %834 = vector.broadcast %cst_220 : f32 to vector<32x1xf32>
    %835 = arith.divf %833, %834 : vector<32x1xf32>
    %836 = vector.broadcast %828 : vector<32x1xf32> to vector<32x64xf32>
    %837 = arith.subf %824, %836 : vector<32x64xf32>
    %cst_221 = arith.constant 9.99999974E-6 : f32
    %838 = vector.broadcast %cst_221 : f32 to vector<32x1xf32>
    %839 = arith.addf %835, %838 : vector<32x1xf32>
    %840 = math.rsqrt %839 : vector<32x1xf32>
    %841 = vector.broadcast %840 : vector<32x1xf32> to vector<32x64xf32>
    %842 = arith.mulf %837, %841 : vector<32x64xf32>
    %843 = vector.broadcast %3 : vector<1x64xf32> to vector<32x64xf32>
    %844 = arith.mulf %842, %843 : vector<32x64xf32>
    %845 = vector.broadcast %4 : vector<1x64xf32> to vector<32x64xf32>
    %846 = arith.addf %844, %845 : vector<32x64xf32>
    %847 = arith.truncf %846 : vector<32x64xf32> to vector<32x64xbf16>
    %848 = arith.truncf %5 : vector<64x192xf32> to vector<64x192xbf16>
    %cst_222 = arith.constant dense<0.000000e+00> : vector<32x192xf32>
    %849 = tpu.matmul %847, %848, %cst_222 {dimension_numbers = #tpu.dot_dimension_numbers<[1], [0], [0], [1], [0, 0, 1, 1], [], []>} : vector<32x64xbf16>, vector<64x192xbf16>, vector<32x192xf32> -> vector<32x192xf32>
    %850 = vector.broadcast %6 : vector<1x192xf32> to vector<32x192xf32>
    %851 = arith.addf %849, %850 : vector<32x192xf32>
    %852 = vector.broadcast %823 : i32 to vector<1x32xi32>
    %853 = arith.cmpi slt, %2, %852 : vector<1x32xi32>
    %cst_223 = arith.constant 0.000000e+00 : f32
    %cst_224 = arith.constant -1.000000e+09 : f32
    %854 = vector.broadcast %cst_223 : f32 to vector<1x32xf32>
    %855 = vector.broadcast %cst_224 : f32 to vector<1x32xf32>
    %856 = arith.select %853, %854, %855 : vector<1x32xi1>, vector<1x32xf32>
    %857 = vector.broadcast %856 : vector<1x32xf32> to vector<32x32xf32>
    %858 = arith.addf %1, %857 : vector<32x32xf32>
    %859 = vector.extract_strided_slice %851 {offsets = [0, 0], sizes = [32, 16], strides = [1, 1]} : vector<32x192xf32> to vector<32x16xf32>
    %860 = vector.extract_strided_slice %851 {offsets = [0, 64], sizes = [32, 16], strides = [1, 1]} : vector<32x192xf32> to vector<32x16xf32>
    %861 = vector.extract_strided_slice %851 {offsets = [0, 128], sizes = [32, 16], strides = [1, 1]} : vector<32x192xf32> to vector<32x16xf32>
    %862 = arith.truncf %859 : vector<32x16xf32> to vector<32x16xbf16>
    %863 = arith.truncf %860 : vector<32x16xf32> to vector<32x16xbf16>
    %cst_225 = arith.constant dense<0.000000e+00> : vector<32x32xf32>
    %864 = tpu.matmul %862, %863, %cst_225 {dimension_numbers = #tpu.dot_dimension_numbers<[1], [1], [0], [0], [0, 0, 1, 0], [], []>} : vector<32x16xbf16>, vector<32x16xbf16>, vector<32x32xf32> -> vector<32x32xf32>
    %cst_226 = arith.constant 2.500000e-01 : f32
    %865 = vector.broadcast %cst_226 : f32 to vector<32x32xf32>
    %866 = arith.mulf %864, %865 : vector<32x32xf32>
    %867 = arith.addf %866, %858 : vector<32x32xf32>
    %cst_227 = arith.constant dense<0xFF800000> : vector<32xf32>
    %868 = vector.multi_reduction <maximumf>, %867, %cst_227 [1] : vector<32x32xf32> to vector<32xf32>
    %869 = vector.shape_cast %868 : vector<32xf32> to vector<32x1xf32>
    %870 = vector.broadcast %869 : vector<32x1xf32> to vector<32x32xf32>
    %871 = arith.subf %867, %870 : vector<32x32xf32>
    %872 = math.exp %871 : vector<32x32xf32>
    %cst_228 = arith.constant dense<0.000000e+00> : vector<32xf32>
    %873 = vector.multi_reduction <add>, %872, %cst_228 [1] : vector<32x32xf32> to vector<32xf32>
    %874 = vector.shape_cast %873 : vector<32xf32> to vector<32x1xf32>
    %875 = tpu.reciprocal %874 {approx = true} : vector<32x1xf32> -> vector<32x1xf32>
    %876 = vector.broadcast %875 : vector<32x1xf32> to vector<32x32xf32>
    %877 = arith.mulf %872, %876 : vector<32x32xf32>
    %878 = arith.truncf %877 : vector<32x32xf32> to vector<32x32xbf16>
    %879 = arith.truncf %861 : vector<32x16xf32> to vector<32x16xbf16>
    %cst_229 = arith.constant dense<0.000000e+00> : vector<32x16xf32>
    %880 = tpu.matmul %878, %879, %cst_229 {dimension_numbers = #tpu.dot_dimension_numbers<[1], [0], [0], [1], [0, 0, 1, 1], [], []>} : vector<32x32xbf16>, vector<32x16xbf16>, vector<32x16xf32> -> vector<32x16xf32>
    %881 = vector.extract_strided_slice %7 {offsets = [0, 0], sizes = [16, 64], strides = [1, 1]} : vector<64x64xf32> to vector<16x64xf32>
    %882 = arith.truncf %880 : vector<32x16xf32> to vector<32x16xbf16>
    %883 = arith.truncf %881 : vector<16x64xf32> to vector<16x64xbf16>
    %cst_230 = arith.constant dense<0.000000e+00> : vector<32x64xf32>
    %884 = tpu.matmul %882, %883, %cst_230 {dimension_numbers = #tpu.dot_dimension_numbers<[1], [0], [0], [1], [0, 0, 1, 1], [], []>} : vector<32x16xbf16>, vector<16x64xbf16>, vector<32x64xf32> -> vector<32x64xf32>
    %885 = vector.extract_strided_slice %851 {offsets = [0, 16], sizes = [32, 16], strides = [1, 1]} : vector<32x192xf32> to vector<32x16xf32>
    %886 = vector.extract_strided_slice %851 {offsets = [0, 80], sizes = [32, 16], strides = [1, 1]} : vector<32x192xf32> to vector<32x16xf32>
    %887 = vector.extract_strided_slice %851 {offsets = [0, 144], sizes = [32, 16], strides = [1, 1]} : vector<32x192xf32> to vector<32x16xf32>
    %888 = arith.truncf %885 : vector<32x16xf32> to vector<32x16xbf16>
    %889 = arith.truncf %886 : vector<32x16xf32> to vector<32x16xbf16>
    %cst_231 = arith.constant dense<0.000000e+00> : vector<32x32xf32>
    %890 = tpu.matmul %888, %889, %cst_231 {dimension_numbers = #tpu.dot_dimension_numbers<[1], [1], [0], [0], [0, 0, 1, 0], [], []>} : vector<32x16xbf16>, vector<32x16xbf16>, vector<32x32xf32> -> vector<32x32xf32>
    %cst_232 = arith.constant 2.500000e-01 : f32
    %891 = vector.broadcast %cst_232 : f32 to vector<32x32xf32>
    %892 = arith.mulf %890, %891 : vector<32x32xf32>
    %893 = arith.addf %892, %858 : vector<32x32xf32>
    %cst_233 = arith.constant dense<0xFF800000> : vector<32xf32>
    %894 = vector.multi_reduction <maximumf>, %893, %cst_233 [1] : vector<32x32xf32> to vector<32xf32>
    %895 = vector.shape_cast %894 : vector<32xf32> to vector<32x1xf32>
    %896 = vector.broadcast %895 : vector<32x1xf32> to vector<32x32xf32>
    %897 = arith.subf %893, %896 : vector<32x32xf32>
    %898 = math.exp %897 : vector<32x32xf32>
    %cst_234 = arith.constant dense<0.000000e+00> : vector<32xf32>
    %899 = vector.multi_reduction <add>, %898, %cst_234 [1] : vector<32x32xf32> to vector<32xf32>
    %900 = vector.shape_cast %899 : vector<32xf32> to vector<32x1xf32>
    %901 = tpu.reciprocal %900 {approx = true} : vector<32x1xf32> -> vector<32x1xf32>
    %902 = vector.broadcast %901 : vector<32x1xf32> to vector<32x32xf32>
    %903 = arith.mulf %898, %902 : vector<32x32xf32>
    %904 = arith.truncf %903 : vector<32x32xf32> to vector<32x32xbf16>
    %905 = arith.truncf %887 : vector<32x16xf32> to vector<32x16xbf16>
    %cst_235 = arith.constant dense<0.000000e+00> : vector<32x16xf32>
    %906 = tpu.matmul %904, %905, %cst_235 {dimension_numbers = #tpu.dot_dimension_numbers<[1], [0], [0], [1], [0, 0, 1, 1], [], []>} : vector<32x32xbf16>, vector<32x16xbf16>, vector<32x16xf32> -> vector<32x16xf32>
    %907 = vector.extract_strided_slice %7 {offsets = [16, 0], sizes = [16, 64], strides = [1, 1]} : vector<64x64xf32> to vector<16x64xf32>
    %908 = arith.truncf %906 : vector<32x16xf32> to vector<32x16xbf16>
    %909 = arith.truncf %907 : vector<16x64xf32> to vector<16x64xbf16>
    %cst_236 = arith.constant dense<0.000000e+00> : vector<32x64xf32>
    %910 = tpu.matmul %908, %909, %cst_236 {dimension_numbers = #tpu.dot_dimension_numbers<[1], [0], [0], [1], [0, 0, 1, 1], [], []>} : vector<32x16xbf16>, vector<16x64xbf16>, vector<32x64xf32> -> vector<32x64xf32>
    %911 = arith.addf %884, %910 : vector<32x64xf32>
    %912 = vector.extract_strided_slice %851 {offsets = [0, 32], sizes = [32, 16], strides = [1, 1]} : vector<32x192xf32> to vector<32x16xf32>
    %913 = vector.extract_strided_slice %851 {offsets = [0, 96], sizes = [32, 16], strides = [1, 1]} : vector<32x192xf32> to vector<32x16xf32>
    %914 = vector.extract_strided_slice %851 {offsets = [0, 160], sizes = [32, 16], strides = [1, 1]} : vector<32x192xf32> to vector<32x16xf32>
    %915 = arith.truncf %912 : vector<32x16xf32> to vector<32x16xbf16>
    %916 = arith.truncf %913 : vector<32x16xf32> to vector<32x16xbf16>
    %cst_237 = arith.constant dense<0.000000e+00> : vector<32x32xf32>
    %917 = tpu.matmul %915, %916, %cst_237 {dimension_numbers = #tpu.dot_dimension_numbers<[1], [1], [0], [0], [0, 0, 1, 0], [], []>} : vector<32x16xbf16>, vector<32x16xbf16>, vector<32x32xf32> -> vector<32x32xf32>
    %cst_238 = arith.constant 2.500000e-01 : f32
    %918 = vector.broadcast %cst_238 : f32 to vector<32x32xf32>
    %919 = arith.mulf %917, %918 : vector<32x32xf32>
    %920 = arith.addf %919, %858 : vector<32x32xf32>
    %cst_239 = arith.constant dense<0xFF800000> : vector<32xf32>
    %921 = vector.multi_reduction <maximumf>, %920, %cst_239 [1] : vector<32x32xf32> to vector<32xf32>
    %922 = vector.shape_cast %921 : vector<32xf32> to vector<32x1xf32>
    %923 = vector.broadcast %922 : vector<32x1xf32> to vector<32x32xf32>
    %924 = arith.subf %920, %923 : vector<32x32xf32>
    %925 = math.exp %924 : vector<32x32xf32>
    %cst_240 = arith.constant dense<0.000000e+00> : vector<32xf32>
    %926 = vector.multi_reduction <add>, %925, %cst_240 [1] : vector<32x32xf32> to vector<32xf32>
    %927 = vector.shape_cast %926 : vector<32xf32> to vector<32x1xf32>
    %928 = tpu.reciprocal %927 {approx = true} : vector<32x1xf32> -> vector<32x1xf32>
    %929 = vector.broadcast %928 : vector<32x1xf32> to vector<32x32xf32>
    %930 = arith.mulf %925, %929 : vector<32x32xf32>
    %931 = arith.truncf %930 : vector<32x32xf32> to vector<32x32xbf16>
    %932 = arith.truncf %914 : vector<32x16xf32> to vector<32x16xbf16>
    %cst_241 = arith.constant dense<0.000000e+00> : vector<32x16xf32>
    %933 = tpu.matmul %931, %932, %cst_241 {dimension_numbers = #tpu.dot_dimension_numbers<[1], [0], [0], [1], [0, 0, 1, 1], [], []>} : vector<32x32xbf16>, vector<32x16xbf16>, vector<32x16xf32> -> vector<32x16xf32>
    %934 = vector.extract_strided_slice %7 {offsets = [32, 0], sizes = [16, 64], strides = [1, 1]} : vector<64x64xf32> to vector<16x64xf32>
    %935 = arith.truncf %933 : vector<32x16xf32> to vector<32x16xbf16>
    %936 = arith.truncf %934 : vector<16x64xf32> to vector<16x64xbf16>
    %cst_242 = arith.constant dense<0.000000e+00> : vector<32x64xf32>
    %937 = tpu.matmul %935, %936, %cst_242 {dimension_numbers = #tpu.dot_dimension_numbers<[1], [0], [0], [1], [0, 0, 1, 1], [], []>} : vector<32x16xbf16>, vector<16x64xbf16>, vector<32x64xf32> -> vector<32x64xf32>
    %938 = arith.addf %911, %937 : vector<32x64xf32>
    %939 = vector.extract_strided_slice %851 {offsets = [0, 48], sizes = [32, 16], strides = [1, 1]} : vector<32x192xf32> to vector<32x16xf32>
    %940 = vector.extract_strided_slice %851 {offsets = [0, 112], sizes = [32, 16], strides = [1, 1]} : vector<32x192xf32> to vector<32x16xf32>
    %941 = vector.extract_strided_slice %851 {offsets = [0, 176], sizes = [32, 16], strides = [1, 1]} : vector<32x192xf32> to vector<32x16xf32>
    %942 = arith.truncf %939 : vector<32x16xf32> to vector<32x16xbf16>
    %943 = arith.truncf %940 : vector<32x16xf32> to vector<32x16xbf16>
    %cst_243 = arith.constant dense<0.000000e+00> : vector<32x32xf32>
    %944 = tpu.matmul %942, %943, %cst_243 {dimension_numbers = #tpu.dot_dimension_numbers<[1], [1], [0], [0], [0, 0, 1, 0], [], []>} : vector<32x16xbf16>, vector<32x16xbf16>, vector<32x32xf32> -> vector<32x32xf32>
    %cst_244 = arith.constant 2.500000e-01 : f32
    %945 = vector.broadcast %cst_244 : f32 to vector<32x32xf32>
    %946 = arith.mulf %944, %945 : vector<32x32xf32>
    %947 = arith.addf %946, %858 : vector<32x32xf32>
    %cst_245 = arith.constant dense<0xFF800000> : vector<32xf32>
    %948 = vector.multi_reduction <maximumf>, %947, %cst_245 [1] : vector<32x32xf32> to vector<32xf32>
    %949 = vector.shape_cast %948 : vector<32xf32> to vector<32x1xf32>
    %950 = vector.broadcast %949 : vector<32x1xf32> to vector<32x32xf32>
    %951 = arith.subf %947, %950 : vector<32x32xf32>
    %952 = math.exp %951 : vector<32x32xf32>
    %cst_246 = arith.constant dense<0.000000e+00> : vector<32xf32>
    %953 = vector.multi_reduction <add>, %952, %cst_246 [1] : vector<32x32xf32> to vector<32xf32>
    %954 = vector.shape_cast %953 : vector<32xf32> to vector<32x1xf32>
    %955 = tpu.reciprocal %954 {approx = true} : vector<32x1xf32> -> vector<32x1xf32>
    %956 = vector.broadcast %955 : vector<32x1xf32> to vector<32x32xf32>
    %957 = arith.mulf %952, %956 : vector<32x32xf32>
    %958 = arith.truncf %957 : vector<32x32xf32> to vector<32x32xbf16>
    %959 = arith.truncf %941 : vector<32x16xf32> to vector<32x16xbf16>
    %cst_247 = arith.constant dense<0.000000e+00> : vector<32x16xf32>
    %960 = tpu.matmul %958, %959, %cst_247 {dimension_numbers = #tpu.dot_dimension_numbers<[1], [0], [0], [1], [0, 0, 1, 1], [], []>} : vector<32x32xbf16>, vector<32x16xbf16>, vector<32x16xf32> -> vector<32x16xf32>
    %961 = vector.extract_strided_slice %7 {offsets = [48, 0], sizes = [16, 64], strides = [1, 1]} : vector<64x64xf32> to vector<16x64xf32>
    %962 = arith.truncf %960 : vector<32x16xf32> to vector<32x16xbf16>
    %963 = arith.truncf %961 : vector<16x64xf32> to vector<16x64xbf16>
    %cst_248 = arith.constant dense<0.000000e+00> : vector<32x64xf32>
    %964 = tpu.matmul %962, %963, %cst_248 {dimension_numbers = #tpu.dot_dimension_numbers<[1], [0], [0], [1], [0, 0, 1, 1], [], []>} : vector<32x16xbf16>, vector<16x64xbf16>, vector<32x64xf32> -> vector<32x64xf32>
    %965 = arith.addf %938, %964 : vector<32x64xf32>
    %966 = arith.addf %824, %965 : vector<32x64xf32>
    %967 = vector.broadcast %8 : vector<1x64xf32> to vector<32x64xf32>
    %968 = arith.addf %966, %967 : vector<32x64xf32>
    %cst_249 = arith.constant dense<0.000000e+00> : vector<32xf32>
    %969 = vector.multi_reduction <add>, %968, %cst_249 [1] : vector<32x64xf32> to vector<32xf32>
    %970 = vector.shape_cast %969 : vector<32xf32> to vector<32x1xf32>
    %cst_250 = arith.constant 6.400000e+01 : f32
    %971 = vector.broadcast %cst_250 : f32 to vector<32x1xf32>
    %972 = arith.divf %970, %971 : vector<32x1xf32>
    %973 = vector.broadcast %972 : vector<32x1xf32> to vector<32x64xf32>
    %974 = arith.subf %968, %973 : vector<32x64xf32>
    %975 = arith.mulf %974, %974 : vector<32x64xf32>
    %cst_251 = arith.constant dense<0.000000e+00> : vector<32xf32>
    %976 = vector.multi_reduction <add>, %975, %cst_251 [1] : vector<32x64xf32> to vector<32xf32>
    %977 = vector.shape_cast %976 : vector<32xf32> to vector<32x1xf32>
    %cst_252 = arith.constant 6.400000e+01 : f32
    %978 = vector.broadcast %cst_252 : f32 to vector<32x1xf32>
    %979 = arith.divf %977, %978 : vector<32x1xf32>
    %980 = vector.broadcast %972 : vector<32x1xf32> to vector<32x64xf32>
    %981 = arith.subf %968, %980 : vector<32x64xf32>
    %cst_253 = arith.constant 9.99999974E-6 : f32
    %982 = vector.broadcast %cst_253 : f32 to vector<32x1xf32>
    %983 = arith.addf %979, %982 : vector<32x1xf32>
    %984 = math.rsqrt %983 : vector<32x1xf32>
    %985 = vector.broadcast %984 : vector<32x1xf32> to vector<32x64xf32>
    %986 = arith.mulf %981, %985 : vector<32x64xf32>
    %987 = vector.broadcast %9 : vector<1x64xf32> to vector<32x64xf32>
    %988 = arith.mulf %986, %987 : vector<32x64xf32>
    %989 = vector.broadcast %10 : vector<1x64xf32> to vector<32x64xf32>
    %990 = arith.addf %988, %989 : vector<32x64xf32>
    %991 = arith.truncf %990 : vector<32x64xf32> to vector<32x64xbf16>
    %992 = arith.truncf %11 : vector<64x128xf32> to vector<64x128xbf16>
    %cst_254 = arith.constant dense<0.000000e+00> : vector<32x128xf32>
    %993 = tpu.matmul %991, %992, %cst_254 {dimension_numbers = #tpu.dot_dimension_numbers<[1], [0], [0], [1], [0, 0, 1, 1], [], []>} : vector<32x64xbf16>, vector<64x128xbf16>, vector<32x128xf32> -> vector<32x128xf32>
    %994 = vector.broadcast %12 : vector<1x128xf32> to vector<32x128xf32>
    %995 = arith.addf %993, %994 : vector<32x128xf32>
    %cst_255 = arith.constant 5.000000e-01 : f32
    %996 = vector.broadcast %cst_255 : f32 to vector<32x128xf32>
    %997 = arith.mulf %996, %995 : vector<32x128xf32>
    %cst_256 = arith.constant 4.471500e-02 : f32
    %998 = vector.broadcast %cst_256 : f32 to vector<32x128xf32>
    %999 = arith.mulf %998, %995 : vector<32x128xf32>
    %1000 = arith.mulf %999, %995 : vector<32x128xf32>
    %1001 = arith.mulf %1000, %995 : vector<32x128xf32>
    %1002 = arith.addf %995, %1001 : vector<32x128xf32>
    %cst_257 = arith.constant 0.797884583 : f32
    %1003 = vector.broadcast %cst_257 : f32 to vector<32x128xf32>
    %1004 = arith.mulf %1003, %1002 : vector<32x128xf32>
    %1005 = math.tanh %1004 : vector<32x128xf32>
    %cst_258 = arith.constant 1.000000e+00 : f32
    %1006 = vector.broadcast %cst_258 : f32 to vector<32x128xf32>
    %1007 = arith.addf %1006, %1005 : vector<32x128xf32>
    %1008 = arith.mulf %997, %1007 : vector<32x128xf32>
    %1009 = arith.truncf %1008 : vector<32x128xf32> to vector<32x128xbf16>
    %1010 = arith.truncf %13 : vector<128x64xf32> to vector<128x64xbf16>
    %cst_259 = arith.constant dense<0.000000e+00> : vector<32x64xf32>
    %1011 = tpu.matmul %1009, %1010, %cst_259 {dimension_numbers = #tpu.dot_dimension_numbers<[1], [0], [0], [1], [0, 0, 1, 1], [], []>} : vector<32x128xbf16>, vector<128x64xbf16>, vector<32x64xf32> -> vector<32x64xf32>
    %1012 = vector.broadcast %14 : vector<1x64xf32> to vector<32x64xf32>
    %1013 = arith.addf %1011, %1012 : vector<32x64xf32>
    %1014 = arith.addf %968, %1013 : vector<32x64xf32>
    %cst_260 = arith.constant dense<0.000000e+00> : vector<32xf32>
    %1015 = vector.multi_reduction <add>, %1014, %cst_260 [1] : vector<32x64xf32> to vector<32xf32>
    %1016 = vector.shape_cast %1015 : vector<32xf32> to vector<32x1xf32>
    %cst_261 = arith.constant 6.400000e+01 : f32
    %1017 = vector.broadcast %cst_261 : f32 to vector<32x1xf32>
    %1018 = arith.divf %1016, %1017 : vector<32x1xf32>
    %1019 = vector.broadcast %1018 : vector<32x1xf32> to vector<32x64xf32>
    %1020 = arith.subf %1014, %1019 : vector<32x64xf32>
    %1021 = arith.mulf %1020, %1020 : vector<32x64xf32>
    %cst_262 = arith.constant dense<0.000000e+00> : vector<32xf32>
    %1022 = vector.multi_reduction <add>, %1021, %cst_262 [1] : vector<32x64xf32> to vector<32xf32>
    %1023 = vector.shape_cast %1022 : vector<32xf32> to vector<32x1xf32>
    %cst_263 = arith.constant 6.400000e+01 : f32
    %1024 = vector.broadcast %cst_263 : f32 to vector<32x1xf32>
    %1025 = arith.divf %1023, %1024 : vector<32x1xf32>
    %1026 = vector.broadcast %1018 : vector<32x1xf32> to vector<32x64xf32>
    %1027 = arith.subf %1014, %1026 : vector<32x64xf32>
    %cst_264 = arith.constant 9.99999974E-6 : f32
    %1028 = vector.broadcast %cst_264 : f32 to vector<32x1xf32>
    %1029 = arith.addf %1025, %1028 : vector<32x1xf32>
    %1030 = math.rsqrt %1029 : vector<32x1xf32>
    %1031 = vector.broadcast %1030 : vector<32x1xf32> to vector<32x64xf32>
    %1032 = arith.mulf %1027, %1031 : vector<32x64xf32>
    %1033 = vector.broadcast %15 : vector<1x64xf32> to vector<32x64xf32>
    %1034 = arith.mulf %1032, %1033 : vector<32x64xf32>
    %1035 = vector.broadcast %16 : vector<1x64xf32> to vector<32x64xf32>
    %1036 = arith.addf %1034, %1035 : vector<32x64xf32>
    %c16_i32_265 = arith.constant 16 : i32
    %1037 = vector.broadcast %c16_i32_265 : i32 to vector<2x32xi32>
    %1038 = arith.muli %21, %1037 : vector<2x32xi32>
    %c1_i32_266 = arith.constant 1 : i32
    %1039 = arith.subi %823, %c1_i32_266 : i32
    %1040 = vector.broadcast %1039 : i32 to vector<2x32xi32>
    %1041 = arith.addi %1038, %1040 : vector<2x32xi32>
    %1042 = arith.cmpi eq, %22, %1041 : vector<2x32xi32>
    %1043 = arith.extui %1042 : vector<2x32xi1> to vector<2x32xi32>
    %1044 = arith.sitofp %1043 : vector<2x32xi32> to vector<2x32xf32>
    %1045 = arith.truncf %1044 : vector<2x32xf32> to vector<2x32xbf16>
    %1046 = arith.truncf %1036 : vector<32x64xf32> to vector<32x64xbf16>
    %cst_267 = arith.constant dense<0.000000e+00> : vector<2x64xf32>
    %1047 = tpu.matmul %1045, %1046, %cst_267 {dimension_numbers = #tpu.dot_dimension_numbers<[1], [0], [0], [1], [0, 0, 1, 1], [], []>} : vector<2x32xbf16>, vector<32x64xbf16>, vector<2x64xf32> -> vector<2x64xf32>
    %1048 = arith.truncf %1047 : vector<2x64xf32> to vector<2x64xbf16>
    %1049 = arith.truncf %17 : vector<64x128xf32> to vector<64x128xbf16>
    %cst_268 = arith.constant dense<0.000000e+00> : vector<2x128xf32>
    %1050 = tpu.matmul %1048, %1049, %cst_268 {dimension_numbers = #tpu.dot_dimension_numbers<[1], [0], [0], [1], [0, 0, 1, 1], [], []>} : vector<2x64xbf16>, vector<64x128xbf16>, vector<2x128xf32> -> vector<2x128xf32>
    %1051 = vector.broadcast %18 : vector<1x128xf32> to vector<2x128xf32>
    %1052 = arith.addf %1050, %1051 : vector<2x128xf32>
    %cst_269 = arith.constant dense<0xFF800000> : vector<2xf32>
    %1053 = vector.multi_reduction <maximumf>, %1052, %cst_269 [1] : vector<2x128xf32> to vector<2xf32>
    %1054 = vector.shape_cast %1053 : vector<2xf32> to vector<2x1xf32>
    %1055 = vector.broadcast %1054 : vector<2x1xf32> to vector<2x128xf32>
    %1056 = arith.cmpf oge, %1052, %1055 : vector<2x128xf32>
    %1057 = arith.sitofp %20 : vector<2x128xi32> to vector<2x128xf32>
    %cst_270 = arith.constant 1.280000e+02 : f32
    %1058 = vector.broadcast %cst_270 : f32 to vector<2x128xf32>
    %1059 = arith.select %1056, %1057, %1058 : vector<2x128xi1>, vector<2x128xf32>
    %cst_271 = arith.constant dense<0x7F800000> : vector<2xf32>
    %1060 = vector.multi_reduction <minimumf>, %1059, %cst_271 [1] : vector<2x128xf32> to vector<2xf32>
    %1061 = vector.shape_cast %1060 : vector<2xf32> to vector<2x1xf32>
    %1062 = arith.fptosi %1061 : vector<2x1xf32> to vector<2x1xi32>
    %1063 = vector.broadcast %c3_i32 : i32 to vector<1x4xi32>
    %1064 = arith.cmpi eq, %25, %1063 : vector<1x4xi32>
    %1065 = vector.shape_cast %1064 : vector<1x4xi1> to vector<1x4xi1>
    %1066 = vector.broadcast %1065 : vector<1x4xi1> to vector<2x4xi1>
    %1067 = vector.shape_cast %1062 : vector<2x1xi32> to vector<2x1xi32>
    %1068 = vector.broadcast %1067 : vector<2x1xi32> to vector<2x4xi32>
    %1069 = arith.select %1066, %1068, %804 : vector<2x4xi1>, vector<2x4xi32>
    %1070 = vector.broadcast %1062 : vector<2x1xi32> to vector<2x128xi32>
    %1071 = arith.cmpi eq, %20, %1070 : vector<2x128xi32>
    %1072 = arith.extui %1071 : vector<2x128xi1> to vector<2x128xi32>
    %1073 = arith.sitofp %1072 : vector<2x128xi32> to vector<2x128xf32>
    %1074 = arith.truncf %1073 : vector<2x128xf32> to vector<2x128xbf16>
    %1075 = arith.truncf %19 : vector<128x64xf32> to vector<128x64xbf16>
    %cst_272 = arith.constant dense<0.000000e+00> : vector<2x64xf32>
    %1076 = tpu.matmul %1074, %1075, %cst_272 {dimension_numbers = #tpu.dot_dimension_numbers<[1], [0], [0], [1], [0, 0, 1, 1], [], []>} : vector<2x128xbf16>, vector<128x64xbf16>, vector<2x64xf32> -> vector<2x64xf32>
    %c16_i32_273 = arith.constant 16 : i32
    %1077 = vector.broadcast %c16_i32_273 : i32 to vector<32x2xi32>
    %1078 = arith.muli %24, %1077 : vector<32x2xi32>
    %1079 = vector.broadcast %823 : i32 to vector<32x2xi32>
    %1080 = arith.addi %1078, %1079 : vector<32x2xi32>
    %1081 = arith.cmpi eq, %23, %1080 : vector<32x2xi32>
    %1082 = arith.extui %1081 : vector<32x2xi1> to vector<32x2xi32>
    %1083 = arith.sitofp %1082 : vector<32x2xi32> to vector<32x2xf32>
    %1084 = arith.truncf %1083 : vector<32x2xf32> to vector<32x2xbf16>
    %1085 = arith.truncf %1076 : vector<2x64xf32> to vector<2x64xbf16>
    %cst_274 = arith.constant dense<0.000000e+00> : vector<32x64xf32>
    %1086 = tpu.matmul %1084, %1085, %cst_274 {dimension_numbers = #tpu.dot_dimension_numbers<[1], [0], [0], [1], [0, 0, 1, 1], [], []>} : vector<32x2xbf16>, vector<2x64xbf16>, vector<32x64xf32> -> vector<32x64xf32>
    %1087 = arith.addf %822, %1086 : vector<32x64xf32>
    %c4_i32 = arith.constant 4 : i32
    %c0_275 = arith.constant 0 : index
    %c0_276 = arith.constant 0 : index
    %1088 = vector.load %arg21[%c0_275, %c0_276] : memref<2x4xi32, #tpu.memory_space<vmem>>, vector<2x4xi32>
    tpu.vector_store %arg21[%c0_275, %c0_276], %1069 {strides = array<i32>} : memref<2x4xi32, #tpu.memory_space<vmem>>, vector<2x4xi32>,
    return
  }
}

</mosaic_0001>

<bundles_post_ra>
// kernel: xray_report_generator_forward.3
= control target key start
LH: loop header
LB: loop body
LE: loop exit
PB: predicated region body
PF: predicated region fallthrough
CT: control target
= control target key end

     0   :  { %v103_v52 = vlaneseq  ;;  %v195_v60 = vmov 0.0   ;;  %vm122_vm3 = vcmask 1043456   ;;  %vm118_vm4 = vcmask 64512   ;;  %s344_s1 = inlined_call_operand.vmem [shape: f32[256,64], index: 1, kind: input, shape index: {}]   ;;  %s345_s2 = inlined_call_operand.vmem [shape: f32[1,64], index: 2, kind: input, shape index: {}]   ;;  %s346_s0 = inlined_call_operand.vmem [shape: f32[8,256], index: 0, kind: input, shape index: {}]   ;;  %s347_s3 = inlined_call_operand.vmem [shape: f32[1,64], index: 3, kind: input, shape index: {}]   ;;  %s348_s4 = inlined_call_operand.vmem [shape: f32[1,64], index: 4, kind: input, shape index: {}]   ;;  %s349_s5 = inlined_call_operand.vmem [shape: f32[2,64], index: 5, kind: output, shape index: {}]  }
   0x1   :  { %v37_v0 = vld [vmem:[%s344_s1 + $0x70] sm:$0xff]  ;;  %v38_v1 = vld [vmem:[%s344_s1 + $0x78] sm:$0xff]  ;;  %v35_v5 = vld [vmem:[%s344_s1 + $0x60] sm:$0xff]  ;;  %vm141_vm5 = vcmask 517120  }
   0x2   :  { %v53_v2 = vld [vmem:[%s344_s1 + $0xf0] sm:$0xff]  ;;  %v64_v3 = vpack.c.bf16 %v38_v1, %v37_v0  ;;  %v54_v4 = vld [vmem:[%s344_s1 + $0xf8] sm:$0xff]  ;;  %v36_v6 = vld [vmem:[%s344_s1 + $0x68] sm:$0xff]  ;;  %v104_v53 = vshrl.u32 %v103_v52, 7  ;;  %v106_v55 = vand.u32 127, %v103_v52 }
   0x3   :  { %v72_v7 = vpack.c.bf16 %v54_v4, %v53_v2  ;;  %v51_v8 = vld [vmem:[%s344_s1 + $0xe0] sm:$0xff]  ;;  %v52_v9 = vld [vmem:[%s344_s1 + $0xe8] sm:$0xff]  ;;  %v63_v10 = vpack.c.bf16 %v36_v6, %v35_v5  ;;  %v33_v12 = vld [vmem:[%s344_s1 + $0x50] sm:$0xff] }
   0x4   :  { %77 = vmatpush.bf16.msra.mxu0 %v64_v3  ;;  %v71_v11 = vpack.c.bf16 %v52_v9, %v51_v8  ;;  %v34_v13 = vld [vmem:[%s344_s1 + $0x58] sm:$0xff]  ;;  %v49_v14 = vld [vmem:[%s344_s1 + $0xd0] sm:$0xff]  ;;  %v31_v18 = vld [vmem:[%s344_s1 + $0x40] sm:$0xff]  ;;  %v109_v54 = vadd.s32 1, %v104_v53  ;;  %v107_v56 = vmul.u32 4, %v104_v53 }
   0x5   :  { %90 = vmatpush.bf16.msra.mxu1 %v72_v7  ;;  %v50_v15 = vld [vmem:[%s344_s1 + $0xd8] sm:$0xff]  ;;  %v62_v16 = vpack.c.bf16 %v34_v13, %v33_v12  ;;  %v32_v19 = vld [vmem:[%s344_s1 + $0x48] sm:$0xff]  ;;  %v47_v20 = vld [vmem:[%s344_s1 + $0xc0] sm:$0xff] }
   0x6   :  { %v70_v17 = vpack.c.bf16 %v50_v15, %v49_v14  ;;  %v48_v21 = vld [vmem:[%s344_s1 + $0xc8] sm:$0xff]  ;;  %v61_v22 = vpack.c.bf16 %v32_v19, %v31_v18  ;;  %v29_v24 = vld [vmem:[%s344_s1 + $0x30] sm:$0xff]  ;;  %v30_v25 = vld [vmem:[%s344_s1 + $0x38] sm:$0xff]  ;;  %v110_v57 = vmul.u32 4, %v109_v54  ;;  %vm108_vm0 = vcmp.ge.s32.totalorder %v106_v55, %v107_v56 }
   0x7   :  { %v69_v23 = vpack.c.bf16 %v48_v21, %v47_v20  ;;  %v45_v26 = vld [vmem:[%s344_s1 + $0xb0] sm:$0xff]  ;;  %v46_v27 = vld [vmem:[%s344_s1 + $0xb8] sm:$0xff]  ;;  %v60_v28 = vpack.c.bf16 %v30_v25, %v29_v24  ;;  %v27_v30 = vld [vmem:[%s344_s1 + $0x20] sm:$0xff] }
   0x8   :  { %78 = vmatpush.bf16.msra.mxu0 %v63_v10  ;;  %v68_v29 = vpack.c.bf16 %v46_v27, %v45_v26  ;;  %v28_v31 = vld [vmem:[%s344_s1 + $0x28] sm:$0xff]  ;;  %v43_v32 = vld [vmem:[%s344_s1 + $0xa0] sm:$0xff]  ;;  %v25_v36 = vld [vmem:[%s344_s1 + $0x10] sm:$0xff]  ;;  %vm111_vm1 = vcmp.lt.s32.totalorder %v106_v55, %v110_v57  ;;  %v196_v10 = vmov 64.0  }
   0x9   :  { %91 = vmatpush.bf16.msra.mxu1 %v71_v11  ;;  %v44_v33 = vld [vmem:[%s344_s1 + $0xa8] sm:$0xff]  ;;  %v59_v34 = vpack.c.bf16 %v28_v31, %v27_v30  ;;  %v26_v37 = vld [vmem:[%s344_s1 + $0x18] sm:$0xff]  ;;  %v41_v38 = vld [vmem:[%s344_s1 + $0x90] sm:$0xff]  ;;  %191 = vrcp.f32 %v196_v10 }
   0xa   :  { %v67_v35 = vpack.c.bf16 %v44_v33, %v43_v32  ;;  %v42_v39 = vld [vmem:[%s344_s1 + $0x98] sm:$0xff]  ;;  %v58_v40 = vpack.c.bf16 %v26_v37, %v25_v36  ;;  %v23_v42 = vld [vmem:[%s344_s1] sm:$0xff]  ;;  %v24_v43 = vld [vmem:[%s344_s1 + $0x8] sm:$0xff] }
   0xb   :  { %v66_v41 = vpack.c.bf16 %v42_v39, %v41_v38  ;;  %v39_v44 = vld [vmem:[%s344_s1 + $0x80] sm:$0xff]  ;;  %v40_v45 = vld [vmem:[%s344_s1 + $0x88] sm:$0xff]  ;;  %v57_v46 = vpack.c.bf16 %v24_v43, %v23_v42  ;;  %vm112_vm2 = vmand %vm108_vm0, %vm111_vm1 }
   0xc   :  { %79 = vmatpush.bf16.msra.mxu0 %v62_v16  ;;  %v21_v47 = vld [vmem:[%s346_s0] sm:$0xff]  ;;  %v65_v48 = vpack.c.bf16 %v40_v45, %v39_v44  ;;  %v22_v49 = vld [vmem:[%s346_s0 + $0x8] sm:$0xff]  ;;  %v184_v61 = vsel %vm112_vm2, 1.0, %v195_v60 }
   0xd   :  { %92 = vmatpush.bf16.msra.mxu1 %v70_v17  ;;  %v55_v50 = vpack.c.bf16 %v21_v47, %v21_v47  ;;  %v56_v51 = vpack.c.bf16 %v22_v49, %v22_v49  ;;  %v188_v58 = vld [vmem:[%s345_s2] ss:$0 sm:$0xff]  ;;  %v115_v1 = vmul.f32 0.25, %v184_v61 }
   0xe   :  { %v189_v31 = vld [vmem:[%s347_s3] ss:$0 sm:$0xff] }
   0xf   :  { %v116_v4 = vpack.c.bf16 %v115_v1, %v115_v1  ;;  %v192_v11 = vpop.eup %191  ;;  %v190_v33 = vld [vmem:[%s348_s4] ss:$0 sm:$0xff] }
  0x10   :  { %80 = vmatpush.bf16.msra.mxu0 %v61_v22  ;;  %v146_v12 = vmul.f32 64.0, %v192_v11  ;;  %vm150_vm6 = vweird.f32 %v192_v11 }
  0x11   :  { %93 = vmatpush.bf16.msra.mxu1 %v69_v23 }
  0x12   :  { %v147_v13 = vsub.f32 1.0, %v146_v12 }
  0x14   :  { %81 = vmatpush.bf16.msra.mxu0 %v60_v28  ;;  %v148_v14 = vmul.f32 %v192_v11, %v147_v13 }
  0x15   :  { %94 = vmatpush.bf16.msra.mxu1 %v68_v29 }
  0x16   :  { %v149_v15 = vadd.f32 %v192_v11, %v148_v14 }
  0x18   :  { %82 = vmatpush.bf16.msra.mxu0 %v59_v34  ;;  %v151_v16 = vsel %vm150_vm6, %v192_v11, %v149_v15 }
  0x19   :  { %95 = vmatpush.bf16.msra.mxu1 %v67_v35 }
  0x1c   :  { %83 = vmatpush.bf16.msra.mxu0 %v58_v40 }
  0x1d   :  { %96 = vmatpush.bf16.msra.mxu1 %v66_v41 }
  0x20   :  { %84 = vmatpush.bf16.msra.mxu0 %v57_v46 }
  0x21   :  { %97 = vmatpush.bf16.msra.mxu1 %v65_v48 }
  0x23   :  { %85 = vmatmul.bf16.vlgmr.msra.gmra.mxu0 %v55_v50 }
  0x24   :  { %98 = vmatmul.bf16.vlgmr.msra.gmra.mxu1 %v56_v51 }
  0xa0   :  { %v86_v59 = vpop.f32.mrf.mxu0 }
  0xa1   :  { %v87_v62 = vadd.f32 %v188_v58, %v86_v59  ;;  %v99_v63 = vpop.f32.mrf.mxu1 }
  0xa3   :  { %v100_v0 = vadd.f32 %v99_v63, %v87_v62 }
  0xa5   :  { %v117_v2 = vpack.c.bf16 %v100_v0, %v100_v0 }
  0xa7   :  { %v124_v3 = vsel %vm122_vm3, %v117_v2, 0 }
  0xa8   :  { %v88_v5 = vpop.f32.mrf.mxu0  ;;  %133 = vmatpush.bf16.msra.mxu2 %v124_v3 }
  0xa9   :  { %v101_v6 = vpop.f32.mrf.mxu1 }
  0xab   :  { %185 = vmatmul.msk.bf16.vlgmr.msra.gmra.mxu2 %vm118_vm4, %v116_v4 }
 0x12e   :  { %v135_v7 = vpop.f32.mrf.mxu2 }
 0x12f   :  { %v142_v8 = vsel %vm141_vm5, %v135_v7, 0.0 }
 0x130   :  { %143 = vadd.xlane.f32.xlu0 %v142_v8 }
 0x136   :  { %v137_v9 = vpop.f32.mrf.mxu2 }
 0x1a3   :  { %v144_v17 = vpop.xlane.xlu0 %143 }
 0x1a4   :  { %v152_v18 = vmul.f32 %v151_v16, %v144_v17 }
 0x1a6   :  { %v153_v19 = vsub.f32 %v135_v7, %v152_v18 }
 0x1a8   :  { %v154_v20 = vmul.f32 %v153_v19, %v153_v19 }
 0x1aa   :  { %v155_v21 = vsel %vm141_vm5, %v154_v20, 0.0 }
 0x1ab   :  { %156 = vadd.xlane.f32.xlu0 %v155_v21 }
 0x21e   :  { %v157_v22 = vpop.xlane.xlu0 %156 }
 0x21f   :  { %v158_v23 = vmul.f32 %v157_v22, %v151_v16 }
 0x221   :  { %v159_v24 = vadd.f32 1e-05, %v158_v23 }
 0x223   :  { %193 = vrsqrt.f32 %v159_v24  ;;  %vm166_vm8 = vweird.f32 %v159_v24 }
 0x229   :  { %v194_v25 = vpop.eup %193 }
 0x22a   :  { %v161_v26 = vmul.f32 %v194_v25, %v159_v24  ;;  %vm167_vm7 = vweird.f32 %v194_v25 }
 0x22b   :  { %vm168_vm9 = vmor %vm166_vm8, %vm167_vm7 }
 0x22c   :  { %v162_v27 = vmul.f32 %v194_v25, %v161_v26 }
 0x22e   :  { %v163_v28 = vmul.f32 0.5, %v162_v27 }
 0x230   :  { %v164_v29 = vsub.f32 1.5, %v163_v28 }
 0x232   :  { %v165_v30 = vmul.f32 %v194_v25, %v164_v29 }
 0x234   :  { %v169_v32 = vsel %vm168_vm9, %v194_v25, %v165_v30 }
 0x235   :  { %v170_v34 = vmul.f32 %v169_v32, %v153_v19 }
 0x237   :  { %v174_v35 = vmul.f32 %v189_v31, %v170_v34 }
 0x239   :  { %v178_v36 = vadd.f32 %v190_v33, %v174_v35 }
 0x23b   :  { %179 = vst.msk [vmem:[%s349_s5] sm:$0x3] %vm141_vm5, %v178_v36 }

// kernel: xray_report_generator_forward.4
= control target key start
LH: loop header
LB: loop body
LE: loop exit
PB: predicated region body
PF: predicated region fallthrough
CT: control target
= control target key end

     0   :  { %vm72_vm0 = vcmask 523264   ;;  %vm177_vm1 = vcmask 1043456   ;;  %vm100_vm2 = vcmask 261120   ;;  %v117_v28 = vlaneseq  ;;  %s701_s2 = inlined_call_operand.vmem [shape: f32[64,32], index: 2, kind: input, shape index: {}]   ;;  %s702_s4 = inlined_call_operand.vmem [shape: f32[32,32], index: 4, kind: input, shape index: {}]   ;;  %s703_s3 = inlined_call_operand.vmem [shape: f32[1,32], index: 3, kind: input, shape index: {}]   ;;  %s704_s0 = inlined_call_operand.vmem [shape: f32[2,64], index: 0, kind: input, shape index: {}]   ;;  %s705_s5 = inlined_call_operand.vmem [shape: f32[1,32], index: 5, kind: input, shape index: {}]   ;;  %s706_s1 = inlined_call_operand.vmem [shape: f32[8,32], index: 1, kind: input, shape index: {}]   ;;  %s707_s6 = inlined_call_operand.vmem [shape: f32[1,32], index: 6, kind: input, shape index: {}]   ;;  %s708_s7 = inlined_call_operand.vmem [shape: f32[1,32], index: 7, kind: input, shape index: {}]   ;;  %s709_s9 = inlined_call_operand.vmem [shape: f32[1,64], index: 9, kind: input, shape index: {}]   ;;  %s710_s8 = inlined_call_operand.vmem [shape: f32[32,64], index: 8, kind: input, shape index: {}]   ;;  %s711_s11 = inlined_call_operand.vmem [shape: f32[1,32], index: 11, kind: input, shape index: {}]   ;;  %s712_s10 = inlined_call_operand.vmem [shape: f32[64,32], index: 10, kind: input, shape index: {}]   ;;  %s713_s12 = inlined_call_operand.vmem [shape: f32[1,32], index: 12, kind: input, shape index: {}]   ;;  %s714_s13 = inlined_call_operand.vmem [shape: f32[1,32], index: 13, kind: input, shape index: {}]   ;;  %s715_s15 = inlined_call_operand.vmem [shape: f32[1,64], index: 15, kind: input, shape index: {}]   ;;  %s716_s14 = inlined_call_operand.vmem [shape: f32[32,64], index: 14, kind: input, shape index: {}]   ;;  %s717_s16 = inlined_call_operand.vmem [shape: f32[16,64], index: 16, kind: output, shape index: {}]  }
   0x1   :  { %719 = sst [smem:[#allocation2_spill]] %s701_s2  ;;  %v91_v6 = vld [vmem:[%s702_s4 + $0x10] sm:$0xff]  ;;  %v92_v7 = vld [vmem:[%s702_s4 + $0x18] sm:$0xff]  ;;  %v54_v15 = vld [vmem:[%s704_s0] sm:$0x3]  ;;  %v466_v33 = vmov 0.0  }
   0x2   :  { %s720_s23 = sld [smem:[#allocation2_spill]]  ;;  %v95_v10 = vpack.c.bf16 %v92_v7, %v91_v6  ;;  %v63_v16 = vpack.c.bf16 %v54_v15, %v54_v15  ;;  %v89_v17 = vld [vmem:[%s702_s4] sm:$0xff]  ;;  %v90_v18 = vld [vmem:[%s702_s4 + $0x8] sm:$0xff]  ;;  %v118_v29 = vshrl.u32 %v117_v28, 7  ;;  %v121_v30 = vand.u32 127, %v117_v28 }
   0x3   :  { %v94_v19 = vpack.c.bf16 %v90_v18, %v89_v17  ;;  %v129_v20 = vld [vmem:[%s706_s1] sm:$0xff]  ;;  %vm173_vm7 = vcmask 64512   ;;  %vm155_vm14 = vcmask 1040384   ;;  %vm151_vm15 = vcmask 15360  }
   0x4   :  { %110 = vmatpush.bf16.msra.mxu1 %v95_v10  ;;  %v135_v21 = vpack.c.bf16 %v129_v20, %v129_v20  ;;  %v443_v23 = vld [vmem:[%s703_s3] ss:$0 sm:$0xff]  ;;  %v119_v31 = vadd.s32 8, %v118_v29  ;;  %v124_v32 = vadd.s32 8, %v121_v30  ;;  %vm122_vm5 = vcmp.eq.s32.totalorder %v118_v29, %v121_v30  ;;  %v260_v10 = vld [vmem:[%s710_s8 + $0x10] sm:$0xff] }
   0x5   :  { %v432_v34 = vsel %vm122_vm5, 1.0, %v466_v33  ;;  %v139_v37 = vadd.s32 1, %v121_v30  ;;  %v136_v38 = vmul.u32 8, %v121_v30  ;;  %v444_v40 = vld [vmem:[%s705_s5] ss:$0 sm:$0xff]  ;;  %v467_v57 = vmov 32.0  }
   0x6   :  { %v179_v22 = vsel %vm177_vm1, %v135_v21, 0  ;;  %vm123_vm3 = vcmp.eq.s32.totalorder %v119_v31, %v121_v30  ;;  %vm126_vm4 = vcmp.eq.s32.totalorder %v119_v31, %v124_v32  ;;  %452 = vrcp.f32 %v467_v57  ;;  %v447_v57 = vld [vmem:[%s709_s9] ss:$0 sm:$0xff] }
   0x7   :  { %188 = vmatpush.bf16.msra.mxu3 %v179_v22  ;;  %vm128_vm6 = vmor %vm123_vm3, %vm126_vm4  ;;  %v140_v39 = vmul.u32 8, %v139_v37  ;;  %vm137_vm8 = vcmp.ge.s32.totalorder %v118_v29, %v136_v38  ;;  %vm138_vm10 = vcmp.ge.s32.totalorder %v119_v31, %v136_v38 }
   0x8   :  { %v61_v0 = vld [vmem:[%s720_s23 + $0x30] sm:$0xff]  ;;  %v62_v1 = vld [vmem:[%s720_s23 + $0x38] sm:$0xff]  ;;  %v59_v2 = vld [vmem:[%s720_s23 + $0x20] sm:$0xff]  ;;  %111 = vmatpush.bf16.msra.mxu1 %v94_v19  ;;  %v433_v35 = vsel %vm128_vm6, 1.0, %v466_v33 }
   0x9   :  { %v67_v3 = vpack.c.bf16 %v62_v1, %v61_v0  ;;  %v60_v4 = vld [vmem:[%s720_s23 + $0x28] sm:$0xff]  ;;  %v57_v8 = vld [vmem:[%s720_s23 + $0x10] sm:$0xff]  ;;  %v58_v9 = vld [vmem:[%s720_s23 + $0x18] sm:$0xff]  ;;  %v134_v36 = vpack.c.bf16 %v433_v35, %v432_v34  ;;  %vm141_vm9 = vcmp.lt.s32.totalorder %v118_v29, %v140_v39  ;;  %vm142_vm11 = vcmp.lt.s32.totalorder %v119_v31, %v140_v39 }
   0xa   :  { %v66_v5 = vpack.c.bf16 %v60_v4, %v59_v2  ;;  %v65_v11 = vpack.c.bf16 %v58_v9, %v57_v8  ;;  %v55_v12 = vld [vmem:[%s720_s23] sm:$0xff]  ;;  %v56_v13 = vld [vmem:[%s720_s23 + $0x8] sm:$0xff]  ;;  %vm143_vm12 = vmand %vm137_vm8, %vm141_vm9 }
   0xb   :  { %80 = vmatpush.bf16.msra.mxu0 %v67_v3  ;;  %v64_v14 = vpack.c.bf16 %v56_v13, %v55_v12  ;;  %437 = vmatmul.msk.bf16.vlgmr.msra.gmra.mxu3 %vm173_vm7, %v134_v36  ;;  %vm144_vm13 = vmand %vm138_vm10, %vm142_vm11  ;;  %v434_v43 = vsel %vm143_vm12, 1.0, %v466_v33  ;;  %v258_v13 = vld [vmem:[%s710_s8] sm:$0xff] }
   0xc   :  { %v435_v44 = vsel %vm144_vm13, 1.0, %v466_v33  ;;  %v453_v58 = vpop.eup %452  ;;  %v445_v35 = vld [vmem:[%s707_s6] ss:$0 sm:$0xff] }
   0xd   :  { %v149_v47 = vpack.c.bf16 %v435_v44, %v434_v43  ;;  %v204_v59 = vmul.f32 32.0, %v453_v58  ;;  %vm208_vm1 = vweird.f32 %v453_v58 }
   0xf   :  { %81 = vmatpush.bf16.msra.mxu0 %v66_v5  ;;  %v205_v60 = vsub.f32 1.0, %v204_v59 }
  0x11   :  { %v206_v61 = vmul.f32 %v453_v58, %v205_v60 }
  0x13   :  { %82 = vmatpush.bf16.msra.mxu0 %v65_v11  ;;  %v207_v62 = vadd.f32 %v453_v58, %v206_v61  ;;  %v261_v11 = vld [vmem:[%s710_s8 + $0x18] sm:$0xff] }
  0x14   :  { %v264_v12 = vpack.c.bf16 %v261_v11, %v260_v10 }
  0x15   :  { %v605_v63 = vsel %vm208_vm1, %v453_v58, %v207_v62 }
  0x17   :  { %83 = vmatpush.bf16.msra.mxu0 %v64_v14  ;;  %v259_v14 = vld [vmem:[%s710_s8 + $0x8] sm:$0xff] }
  0x1a   :  { %430 = vmatmul.msk.bf16.vlgmr.msra.gmra.mxu0 %vm72_vm0, %v63_v16  ;;  %v263_v16 = vpack.c.bf16 %v259_v14, %v258_v13 }
  0x8e   :  { %v190_v49 = vpop.f32.mrf.mxu3 }
  0x96   :  { %v192_v53 = vpop.f32.mrf.mxu3 }
  0x97   :  { %v85_v24 = vpop.f32.mrf.mxu0 }
  0x98   :  { %v86_v25 = vadd.f32 %v443_v23, %v85_v24 }
  0x9a   :  { %v93_v26 = vpack.c.bf16 %v86_v25, %v86_v25 }
  0x9c   :  { %431 = vmatmul.msk.bf16.vlgmr.msra.gmra.mxu1 %vm100_vm2, %v93_v26 }
  0x9f   :  { %v87_v27 = vpop.f32.mrf.mxu0 }
 0x119   :  { %v113_v41 = vpop.f32.mrf.mxu1 }
 0x11a   :  { %v114_v42 = vadd.f32 %v444_v40, %v113_v41  ;;  %v446_v40 = vld [vmem:[%s708_s7] ss:$0 sm:$0xff] }
 0x11c   :  { %v150_v45 = vpack.c.bf16 %v114_v42, %v114_v42 }
 0x11e   :  { %v157_v46 = vsel %vm155_vm14, %v150_v45, 0  ;;  %v310_v45 = vld [vmem:[%s712_s10 + $0x30] sm:$0xff] }
 0x11f   :  { %166 = vmatpush.bf16.msra.mxu2 %v157_v46  ;;  %v311_v46 = vld [vmem:[%s712_s10 + $0x38] sm:$0xff] }
 0x121   :  { %v115_v48 = vpop.f32.mrf.mxu1 }
 0x122   :  { %436 = vmatmul.msk.bf16.vlgmr.msra.gmra.mxu2 %vm151_vm15, %v149_v47  ;;  %v316_v47 = vpack.c.bf16 %v311_v46, %v310_v45  ;;  %v308_v48 = vld [vmem:[%s712_s10 + $0x20] sm:$0xff] }
 0x123   :  { %278 = vmatpush.bf16.msrb.mxu2 %v264_v12 }
 0x124   :  { %328 = vmatpush.bf16.msrb.mxu3 %v316_v47 }
 0x127   :  { %279 = vmatpush.bf16.msrb.mxu2 %v263_v16 }
 0x1a5   :  { %v168_v50 = vpop.f32.mrf.mxu2 }
 0x1a6   :  { %v191_v51 = vadd.f32 %v190_v49, %v168_v50  ;;  %v309_v49 = vld [vmem:[%s712_s10 + $0x28] sm:$0xff] }
 0x1a7   :  { %v315_v50 = vpack.c.bf16 %v309_v49, %v308_v48 }
 0x1a8   :  { %v197_v52 = vsel %vm100_vm2, %v191_v51, 0.0 }
 0x1a9   :  { %198 = vadd.xlane.f32.xlu0 %v197_v52  ;;  %v307_v52 = vld [vmem:[%s712_s10 + $0x18] sm:$0xff]  ;;  %329 = vmatpush.bf16.msrb.mxu3 %v315_v50 }
 0x1ad   :  { %v170_v54 = vpop.f32.mrf.mxu2 }
 0x1ae   :  { %v193_v55 = vadd.f32 %v192_v53, %v170_v54  ;;  %v304_v54 = vld [vmem:[%s712_s10] sm:$0xff] }
 0x1b0   :  { %v200_v56 = vsel %vm100_vm2, %v193_v55, 0.0 }
 0x1b1   :  { %201 = vadd.xlane.f32.xlu0 %v200_v56 }
 0x21c   :  { %v199_v0 = vpop.xlane.xlu0 %198 }
 0x21d   :  { %v210_v1 = vmul.f32 %v605_v63, %v199_v0 }
 0x21f   :  { %v212_v2 = vsub.f32 %v191_v51, %v210_v1  ;;  %v306_v51 = vld [vmem:[%s712_s10 + $0x10] sm:$0xff] }
 0x220   :  { %v314_v53 = vpack.c.bf16 %v307_v52, %v306_v51 }
 0x221   :  { %v214_v3 = vmul.f32 %v212_v2, %v212_v2 }
 0x222   :  { %330 = vmatpush.bf16.msrb.mxu3 %v314_v53 }
 0x223   :  { %v216_v4 = vsel %vm100_vm2, %v214_v3, 0.0 }
 0x224   :  { %217 = vadd.xlane.f32.xlu1 %v216_v4  ;;  %v202_v5 = vpop.xlane.xlu0 %201 }
 0x225   :  { %v211_v6 = vmul.f32 %v605_v63, %v202_v5 }
 0x227   :  { %v213_v7 = vsub.f32 %v193_v55, %v211_v6  ;;  %v305_v55 = vld [vmem:[%s712_s10 + $0x8] sm:$0xff] }
 0x228   :  { %v313_v56 = vpack.c.bf16 %v305_v55, %v304_v54 }
 0x229   :  { %v215_v8 = vmul.f32 %v213_v7, %v213_v7 }
 0x22a   :  { %331 = vmatpush.bf16.msrb.mxu3 %v313_v56 }
 0x22b   :  { %v219_v9 = vsel %vm100_vm2, %v215_v8, 0.0 }
 0x22c   :  { %220 = vadd.xlane.f32.xlu1 %v219_v9 }
 0x297   :  { %v218_v15 = vpop.xlane.xlu1 %217 }
 0x298   :  { %v222_v17 = vmul.f32 %v218_v15, %v605_v63 }
 0x29a   :  { %v224_v18 = vadd.f32 1e-05, %v222_v17 }
 0x29c   :  { %454 = vrsqrt.f32 %v224_v18  ;;  %vm232_vm4 = vweird.f32 %v224_v18 }
 0x29f   :  { %v221_v19 = vpop.xlane.xlu1 %220 }
 0x2a0   :  { %v223_v20 = vmul.f32 %v221_v19, %v605_v63 }
 0x2a2   :  { %v455_v21 = vpop.eup %454  ;;  %v225_v22 = vadd.f32 1e-05, %v223_v20 }
 0x2a3   :  { %v227_v23 = vmul.f32 %v455_v21, %v224_v18  ;;  %vm233_vm3 = vweird.f32 %v455_v21  ;;  %v448_v18 = vld [vmem:[%s711_s11] ss:$0 sm:$0xff] }
 0x2a4   :  { %456 = vrsqrt.f32 %v225_v22  ;;  %vm234_vm5 = vmor %vm232_vm4, %vm233_vm3  ;;  %vm242_vm7 = vweird.f32 %v225_v22 }
 0x2a5   :  { %v228_v24 = vmul.f32 %v455_v21, %v227_v23 }
 0x2a7   :  { %v229_v25 = vmul.f32 0.5, %v228_v24 }
 0x2a9   :  { %v230_v26 = vsub.f32 1.5, %v229_v25 }
 0x2aa   :  { %v457_v27 = vpop.eup %456 }
 0x2ab   :  { %v231_v28 = vmul.f32 %v455_v21, %v230_v26  ;;  %v237_v29 = vmul.f32 %v457_v27, %v225_v22  ;;  %vm243_vm6 = vweird.f32 %v457_v27 }
 0x2ac   :  { %vm244_vm8 = vmor %vm242_vm7, %vm243_vm6 }
 0x2ad   :  { %v238_v30 = vmul.f32 %v457_v27, %v237_v29  ;;  %v235_v31 = vsel %vm234_vm5, %v455_v21, %v231_v28 }
 0x2ae   :  { %v246_v34 = vmul.f32 %v235_v31, %v212_v2 }
 0x2af   :  { %v239_v32 = vmul.f32 0.5, %v238_v30 }
 0x2b0   :  { %v251_v39 = vmul.f32 %v445_v35, %v246_v34 }
 0x2b1   :  { %v240_v33 = vsub.f32 1.5, %v239_v32 }
 0x2b2   :  { %v256_v42 = vadd.f32 %v446_v40, %v251_v39 }
 0x2b3   :  { %v241_v36 = vmul.f32 %v457_v27, %v240_v33 }
 0x2b5   :  { %v245_v37 = vsel %vm244_vm8, %v457_v27, %v241_v36 }
 0x2b6   :  { %v247_v38 = vmul.f32 %v245_v37, %v213_v7  ;;  %v398_v37 = vld [vmem:[%s716_s14 + $0x10] sm:$0xff] }
 0x2b8   :  { %v252_v41 = vmul.f32 %v445_v35, %v247_v38  ;;  %v399_v38 = vld [vmem:[%s716_s14 + $0x18] sm:$0xff] }
 0x2b9   :  { %v402_v39 = vpack.c.bf16 %v399_v38, %v398_v37 }
 0x2ba   :  { %v257_v43 = vadd.f32 %v446_v40, %v252_v41  ;;  %v396_v40 = vld [vmem:[%s716_s14] sm:$0xff]  ;;  %v397_v41 = vld [vmem:[%s716_s14 + $0x8] sm:$0xff] }
 0x2bb   :  { %416 = vmatpush.bf16.msrb.mxu1 %v402_v39 }
 0x2bc   :  { %v262_v44 = vpack.c.bf16 %v257_v43, %v256_v42 }
 0x2be   :  { %438 = vmatmul.msk.bf16.vlgmr.msrb.gmra.mxu2 %vm100_vm2, %v262_v44 }
 0x341   :  { %v281_v58 = vpop.f32.mrf.mxu2 }
 0x342   :  { %v282_v59 = vadd.f32 %v447_v57, %v281_v58 }
 0x344   :  { %v288_v60 = vmul.f32 0.044715, %v282_v59  ;;  %v286_v12 = vmul.f32 0.5, %v282_v59 }
 0x346   :  { %v290_v61 = vmul.f32 %v288_v60, %v282_v59 }
 0x348   :  { %v292_v62 = vmul.f32 %v290_v61, %v282_v59 }
 0x349   :  { %v283_v0 = vpop.f32.mrf.mxu2 }
 0x34a   :  { %v294_v1 = vadd.f32 %v292_v62, %v282_v59  ;;  %v284_v2 = vadd.f32 %v447_v57, %v283_v0 }
 0x34c   :  { %v289_v3 = vmul.f32 0.044715, %v284_v2  ;;  %v296_v4 = vmul.f32 0.7978846, %v294_v1  ;;  %v287_v13 = vmul.f32 0.5, %v284_v2 }
 0x34e   :  { %v291_v5 = vmul.f32 %v289_v3, %v284_v2  ;;  %458 = vtanh.f32 %v296_v4  ;;  %v450_v3 = vld [vmem:[%s714_s13] ss:$0 sm:$0xff] }
 0x350   :  { %v293_v6 = vmul.f32 %v291_v5, %v284_v2 }
 0x352   :  { %v295_v7 = vadd.f32 %v293_v6, %v284_v2 }
 0x354   :  { %v297_v8 = vmul.f32 0.7978846, %v295_v7  ;;  %v459_v9 = vpop.eup %458 }
 0x355   :  { %v300_v10 = vadd.f32 1.0, %v459_v9 }
 0x356   :  { %460 = vtanh.f32 %v297_v8  ;;  %v451_v8 = vld [vmem:[%s715_s15] ss:$0 sm:$0xff] }
 0x357   :  { %v302_v15 = vmul.f32 %v300_v10, %v286_v12 }
 0x35c   :  { %v461_v11 = vpop.eup %460 }
 0x35d   :  { %v301_v14 = vadd.f32 1.0, %v461_v11 }
 0x35f   :  { %v303_v16 = vmul.f32 %v301_v14, %v287_v13 }
 0x361   :  { %v312_v17 = vpack.c.bf16 %v303_v16, %v302_v15 }
 0x363   :  { %439 = vmatmul.msk.bf16.vlgmr.msrb.gmra.mxu3 %vm72_vm0, %v312_v17 }
 0x3e6   :  { %v333_v19 = vpop.f32.mrf.mxu3 }
 0x3e7   :  { %v334_v20 = vadd.f32 %v448_v18, %v333_v19 }
 0x3e9   :  { %v338_v21 = vadd.f32 %v334_v20, %v256_v42 }
 0x3eb   :  { %v342_v22 = vsel %vm100_vm2, %v338_v21, 0.0 }
 0x3ec   :  { %343 = vadd.xlane.f32.xlu2 %v342_v22 }
 0x3ee   :  { %v335_v23 = vpop.f32.mrf.mxu3 }
 0x3ef   :  { %v336_v24 = vadd.f32 %v448_v18, %v335_v23 }
 0x3f1   :  { %v339_v25 = vadd.f32 %v336_v24, %v257_v43  ;;  %v401_v43 = vpack.c.bf16 %v397_v41, %v396_v40 }
 0x3f3   :  { %v345_v26 = vsel %vm100_vm2, %v339_v25, 0.0  ;;  %417 = vmatpush.bf16.msrb.mxu1 %v401_v43 }
 0x3f4   :  { %346 = vadd.xlane.f32.xlu2 %v345_v26 }
 0x45f   :  { %v344_v27 = vpop.xlane.xlu2 %343 }
 0x460   :  { %v348_v28 = vmul.f32 %v344_v27, %v605_v63 }
 0x462   :  { %v350_v29 = vsub.f32 %v338_v21, %v348_v28 }
 0x464   :  { %v352_v30 = vmul.f32 %v350_v29, %v350_v29 }
 0x466   :  { %v354_v31 = vsel %vm100_vm2, %v352_v30, 0.0 }
 0x467   :  { %355 = vadd.xlane.f32.xlu0 %v354_v31  ;;  %v347_v32 = vpop.xlane.xlu2 %346 }
 0x468   :  { %v349_v33 = vmul.f32 %v347_v32, %v605_v63 }
 0x46a   :  { %v351_v34 = vsub.f32 %v339_v25, %v349_v33 }
 0x46c   :  { %v353_v35 = vmul.f32 %v351_v34, %v351_v34 }
 0x46e   :  { %v357_v36 = vsel %vm100_vm2, %v353_v35, 0.0 }
 0x46f   :  { %358 = vadd.xlane.f32.xlu1 %v357_v36 }
 0x4da   :  { %v356_v42 = vpop.xlane.xlu0 %355 }
 0x4db   :  { %v360_v44 = vmul.f32 %v356_v42, %v605_v63 }
 0x4dd   :  { %v362_v45 = vadd.f32 1e-05, %v360_v44 }
 0x4df   :  { %462 = vrsqrt.f32 %v362_v45  ;;  %vm370_vm10 = vweird.f32 %v362_v45 }
 0x4e2   :  { %v359_v46 = vpop.xlane.xlu1 %358 }
 0x4e3   :  { %v361_v47 = vmul.f32 %v359_v46, %v605_v63  ;;  %v449_v63 = vld [vmem:[%s713_s12] ss:$0 sm:$0xff] }
 0x4e5   :  { %v463_v48 = vpop.eup %462  ;;  %v363_v49 = vadd.f32 1e-05, %v361_v47 }
 0x4e6   :  { %v365_v50 = vmul.f32 %v463_v48, %v362_v45  ;;  %vm371_vm9 = vweird.f32 %v463_v48 }
 0x4e7   :  { %464 = vrsqrt.f32 %v363_v49  ;;  %vm372_vm11 = vmor %vm370_vm10, %vm371_vm9  ;;  %vm380_vm13 = vweird.f32 %v363_v49 }
 0x4e8   :  { %v366_v51 = vmul.f32 %v463_v48, %v365_v50 }
 0x4ea   :  { %v367_v52 = vmul.f32 0.5, %v366_v51 }
 0x4ec   :  { %v368_v53 = vsub.f32 1.5, %v367_v52 }
 0x4ed   :  { %v465_v54 = vpop.eup %464 }
 0x4ee   :  { %v369_v55 = vmul.f32 %v463_v48, %v368_v53  ;;  %v375_v56 = vmul.f32 %v465_v54, %v363_v49  ;;  %vm381_vm12 = vweird.f32 %v465_v54 }
 0x4ef   :  { %vm382_vm14 = vmor %vm380_vm13, %vm381_vm12 }
 0x4f0   :  { %v376_v57 = vmul.f32 %v465_v54, %v375_v56  ;;  %v373_v58 = vsel %vm372_vm11, %v463_v48, %v369_v55 }
 0x4f1   :  { %v384_v61 = vmul.f32 %v373_v58, %v350_v29 }
 0x4f2   :  { %v377_v59 = vmul.f32 0.5, %v376_v57 }
 0x4f3   :  { %v389_v2 = vmul.f32 %v449_v63, %v384_v61 }
 0x4f4   :  { %v378_v60 = vsub.f32 1.5, %v377_v59 }
 0x4f5   :  { %v394_v5 = vadd.f32 %v450_v3, %v389_v2 }
 0x4f6   :  { %v379_v62 = vmul.f32 %v465_v54, %v378_v60 }
 0x4f8   :  { %v383_v0 = vsel %vm382_vm14, %v465_v54, %v379_v62 }
 0x4f9   :  { %v385_v1 = vmul.f32 %v383_v0, %v351_v34 }
 0x4fb   :  { %v390_v4 = vmul.f32 %v449_v63, %v385_v1 }
 0x4fd   :  { %v395_v6 = vadd.f32 %v450_v3, %v390_v4 }
 0x4ff   :  { %v400_v7 = vpack.c.bf16 %v395_v6, %v394_v5 }
 0x501   :  { %440 = vmatmul.msk.bf16.vlgmr.msrb.gmra.mxu1 %vm100_vm2, %v400_v7 }
 0x57e   :  { %v419_v9 = vpop.f32.mrf.mxu1 }
 0x57f   :  { %v420_v10 = vadd.f32 %v451_v8, %v419_v9 }
 0x581   :  { %424 = vst.msk [vmem:[%s717_s16] sm:$0xff] %vm72_vm0, %v420_v10 }
 0x586   :  { %v421_v11 = vpop.f32.mrf.mxu1 }
 0x587   :  { %v422_v12 = vadd.f32 %v451_v8, %v421_v11 }
 0x589   :  { %425 = vst.msk [vmem:[%s717_s16 + $0x8] sm:$0xff] %vm72_vm0, %v422_v12 }

// kernel: xray_report_generator_forward.5
= control target key start
LH: loop header
LB: loop body
LE: loop exit
PB: predicated region body
PF: predicated region fallthrough
CT: control target
= control target key end

     0   :  { %s7945_s0 = inlined_call_operand.vmem [shape: f32[32,64], index: 0, kind: input, shape index: {}]   ;;  %s7946_s1 = inlined_call_operand.vmem [shape: f32[32,64], index: 1, kind: input, shape index: {}]   ;;  %s7947_s2 = inlined_call_operand.vmem [shape: f32[32,32], index: 2, kind: input, shape index: {}]   ;;  %s7948_s3 = inlined_call_operand.vmem [shape: s32[1,32], index: 3, kind: input, shape index: {}]   ;;  %s7949_s4 = inlined_call_operand.vmem [shape: f32[1,64], index: 4, kind: input, shape index: {}]   ;;  %s7950_s5 = inlined_call_operand.vmem [shape: f32[1,64], index: 5, kind: input, shape index: {}]   ;;  %s7951_s6 = inlined_call_operand.vmem [shape: f32[64,192], index: 6, kind: input, shape index: {}]   ;;  %s7952_s7 = inlined_call_operand.vmem [shape: f32[1,192], index: 7, kind: input, shape index: {}]   ;;  %s7953_s8 = inlined_call_operand.vmem [shape: f32[64,64], index: 8, kind: input, shape index: {}]   ;;  %s7954_s9 = inlined_call_operand.vmem [shape: f32[1,64], index: 9, kind: input, shape index: {}]   ;;  %s7955_s10 = inlined_call_operand.vmem [shape: f32[1,64], index: 10, kind: input, shape index: {}]   ;;  %s7956_s11 = inlined_call_operand.vmem [shape: f32[1,64], index: 11, kind: input, shape index: {}]   ;;  %s7957_s12 = inlined_call_operand.vmem [shape: f32[64,128], index: 12, kind: input, shape index: {}]   ;;  %s7958_s13 = inlined_call_operand.vmem [shape: f32[1,128], index: 13, kind: input, shape index: {}]   ;;  %s7959_s14 = inlined_call_operand.vmem [shape: f32[128,64], index: 14, kind: input, shape index: {}]   ;;  %s7960_s15 = inlined_call_operand.vmem [shape: f32[1,64], index: 15, kind: input, shape index: {}]   ;;  %s7961_s16 = inlined_call_operand.vmem [shape: f32[1,64], index: 16, kind: input, shape index: {}]   ;;  %s7962_s17 = inlined_call_operand.vmem [shape: f32[1,64], index: 17, kind: input, shape index: {}]   ;;  %s7963_s18 = inlined_call_operand.vmem [shape: f32[64,128], index: 18, kind: input, shape index: {}]   ;;  %s7964_s19 = inlined_call_operand.vmem [shape: f32[1,128], index: 19, kind: input, shape index: {}]   ;;  %s7965_s20 = inlined_call_operand.vmem [shape: f32[128,64], index: 20, kind: input, shape index: {}]   ;;  %s7966_s21 = inlined_call_operand.hbm [shape: s32[2,4], index: 21, kind: output, shape index: {}]  }
   0x1   :  { %8042 = sst [smem:[#allocation34_spill]] %s7945_s0 }
   0x2   :  { %8043 = sst [smem:[#allocation35_spill]] %s7946_s1 }
   0x3   :  { %8044 = sst [smem:[#allocation36_spill]] %s7947_s2 }
   0x4   :  { %8045 = sst [smem:[#allocation37_spill]] %s7948_s3 }
   0x5   :  { %8046 = sst [smem:[#allocation38_spill]] %s7949_s4 }
   0x6   :  { %8047 = sst [smem:[#allocation39_spill]] %s7950_s5 }
   0x7   :  { %8048 = sst [smem:[#allocation40_spill]] %s7961_s16 }
   0x8   :  { %s8049_s26 = sld [smem:[#allocation35_spill]]  ;;  %vm177_vm0 = vcmask 523264  }
   0x9   :  { %s8050_s16 = sld [smem:[#allocation34_spill]] }
   0xe   :  { %v72_v0 = vld [vmem:[%s8049_s26 + $0x10] sm:$0xff]  ;;  %v70_v2 = vld [vmem:[%s8049_s26] sm:$0xff]  ;;  %v73_v5 = vld [vmem:[%s8049_s26 + $0x18] sm:$0xff] }
   0xf   :  { %v171_v1 = vld [vmem:[%s8050_s16 + $0x10] sm:$0xff]  ;;  %v169_v4 = vld [vmem:[%s8050_s16] sm:$0xff]  ;;  %v172_v7 = vld [vmem:[%s8050_s16 + $0x18] sm:$0xff] }
  0x10   :  { %v5704_v3 = vadd.f32 %v171_v1, %v72_v0  ;;  %v5712_v6 = vadd.f32 %v169_v4, %v70_v2  ;;  %v71_v8 = vld [vmem:[%s8049_s26 + $0x8] sm:$0xff]  ;;  %v5727_v12 = vadd.f32 %v172_v7, %v73_v5 }
  0x11   :  { %v170_v10 = vld [vmem:[%s8050_s16 + $0x8] sm:$0xff] }
  0x12   :  { %v184_v9 = vsel %vm177_vm0, %v5704_v3, 0.0  ;;  %v178_v11 = vsel %vm177_vm0, %v5712_v6, 0.0  ;;  %v5729_v13 = vadd.f32 %v170_v10, %v71_v8 }
  0x13   :  { %185 = vadd.xlane.f32.xlu1 %v184_v9  ;;  %179 = vadd.xlane.f32.xlu0 %v178_v11 }
  0x14   :  { %26 = vsyncpa [#allocation3], 0  ;;  %v187_v14 = vsel %vm177_vm0, %v5727_v12, 0.0  ;;  %v181_v15 = vsel %vm177_vm0, %v5729_v13, 0.0  ;;  %v5573_v16 = vmov 64.0   ;;  %v93_v43 = vld [vmem:[%s7951_s6 + $0x60] sm:$0xff] }
  0x15   :  { %5100 = vrcp.f32 %v5573_v16  ;;  %v95_v44 = vld [vmem:[%s7951_s6 + $0x70] sm:$0xff]  ;;  %v94_v45 = vld [vmem:[%s7951_s6 + $0x68] sm:$0xff]  ;;  %v96_v47 = vld [vmem:[%s7951_s6 + $0x78] sm:$0xff]  ;;  %s8054_s4 = sld [smem:[#allocation38_spill]]  ;;  %s5574_s24 = smov 64   ;;  %vm8041_vm14 = vcmask 130048  }
  0x16   :  { %v5774_v46 = vpack.c.bf16 %v95_v44, %v93_v43  ;;  %v5779_v48 = vpack.c.bf16 %v96_v47, %v94_v45  ;;  %v89_v49 = vld [vmem:[%s7951_s6 + $0x40] sm:$0xff]  ;;  %v91_v50 = vld [vmem:[%s7951_s6 + $0x50] sm:$0xff]  ;;  %v90_v51 = vld [vmem:[%s7951_s6 + $0x48] sm:$0xff]  ;;  %s8055_s22 = sld [smem:[#allocation39_spill]]  ;;  %s5576_s1 = smov 48  }
  0x17   :  { %v5792_v52 = vpack.c.bf16 %v91_v50, %v89_v49  ;;  %v92_v53 = vld [vmem:[%s7951_s6 + $0x58] sm:$0xff]  ;;  %v85_v55 = vld [vmem:[%s7951_s6 + $0x20] sm:$0xff]  ;;  %v87_v56 = vld [vmem:[%s7951_s6 + $0x30] sm:$0xff]  ;;  %s8058_s25 = sld [smem:[#allocation37_spill]]  ;;  %s7976_s2 = smov 16  }
  0x18   :  { %312 = vmatpush.bf16.msra.mxu0 %v5774_v46  ;;  %331 = vmatpush.bf16.msra.mxu1 %v5779_v48  ;;  %v5797_v54 = vpack.c.bf16 %v92_v53, %v90_v51  ;;  %v86_v57 = vld [vmem:[%s7951_s6 + $0x28] sm:$0xff]  ;;  %v5810_v58 = vpack.c.bf16 %v87_v56, %v85_v55  ;;  %v88_v59 = vld [vmem:[%s7951_s6 + $0x38] sm:$0xff]  ;;  %v81_v60 = vld [vmem:[%s7951_s6] sm:$0xff]  ;;  %s8059_s28 = sld [smem:[#allocation36_spill]]  ;;  %s5579_s27 = smov 32  }
  0x19   :  { %v83_v61 = vld [vmem:[%s7951_s6 + $0x10] sm:$0xff]  ;;  %v5821_v62 = vpack.c.bf16 %v88_v59, %v86_v57  ;;  %v82_v63 = vld [vmem:[%s7951_s6 + $0x8] sm:$0xff]  ;;  %v84_v0 = vld [vmem:[%s7951_s6 + $0x18] sm:$0xff]  ;;  %s7974_s30 = smov 96   ;;  %s5581_s5 = smov 80  }
  0x1a   :  { %8051 = vst [vmem:[#allocation5_spill] sm:$0xff] %v5797_v54  ;;  %v5830_v4 = vpack.c.bf16 %v83_v61, %v81_v60  ;;  %v5834_v7 = vpack.c.bf16 %v84_v0, %v82_v63  ;;  %s8088_s23 = smov 16   ;;  %s8089_s3 = smov 96  }
  0x1b   :  { %188 = vadd.xlane.f32.xlu1 %v187_v14  ;;  %182 = vadd.xlane.f32.xlu0 %v181_v15  ;;  %v5101_v17 = vpop.eup %5100  ;;  %8052 = vst [vmem:[#allocation6_spill] sm:$0xff] %v5821_v62  ;;  %v5090_v44 = vld [vmem:[%s8054_s4] ss:$0 sm:$0xff] }
  0x1c   :  { %v191_v18 = vmul.f32 64.0, %v5101_v17  ;;  %vm195_vm1 = vweird.f32 %v5101_v17  ;;  %313 = vmatpush.bf16.msra.mxu0 %v5792_v52  ;;  %332 = vmatpush.bf16.msra.mxu1 %v5797_v54  ;;  %8053 = vst [vmem:[#allocation7_spill] sm:$0xff] %v5834_v7  ;;  %v5091_v55 = vld [vmem:[%s8055_s22] ss:$0 sm:$0xff] }
  0x1e   :  { %v192_v19 = vsub.f32 1.0, %v191_v18 }
  0x20   :  { %v193_v20 = vmul.f32 %v5101_v17, %v192_v19  ;;  %314 = vmatpush.bf16.msra.mxu0 %v5810_v58  ;;  %333 = vmatpush.bf16.msra.mxu1 %v5821_v62 }
  0x22   :  { %v194_v21 = vadd.f32 %v5101_v17, %v193_v20 }
  0x24   :  { %v5735_v22 = vsel %vm195_vm1, %v5101_v17, %v194_v21  ;;  %315 = vmatpush.bf16.msra.mxu0 %v5830_v4  ;;  %334 = vmatpush.bf16.msra.mxu1 %v5834_v7  ;;  %vm403_vm1 = vcmask 261120  }
  0x86   :  { %v186_v23 = vpop.xlane.xlu1 %185  ;;  %v180_v25 = vpop.xlane.xlu0 %179 }
  0x87   :  { %v199_v24 = vmul.f32 %v5735_v22, %v186_v23  ;;  %v197_v26 = vmul.f32 %v5735_v22, %v180_v25 }
  0x89   :  { %v5740_v27 = vsub.f32 %v5704_v3, %v199_v24  ;;  %v5743_v28 = vsub.f32 %v5712_v6, %v197_v26 }
  0x8b   :  { %v207_v29 = vmul.f32 %v5740_v27, %v5740_v27  ;;  %v205_v30 = vmul.f32 %v5743_v28, %v5743_v28 }
  0x8d   :  { %v215_v31 = vsel %vm177_vm0, %v207_v29, 0.0  ;;  %v209_v33 = vsel %vm177_vm0, %v205_v30, 0.0 }
  0x8e   :  { %v189_v32 = vpop.xlane.xlu1 %188  ;;  %216 = vadd.xlane.f32.xlu0 %v215_v31  ;;  %210 = vadd.xlane.f32.xlu2 %v209_v33  ;;  %v183_v35 = vpop.xlane.xlu0 %182 }
  0x8f   :  { %v200_v34 = vmul.f32 %v5735_v22, %v189_v32  ;;  %v198_v36 = vmul.f32 %v5735_v22, %v183_v35 }
  0x91   :  { %v5754_v37 = vsub.f32 %v5727_v12, %v200_v34  ;;  %v5757_v38 = vsub.f32 %v5729_v13, %v198_v36 }
  0x93   :  { %v208_v39 = vmul.f32 %v5754_v37, %v5754_v37  ;;  %v206_v40 = vmul.f32 %v5757_v38, %v5757_v38 }
  0x95   :  { %v218_v41 = vsel %vm177_vm0, %v208_v39, 0.0  ;;  %v212_v42 = vsel %vm177_vm0, %v206_v40, 0.0 }
  0x96   :  { %219 = vadd.xlane.f32.xlu1 %v218_v41  ;;  %213 = vadd.xlane.f32.xlu2 %v212_v42 }
 0x101   :  { %v211_v1 = vpop.xlane.xlu2 %210  ;;  %v217_v2 = vpop.xlane.xlu0 %216 }
 0x102   :  { %v221_v5 = vmul.f32 %v211_v1, %v5735_v22  ;;  %v223_v9 = vmul.f32 %v217_v2, %v5735_v22 }
 0x104   :  { %v225_v8 = vadd.f32 1e-05, %v221_v5  ;;  %v227_v10 = vadd.f32 1e-05, %v223_v9 }
 0x106   :  { %5102 = vrsqrt.f32 %v225_v8  ;;  %vm235_vm3 = vweird.f32 %v225_v8  ;;  %vm255_vm10 = vweird.f32 %v227_v10 }
 0x107   :  { %5104 = vrsqrt.f32 %v227_v10 }
 0x109   :  { %v220_v11 = vpop.xlane.xlu1 %219  ;;  %v214_v15 = vpop.xlane.xlu2 %213 }
 0x10a   :  { %v224_v14 = vmul.f32 %v220_v11, %v5735_v22  ;;  %v222_v16 = vmul.f32 %v214_v15, %v5735_v22 }
 0x10c   :  { %v228_v17 = vadd.f32 1e-05, %v224_v14  ;;  %v5103_v18 = vpop.eup %5102  ;;  %v226_v19 = vadd.f32 1e-05, %v222_v16  ;;  %v97_v16 = vld [vmem:[%s7952_s7] sm:$0x3] }
 0x10d   :  { %v230_v20 = vmul.f32 %v5103_v18, %v225_v8  ;;  %v5105_v24 = vpop.eup %5104  ;;  %vm236_vm2 = vweird.f32 %v5103_v18  ;;  %s5577_s7 = smov 112  }
 0x10e   :  { %5106 = vrsqrt.f32 %v228_v17  ;;  %v250_v32 = vmul.f32 %v5105_v24, %v227_v10  ;;  %vm237_vm4 = vmor %vm235_vm3, %vm236_vm2  ;;  %vm245_vm6 = vweird.f32 %v226_v19  ;;  %vm265_vm8 = vweird.f32 %v228_v17 }
 0x10f   :  { %5108 = vrsqrt.f32 %v226_v19  ;;  %v231_v21 = vmul.f32 %v5103_v18, %v230_v20  ;;  %vm256_vm11 = vweird.f32 %v5105_v24 }
 0x110   :  { %v251_v39 = vmul.f32 %v5105_v24, %v250_v32  ;;  %vm257_vm13 = vmor %vm255_vm10, %vm256_vm11 }
 0x111   :  { %v232_v23 = vmul.f32 0.5, %v231_v21 }
 0x112   :  { %v252_v45 = vmul.f32 0.5, %v251_v39 }
 0x113   :  { %v233_v26 = vsub.f32 1.5, %v232_v23 }
 0x114   :  { %v5107_v25 = vpop.eup %5106  ;;  %v253_v56 = vsub.f32 1.5, %v252_v45  ;;  %v7983_v45 = vmov -1e+09  }
 0x115   :  { %v5109_v29 = vpop.eup %5108  ;;  %v260_v30 = vmul.f32 %v5107_v25, %v228_v17  ;;  %v234_v31 = vmul.f32 %v5103_v18, %v233_v26  ;;  %vm266_vm9 = vweird.f32 %v5107_v25  ;;  %v5858_v17 = vperm.slane %v97_v16, 0 }
 0x116   :  { %v240_v33 = vmul.f32 %v5109_v29, %v226_v19  ;;  %vm246_vm5 = vweird.f32 %v5109_v29  ;;  %vm267_vm12 = vmor %vm265_vm8, %vm266_vm9  ;;  %v254_v61 = vmul.f32 %v5105_v24, %v253_v56 }
 0x117   :  { %v261_v34 = vmul.f32 %v5107_v25, %v260_v30  ;;  %v238_v36 = vsel %vm237_vm4, %v5103_v18, %v234_v31  ;;  %vm247_vm7 = vmor %vm245_vm6, %vm246_vm5  ;;  %8056 = vst [vmem:[#allocation8_spill] sm:$0xff] %v5858_v17 }
 0x118   :  { %v241_v35 = vmul.f32 %v5109_v29, %v240_v33  ;;  %v269_v43 = vmul.f32 %v238_v36, %v5743_v28 }
 0x119   :  { %v262_v41 = vmul.f32 0.5, %v261_v34 }
 0x11a   :  { %v242_v40 = vmul.f32 0.5, %v241_v35  ;;  %v276_v53 = vmul.f32 %v5090_v44, %v269_v43 }
 0x11b   :  { %v263_v49 = vsub.f32 1.5, %v262_v41 }
 0x11c   :  { %v243_v42 = vsub.f32 1.5, %v242_v40  ;;  %v283_v59 = vadd.f32 %v5091_v55, %v276_v53 }
 0x11d   :  { %v264_v57 = vmul.f32 %v5107_v25, %v263_v49 }
 0x11e   :  { %v244_v47 = vmul.f32 %v5109_v29, %v243_v42 }
 0x11f   :  { %v268_v0 = vsel %vm267_vm12, %v5107_v25, %v264_v57 }
 0x120   :  { %v248_v50 = vsel %vm247_vm7, %v5109_v29, %v244_v47  ;;  %v272_v1 = vmul.f32 %v268_v0, %v5754_v37  ;;  %v76_v0 = vld [vmem:[%s8059_s28 + $0x10] sm:$0xff] }
 0x121   :  { %v270_v51 = vmul.f32 %v248_v50, %v5757_v38  ;;  %v258_v38 = vsel %vm257_vm13, %v5105_v24, %v254_v61  ;;  %v5866_v24 = vperm.slane %v97_v16, 1  ;;  %v74_v50 = vld [vmem:[%s8059_s28] sm:$0xff] }
 0x122   :  { %v271_v2 = vmul.f32 %v258_v38, %v5740_v27  ;;  %v279_v5 = vmul.f32 %v5090_v44, %v272_v1 }
 0x123   :  { %v277_v28 = vmul.f32 %v5090_v44, %v270_v51  ;;  %8057 = vst [vmem:[#allocation9_spill] sm:$0xff] %v5866_v24 }
 0x124   :  { %v278_v8 = vmul.f32 %v5090_v44, %v271_v2  ;;  %v286_v9 = vadd.f32 %v5091_v55, %v279_v5  ;;  %v78_v44 = vld [vmem:[%s8058_s25] sm:$0x1] }
 0x125   :  { %v284_v60 = vadd.f32 %v5091_v55, %v277_v28  ;;  %vm346_vm15 = vcmp.lt.s32.totalorder %v78_v44, 12  ;;  %v75_v28 = vld [vmem:[%s8059_s28 + $0x8] sm:$0xff] }
 0x126   :  { %v285_v10 = vadd.f32 %v5091_v55, %v278_v8  ;;  %v347_v47 = vsel %vm346_vm15, 0.0, %v7983_v45 }
 0x127   :  { %v287_v63 = vpack.c.bf16 %v284_v60, %v283_v59  ;;  %v349_v49 = vperm.slane %v347_v47, 0 }
 0x128   :  { %v288_v11 = vpack.c.bf16 %v286_v9, %v285_v10  ;;  %v77_v9 = vld [vmem:[%s8059_s28 + $0x18] sm:$0xff] }
 0x129   :  { %4897 = vmatmul.msk.bf16.vlgmr.msra.gmra.mxu0 %vm177_vm0, %v287_v63  ;;  %4899 = vmatmul.msk.bf16.vlgmr.msra.gmra.mxu1 %vm177_vm0, %v287_v63  ;;  %v5897_v51 = vadd.f32 %v349_v49, %v74_v50  ;;  %v5904_v59 = vadd.f32 %v349_v49, %v75_v28  ;;  %v5911_v1 = vadd.f32 %v349_v49, %v76_v0  ;;  %v98_v50 = vld [vmem:[%s7953_s8] sm:$0xff] }
 0x139   :  { %4898 = vmatmul.msk.bf16.gmra.mxu0 %vm177_vm0, %v288_v11  ;;  %4900 = vmatmul.msk.bf16.gmra.mxu1 %vm177_vm0, %v288_v11  ;;  %v5918_v11 = vadd.f32 %v349_v49, %v77_v9 }
 0x1a6   :  { %v317_v14 = vpop.f32.mrf.mxu0  ;;  %v336_v15 = vpop.f32.mrf.mxu1 }
 0x1a7   :  { %v318_v27 = vadd.f32 %v317_v14, %v5858_v17  ;;  %v337_v36 = vadd.f32 %v336_v15, %v5866_v24 }
 0x1ae   :  { %v319_v37 = vpop.f32.mrf.mxu0  ;;  %v338_v18 = vpop.f32.mrf.mxu1 }
 0x1af   :  { %v320_v19 = vadd.f32 %v319_v37, %v5858_v17  ;;  %v339_v33 = vadd.f32 %v338_v18, %v5866_v24 }
 0x1b1   :  { %v5862_v20 = vpack.c.bf16 %v320_v19, %v318_v27  ;;  %v5881_v39 = vpack.c.bf16 %v339_v33, %v337_v36 }
 0x1b3   :  { %359 = vrot.lane.b32.xlu0 %v5862_v20, %s5574_s24 }
 0x1b6   :  { %v322_v21 = vpop.f32.mrf.mxu0  ;;  %v341_v23 = vpop.f32.mrf.mxu1 }
 0x1b7   :  { %v323_v29 = vadd.f32 %v322_v21, %v5858_v17  ;;  %v342_v30 = vadd.f32 %v341_v23, %v5866_v24 }
 0x1be   :  { %v324_v25 = vpop.f32.mrf.mxu0  ;;  %v343_v26 = vpop.f32.mrf.mxu1 }
 0x1bf   :  { %v325_v31 = vadd.f32 %v324_v25, %v5858_v17  ;;  %v344_v32 = vadd.f32 %v343_v26, %v5866_v24 }
 0x1c1   :  { %v5873_v34 = vpack.c.bf16 %v325_v31, %v323_v29  ;;  %v5875_v35 = vpack.c.bf16 %v344_v32, %v342_v30 }
 0x1c3   :  { %464 = vmatpush.bf16.msra.mxu3 %v5875_v35  ;;  %361 = vrot.lane.b32.xlu2 %v5873_v34, %s5574_s24 }
 0x1c7   :  { %465 = vmatpush.bf16.msra.mxu3 %v5881_v39 }
 0x21d   :  { %v362_v40 = vpop.permute.xlu2 %361 }
 0x21e   :  { %v374_v41 = vsel %vm8041_vm14, %v362_v40, 0 }
 0x21f   :  { %382 = vmatpush.bf16.xpose.msra.mxu2 %v374_v41 }
 0x225   :  { %v360_v42 = vpop.permute.xlu0 %359 }
 0x226   :  { %v371_v43 = vsel %vm8041_vm14, %v360_v42, 0 }
 0x227   :  { %383 = vmatpush.bf16.xpose.msra.mxu2 %v371_v43 }
 0x22e   :  { %4901 = vmatmul.msk.bf16.vlgmr.msra.gmra.mxu2 %vm8041_vm14, %v5862_v20 }
 0x23e   :  { %4902 = vmatmul.msk.bf16.gmra.mxu2 %vm8041_vm14, %v5873_v34 }
 0x2b1   :  { %v385_v53 = vpop.f32.mrf.mxu2 }
 0x2b2   :  { %v395_v55 = vmul.f32 0.25, %v385_v53  ;;  %v99_v53 = vld [vmem:[%s7953_s8 + $0x8] sm:$0xff] }
 0x2b4   :  { %v399_v56 = vadd.f32 %v395_v55, %v5897_v51  ;;  %v5946_v55 = vpack.c.bf16 %v99_v53, %v98_v50 }
 0x2b6   :  { %v404_v57 = vsel %vm403_vm1, %v399_v56, -inf  ;;  %8060 = vst [vmem:[#allocation10_spill] sm:$0xff] %v5946_v55  ;;  %647 = vmatpush.bf16.msrb.mxu2 %v5946_v55 }
 0x2b7   :  { %405 = vmax.xlane.f32.xlu1 %v404_v57 }
 0x2b9   :  { %v387_v60 = vpop.f32.mrf.mxu2 }
 0x2ba   :  { %v396_v61 = vmul.f32 0.25, %v387_v60 }
 0x2bc   :  { %v400_v63 = vadd.f32 %v396_v61, %v5904_v59 }
 0x2be   :  { %v407_v38 = vsel %vm403_vm1, %v400_v63, -inf }
 0x2bf   :  { %408 = vmax.xlane.f32.xlu1 %v407_v38 }
 0x2c1   :  { %v390_v2 = vpop.f32.mrf.mxu2 }
 0x2c2   :  { %v397_v5 = vmul.f32 0.25, %v390_v2 }
 0x2c4   :  { %v401_v8 = vadd.f32 %v397_v5, %v5911_v1 }
 0x2c6   :  { %v410_v10 = vsel %vm403_vm1, %v401_v8, -inf }
 0x2c7   :  { %411 = vmax.xlane.f32.xlu1 %v410_v10 }
 0x2c9   :  { %v392_v14 = vpop.f32.mrf.mxu2 }
 0x2ca   :  { %v398_v15 = vmul.f32 0.25, %v392_v14 }
 0x2cc   :  { %v402_v16 = vadd.f32 %v398_v15, %v5918_v11 }
 0x2ce   :  { %v413_v37 = vsel %vm403_vm1, %v402_v16, -inf }
 0x2cf   :  { %414 = vmax.xlane.f32.xlu2 %v413_v37 }
 0x2e7   :  { %484 = vrot.lane.b32.xlu2 %v5862_v20, %s5576_s1 }
 0x32a   :  { %v406_v18 = vpop.xlane.xlu1 %405 }
 0x32b   :  { %v416_v27 = vsub.f32 %v399_v56, %v406_v18 }
 0x32d   :  { %v420_v19 = vmul.f32 1.442695, %v416_v27 }
 0x32f   :  { %5110 = vpow2.f32 %v420_v19 }
 0x332   :  { %v409_v21 = vpop.xlane.xlu1 %408 }
 0x333   :  { %v417_v23 = vsub.f32 %v400_v63, %v409_v21 }
 0x335   :  { %v5111_v25 = vpop.eup %5110  ;;  %v422_v26 = vmul.f32 1.442695, %v417_v23 }
 0x336   :  { %v428_v29 = vsel %vm403_vm1, %v5111_v25, 0.0 }
 0x337   :  { %5112 = vpow2.f32 %v422_v26  ;;  %429 = vadd.xlane.f32.xlu0 %v428_v29 }
 0x33a   :  { %v412_v30 = vpop.xlane.xlu1 %411 }
 0x33b   :  { %v418_v31 = vsub.f32 %v401_v8, %v412_v30 }
 0x33d   :  { %v5113_v32 = vpop.eup %5112  ;;  %v424_v33 = vmul.f32 1.442695, %v418_v31 }
 0x33e   :  { %v431_v36 = vsel %vm403_vm1, %v5113_v32, 0.0 }
 0x33f   :  { %5114 = vpow2.f32 %v424_v33  ;;  %432 = vadd.xlane.f32.xlu1 %v431_v36 }
 0x342   :  { %v415_v40 = vpop.xlane.xlu2 %414 }
 0x343   :  { %v419_v41 = vsub.f32 %v402_v16, %v415_v40 }
 0x345   :  { %v5115_v42 = vpop.eup %5114  ;;  %v426_v43 = vmul.f32 1.442695, %v419_v41 }
 0x346   :  { %v434_v44 = vsel %vm403_vm1, %v5115_v42, 0.0 }
 0x347   :  { %5116 = vpow2.f32 %v426_v43  ;;  %435 = vadd.xlane.f32.xlu1 %v434_v44 }
 0x34a   :  { %v485_v19 = vpop.permute.xlu2 %484 }
 0x34b   :  { %480 = vrot.lane.b32.xlu0 %v5862_v20, %s5577_s7  ;;  %v495_v21 = vsel %vm8041_vm14, %v485_v19, 0 }
 0x34d   :  { %v5117_v47 = vpop.eup %5116 }
 0x34e   :  { %v437_v49 = vsel %vm403_vm1, %v5117_v47, 0.0 }
 0x34f   :  { %438 = vadd.xlane.f32.xlu1 %v437_v49 }
 0x353   :  { %821 = vrot.lane.b32.xlu0 %v5873_v34, %s7976_s2 }
 0x35b   :  { %665 = vrot.lane.b32.xlu0 %v5873_v34, %s5579_s27 }
 0x363   :  { %663 = vrot.lane.b32.xlu0 %v5862_v20, %s5579_s27 }
 0x368   :  { %486 = vrot.lane.b32.xlu1 %v5873_v34, %s5576_s1 }
 0x370   :  { %482 = vrot.lane.b32.xlu1 %v5873_v34, %s5577_s7 }
 0x3aa   :  { %v430_v56 = vpop.xlane.xlu0 %429 }
 0x3ab   :  { %5118 = vrcp.f32 %v430_v56 }
 0x3b1   :  { %v5119_v57 = vpop.eup %5118 }
 0x3b2   :  { %v433_v28 = vpop.xlane.xlu1 %432  ;;  %v444_v63 = vmul.f32 %v5119_v57, %v5111_v25 }
 0x3b3   :  { %5120 = vrcp.f32 %v433_v28 }
 0x3b9   :  { %v5121_v60 = vpop.eup %5120 }
 0x3ba   :  { %v436_v61 = vpop.xlane.xlu1 %435  ;;  %v445_v0 = vmul.f32 %v5121_v60, %v5113_v32 }
 0x3bb   :  { %5122 = vrcp.f32 %v436_v61 }
 0x3bc   :  { %v448_v38 = vpack.c.bf16 %v445_v0, %v444_v63 }
 0x3bd   :  { %v481_v2 = vpop.permute.xlu0 %480 }
 0x3be   :  { %4903 = vmatmul.msk.bf16.vlgmr.msra.gmra.mxu3 %vm403_vm1, %v448_v38 }
 0x3c1   :  { %v5123_v10 = vpop.eup %5122 }
 0x3c2   :  { %v439_v5 = vpop.xlane.xlu1 %438  ;;  %v446_v15 = vmul.f32 %v5123_v10, %v5115_v42 }
 0x3c3   :  { %5124 = vrcp.f32 %v439_v5 }
 0x3c5   :  { %v822_v8 = vpop.permute.xlu0 %821 }
 0x3c6   :  { %v833_v9 = vsel %vm8041_vm14, %v822_v8, 0 }
 0x3c7   :  { %841 = vmatpush.bf16.xpose.msra.mxu2 %v833_v9 }
 0x3c9   :  { %v5125_v14 = vpop.eup %5124 }
 0x3ca   :  { %v447_v16 = vmul.f32 %v5125_v14, %v5117_v47 }
 0x3cc   :  { %v449_v37 = vpack.c.bf16 %v447_v16, %v446_v15 }
 0x3cd   :  { %v666_v10 = vpop.permute.xlu0 %665 }
 0x3ce   :  { %4904 = vmatmul.msk.bf16.gmra.mxu3 %vm403_vm1, %v449_v37  ;;  %v677_v16 = vsel %vm8041_vm14, %v666_v10, 0 }
 0x3da   :  { %v487_v18 = vpop.permute.xlu1 %486 }
 0x3db   :  { %v498_v27 = vsel %vm8041_vm14, %v487_v18, 0 }
 0x3dc   :  { %506 = vmatpush.bf16.xpose.msrb.mxu3 %v498_v27  ;;  %v664_v27 = vpop.permute.xlu0 %663 }
 0x3dd   :  { %v674_v19 = vsel %vm8041_vm14, %v664_v27, 0 }
 0x3e2   :  { %v483_v23 = vpop.permute.xlu1 %482 }
 0x3e4   :  { %507 = vmatpush.bf16.xpose.msrb.mxu3 %v495_v21 }
 0x3eb   :  { %4905 = vmatmul.msk.bf16.vlgmr.msrb.gmra.mxu3 %vm8041_vm14, %v481_v2 }
 0x3fb   :  { %4906 = vmatmul.msk.bf16.gmra.mxu3 %vm8041_vm14, %v483_v23 }
 0x441   :  { %v467_v25 = vpop.f32.mrf.mxu3 }
 0x449   :  { %v469_v26 = vpop.f32.mrf.mxu3 }
 0x44a   :  { %v477_v29 = vpack.c.bf16 %v469_v26, %v467_v25 }
 0x44c   :  { %4911 = vmatmul.msk.bf16.vlgmr.msrb.gmra.mxu2 %vm8041_vm14, %v477_v29 }
 0x451   :  { %v472_v30 = vpop.f32.mrf.mxu3 }
 0x459   :  { %v474_v31 = vpop.f32.mrf.mxu3 }
 0x45a   :  { %v478_v32 = vpack.c.bf16 %v474_v31, %v472_v30 }
 0x45c   :  { %4912 = vmatmul.msk.bf16.gmra.mxu2 %vm8041_vm14, %v478_v32 }
 0x46e   :  { %v509_v33 = vpop.f32.mrf.mxu3 }
 0x46f   :  { %v519_v53 = vmul.f32 0.25, %v509_v33 }
 0x471   :  { %v523_v56 = vadd.f32 %v519_v53, %v5897_v51 }
 0x473   :  { %v527_v28 = vsel %vm403_vm1, %v523_v56, -inf }
 0x476   :  { %v511_v36 = vpop.f32.mrf.mxu3 }
 0x477   :  { %v520_v21 = vmul.f32 0.25, %v511_v36 }
 0x479   :  { %v524_v23 = vadd.f32 %v520_v21, %v5904_v59 }
 0x47b   :  { %v530_v25 = vsel %vm403_vm1, %v524_v23, -inf }
 0x47e   :  { %v514_v40 = vpop.f32.mrf.mxu3 }
 0x47f   :  { %v521_v41 = vmul.f32 0.25, %v514_v40 }
 0x481   :  { %v525_v42 = vadd.f32 %v521_v41, %v5911_v1 }
 0x483   :  { %v533_v43 = vsel %vm403_vm1, %v525_v42, -inf }
 0x484   :  { %534 = vmax.xlane.f32.xlu1 %v533_v43 }
 0x486   :  { %v516_v44 = vpop.f32.mrf.mxu3 }
 0x487   :  { %v522_v47 = vmul.f32 0.25, %v516_v44 }
 0x489   :  { %v526_v49 = vadd.f32 %v522_v47, %v5918_v11 }
 0x48b   :  { %v536_v50 = vsel %vm403_vm1, %v526_v49, -inf }
 0x48c   :  { %537 = vmax.xlane.f32.xlu2 %v536_v50 }
 0x49d   :  { %577 = vrot.lane.b32.xlu1 %v5875_v35, %s5577_s7 }
 0x4a4   :  { %575 = vrot.lane.b32.xlu2 %v5881_v39, %s5577_s7 }
 0x4a5   :  { %819 = vrot.lane.b32.xlu1 %v5862_v20, %s7976_s2 }
 0x4ad   :  { %659 = vrot.lane.b32.xlu1 %v5862_v20, %s7974_s30 }
 0x4cf   :  { %v5994_v50 = vpop.f32.mrf.mxu2 }
 0x4d7   :  { %528 = vmax.xlane.f32.xlu1 %v527_v28  ;;  %v5996_v53 = vpop.f32.mrf.mxu2 }
 0x4f7   :  { %v535_v57 = vpop.xlane.xlu1 %534 }
 0x4f8   :  { %v541_v60 = vsub.f32 %v525_v42, %v535_v57 }
 0x4fa   :  { %v547_v61 = vmul.f32 1.442695, %v541_v60 }
 0x4fc   :  { %5126 = vpow2.f32 %v547_v61 }
 0x4ff   :  { %v538_v63 = vpop.xlane.xlu2 %537 }
 0x500   :  { %v542_v0 = vsub.f32 %v526_v49, %v538_v63 }
 0x502   :  { %v5127_v38 = vpop.eup %5126  ;;  %v549_v2 = vmul.f32 1.442695, %v542_v0 }
 0x503   :  { %v557_v5 = vsel %vm403_vm1, %v5127_v38, 0.0 }
 0x504   :  { %5128 = vpow2.f32 %v549_v2  ;;  %558 = vadd.xlane.f32.xlu0 %v557_v5 }
 0x507   :  { %v576_v15 = vpop.permute.xlu2 %575 }
 0x50a   :  { %v5129_v8 = vpop.eup %5128 }
 0x50b   :  { %v560_v9 = vsel %vm403_vm1, %v5129_v8, 0.0 }
 0x50c   :  { %561 = vadd.xlane.f32.xlu2 %v560_v9 }
 0x50f   :  { %v578_v14 = vpop.permute.xlu1 %577 }
 0x510   :  { %593 = vmatpush.bf16.msrb.mxu0 %v578_v14  ;;  %5056 = vmatpush.bf16.msra.mxu3 %v578_v14 }
 0x514   :  { %594 = vmatpush.bf16.msrb.mxu0 %v576_v15  ;;  %5057 = vmatpush.bf16.msra.mxu3 %v576_v15 }
 0x517   :  { %v820_v37 = vpop.permute.xlu1 %819 }
 0x518   :  { %685 = vmatpush.bf16.xpose.msrb.mxu3 %v677_v16  ;;  %817 = vrot.lane.b32.xlu0 %v5873_v34, %s5581_s5  ;;  %v830_v18 = vsel %vm8041_vm14, %v820_v37, 0 }
 0x519   :  { %842 = vmatpush.bf16.xpose.msra.mxu2 %v830_v18 }
 0x51f   :  { %v660_v26 = vpop.permute.xlu1 %659 }
 0x520   :  { %686 = vmatpush.bf16.xpose.msrb.mxu3 %v674_v19 }
 0x524   :  { %815 = vrot.lane.b32.xlu2 %v5862_v20, %s5581_s5 }
 0x52c   :  { %661 = vrot.lane.b32.xlu2 %v5873_v34, %s7974_s30 }
 0x542   :  { %531 = vmax.xlane.f32.xlu0 %v530_v25 }
 0x54a   :  { %v529_v29 = vpop.xlane.xlu1 %528 }
 0x54b   :  { %v539_v30 = vsub.f32 %v523_v56, %v529_v29  ;;  %v5998_v56 = vpop.f32.mrf.mxu2 }
 0x54d   :  { %v543_v31 = vmul.f32 1.442695, %v539_v30 }
 0x54f   :  { %5130 = vpow2.f32 %v543_v31 }
 0x553   :  { %v6000_v28 = vpop.f32.mrf.mxu2 }
 0x555   :  { %v5985_v32 = vpop.eup %5130 }
 0x556   :  { %v551_v33 = vsel %vm403_vm1, %v5985_v32, 0.0 }
 0x557   :  { %552 = vadd.xlane.f32.xlu0 %v551_v33 }
 0x577   :  { %v559_v20 = vpop.xlane.xlu0 %558 }
 0x578   :  { %5132 = vrcp.f32 %v559_v20 }
 0x57e   :  { %v5133_v36 = vpop.eup %5132 }
 0x57f   :  { %v562_v34 = vpop.xlane.xlu2 %561  ;;  %v569_v41 = vmul.f32 %v5133_v36, %v5127_v38 }
 0x580   :  { %5134 = vrcp.f32 %v562_v34 }
 0x586   :  { %v5135_v40 = vpop.eup %5134 }
 0x587   :  { %v570_v42 = vmul.f32 %v5135_v40, %v5129_v8  ;;  %v816_v43 = vpop.permute.xlu2 %815 }
 0x588   :  { %4919 = vmatmul.msk.bf16.vlgmr.msra.gmra.mxu2 %vm8041_vm14, %v816_v43 }
 0x589   :  { %v572_v44 = vpack.c.bf16 %v570_v42, %v569_v41 }
 0x58a   :  { %v818_v47 = vpop.permute.xlu0 %817 }
 0x58b   :  { %4908 = vmatmul.msk.bf16.vlgmr.msra.gmra.mxu3 %vm403_vm1, %v572_v44 }
 0x58f   :  { %v662_v49 = vpop.permute.xlu2 %661 }
 0x598   :  { %4920 = vmatmul.msk.bf16.gmra.mxu2 %vm8041_vm14, %v818_v47 }
 0x59b   :  { %4913 = vmatmul.msk.bf16.vlgmr.msrb.gmra.mxu3 %vm8041_vm14, %v660_v26 }
 0x5ab   :  { %4914 = vmatmul.msk.bf16.gmra.mxu3 %vm8041_vm14, %v662_v49 }
 0x5b5   :  { %v532_v57 = vpop.xlane.xlu0 %531 }
 0x5b6   :  { %v540_v60 = vsub.f32 %v524_v23, %v532_v57 }
 0x5b8   :  { %v545_v61 = vmul.f32 1.442695, %v540_v60 }
 0x5ba   :  { %5136 = vpow2.f32 %v545_v61 }
 0x5c0   :  { %v5137_v10 = vpop.eup %5136 }
 0x5c1   :  { %v554_v16 = vsel %vm403_vm1, %v5137_v10, 0.0 }
 0x5ca   :  { %v553_v49 = vpop.xlane.xlu0 %552 }
 0x60b   :  { %v844_v63 = vpop.f32.mrf.mxu2 }
 0x60c   :  { %v854_v0 = vmul.f32 0.25, %v844_v63 }
 0x60e   :  { %v6002_v38 = vpop.f32.mrf.mxu3  ;;  %v858_v2 = vadd.f32 %v854_v0, %v5897_v51 }
 0x610   :  { %v862_v5 = vsel %vm403_vm1, %v858_v2, -inf }
 0x611   :  { %863 = vmax.xlane.f32.xlu2 %v862_v5 }
 0x613   :  { %v846_v8 = vpop.f32.mrf.mxu2 }
 0x614   :  { %v855_v9 = vmul.f32 0.25, %v846_v8 }
 0x616   :  { %v6006_v14 = vpop.f32.mrf.mxu3  ;;  %v859_v15 = vadd.f32 %v855_v9, %v5904_v59 }
 0x618   :  { %v865_v37 = vsel %vm403_vm1, %v859_v15, -inf }
 0x619   :  { %555 = vadd.xlane.f32.xlu2 %v554_v16  ;;  %866 = vmax.xlane.f32.xlu1 %v865_v37 }
 0x61b   :  { %v849_v18 = vpop.f32.mrf.mxu2 }
 0x61c   :  { %v856_v27 = vmul.f32 0.25, %v849_v18 }
 0x61e   :  { %v688_v19 = vpop.f32.mrf.mxu3  ;;  %v6012_v21 = vadd.f32 %v856_v27, %v5911_v1 }
 0x620   :  { %v868_v23 = vsel %vm403_vm1, %v6012_v21, -inf }
 0x621   :  { %869 = vmax.xlane.f32.xlu1 %v868_v23 }
 0x623   :  { %v851_v25 = vpop.f32.mrf.mxu2 }
 0x624   :  { %v857_v26 = vmul.f32 0.25, %v851_v25 }
 0x626   :  { %v690_v29 = vpop.f32.mrf.mxu3  ;;  %v861_v30 = vadd.f32 %v857_v26, %v5918_v11 }
 0x627   :  { %v699_v31 = vmul.f32 0.25, %v690_v29 }
 0x628   :  { %v871_v33 = vsel %vm403_vm1, %v861_v30, -inf }
 0x629   :  { %872 = vmax.xlane.f32.xlu0 %v871_v33  ;;  %v703_v20 = vadd.f32 %v699_v31, %v5904_v59 }
 0x62b   :  { %v709_v34 = vsel %vm403_vm1, %v703_v20, -inf }
 0x62c   :  { %710 = vmax.xlane.f32.xlu2 %v709_v34 }
 0x62e   :  { %v693_v36 = vpop.f32.mrf.mxu3 }
 0x62f   :  { %v700_v40 = vmul.f32 0.25, %v693_v36 }
 0x631   :  { %v704_v41 = vadd.f32 %v700_v40, %v5911_v1 }
 0x633   :  { %v712_v42 = vsel %vm403_vm1, %v704_v41, -inf }
 0x634   :  { %713 = vmax.xlane.f32.xlu2 %v712_v42 }
 0x636   :  { %v695_v60 = vpop.f32.mrf.mxu3 }
 0x637   :  { %v701_v0 = vmul.f32 0.25, %v695_v60 }
 0x639   :  { %v705_v37 = vadd.f32 %v701_v0, %v5918_v11 }
 0x63b   :  { %v715_v25 = vsel %vm403_vm1, %v705_v37, -inf }
 0x64c   :  { %754 = vrot.lane.b32.xlu2 %v5875_v35, %s7974_s30 }
 0x684   :  { %v864_v43 = vpop.xlane.xlu2 %863 }
 0x685   :  { %v874_v44 = vsub.f32 %v858_v2, %v864_v43 }
 0x687   :  { %v878_v47 = vmul.f32 1.442695, %v874_v44 }
 0x689   :  { %5138 = vpow2.f32 %v878_v47 }
 0x68a   :  { %5140 = vrcp.f32 %v553_v49 }
 0x68c   :  { %v867_v59 = vpop.xlane.xlu1 %866  ;;  %v556_v57 = vpop.xlane.xlu2 %555 }
 0x68d   :  { %v875_v61 = vsub.f32 %v859_v15, %v867_v59  ;;  %5142 = vrcp.f32 %v556_v57  ;;  %v698_v15 = vmul.f32 0.25, %v688_v19 }
 0x68f   :  { %v6024_v63 = vpop.eup %5138  ;;  %v880_v1 = vmul.f32 1.442695, %v875_v61  ;;  %v702_v26 = vadd.f32 %v698_v15, %v5897_v51 }
 0x690   :  { %v886_v5 = vsel %vm403_vm1, %v6024_v63, 0.0  ;;  %v5141_v8 = vpop.eup %5140 }
 0x691   :  { %5144 = vpow2.f32 %v880_v1  ;;  %887 = vadd.xlane.f32.xlu1 %v886_v5  ;;  %v567_v9 = vmul.f32 %v5141_v8, %v5985_v32 }
 0x693   :  { %v5143_v2 = vpop.eup %5142 }
 0x694   :  { %v568_v16 = vmul.f32 %v5143_v2, %v5137_v10  ;;  %v706_v10 = vsel %vm403_vm1, %v702_v26, -inf  ;;  %v870_v49 = vpop.xlane.xlu1 %869 }
 0x695   :  { %v876_v0 = vsub.f32 %v6012_v21, %v870_v49 }
 0x696   :  { %v571_v18 = vpack.c.bf16 %v568_v16, %v567_v9 }
 0x697   :  { %v6030_v27 = vpop.eup %5144  ;;  %v882_v8 = vmul.f32 1.442695, %v876_v0 }
 0x698   :  { %4907 = vmatmul.msk.bf16.vlgmr.msrb.gmra.mxu0 %vm403_vm1, %v571_v18  ;;  %v889_v23 = vsel %vm403_vm1, %v6030_v27, 0.0 }
 0x699   :  { %890 = vadd.xlane.f32.xlu0 %v889_v23  ;;  %716 = vmax.xlane.f32.xlu1 %v715_v25 }
 0x69c   :  { %v873_v51 = vpop.xlane.xlu0 %872 }
 0x69f   :  { %v711_v29 = vpop.xlane.xlu2 %710 }
 0x6a0   :  { %v719_v32 = vsub.f32 %v703_v20, %v711_v29  ;;  %v877_v20 = vsub.f32 %v861_v30, %v873_v51  ;;  %v101_v30 = vld [vmem:[%s7953_s8 + $0x18] sm:$0xff] }
 0x6a1   :  { %707 = vmax.xlane.f32.xlu0 %v706_v10  ;;  %v607_v10 = vpack.c.bf16 %v6006_v14, %v6002_v38 }
 0x6a2   :  { %v724_v11 = vmul.f32 1.442695, %v719_v32  ;;  %v884_v36 = vmul.f32 1.442695, %v877_v20 }
 0x6a4   :  { %5146 = vpow2.f32 %v724_v11 }
 0x6a5   :  { %5148 = vpow2.f32 %v884_v36 }
 0x6a7   :  { %v714_v31 = vpop.xlane.xlu2 %713 }
 0x6a8   :  { %v720_v40 = vsub.f32 %v704_v41, %v714_v31 }
 0x6aa   :  { %v6038_v19 = vpop.eup %5146  ;;  %v726_v42 = vmul.f32 1.442695, %v720_v40 }
 0x6ab   :  { %v733_v33 = vsel %vm403_vm1, %v6038_v19, 0.0  ;;  %v6048_v43 = vpop.eup %5148 }
 0x6ac   :  { %734 = vadd.xlane.f32.xlu1 %v733_v33  ;;  %5150 = vpow2.f32 %v726_v42  ;;  %v895_v44 = vsel %vm403_vm1, %v6048_v43, 0.0 }
 0x6af   :  { %v755_v34 = vpop.permute.xlu2 %754 }
 0x6b0   :  { %770 = vmatpush.bf16.msra.mxu0 %v755_v34 }
 0x6b5   :  { %910 = vrot.lane.b32.xlu0 %v5875_v35, %s5581_s5  ;;  %v6052_v35 = vpop.eup %5150 }
 0x6b6   :  { %v736_v47 = vsel %vm403_vm1, %v6052_v35, 0.0 }
 0x6bd   :  { %752 = vrot.lane.b32.xlu0 %v5881_v39, %s7974_s30  ;;  %s5584_s30 = smov [#allocation2]  }
 0x6c5   :  { %908 = vrot.lane.b32.xlu1 %v5881_v39, %s5581_s5  ;;  %v100_v39 = vld [vmem:[%s7953_s8 + $0x10] sm:$0xff] }
 0x6c6   :  { %v6062_v41 = vpack.c.bf16 %v101_v30, %v100_v39 }
 0x6c8   :  { %8061 = vst [vmem:[#allocation11_spill] sm:$0xff] %v6062_v41  ;;  %622 = vmatpush.bf16.msrb.mxu1 %v6062_v41 }
 0x6e7   :  { %896 = vadd.xlane.f32.xlu0 %v895_v44 }
 0x6ef   :  { %737 = vadd.xlane.f32.xlu1 %v736_v47 }
 0x704   :  { %v888_v57 = vpop.xlane.xlu1 %887 }
 0x70c   :  { %v891_v59 = vpop.xlane.xlu0 %890  ;;  %v717_v2 = vpop.xlane.xlu1 %716 }
 0x70d   :  { %v721_v15 = vsub.f32 %v705_v37, %v717_v2 }
 0x70f   :  { %v728_v25 = vmul.f32 1.442695, %v721_v15 }
 0x714   :  { %v708_v60 = vpop.xlane.xlu0 %707 }
 0x715   :  { %v718_v61 = vsub.f32 %v702_v26, %v708_v60  ;;  %v596_v1 = vpop.f32.mrf.mxu0  ;;  %v105_v60 = vld [vmem:[%s7953_s8 + $0x38] sm:$0xff] }
 0x717   :  { %v722_v5 = vmul.f32 1.442695, %v718_v61 }
 0x719   :  { %5152 = vpow2.f32 %v722_v5 }
 0x71a   :  { %5154 = vpow2.f32 %v882_v8 }
 0x71b   :  { %5156 = vpow2.f32 %v728_v25 }
 0x71c   :  { %5158 = vrcp.f32 %v891_v59 }
 0x71d   :  { %v598_v9 = vpop.f32.mrf.mxu0  ;;  %5160 = vrcp.f32 %v888_v57  ;;  %v104_v57 = vld [vmem:[%s7953_s8 + $0x30] sm:$0xff] }
 0x71e   :  { %v606_v16 = vpack.c.bf16 %v598_v9, %v596_v1  ;;  %v6085_v0 = vpack.c.bf16 %v105_v60, %v104_v57 }
 0x71f   :  { %v5153_v18 = vpop.eup %5152  ;;  %v735_v37 = vpop.xlane.xlu1 %734 }
 0x720   :  { %4909 = vmatmul.msk.bf16.vlgmr.msrb.gmra.mxu1 %vm8041_vm14, %v606_v16  ;;  %v730_v23 = vsel %vm403_vm1, %v5153_v18, 0.0  ;;  %v5155_v29 = vpop.eup %5154  ;;  %5162 = vrcp.f32 %v735_v37 }
 0x721   :  { %731 = vadd.xlane.f32.xlu2 %v730_v23  ;;  %v892_v21 = vsel %vm403_vm1, %v5155_v29, 0.0  ;;  %v5157_v32 = vpop.eup %5156 }
 0x722   :  { %v739_v31 = vsel %vm403_vm1, %v5157_v32, 0.0  ;;  %v5159_v33 = vpop.eup %5158 }
 0x723   :  { %v5161_v34 = vpop.eup %5160  ;;  %v903_v51 = vmul.f32 %v5159_v33, %v6030_v27 }
 0x724   :  { %v902_v20 = vmul.f32 %v5161_v34, %v6024_v63 }
 0x726   :  { %v906_v40 = vpack.c.bf16 %v903_v51, %v902_v20  ;;  %v5163_v42 = vpop.eup %5162 }
 0x727   :  { %v911_v26 = vpop.permute.xlu0 %910  ;;  %v747_v47 = vmul.f32 %v5163_v42, %v6038_v19 }
 0x728   :  { %926 = vmatpush.bf16.msra.mxu3 %v911_v26 }
 0x729   :  { %893 = vadd.xlane.f32.xlu2 %v892_v21 }
 0x72f   :  { %v753_v11 = vpop.permute.xlu0 %752 }
 0x730   :  { %4910 = vmatmul.msk.bf16.gmra.mxu1 %vm8041_vm14, %v607_v10  ;;  %771 = vmatpush.bf16.msra.mxu0 %v753_v11 }
 0x731   :  { %740 = vadd.xlane.f32.xlu2 %v739_v31 }
 0x734   :  { %955 = vmatpush.bf16.msrb.mxu0 %v6085_v0 }
 0x737   :  { %v909_v36 = vpop.permute.xlu1 %908 }
 0x738   :  { %927 = vmatpush.bf16.msra.mxu3 %v909_v36 }
 0x73b   :  { %4921 = vmatmul.msk.bf16.vlgmr.msra.gmra.mxu3 %vm403_vm1, %v906_v40 }
 0x75a   :  { %v897_v14 = vpop.xlane.xlu0 %896 }
 0x762   :  { %v738_v49 = vpop.xlane.xlu1 %737 }
 0x794   :  { %v732_v38 = vpop.xlane.xlu2 %731 }
 0x795   :  { %5164 = vrcp.f32 %v732_v38 }
 0x796   :  { %5166 = vrcp.f32 %v897_v14 }
 0x79b   :  { %v5165_v44 = vpop.eup %5164 }
 0x79c   :  { %v746_v39 = vmul.f32 %v5165_v44, %v5153_v18  ;;  %v894_v30 = vpop.xlane.xlu2 %893  ;;  %v5167_v63 = vpop.eup %5166 }
 0x79d   :  { %5168 = vrcp.f32 %v894_v30  ;;  %v905_v1 = vmul.f32 %v5167_v63, %v6048_v43  ;;  %v102_v43 = vld [vmem:[%s7953_s8 + $0x20] sm:$0xff]  ;;  %v624_v51 = vpop.f32.mrf.mxu1 }
 0x79e   :  { %v750_v27 = vpack.c.bf16 %v747_v47, %v746_v39  ;;  %5170 = vrcp.f32 %v738_v49  ;;  %v650_v14 = vadd.f32 %v5994_v50, %v624_v51  ;;  %v5092_v39 = vld [vmem:[%s7954_s9] ss:$0 sm:$0xff] }
 0x7a0   :  { %4915 = vmatmul.msk.bf16.vlgmr.msra.gmra.mxu0 %vm403_vm1, %v750_v27 }
 0x7a3   :  { %v5169_v59 = vpop.eup %5168 }
 0x7a4   :  { %v741_v61 = vpop.xlane.xlu2 %740  ;;  %v904_v19 = vmul.f32 %v5169_v59, %v5155_v29  ;;  %v5171_v8 = vpop.eup %5170  ;;  %v103_v29 = vld [vmem:[%s7953_s8 + $0x28] sm:$0xff]  ;;  %s8075_s8 = sld [smem:[#allocation40_spill]] }
 0x7a5   :  { %5172 = vrcp.f32 %v741_v61  ;;  %v748_v9 = vmul.f32 %v5171_v8, %v6052_v35  ;;  %v6098_v26 = vpack.c.bf16 %v103_v29, %v102_v43  ;;  %v626_v20 = vpop.f32.mrf.mxu1 }
 0x7a6   :  { %v907_v5 = vpack.c.bf16 %v905_v1, %v904_v19  ;;  %v652_v27 = vadd.f32 %v5996_v53, %v626_v20 }
 0x7a7   :  { %8062 = vst [vmem:[#allocation12_spill] sm:$0xff] %v6098_v26  ;;  %799 = vmatpush.bf16.msra.mxu1 %v6098_v26 }
 0x7a8   :  { %4922 = vmatmul.msk.bf16.gmra.mxu3 %vm403_vm1, %v907_v5 }
 0x7ab   :  { %v5173_v2 = vpop.eup %5172 }
 0x7ac   :  { %v749_v16 = vmul.f32 %v5173_v2, %v5157_v32 }
 0x7ad   :  { %v629_v36 = vpop.f32.mrf.mxu1 }
 0x7ae   :  { %v751_v18 = vpack.c.bf16 %v749_v16, %v748_v9  ;;  %v655_v19 = vadd.f32 %v5998_v56, %v629_v36 }
 0x7b0   :  { %4916 = vmatmul.msk.bf16.gmra.mxu0 %vm403_vm1, %v751_v18 }
 0x7b5   :  { %v631_v40 = vpop.f32.mrf.mxu1 }
 0x7b6   :  { %v657_v16 = vadd.f32 %v6000_v28, %v631_v40 }
 0x7be   :  { %v929_v15 = vpop.f32.mrf.mxu3 }
 0x7c6   :  { %v931_v23 = vpop.f32.mrf.mxu3 }
 0x7c7   :  { %v939_v25 = vpack.c.bf16 %v931_v23, %v929_v15 }
 0x7c9   :  { %4923 = vmatmul.msk.bf16.vlgmr.msrb.gmra.mxu0 %vm8041_vm14, %v939_v25 }
 0x81d   :  { %v773_v35 = vpop.f32.mrf.mxu0 }
 0x825   :  { %v775_v21 = vpop.f32.mrf.mxu0 }
 0x826   :  { %v783_v32 = vpack.c.bf16 %v775_v21, %v773_v35 }
 0x828   :  { %4917 = vmatmul.msk.bf16.vlgmr.msra.gmra.mxu1 %vm8041_vm14, %v783_v32 }
 0x82b   :  { %v934_v10 = vpop.f32.mrf.mxu3 }
 0x82d   :  { %v778_v37 = vpop.f32.mrf.mxu0 }
 0x833   :  { %v936_v11 = vpop.f32.mrf.mxu3 }
 0x834   :  { %v940_v31 = vpack.c.bf16 %v936_v11, %v934_v10 }
 0x835   :  { %v780_v33 = vpop.f32.mrf.mxu0 }
 0x836   :  { %v784_v34 = vpack.c.bf16 %v780_v33, %v778_v37  ;;  %4924 = vmatmul.msk.bf16.gmra.mxu0 %vm8041_vm14, %v940_v31 }
 0x838   :  { %4918 = vmatmul.msk.bf16.gmra.mxu1 %vm8041_vm14, %v784_v34 }
 0x846   :  { %v957_v38 = vpop.f32.mrf.mxu0 }
 0x84e   :  { %v959_v63 = vpop.f32.mrf.mxu0 }
 0x8a5   :  { %v801_v42 = vpop.f32.mrf.mxu1 }
 0x8a6   :  { %v811_v44 = vadd.f32 %v801_v42, %v650_v14 }
 0x8a8   :  { %v967_v47 = vadd.f32 %v957_v38, %v811_v44 }
 0x8aa   :  { %v971_v30 = vadd.f32 %v967_v47, %v5712_v6 }
 0x8ac   :  { %v6110_v49 = vadd.f32 %v5092_v39, %v971_v30  ;;  %v116_v30 = vld [vmem:[%s7957_s12 + $0x38] sm:$0xff] }
 0x8ad   :  { %v803_v59 = vpop.f32.mrf.mxu1 }
 0x8ae   :  { %v812_v57 = vadd.f32 %v803_v59, %v652_v27  ;;  %v982_v60 = vsel %vm177_vm0, %v6110_v49, 0.0  ;;  %v114_v59 = vld [vmem:[%s7957_s12 + $0x28] sm:$0xff] }
 0x8af   :  { %983 = vadd.xlane.f32.xlu0 %v982_v60  ;;  %v111_v60 = vld [vmem:[%s7957_s12 + $0x10] sm:$0xff] }
 0x8b0   :  { %v968_v50 = vadd.f32 %v959_v63, %v812_v57  ;;  %v113_v63 = vld [vmem:[%s7957_s12 + $0x20] sm:$0xff] }
 0x8b1   :  { %v6174_v57 = vpack.c.bf16 %v114_v59, %v113_v63 }
 0x8b2   :  { %v972_v61 = vadd.f32 %v968_v50, %v5729_v13  ;;  %v112_v50 = vld [vmem:[%s7957_s12 + $0x18] sm:$0xff] }
 0x8b3   :  { %v962_v5 = vpop.f32.mrf.mxu0 }
 0x8b4   :  { %v6116_v1 = vadd.f32 %v5092_v39, %v972_v61  ;;  %v6183_v61 = vpack.c.bf16 %v112_v50, %v111_v60  ;;  %v5094_v50 = vld [vmem:[%s7956_s11] ss:$0 sm:$0xff] }
 0x8b5   :  { %v806_v6 = vpop.f32.mrf.mxu1 }
 0x8b6   :  { %v813_v8 = vadd.f32 %v806_v6, %v655_v19  ;;  %v985_v53 = vsel %vm177_vm0, %v6116_v1, 0.0  ;;  %v109_v6 = vld [vmem:[%s7957_s12] sm:$0xff] }
 0x8b7   :  { %986 = vadd.xlane.f32.xlu1 %v985_v53 }
 0x8b8   :  { %v969_v2 = vadd.f32 %v962_v5, %v813_v8  ;;  %v110_v8 = vld [vmem:[%s7957_s12 + $0x8] sm:$0xff] }
 0x8b9   :  { %v6193_v53 = vpack.c.bf16 %v110_v8, %v109_v6 }
 0x8ba   :  { %v973_v9 = vadd.f32 %v969_v2, %v5704_v3 }
 0x8bb   :  { %v964_v23 = vpop.f32.mrf.mxu0 }
 0x8bc   :  { %v6122_v18 = vadd.f32 %v5092_v39, %v973_v9 }
 0x8bd   :  { %v808_v15 = vpop.f32.mrf.mxu1 }
 0x8be   :  { %v814_v13 = vadd.f32 %v808_v15, %v657_v16  ;;  %v988_v56 = vsel %vm177_vm0, %v6122_v18, 0.0 }
 0x8bf   :  { %989 = vadd.xlane.f32.xlu2 %v988_v56 }
 0x8c0   :  { %v970_v25 = vadd.f32 %v964_v23, %v814_v13 }
 0x8c2   :  { %v974_v43 = vadd.f32 %v970_v25, %v5727_v12 }
 0x8c4   :  { %v6127_v29 = vadd.f32 %v5092_v39, %v974_v43  ;;  %v115_v39 = vld [vmem:[%s7957_s12 + $0x30] sm:$0xff] }
 0x8c5   :  { %v6165_v27 = vpack.c.bf16 %v116_v30, %v115_v39 }
 0x8c6   :  { %v991_v35 = vsel %vm177_vm0, %v6127_v29, 0.0 }
 0x8c7   :  { %992 = vadd.xlane.f32.xlu0 %v991_v35  ;;  %1103 = vmatpush.bf16.msrb.mxu1 %v6165_v27 }
 0x8cb   :  { %1104 = vmatpush.bf16.msrb.mxu1 %v6174_v57 }
 0x8cf   :  { %1105 = vmatpush.bf16.msrb.mxu1 %v6183_v61 }
 0x8d3   :  { %1106 = vmatpush.bf16.msrb.mxu1 %v6193_v53 }
 0x922   :  { %v984_v3 = vpop.xlane.xlu0 %983 }
 0x923   :  { %v994_v28 = vmul.f32 %v984_v3, %v5735_v22 }
 0x925   :  { %v6133_v21 = vsub.f32 %v6110_v49, %v994_v28 }
 0x927   :  { %v1002_v32 = vmul.f32 %v6133_v21, %v6133_v21 }
 0x929   :  { %v1006_v10 = vsel %vm177_vm0, %v1002_v32, 0.0 }
 0x92a   :  { %1007 = vadd.xlane.f32.xlu1 %v1006_v10  ;;  %v987_v37 = vpop.xlane.xlu1 %986 }
 0x92b   :  { %v995_v12 = vmul.f32 %v987_v37, %v5735_v22 }
 0x92d   :  { %v6140_v11 = vsub.f32 %v6116_v1, %v995_v12 }
 0x92f   :  { %v1003_v31 = vmul.f32 %v6140_v11, %v6140_v11 }
 0x931   :  { %v1009_v33 = vsel %vm177_vm0, %v1003_v31, 0.0 }
 0x932   :  { %1010 = vadd.xlane.f32.xlu2 %v1009_v33  ;;  %v990_v34 = vpop.xlane.xlu2 %989 }
 0x933   :  { %v996_v51 = vmul.f32 %v990_v34, %v5735_v22 }
 0x935   :  { %v6147_v20 = vsub.f32 %v6122_v18, %v996_v51 }
 0x937   :  { %v1004_v36 = vmul.f32 %v6147_v20, %v6147_v20 }
 0x939   :  { %v1012_v40 = vsel %vm177_vm0, %v1004_v36, 0.0 }
 0x93a   :  { %1013 = vadd.xlane.f32.xlu0 %v1012_v40  ;;  %v993_v38 = vpop.xlane.xlu0 %992 }
 0x93b   :  { %v997_v14 = vmul.f32 %v993_v38, %v5735_v22  ;;  %v5093_v38 = vld [vmem:[%s7955_s10] ss:$0 sm:$0xff] }
 0x93d   :  { %v6154_v42 = vsub.f32 %v6127_v29, %v997_v14 }
 0x93f   :  { %v1005_v44 = vmul.f32 %v6154_v42, %v6154_v42 }
 0x941   :  { %v1015_v47 = vsel %vm177_vm0, %v1005_v44, 0.0 }
 0x942   :  { %1016 = vadd.xlane.f32.xlu1 %v1015_v47 }
 0x99d   :  { %v1008_v19 = vpop.xlane.xlu1 %1007 }
 0x99e   :  { %v1018_v5 = vmul.f32 %v1008_v19, %v5735_v22 }
 0x9a0   :  { %v1022_v2 = vadd.f32 1e-05, %v1018_v5 }
 0x9a2   :  { %5174 = vrsqrt.f32 %v1022_v2  ;;  %vm1032_vm3 = vweird.f32 %v1022_v2 }
 0x9a5   :  { %v1011_v9 = vpop.xlane.xlu2 %1010 }
 0x9a6   :  { %v1019_v16 = vmul.f32 %v1011_v9, %v5735_v22 }
 0x9a8   :  { %v5175_v15 = vpop.eup %5174  ;;  %v1023_v13 = vadd.f32 1e-05, %v1019_v16 }
 0x9a9   :  { %v1027_v56 = vmul.f32 %v5175_v15, %v1022_v2  ;;  %vm1033_vm2 = vweird.f32 %v5175_v15 }
 0x9aa   :  { %5176 = vrsqrt.f32 %v1023_v13  ;;  %vm1034_vm4 = vmor %vm1032_vm3, %vm1033_vm2  ;;  %vm1042_vm6 = vweird.f32 %v1023_v13 }
 0x9ab   :  { %v1028_v23 = vmul.f32 %v5175_v15, %v1027_v56 }
 0x9ad   :  { %v1029_v25 = vmul.f32 0.5, %v1028_v23  ;;  %v1014_v43 = vpop.xlane.xlu0 %1013 }
 0x9ae   :  { %v1020_v35 = vmul.f32 %v1014_v43, %v5735_v22 }
 0x9af   :  { %v1030_v3 = vsub.f32 1.5, %v1029_v25 }
 0x9b0   :  { %v5177_v28 = vpop.eup %5176  ;;  %v1024_v32 = vadd.f32 1e-05, %v1020_v35 }
 0x9b1   :  { %v1031_v10 = vmul.f32 %v5175_v15, %v1030_v3  ;;  %v1037_v37 = vmul.f32 %v5177_v28, %v1023_v13  ;;  %vm1043_vm5 = vweird.f32 %v5177_v28 }
 0x9b2   :  { %5178 = vrsqrt.f32 %v1024_v32  ;;  %vm1044_vm7 = vmor %vm1042_vm6, %vm1043_vm5  ;;  %vm1052_vm9 = vweird.f32 %v1024_v32 }
 0x9b3   :  { %v1038_v12 = vmul.f32 %v5177_v28, %v1037_v37  ;;  %v1035_v31 = vsel %vm1034_vm4, %v5175_v15, %v1031_v10 }
 0x9b4   :  { %v1066_v14 = vmul.f32 %v1035_v31, %v6133_v21  ;;  %v132_v31 = vld [vmem:[%s7959_s14 + $0x70] sm:$0xff] }
 0x9b5   :  { %v1039_v33 = vmul.f32 0.5, %v1038_v12  ;;  %v1017_v34 = vpop.xlane.xlu1 %1016 }
 0x9b6   :  { %v1021_v51 = vmul.f32 %v1017_v34, %v5735_v22  ;;  %v1073_v59 = vmul.f32 %v5093_v38, %v1066_v14  ;;  %v131_v34 = vld [vmem:[%s7959_s14 + $0x68] sm:$0xff]  ;;  %v126_v14 = vld [vmem:[%s7959_s14 + $0x40] sm:$0xff] }
 0x9b7   :  { %v1040_v36 = vsub.f32 1.5, %v1039_v33 }
 0x9b8   :  { %v5179_v40 = vpop.eup %5178  ;;  %v1025_v44 = vadd.f32 1e-05, %v1021_v51  ;;  %v1080_v21 = vadd.f32 %v5094_v50, %v1073_v59  ;;  %v122_v59 = vld [vmem:[%s7959_s14 + $0x20] sm:$0xff] }
 0x9b9   :  { %v1041_v47 = vmul.f32 %v5177_v28, %v1040_v36  ;;  %v1047_v39 = vmul.f32 %v5179_v40, %v1024_v32  ;;  %vm1053_vm8 = vweird.f32 %v5179_v40  ;;  %v128_v36 = vld [vmem:[%s7959_s14 + $0x50] sm:$0xff] }
 0x9ba   :  { %5180 = vrsqrt.f32 %v1025_v44  ;;  %vm1054_vm10 = vmor %vm1052_vm9, %vm1053_vm8  ;;  %vm1062_vm12 = vweird.f32 %v1025_v44 }
 0x9bb   :  { %v1045_v30 = vsel %vm1044_vm7, %v5177_v28, %v1041_v47  ;;  %v1048_v63 = vmul.f32 %v5179_v40, %v1047_v39  ;;  %v124_v39 = vld [vmem:[%s7959_s14 + $0x30] sm:$0xff] }
 0x9bc   :  { %v1067_v60 = vmul.f32 %v1045_v30, %v6140_v11  ;;  %v125_v30 = vld [vmem:[%s7959_s14 + $0x38] sm:$0xff] }
 0x9bd   :  { %v1049_v19 = vmul.f32 0.5, %v1048_v63  ;;  %v6253_v63 = vpack.c.bf16 %v125_v30, %v124_v39 }
 0x9be   :  { %v1074_v5 = vmul.f32 %v5093_v38, %v1067_v60  ;;  %v123_v60 = vld [vmem:[%s7959_s14 + $0x28] sm:$0xff] }
 0x9bf   :  { %v1050_v6 = vsub.f32 1.5, %v1049_v19  ;;  %8067 = vst [vmem:[#allocation17_spill] sm:$0xff] %v6253_v63  ;;  %v120_v19 = vld [vmem:[%s7959_s14 + $0x10] sm:$0xff] }
 0x9c0   :  { %v5181_v8 = vpop.eup %5180  ;;  %v1081_v2 = vadd.f32 %v5094_v50, %v1074_v5  ;;  %v121_v5 = vld [vmem:[%s7959_s14 + $0x18] sm:$0xff] }
 0x9c1   :  { %v1051_v9 = vmul.f32 %v5179_v40, %v1050_v6  ;;  %v1057_v16 = vmul.f32 %v5181_v8, %v1025_v44  ;;  %vm1063_vm11 = vweird.f32 %v5181_v8  ;;  %v127_v44 = vld [vmem:[%s7959_s14 + $0x48] sm:$0xff]  ;;  %v6271_v6 = vpack.c.bf16 %v121_v5, %v120_v19 }
 0x9c2   :  { %v1084_v15 = vpack.c.bf16 %v1081_v2, %v1080_v21  ;;  %vm1064_vm13 = vmor %vm1062_vm12, %vm1063_vm11  ;;  %v6244_v47 = vpack.c.bf16 %v127_v44, %v126_v14  ;;  %v119_v21 = vld [vmem:[%s7959_s14 + $0x8] sm:$0xff] }
 0x9c3   :  { %v1058_v13 = vmul.f32 %v5181_v8, %v1057_v16  ;;  %v1055_v11 = vsel %vm1054_vm10, %v5179_v40, %v1051_v9  ;;  %v129_v40 = vld [vmem:[%s7959_s14 + $0x58] sm:$0xff]  ;;  %8069 = vst [vmem:[#allocation19_spill] sm:$0xff] %v6271_v6  ;;  %v5095_v9 = vld [vmem:[%s7958_s13] ss:$0 sm:$0xff] }
 0x9c4   :  { %4925 = vmatmul.msk.bf16.vlgmr.msrb.gmra.mxu1 %vm177_vm0, %v1084_v15  ;;  %v1068_v25 = vmul.f32 %v1055_v11, %v6147_v20  ;;  %v133_v20 = vld [vmem:[%s7959_s14 + $0x78] sm:$0xff]  ;;  %8066 = vst [vmem:[#allocation16_spill] sm:$0xff] %v6244_v47 }
 0x9c5   :  { %v1059_v56 = vmul.f32 0.5, %v1058_v13  ;;  %v6217_v33 = vpack.c.bf16 %v133_v20, %v132_v31 }
 0x9c6   :  { %v1075_v28 = vmul.f32 %v5093_v38, %v1068_v25 }
 0x9c7   :  { %v1060_v23 = vsub.f32 1.5, %v1059_v56  ;;  %8063 = vst [vmem:[#allocation13_spill] sm:$0xff] %v6217_v33  ;;  %1167 = vmatpush.bf16.msrb.mxu2 %v6217_v33 }
 0x9c8   :  { %v1082_v37 = vadd.f32 %v5094_v50, %v1075_v28 }
 0x9c9   :  { %v1061_v43 = vmul.f32 %v5181_v8, %v1060_v23 }
 0x9cb   :  { %v1065_v35 = vsel %vm1064_vm13, %v5181_v8, %v1061_v43  ;;  %v118_v8 = vld [vmem:[%s7959_s14] sm:$0xff] }
 0x9cc   :  { %v1069_v3 = vmul.f32 %v1065_v35, %v6154_v42  ;;  %v130_v42 = vld [vmem:[%s7959_s14 + $0x60] sm:$0xff]  ;;  %v6280_v2 = vpack.c.bf16 %v119_v21, %v118_v8 }
 0x9cd   :  { %v6226_v51 = vpack.c.bf16 %v131_v34, %v130_v42 }
 0x9ce   :  { %v1076_v10 = vmul.f32 %v5093_v38, %v1069_v3  ;;  %v6235_v38 = vpack.c.bf16 %v129_v40, %v128_v36  ;;  %8070 = vst [vmem:[#allocation20_spill] sm:$0xff] %v6280_v2 }
 0x9cf   :  { %8064 = vst [vmem:[#allocation14_spill] sm:$0xff] %v6226_v51  ;;  %1168 = vmatpush.bf16.msrb.mxu2 %v6226_v51 }
 0x9d0   :  { %v1083_v32 = vadd.f32 %v5094_v50, %v1076_v10  ;;  %8065 = vst [vmem:[#allocation15_spill] sm:$0xff] %v6235_v38  ;;  %v6262_v50 = vpack.c.bf16 %v123_v60, %v122_v59 }
 0x9d2   :  { %v1085_v12 = vpack.c.bf16 %v1083_v32, %v1082_v37  ;;  %8068 = vst [vmem:[#allocation18_spill] sm:$0xff] %v6262_v50 }
 0x9d3   :  { %1169 = vmatpush.bf16.msrb.mxu2 %v6235_v38 }
 0x9d4   :  { %4926 = vmatmul.msk.bf16.gmra.mxu1 %vm177_vm0, %v1085_v12 }
 0x9d7   :  { %1170 = vmatpush.bf16.msrb.mxu2 %v6244_v47 }
 0x9db   :  { %1171 = vmatpush.bf16.msrb.mxu2 %v6253_v63 }
 0x9df   :  { %1172 = vmatpush.bf16.msrb.mxu2 %v6262_v50 }
 0x9e3   :  { %1173 = vmatpush.bf16.msrb.mxu2 %v6271_v6 }
 0x9e7   :  { %1174 = vmatpush.bf16.msrb.mxu2 %v6280_v2 }
 0xa41   :  { %v1108_v16 = vpop.f32.mrf.mxu1 }
 0xa42   :  { %v1109_v15 = vadd.f32 %v5095_v9, %v1108_v16 }
 0xa44   :  { %v1122_v13 = vmul.f32 0.044715, %v1109_v15  ;;  %v1118_v60 = vmul.f32 0.5, %v1109_v15 }
 0xa46   :  { %v1126_v11 = vmul.f32 %v1122_v13, %v1109_v15 }
 0xa48   :  { %v1130_v56 = vmul.f32 %v1126_v11, %v1109_v15 }
 0xa49   :  { %v1110_v23 = vpop.f32.mrf.mxu1 }
 0xa4a   :  { %v1134_v25 = vadd.f32 %v1130_v56, %v1109_v15  ;;  %v1111_v43 = vadd.f32 %v5095_v9, %v1110_v23 }
 0xa4c   :  { %v1123_v35 = vmul.f32 0.044715, %v1111_v43  ;;  %v1138_v3 = vmul.f32 0.7978846, %v1134_v25  ;;  %v1119_v19 = vmul.f32 0.5, %v1111_v43 }
 0xa4e   :  { %v1127_v28 = vmul.f32 %v1123_v35, %v1111_v43  ;;  %5182 = vtanh.f32 %v1138_v3 }
 0xa50   :  { %v1131_v10 = vmul.f32 %v1127_v28, %v1111_v43 }
 0xa51   :  { %v1113_v37 = vpop.f32.mrf.mxu1 }
 0xa52   :  { %v1114_v32 = vadd.f32 %v5095_v9, %v1113_v37  ;;  %v1135_v12 = vadd.f32 %v1131_v10, %v1111_v43 }
 0xa54   :  { %v1124_v31 = vmul.f32 0.044715, %v1114_v32  ;;  %v1139_v20 = vmul.f32 0.7978846, %v1135_v12  ;;  %v5183_v34 = vpop.eup %5182  ;;  %v1120_v28 = vmul.f32 0.5, %v1114_v32 }
 0xa55   :  { %v1146_v39 = vadd.f32 1.0, %v5183_v34 }
 0xa56   :  { %5184 = vtanh.f32 %v1139_v20  ;;  %v1128_v42 = vmul.f32 %v1124_v31, %v1114_v32  ;;  %v5096_v31 = vld [vmem:[%s7960_s15] ss:$0 sm:$0xff] }
 0xa57   :  { %v1150_v16 = vmul.f32 %v1146_v39, %v1118_v60 }
 0xa58   :  { %v1132_v36 = vmul.f32 %v1128_v42, %v1114_v32 }
 0xa59   :  { %v1115_v40 = vpop.f32.mrf.mxu1 }
 0xa5a   :  { %v1116_v14 = vadd.f32 %v5095_v9, %v1115_v40  ;;  %v1136_v44 = vadd.f32 %v1132_v36, %v1114_v32 }
 0xa5c   :  { %v5185_v30 = vpop.eup %5184  ;;  %v1125_v59 = vmul.f32 0.044715, %v1116_v14  ;;  %v1140_v21 = vmul.f32 0.7978846, %v1136_v44  ;;  %v1121_v10 = vmul.f32 0.5, %v1116_v14 }
 0xa5d   :  { %v1147_v5 = vadd.f32 1.0, %v5185_v30 }
 0xa5e   :  { %v1129_v8 = vmul.f32 %v1125_v59, %v1116_v14  ;;  %5186 = vtanh.f32 %v1140_v21 }
 0xa5f   :  { %v1151_v13 = vmul.f32 %v1147_v5, %v1119_v19 }
 0xa60   :  { %v1133_v11 = vmul.f32 %v1129_v8, %v1116_v14 }
 0xa61   :  { %v1154_v56 = vpack.c.bf16 %v1151_v13, %v1150_v16 }
 0xa62   :  { %v1137_v23 = vadd.f32 %v1133_v11, %v1116_v14 }
 0xa63   :  { %1175 = vmatmul.bf16.vlgmr.msrb.gmra.mxu2 %v1154_v56 }
 0xa64   :  { %v1141_v25 = vmul.f32 0.7978846, %v1137_v23  ;;  %v5187_v35 = vpop.eup %5186 }
 0xa65   :  { %v1148_v9 = vadd.f32 1.0, %v5187_v35 }
 0xa66   :  { %5188 = vtanh.f32 %v1141_v25 }
 0xa67   :  { %v1152_v15 = vmul.f32 %v1148_v9, %v1120_v28 }
 0xa6c   :  { %v5189_v3 = vpop.eup %5188 }
 0xa6d   :  { %v1149_v37 = vadd.f32 1.0, %v5189_v3 }
 0xa6f   :  { %v1153_v43 = vmul.f32 %v1149_v37, %v1121_v10 }
 0xa71   :  { %v1155_v12 = vpack.c.bf16 %v1153_v43, %v1152_v15 }
 0xa73   :  { %1180 = vmatmul.bf16.gmra.mxu2 %v1155_v12 }
 0xae6   :  { %v1176_v20 = vpop.f32.mrf.mxu2 }
 0xae7   :  { %v1177_v42 = vadd.f32 %v5096_v31, %v1176_v20 }
 0xae9   :  { %v1186_v34 = vadd.f32 %v1177_v42, %v6110_v49 }
 0xaeb   :  { %v1190_v36 = vsel %vm177_vm0, %v1186_v34, 0.0 }
 0xaec   :  { %1191 = vadd.xlane.f32.xlu1 %v1190_v36 }
 0xaee   :  { %v1178_v40 = vpop.f32.mrf.mxu2 }
 0xaef   :  { %v1179_v39 = vadd.f32 %v5096_v31, %v1178_v40 }
 0xaf1   :  { %v1187_v19 = vadd.f32 %v1179_v39, %v6116_v1 }
 0xaf3   :  { %v1193_v8 = vsel %vm177_vm0, %v1187_v19, 0.0 }
 0xaf6   :  { %v1181_v44 = vpop.f32.mrf.mxu2 }
 0xaf7   :  { %v1182_v32 = vadd.f32 %v5096_v31, %v1181_v44 }
 0xaf9   :  { %v1188_v14 = vadd.f32 %v1182_v32, %v6122_v18 }
 0xafb   :  { %v1196_v30 = vsel %vm177_vm0, %v1188_v14, 0.0 }
 0xafc   :  { %1197 = vadd.xlane.f32.xlu2 %v1196_v30 }
 0xafe   :  { %v1183_v59 = vpop.f32.mrf.mxu2 }
 0xaff   :  { %v1184_v60 = vadd.f32 %v5096_v31, %v1183_v59 }
 0xb01   :  { %v1189_v5 = vadd.f32 %v1184_v60, %v6127_v29 }
 0xb03   :  { %v1199_v49 = vsel %vm177_vm0, %v1189_v5, 0.0 }
 0xb04   :  { %1200 = vadd.xlane.f32.xlu0 %v1199_v49  ;;  %1194 = vadd.xlane.f32.xlu2 %v1193_v8 }
 0xb5f   :  { %v1192_v21 = vpop.xlane.xlu1 %1191 }
 0xb60   :  { %v1202_v16 = vmul.f32 %v1192_v21, %v5735_v22 }
 0xb62   :  { %v6298_v18 = vsub.f32 %v1186_v34, %v1202_v16 }
 0xb64   :  { %v1210_v13 = vmul.f32 %v6298_v18, %v6298_v18 }
 0xb66   :  { %v1214_v11 = vsel %vm177_vm0, %v1210_v13, 0.0  ;;  %v143_v13 = vld [vmem:[%s7963_s18 + $0x30] sm:$0xff] }
 0xb67   :  { %1215 = vadd.xlane.f32.xlu2 %v1214_v11  ;;  %v144_v11 = vld [vmem:[%s7963_s18 + $0x38] sm:$0xff] }
 0xb6f   :  { %v1198_v1 = vpop.xlane.xlu2 %1197 }
 0xb70   :  { %v1204_v29 = vmul.f32 %v1198_v1, %v5735_v22  ;;  %v141_v1 = vld [vmem:[%s7963_s18 + $0x20] sm:$0xff] }
 0xb72   :  { %v6304_v56 = vsub.f32 %v1188_v14, %v1204_v29 }
 0xb74   :  { %v1212_v23 = vmul.f32 %v6304_v56, %v6304_v56 }
 0xb76   :  { %v1220_v25 = vsel %vm177_vm0, %v1212_v23, 0.0  ;;  %v6338_v23 = vpack.c.bf16 %v144_v11, %v143_v13 }
 0xb77   :  { %v1201_v35 = vpop.xlane.xlu0 %1200  ;;  %1221 = vadd.xlane.f32.xlu0 %v1220_v25  ;;  %v1195_v9 = vpop.xlane.xlu2 %1194  ;;  %v142_v25 = vld [vmem:[%s7963_s18 + $0x28] sm:$0xff] }
 0xb78   :  { %v1205_v3 = vmul.f32 %v1201_v35, %v5735_v22  ;;  %v1203_v28 = vmul.f32 %v1195_v9, %v5735_v22  ;;  %1331 = vmatpush.bf16.msra.mxu0 %v6338_v23  ;;  %v6344_v9 = vpack.c.bf16 %v142_v25, %v141_v1 }
 0xb7a   :  { %v6311_v10 = vsub.f32 %v1189_v5, %v1205_v3  ;;  %v6313_v37 = vsub.f32 %v1187_v19, %v1203_v28  ;;  %v139_v28 = vld [vmem:[%s7963_s18 + $0x10] sm:$0xff] }
 0xb7c   :  { %v1213_v15 = vmul.f32 %v6311_v10, %v6311_v10  ;;  %v1211_v43 = vmul.f32 %v6313_v37, %v6313_v37  ;;  %1332 = vmatpush.bf16.msra.mxu0 %v6344_v9 }
 0xb7e   :  { %v1223_v12 = vsel %vm177_vm0, %v1213_v15, 0.0  ;;  %v1217_v31 = vsel %vm177_vm0, %v1211_v43, 0.0  ;;  %v140_v15 = vld [vmem:[%s7963_s18 + $0x18] sm:$0xff] }
 0xb7f   :  { %1224 = vadd.xlane.f32.xlu1 %v1223_v12  ;;  %1218 = vadd.xlane.f32.xlu0 %v1217_v31 }
 0xbda   :  { %v1216_v20 = vpop.xlane.xlu2 %1215 }
 0xbdb   :  { %v1226_v42 = vmul.f32 %v1216_v20, %v5735_v22 }
 0xbdd   :  { %v1230_v34 = vadd.f32 1e-05, %v1226_v42 }
 0xbdf   :  { %5190 = vrsqrt.f32 %v1230_v34  ;;  %vm1240_vm5 = vweird.f32 %v1230_v34 }
 0xbe5   :  { %v6323_v32 = vpop.eup %5190 }
 0xbe6   :  { %v1235_v14 = vmul.f32 %v6323_v32, %v1230_v34  ;;  %vm1241_vm3 = vweird.f32 %v6323_v32 }
 0xbe7   :  { %vm6360_vm7 = vmor %vm1240_vm5, %vm1241_vm3 }
 0xbe8   :  { %v1236_v5 = vmul.f32 %v6323_v32, %v1235_v14  ;;  %v6353_v14 = vpack.c.bf16 %v140_v15, %v139_v28 }
 0xbea   :  { %v1222_v36 = vpop.xlane.xlu0 %1221  ;;  %v1237_v29 = vmul.f32 0.5, %v1236_v5  ;;  %1333 = vmatpush.bf16.msra.mxu0 %v6353_v14 }
 0xbeb   :  { %v1228_v40 = vmul.f32 %v1222_v36, %v5735_v22  ;;  %v162_v36 = vlaneseq }
 0xbec   :  { %v1238_v12 = vsub.f32 1.5, %v1237_v29 }
 0xbed   :  { %v1232_v44 = vadd.f32 1e-05, %v1228_v40 }
 0xbef   :  { %5192 = vrsqrt.f32 %v1232_v44  ;;  %vm1260_vm2 = vweird.f32 %v1232_v44 }
 0xbf2   :  { %v1225_v39 = vpop.xlane.xlu1 %1224  ;;  %v1219_v30 = vpop.xlane.xlu0 %1218 }
 0xbf3   :  { %v1229_v59 = vmul.f32 %v1225_v39, %v5735_v22  ;;  %v1227_v60 = vmul.f32 %v1219_v30, %v5735_v22 }
 0xbf5   :  { %v5193_v19 = vpop.eup %5192  ;;  %v1233_v49 = vadd.f32 1e-05, %v1229_v59  ;;  %v1231_v8 = vadd.f32 1e-05, %v1227_v60  ;;  %v1239_v59 = vmul.f32 %v6323_v32, %v1238_v12  ;;  %v6377_v12 = vand.u32 127, %v162_v36 }
 0xbf6   :  { %v1255_v21 = vmul.f32 %v5193_v19, %v1232_v44  ;;  %vm1261_vm15 = vweird.f32 %v5193_v19 }
 0xbf7   :  { %5194 = vrsqrt.f32 %v1233_v49  ;;  %vm1262_vm4 = vmor %vm1260_vm2, %vm1261_vm15  ;;  %vm1270_vm9 = vweird.f32 %v1233_v49  ;;  %vm1250_vm11 = vweird.f32 %v1231_v8  ;;  %8076 = vst [vmem:[#allocation23_spill] sm:$0xff] %v6377_v12  ;;  %vm1340_vm15 = vcmask 1041408  }
 0xbf8   :  { %v1256_v16 = vmul.f32 %v5193_v19, %v1255_v21  ;;  %5196 = vrsqrt.f32 %v1231_v8  ;;  %v6357_v21 = vshrl.u32 %v162_v36, 7 }
 0xbfa   :  { %v1257_v35 = vmul.f32 0.5, %v1256_v16  ;;  %8071 = vst [vmem:[#allocation21_spill] sm:$0xff] %v6357_v21  ;;  %v6369_v25 = vmul.u32 16, %v6357_v21 }
 0xbfc   :  { %v1258_v3 = vsub.f32 1.5, %v1257_v35  ;;  %8074 = vst [vmem:[#allocation22_spill] sm:$0xff] %v6369_v25  ;;  %v5097_v35 = vld [vmem:[%s8075_s8] ss:$0 sm:$0xff] }
 0xbfd   :  { %v5195_v43 = vpop.eup %5194 }
 0xbfe   :  { %v5197_v31 = vpop.eup %5196  ;;  %v1259_v20 = vmul.f32 %v5193_v19, %v1258_v3  ;;  %v1265_v42 = vmul.f32 %v5195_v43, %v1233_v49  ;;  %vm1271_vm6 = vweird.f32 %v5195_v43 }
 0xbff   :  { %v1245_v40 = vmul.f32 %v5197_v31, %v1231_v8  ;;  %vm1251_vm8 = vweird.f32 %v5197_v31  ;;  %vm1272_vm10 = vmor %vm1270_vm9, %vm1271_vm6  ;;  %v5098_v8 = vld [vmem:[%s7962_s17] ss:$0 sm:$0xff]  ;;  %vm1397_vm9 = vcmask 15360  }
 0xc00   :  { %v1266_v39 = vmul.f32 %v5195_v43, %v1265_v42  ;;  %v1263_v60 = vsel %vm1262_vm4, %v5193_v19, %v1259_v20  ;;  %v1243_v19 = vsel %vm6360_vm7, %v6323_v32, %v1239_v59  ;;  %vm1252_vm12 = vmor %vm1250_vm11, %vm1251_vm8  ;;  %v1293_v20 = vadd.s32 11, %v6369_v25 }
 0xc01   :  { %v1246_v30 = vmul.f32 %v5197_v31, %v1245_v40  ;;  %v1276_v44 = vmul.f32 %v1263_v60, %v6304_v56  ;;  %v1274_v32 = vmul.f32 %v1243_v19, %v6298_v18  ;;  %v5099_v19 = vld [vmem:[%s7964_s19] ss:$0 sm:$0xff]  ;;  %vm1404_vm8 = vcmask 1040384  }
 0xc02   :  { %v1267_v5 = vmul.f32 0.5, %v1266_v39  ;;  %vm1294_vm13 = vcmp.eq.s32.totalorder %v6377_v12, %v1293_v20 }
 0xc03   :  { %v1247_v16 = vmul.f32 0.5, %v1246_v30  ;;  %v1283_v15 = vmul.f32 %v5097_v35, %v1276_v44  ;;  %v1281_v30 = vmul.f32 %v5097_v35, %v1274_v32 }
 0xc04   :  { %v1268_v13 = vsub.f32 1.5, %v1267_v5  ;;  %v137_v5 = vld [vmem:[%s7963_s18] sm:$0xff] }
 0xc05   :  { %v1248_v1 = vsub.f32 1.5, %v1247_v16  ;;  %v1288_v18 = vadd.f32 %v5098_v8, %v1281_v30  ;;  %v138_v16 = vld [vmem:[%s7963_s18 + $0x8] sm:$0xff] }
 0xc06   :  { %v1269_v29 = vmul.f32 %v5195_v43, %v1268_v13  ;;  %v6396_v13 = vpack.c.bf16 %v138_v16, %v137_v5  ;;  %v6463_v5 = vcvt.s32.f32 %v6377_v12 }
 0xc07   :  { %v1249_v34 = vmul.f32 %v5197_v31, %v1248_v1 }
 0xc08   :  { %v1273_v3 = vsel %vm1272_vm10, %v5195_v43, %v1269_v29  ;;  %v1290_v43 = vadd.f32 %v5098_v8, %v1283_v15  ;;  %1334 = vmatpush.bf16.msra.mxu0 %v6396_v13  ;;  %v158_v15 = vld [vmem:[%s7965_s20 + $0x60] sm:$0xff]  ;;  %8077 = vst [vmem:[#allocation24_spill] sm:$0xff] %v6463_v5 }
 0xc09   :  { %v1277_v56 = vmul.f32 %v1273_v3, %v6311_v10  ;;  %v1253_v28 = vsel %vm1252_vm12, %v5197_v31, %v1249_v34 }
 0xc0a   :  { %v1275_v49 = vmul.f32 %v1253_v28, %v6313_v37  ;;  %v7981_v37 = vmov 0.0   ;;  %v161_v28 = vld [vmem:[%s7965_s20 + $0x78] sm:$0xff] }
 0xc0b   :  { %v1284_v42 = vmul.f32 %v5097_v35, %v1277_v56  ;;  %v4927_v36 = vsel %vm1294_vm13, 1.0, %v7981_v37  ;;  %v160_v56 = vld [vmem:[%s7965_s20 + $0x70] sm:$0xff] }
 0xc0c   :  { %v1282_v40 = vmul.f32 %v5097_v35, %v1275_v49  ;;  %v1297_v60 = vpack.c.bf16 %v4927_v36, %v4927_v36  ;;  %1562 = vmatpush.bf16.msrb.mxu0 %v5779_v48  ;;  %v6417_v32 = vpack.c.bf16 %v161_v28, %v160_v56  ;;  %v159_v49 = vld [vmem:[%s7965_s20 + $0x68] sm:$0xff]  ;;  %v150_v36 = vld [vmem:[%s7965_s20 + $0x20] sm:$0xff] }
 0xc0d   :  { %v1291_v39 = vadd.f32 %v5098_v8, %v1284_v42  ;;  %v6423_v20 = vpack.c.bf16 %v159_v49, %v158_v15  ;;  %v156_v42 = vld [vmem:[%s7965_s20 + $0x50] sm:$0xff] }
 0xc0e   :  { %v1289_v31 = vadd.f32 %v5098_v8, %v1282_v40  ;;  %1367 = vmatpush.bf16.msra.mxu1 %v6417_v32  ;;  %v157_v8 = vld [vmem:[%s7965_s20 + $0x58] sm:$0xff] }
 0xc0f   :  { %v1299_v10 = vpack.c.bf16 %v1291_v39, %v1290_v43  ;;  %v6432_v40 = vpack.c.bf16 %v157_v8, %v156_v42  ;;  %v154_v43 = vld [vmem:[%s7965_s20 + $0x40] sm:$0xff]  ;;  %v155_v39 = vld [vmem:[%s7965_s20 + $0x48] sm:$0xff]  ;;  %v7978_v8 = vmov 1.0|1.0  }
 0xc10   :  { %v1298_v59 = vpack.c.bf16 %v1289_v31, %v1288_v18  ;;  %1563 = vmatpush.bf16.msrb.mxu0 %v5797_v54  ;;  %v6441_v30 = vpack.c.bf16 %v155_v39, %v154_v43  ;;  %v153_v31 = vld [vmem:[%s7965_s20 + $0x38] sm:$0xff]  ;;  %v6493_v43 = vmul.u32 16, %v6377_v12  ;;  %v6496_v39 = vadd.s32 8, %v6357_v21 }
 0xc11   :  { %1309 = vmatpush.bf16.msrb.mxu3 %v1299_v10  ;;  %v152_v10 = vld [vmem:[%s7965_s20 + $0x30] sm:$0xff] }
 0xc12   :  { %1368 = vmatpush.bf16.msra.mxu1 %v6423_v20  ;;  %v6450_v18 = vpack.c.bf16 %v153_v31, %v152_v10  ;;  %8079 = vst [vmem:[#allocation26_spill] sm:$0xff] %v6493_v43  ;;  %v1381_v10 = vadd.s32 12, %v6493_v43 }
 0xc13   :  { %8080 = vst [vmem:[#allocation27_spill] sm:$0xff] %v6496_v39 }
 0xc14   :  { %1564 = vmatpush.bf16.msrb.mxu0 %v5821_v62  ;;  %vm1382_vm6 = vcmp.eq.s32.totalorder %v6357_v21, %v1381_v10  ;;  %vm1383_vm7 = vcmp.eq.s32.totalorder %v6496_v39, %v1381_v10 }
 0xc15   :  { %1310 = vmatpush.bf16.msrb.mxu3 %v1298_v59  ;;  %v151_v59 = vld [vmem:[%s7965_s20 + $0x28] sm:$0xff] }
 0xc16   :  { %1369 = vmatpush.bf16.msra.mxu1 %v6432_v40 }
 0xc18   :  { %4928 = vmatmul.msk.bf16.vlgmr.msrb.gmra.mxu3 %vm403_vm1, %v1297_v60  ;;  %1565 = vmatpush.bf16.msrb.mxu0 %v5834_v7  ;;  %v6459_v60 = vpack.c.bf16 %v151_v59, %v150_v36  ;;  %v4933_v36 = vsel %vm1382_vm6, 1.0, %v7981_v37  ;;  %v4934_v59 = vsel %vm1383_vm7, 1.0, %v7981_v37 }
 0xc19   :  { %1543 = vmatpush.bf16.msra.mxu3 %v5774_v46 }
 0xc1a   :  { %1370 = vmatpush.bf16.msra.mxu1 %v6441_v30 }
 0xc1d   :  { %1544 = vmatpush.bf16.msra.mxu3 %v5792_v52 }
 0xc1e   :  { %1371 = vmatpush.bf16.msra.mxu1 %v6450_v18 }
 0xc21   :  { %1545 = vmatpush.bf16.msra.mxu3 %v5810_v58 }
 0xc22   :  { %1372 = vmatpush.bf16.msra.mxu1 %v6459_v60 }
 0xc25   :  { %1546 = vmatpush.bf16.msra.mxu3 %v5830_v4 }
 0xc9b   :  { %v1312_v11 = vpop.f32.mrf.mxu3 }
 0xc9c   :  { %v1316_v44 = vpack.c.bf16 %v1312_v11, %v1312_v11 }
 0xc9e   :  { %4929 = vmatmul.msk.bf16.vlgmr.msra.gmra.mxu0 %vm177_vm0, %v1316_v44 }
 0xca3   :  { %v1314_v1 = vpop.f32.mrf.mxu3 }
 0xca4   :  { %v148_v1 = vld [vmem:[%s7965_s20 + $0x10] sm:$0xff] }
 0xd1b   :  { %v1336_v29 = vpop.f32.mrf.mxu0 }
 0xd1c   :  { %v1337_v34 = vadd.f32 %v5099_v19, %v1336_v29  ;;  %v149_v19 = vld [vmem:[%s7965_s20 + $0x18] sm:$0xff] }
 0xd1d   :  { %v6473_v29 = vpack.c.bf16 %v149_v19, %v148_v1  ;;  %v6506_v19 = vadd.s32 16, %v6357_v21 }
 0xd1e   :  { %v1341_v35 = vsel %vm1340_vm15, %v1337_v34, -inf }
 0xd1f   :  { %1342 = vmax.xlane.f32.xlu1 %v1341_v35  ;;  %1373 = vmatpush.bf16.msra.mxu1 %v6473_v29  ;;  %v147_v35 = vld [vmem:[%s7965_s20 + $0x8] sm:$0xff]  ;;  %8081 = vst [vmem:[#allocation28_spill] sm:$0xff] %v6506_v19  ;;  %vm1384_vm10 = vcmp.eq.s32.totalorder %v6506_v19, %v1381_v10 }
 0xd23   :  { %v1338_v3 = vpop.f32.mrf.mxu0 }
 0xd92   :  { %v1343_v16 = vpop.xlane.xlu1 %1342 }
 0xd93   :  { %vm1344_vm2 = vcmp.ge.f32.partialorder %v1337_v34, %v1343_v16  ;;  %v146_v34 = vld [vmem:[%s7965_s20] sm:$0xff]  ;;  %s4886_s20 = sshll.u32 %s5584_s30, 4  ;;  %s4887_s20 = int_to_ptr.vmem [resolvable:$true] %s4886_s20 }
 0xd94   :  { %v1346_v11 = vsel %vm1344_vm2, %v6463_v5, 128.0  ;;  %v6482_v3 = vpack.c.bf16 %v147_v35, %v146_v34  ;;  %v6509_v34 = vadd.s32 24, %v6357_v21  ;;  %v4935_v35 = vsel %vm1384_vm10, 1.0, %v7981_v37 }
 0xd95   :  { %v1347_v44 = vsel %vm1340_vm15, %v1346_v11, inf }
 0xd96   :  { %1348 = vmin.xlane.f32.xlu2 %v1347_v44  ;;  %1374 = vmatpush.bf16.msra.mxu1 %v6482_v3  ;;  %v1394_v44 = vpack.c.bf16 %v4934_v59, %v4933_v36  ;;  %8082 = vst [vmem:[#allocation29_spill] sm:$0xff] %v6509_v34  ;;  %vm1385_vm11 = vcmp.eq.s32.totalorder %v6509_v34, %v1381_v10  ;;  %v5487_v59 = vld [vmem:[%s8049_s26] sm:$0xff] }
 0xe09   :  { %v1349_v56 = vpop.xlane.xlu2 %1348 }
 0xe0a   :  { %vm5058_vm3 = vcmp.lt.s32.totalorder %v1349_v56, 0  ;;  %v5059_v28 = vceil.f32 %v1349_v56  ;;  %v5060_v15 = vfloor.f32 %v1349_v56  ;;  %v4936_v56 = vsel %vm1385_vm11, 1.0, %v7981_v37 }
 0xe0c   :  { %v6485_v49 = vsel %vm5058_vm3, %v5059_v28, %v5060_v15  ;;  %v1395_v28 = vpack.c.bf16 %v4936_v56, %v4935_v35  ;;  %v5489_v35 = vld [vmem:[%s8049_s26 + $0x8] sm:$0xff] }
 0xe0d   :  { %8078 = vst [vmem:[#allocation25_spill] sm:$0xff] %v6485_v49  ;;  %v7980_v42 = vcvt.f32.s32 %v6485_v49 }
 0xe0f   :  { %vm1355_vm4 = vcmp.eq.s32.totalorder %v6377_v12, %v7980_v42 }
 0xe10   :  { %vm4931_vm5 = vmpackc.low %vm1355_vm4, %vm1355_vm4 }
 0xe11   :  { %4932 = vmatmul.msk.bf16.vlgmr.msra.gmra.mxu1 %vm4931_vm5, %v7978_v8 }
 0xe8e   :  { %v1376_v31 = vpop.f32.mrf.mxu1 }
 0xe8f   :  { %v1396_v16 = vpack.c.bf16 %v1376_v31, %v1376_v31  ;;  %v5486_v31 = vld [vmem:[%s8050_s16] sm:$0xff] }
 0xe91   :  { %v1406_v11 = vsel %vm1404_vm8, %v1396_v16, 0 }
 0xe92   :  { %1415 = vmatpush.bf16.msra.mxu2 %v1406_v11 }
 0xe95   :  { %4937 = vmatmul.msk.bf16.vlgmr.msra.gmra.mxu2 %vm1397_vm9, %v1394_v44  ;;  %v5488_v44 = vld [vmem:[%s8050_s16 + $0x8] sm:$0xff] }
 0xe96   :  { %v1378_v1 = vpop.f32.mrf.mxu1 }
 0xea5   :  { %4938 = vmatmul.msk.bf16.gmra.mxu2 %vm1397_vm9, %v1395_v28 }
 0xf18   :  { %v1417_v15 = vpop.f32.mrf.mxu2 }
 0xf19   :  { %v6519_v36 = vadd.f32 %v5486_v31, %v1417_v15  ;;  %v5490_v31 = vld [vmem:[%s8050_s16 + $0x10] sm:$0xff] }
 0xf1b   :  { %8083 = vst [vmem:[#allocation30_spill] sm:$0xff] %v6519_v36  ;;  %v6525_v10 = vadd.f32 %v5487_v59, %v6519_v36 }
 0xf1d   :  { %v1435_v16 = vsel %vm177_vm0, %v6525_v10, 0.0 }
 0xf1e   :  { %1436 = vadd.xlane.f32.xlu0 %v1435_v16  ;;  %v5491_v16 = vld [vmem:[%s8049_s26 + $0x10] sm:$0xff] }
 0xf20   :  { %v1419_v11 = vpop.f32.mrf.mxu2 }
 0xf21   :  { %v6532_v1 = vadd.f32 %v5488_v44, %v1419_v11 }
 0xf23   :  { %8084 = vst [vmem:[#allocation31_spill] sm:$0xff] %v6532_v1  ;;  %v6538_v56 = vadd.f32 %v5489_v35, %v6532_v1 }
 0xf25   :  { %v1438_v28 = vsel %vm177_vm0, %v6538_v56, 0.0 }
 0xf26   :  { %1439 = vadd.xlane.f32.xlu1 %v1438_v28  ;;  %v5492_v28 = vld [vmem:[%s8050_s16 + $0x18] sm:$0xff] }
 0xf28   :  { %v1422_v15 = vpop.f32.mrf.mxu2 }
 0xf29   :  { %v6545_v59 = vadd.f32 %v5490_v31, %v1422_v15  ;;  %v5493_v15 = vld [vmem:[%s8049_s26 + $0x18] sm:$0xff] }
 0xf2b   :  { %8085 = vst [vmem:[#allocation32_spill] sm:$0xff] %v6545_v59  ;;  %v6551_v11 = vadd.f32 %v5491_v16, %v6545_v59 }
 0xf2d   :  { %v1441_v44 = vsel %vm177_vm0, %v6551_v11, 0.0 }
 0xf2e   :  { %1442 = vadd.xlane.f32.xlu2 %v1441_v44 }
 0xf30   :  { %v1424_v35 = vpop.f32.mrf.mxu2 }
 0xf31   :  { %v6558_v8 = vadd.f32 %v5492_v28, %v1424_v35 }
 0xf33   :  { %8086 = vst [vmem:[#allocation33_spill] sm:$0xff] %v6558_v8  ;;  %v6564_v31 = vadd.f32 %v5493_v15, %v6558_v8 }
 0xf35   :  { %v1444_v16 = vsel %vm177_vm0, %v6564_v31, 0.0 }
 0xf36   :  { %1445 = vadd.xlane.f32.xlu0 %v1444_v16 }
 0xf91   :  { %v1437_v42 = vpop.xlane.xlu0 %1436 }
 0xf92   :  { %v1447_v44 = vmul.f32 %v1437_v42, %v5735_v22 }
 0xf94   :  { %v1451_v37 = vsub.f32 %v6525_v10, %v1447_v44 }
 0xf96   :  { %v1455_v45 = vmul.f32 %v1451_v37, %v1451_v37 }
 0xf98   :  { %v1459_v35 = vsel %vm177_vm0, %v1455_v45, 0.0 }
 0xf99   :  { %1460 = vadd.xlane.f32.xlu1 %v1459_v35  ;;  %v1440_v28 = vpop.xlane.xlu1 %1439 }
 0xf9a   :  { %v1448_v59 = vmul.f32 %v1440_v28, %v5735_v22 }
 0xf9c   :  { %v1452_v1 = vsub.f32 %v6538_v56, %v1448_v59 }
 0xf9e   :  { %v1456_v15 = vmul.f32 %v1452_v1, %v1452_v1 }
 0xfa0   :  { %v1462_v8 = vsel %vm177_vm0, %v1456_v15, 0.0 }
 0xfa1   :  { %1463 = vadd.xlane.f32.xlu2 %v1462_v8  ;;  %v1443_v36 = vpop.xlane.xlu2 %1442 }
 0xfa2   :  { %v1449_v16 = vmul.f32 %v1443_v36, %v5735_v22 }
 0xfa4   :  { %v6576_v42 = vsub.f32 %v6551_v11, %v1449_v16 }
 0xfa6   :  { %v1457_v44 = vmul.f32 %v6576_v42, %v6576_v42 }
 0xfa8   :  { %v1465_v45 = vsel %vm177_vm0, %v1457_v44, 0.0 }
 0xfa9   :  { %1466 = vadd.xlane.f32.xlu0 %v1465_v45  ;;  %v1446_v35 = vpop.xlane.xlu0 %1445 }
 0xfaa   :  { %v1450_v28 = vmul.f32 %v1446_v35, %v5735_v22 }
 0xfac   :  { %v6583_v59 = vsub.f32 %v6564_v31, %v1450_v28 }
 0xfae   :  { %v1458_v8 = vmul.f32 %v6583_v59, %v6583_v59 }
 0xfb0   :  { %v1468_v36 = vsel %vm177_vm0, %v1458_v8, 0.0 }
 0xfb1   :  { %1469 = vadd.xlane.f32.xlu1 %v1468_v36 }
0x100c   :  { %v1461_v15 = vpop.xlane.xlu1 %1460 }
0x100d   :  { %v1471_v16 = vmul.f32 %v1461_v15, %v5735_v22 }
0x100f   :  { %v1475_v34 = vadd.f32 1e-05, %v1471_v16 }
0x1011   :  { %5198 = vrsqrt.f32 %v1475_v34  ;;  %vm1485_vm13 = vweird.f32 %v1475_v34 }
0x1014   :  { %v1464_v19 = vpop.xlane.xlu2 %1463 }
0x1015   :  { %v1472_v44 = vmul.f32 %v1464_v19, %v5735_v22 }
0x1017   :  { %v5199_v45 = vpop.eup %5198  ;;  %v1476_v39 = vadd.f32 1e-05, %v1472_v44 }
0x1018   :  { %v1480_v35 = vmul.f32 %v5199_v45, %v1475_v34  ;;  %vm1486_vm12 = vweird.f32 %v5199_v45 }
0x1019   :  { %5200 = vrsqrt.f32 %v1476_v39  ;;  %vm1487_vm2 = vmor %vm1485_vm13, %vm1486_vm12  ;;  %vm1495_vm4 = vweird.f32 %v1476_v39 }
0x101a   :  { %v1481_v28 = vmul.f32 %v5199_v45, %v1480_v35 }
0x101c   :  { %v1482_v21 = vmul.f32 0.5, %v1481_v28  ;;  %v1467_v43 = vpop.xlane.xlu0 %1466 }
0x101d   :  { %v1473_v49 = vmul.f32 %v1467_v43, %v5735_v22 }
0x101e   :  { %v1483_v5 = vsub.f32 1.5, %v1482_v21 }
0x101f   :  { %v5201_v8 = vpop.eup %5200  ;;  %v1477_v36 = vadd.f32 1e-05, %v1473_v49 }
0x1020   :  { %v1484_v12 = vmul.f32 %v5199_v45, %v1483_v5  ;;  %v1490_v15 = vmul.f32 %v5201_v8, %v1476_v39  ;;  %vm1496_vm3 = vweird.f32 %v5201_v8 }
0x1021   :  { %5202 = vrsqrt.f32 %v1477_v36  ;;  %vm1497_vm5 = vmor %vm1495_vm4, %vm1496_vm3  ;;  %vm1505_vm7 = vweird.f32 %v1477_v36 }
0x1022   :  { %v1491_v16 = vmul.f32 %v5201_v8, %v1490_v15  ;;  %v1488_v19 = vsel %vm1487_vm2, %v5199_v45, %v1484_v12  ;;  %v5494_v12 = vld [vmem:[%s8054_s4] ss:$0 sm:$0xff] }
0x1023   :  { %v1519_v62 = vmul.f32 %v1488_v19, %v1451_v37 }
0x1024   :  { %v1492_v25 = vmul.f32 0.5, %v1491_v16  ;;  %v1470_v44 = vpop.xlane.xlu1 %1469 }
0x1025   :  { %v1474_v7 = vmul.f32 %v1470_v44, %v5735_v22  ;;  %v1523_v34 = vmul.f32 %v5494_v12, %v1519_v62 }
0x1026   :  { %v1493_v35 = vsub.f32 1.5, %v1492_v25 }
0x1027   :  { %v5203_v28 = vpop.eup %5202  ;;  %v1478_v43 = vadd.f32 1e-05, %v1474_v7  ;;  %v5495_v7 = vld [vmem:[%s8055_s22] ss:$0 sm:$0xff] }
0x1028   :  { %v1494_v21 = vmul.f32 %v5201_v8, %v1493_v35  ;;  %v1500_v49 = vmul.f32 %v5203_v28, %v1477_v36  ;;  %v1527_v37 = vadd.f32 %v5495_v7, %v1523_v34  ;;  %vm1506_vm6 = vweird.f32 %v5203_v28 }
0x1029   :  { %5204 = vrsqrt.f32 %v1478_v43  ;;  %vm1507_vm10 = vmor %vm1505_vm7, %vm1506_vm6  ;;  %vm1515_vm12 = vweird.f32 %v1478_v43 }
0x102a   :  { %v1498_v5 = vsel %vm1497_vm5, %v5201_v8, %v1494_v21  ;;  %v1501_v54 = vmul.f32 %v5203_v28, %v1500_v49 }
0x102b   :  { %v1520_v45 = vmul.f32 %v1498_v5, %v1452_v1 }
0x102c   :  { %v1502_v15 = vmul.f32 0.5, %v1501_v54 }
0x102d   :  { %v1524_v16 = vmul.f32 %v5494_v12, %v1520_v45 }
0x102e   :  { %v1503_v25 = vsub.f32 1.5, %v1502_v15 }
0x102f   :  { %v5205_v44 = vpop.eup %5204  ;;  %v1528_v39 = vadd.f32 %v5495_v7, %v1524_v16 }
0x1030   :  { %v1504_v19 = vmul.f32 %v5203_v28, %v1503_v25  ;;  %v1510_v8 = vmul.f32 %v5205_v44, %v1478_v43  ;;  %vm1516_vm11 = vweird.f32 %v5205_v44 }
0x1031   :  { %v1531_v35 = vpack.c.bf16 %v1528_v39, %v1527_v37  ;;  %vm1517_vm13 = vmor %vm1515_vm12, %vm1516_vm11 }
0x1032   :  { %v1511_v21 = vmul.f32 %v5205_v44, %v1510_v8  ;;  %v1508_v54 = vsel %vm1507_vm10, %v5203_v28, %v1504_v19 }
0x1033   :  { %4939 = vmatmul.msk.bf16.vlgmr.msra.gmra.mxu3 %vm177_vm0, %v1531_v35  ;;  %4941 = vmatmul.msk.bf16.vlgmr.msrb.gmra.mxu0 %vm177_vm0, %v1531_v35  ;;  %v1521_v49 = vmul.f32 %v1508_v54, %v6576_v42 }
0x1034   :  { %v1512_v62 = vmul.f32 0.5, %v1511_v21 }
0x1035   :  { %v1525_v15 = vmul.f32 %v5494_v12, %v1521_v49 }
0x1036   :  { %v1513_v1 = vsub.f32 1.5, %v1512_v62 }
0x1037   :  { %v1529_v16 = vadd.f32 %v5495_v7, %v1525_v15 }
0x1038   :  { %v1514_v5 = vmul.f32 %v5205_v44, %v1513_v1 }
0x103a   :  { %v1518_v34 = vsel %vm1517_vm13, %v5205_v44, %v1514_v5 }
0x103b   :  { %v1522_v45 = vmul.f32 %v1518_v34, %v6583_v59 }
0x103d   :  { %v1526_v36 = vmul.f32 %v5494_v12, %v1522_v45 }
0x103f   :  { %v1530_v25 = vadd.f32 %v5495_v7, %v1526_v36 }
0x1041   :  { %v1532_v37 = vpack.c.bf16 %v1530_v25, %v1529_v16 }
0x1043   :  { %4940 = vmatmul.msk.bf16.gmra.mxu3 %vm177_vm0, %v1532_v37  ;;  %4942 = vmatmul.msk.bf16.gmra.mxu0 %vm177_vm0, %v1532_v37 }
0x10b0   :  { %v1567_v28 = vpop.f32.mrf.mxu0 }
0x10b1   :  { %v1568_v1 = vadd.f32 %v1567_v28, %v5866_v24  ;;  %v5496_v28 = vld [vmem:[%s8058_s25] sm:$0x1] }
0x10b2   :  { %vm1577_vm2 = vcmp.lt.s32.totalorder %v5496_v28, 13 }
0x10b6   :  { %v1548_v39 = vpop.f32.mrf.mxu3 }
0x10b7   :  { %v1549_v42 = vadd.f32 %v1548_v39, %v5858_v17  ;;  %v8087_v39 = vmov -1e+09  }
0x10b8   :  { %v1569_v19 = vpop.f32.mrf.mxu0 }
0x10b9   :  { %v1570_v54 = vadd.f32 %v1569_v19, %v5866_v24  ;;  %v1578_v19 = vsel %vm1577_vm2, 0.0, %v8087_v39 }
0x10bb   :  { %v6617_v5 = vpack.c.bf16 %v1570_v54, %v1568_v1 }
0x10be   :  { %v1550_v8 = vpop.f32.mrf.mxu3 }
0x10bf   :  { %v1551_v43 = vadd.f32 %v1550_v8, %v5858_v17  ;;  %v1580_v8 = vperm.slane %v1578_v19, 0 }
0x10c0   :  { %v1572_v44 = vpop.f32.mrf.mxu0 }
0x10c1   :  { %v6606_v35 = vpack.c.bf16 %v1551_v43, %v1549_v42  ;;  %v1573_v7 = vadd.f32 %v1572_v44, %v5866_v24  ;;  %v5497_v42 = vld [vmem:[%s8059_s28] sm:$0xff] }
0x10c2   :  { %v6642_v43 = vadd.f32 %v5497_v42, %v1580_v8  ;;  %v5500_v42 = vld [vmem:[%s8059_s28 + $0x18] sm:$0xff] }
0x10c3   :  { %1590 = vrot.lane.b32.xlu0 %v6606_v35, %s5574_s24 }
0x10c6   :  { %v1553_v59 = vpop.f32.mrf.mxu3 }
0x10c7   :  { %v1554_v34 = vadd.f32 %v1553_v59, %v5858_v17 }
0x10c8   :  { %v1574_v12 = vpop.f32.mrf.mxu0 }
0x10c9   :  { %v1575_v21 = vadd.f32 %v1574_v12, %v5866_v24 }
0x10cb   :  { %v6613_v62 = vpack.c.bf16 %v1575_v21, %v1573_v7  ;;  %v5498_v21 = vld [vmem:[%s8059_s28 + $0x8] sm:$0xff] }
0x10cc   :  { %v6649_v54 = vadd.f32 %v5498_v21, %v1580_v8 }
0x10cd   :  { %1693 = vmatpush.bf16.msrb.mxu2 %v6613_v62 }
0x10ce   :  { %v1555_v49 = vpop.f32.mrf.mxu3 }
0x10cf   :  { %v1556_v45 = vadd.f32 %v1555_v49, %v5858_v17 }
0x10d1   :  { %v6621_v15 = vpack.c.bf16 %v1556_v45, %v1554_v34  ;;  %1694 = vmatpush.bf16.msrb.mxu2 %v6617_v5 }
0x10d3   :  { %1592 = vrot.lane.b32.xlu2 %v6621_v15, %s5574_s24 }
0x10d5   :  { %1874 = vmatpush.bf16.msra.mxu2 %v5946_v55 }
0x112d   :  { %v1593_v36 = vpop.permute.xlu2 %1592 }
0x112e   :  { %v1604_v16 = vsel %vm8041_vm14, %v1593_v36, 0  ;;  %v5499_v36 = vld [vmem:[%s8059_s28 + $0x10] sm:$0xff] }
0x112f   :  { %1612 = vmatpush.bf16.xpose.msrb.mxu1 %v1604_v16  ;;  %v6656_v16 = vadd.f32 %v5499_v36, %v1580_v8 }
0x1135   :  { %v1591_v25 = vpop.permute.xlu0 %1590 }
0x1136   :  { %v1601_v37 = vsel %vm8041_vm14, %v1591_v25, 0 }
0x1137   :  { %1613 = vmatpush.bf16.xpose.msrb.mxu1 %v1601_v37 }
0x113e   :  { %4943 = vmatmul.msk.bf16.vlgmr.msrb.gmra.mxu1 %vm8041_vm14, %v6606_v35 }
0x113f   :  { %1849 = vmatpush.bf16.msra.mxu1 %v6062_v41 }
0x1143   :  { %2025 = vmatpush.bf16.msrb.mxu1 %v6098_v26 }
0x114e   :  { %4944 = vmatmul.msk.bf16.gmra.mxu1 %vm8041_vm14, %v6621_v15 }
0x11bb   :  { %v1615_v44 = vpop.f32.mrf.mxu1 }
0x11bc   :  { %v1625_v59 = vmul.f32 0.25, %v1615_v44  ;;  %v6663_v44 = vadd.f32 %v5500_v42, %v1580_v8 }
0x11be   :  { %v1629_v12 = vadd.f32 %v1625_v59, %v6642_v43 }
0x11c0   :  { %v1633_v7 = vsel %vm403_vm1, %v1629_v12, -inf }
0x11c1   :  { %1634 = vmax.xlane.f32.xlu1 %v1633_v7 }
0x11c3   :  { %v1617_v1 = vpop.f32.mrf.mxu1 }
0x11c4   :  { %v1626_v49 = vmul.f32 0.25, %v1617_v1 }
0x11c6   :  { %v1630_v34 = vadd.f32 %v1626_v49, %v6649_v54 }
0x11c8   :  { %v1636_v45 = vsel %vm403_vm1, %v1630_v34, -inf }
0x11c9   :  { %1637 = vmax.xlane.f32.xlu1 %v1636_v45 }
0x11cb   :  { %v1620_v25 = vpop.f32.mrf.mxu1 }
0x11cc   :  { %v1627_v37 = vmul.f32 0.25, %v1620_v25 }
0x11ce   :  { %v1631_v28 = vadd.f32 %v1627_v37, %v6656_v16 }
0x11d0   :  { %v1639_v19 = vsel %vm403_vm1, %v1631_v28, -inf }
0x11d1   :  { %1640 = vmax.xlane.f32.xlu1 %v1639_v19 }
0x11d3   :  { %v1622_v59 = vpop.f32.mrf.mxu1 }
0x11d4   :  { %v1628_v7 = vmul.f32 0.25, %v1622_v59 }
0x11d6   :  { %v1632_v21 = vadd.f32 %v1628_v7, %v6663_v44 }
0x11d8   :  { %v1642_v1 = vsel %vm403_vm1, %v1632_v21, -inf }
0x11d9   :  { %1643 = vmax.xlane.f32.xlu0 %v1642_v1 }
0x11ed   :  { %1708 = vrot.lane.b32.xlu0 %v6606_v35, %s5577_s7 }
0x11f5   :  { %1710 = vrot.lane.b32.xlu0 %v6621_v15, %s5577_s7 }
0x11fd   :  { %1890 = vrot.lane.b32.xlu0 %v6606_v35, %s5579_s27 }
0x1205   :  { %2043 = vrot.lane.b32.xlu0 %v6621_v15, %s5581_s5 }
0x1234   :  { %v1635_v8 = vpop.xlane.xlu1 %1634 }
0x1235   :  { %v1645_v49 = vsub.f32 %v1629_v12, %v1635_v8 }
0x1237   :  { %v1649_v45 = vmul.f32 1.442695, %v1645_v49 }
0x1239   :  { %5206 = vpow2.f32 %v1649_v45 }
0x123c   :  { %v1638_v36 = vpop.xlane.xlu1 %1637 }
0x123d   :  { %v1646_v25 = vsub.f32 %v1630_v34, %v1638_v36 }
0x123f   :  { %v5207_v37 = vpop.eup %5206  ;;  %v1651_v19 = vmul.f32 1.442695, %v1646_v25 }
0x1240   :  { %v1657_v42 = vsel %vm403_vm1, %v5207_v37, 0.0 }
0x1241   :  { %5208 = vpow2.f32 %v1651_v19  ;;  %1658 = vadd.xlane.f32.xlu2 %v1657_v42 }
0x1244   :  { %v1641_v59 = vpop.xlane.xlu1 %1640 }
0x1245   :  { %v1647_v7 = vsub.f32 %v1631_v28, %v1641_v59 }
0x1247   :  { %v5209_v1 = vpop.eup %5208  ;;  %v1653_v39 = vmul.f32 1.442695, %v1647_v7 }
0x1248   :  { %v1660_v26 = vsel %vm403_vm1, %v5209_v1, 0.0 }
0x1249   :  { %5210 = vpow2.f32 %v1653_v39  ;;  %1661 = vadd.xlane.f32.xlu1 %v1660_v26 }
0x124c   :  { %v1644_v41 = vpop.xlane.xlu0 %1643 }
0x124d   :  { %v1648_v12 = vsub.f32 %v1632_v21, %v1644_v41 }
0x124f   :  { %v5211_v8 = vpop.eup %5210  ;;  %v1655_v49 = vmul.f32 1.442695, %v1648_v12 }
0x1250   :  { %v1663_v34 = vsel %vm403_vm1, %v5211_v8, 0.0 }
0x1251   :  { %5212 = vpow2.f32 %v1655_v49  ;;  %1664 = vadd.xlane.f32.xlu1 %v1663_v34 }
0x1257   :  { %v5213_v45 = vpop.eup %5212 }
0x1258   :  { %v1666_v36 = vsel %vm403_vm1, %v5213_v45, 0.0 }
0x1259   :  { %1712 = vrot.lane.b32.xlu2 %v6606_v35, %s5576_s1  ;;  %1667 = vadd.xlane.f32.xlu1 %v1666_v36 }
0x1261   :  { %2045 = vrot.lane.b32.xlu2 %v6606_v35, %s8088_s23 }
0x1269   :  { %1886 = vrot.lane.b32.xlu2 %v6606_v35, %s8089_s3 }
0x1272   :  { %1714 = vrot.lane.b32.xlu1 %v6621_v15, %s5576_s1 }
0x127a   :  { %2047 = vrot.lane.b32.xlu1 %v6621_v15, %s8088_s23 }
0x1282   :  { %1892 = vrot.lane.b32.xlu1 %v6621_v15, %s5579_s27 }
0x128a   :  { %2041 = vrot.lane.b32.xlu1 %v6606_v35, %s5581_s5 }
0x1292   :  { %1888 = vrot.lane.b32.xlu1 %v6621_v15, %s8089_s3 }
0x12b4   :  { %v1659_v41 = vpop.xlane.xlu2 %1658 }
0x12b5   :  { %5214 = vrcp.f32 %v1659_v41  ;;  %v1709_v41 = vpop.permute.xlu0 %1708 }
0x12bb   :  { %v5215_v39 = vpop.eup %5214 }
0x12bc   :  { %v1662_v26 = vpop.xlane.xlu1 %1661  ;;  %v1673_v21 = vmul.f32 %v5215_v39, %v5207_v37  ;;  %v1713_v37 = vpop.permute.xlu2 %1712 }
0x12bd   :  { %5216 = vrcp.f32 %v1662_v26  ;;  %v1723_v39 = vsel %vm8041_vm14, %v1713_v37, 0 }
0x12c3   :  { %v5217_v28 = vpop.eup %5216 }
0x12c4   :  { %v1674_v25 = vmul.f32 %v5217_v28, %v5209_v1  ;;  %v1665_v19 = vpop.xlane.xlu1 %1664  ;;  %v1711_v28 = vpop.permute.xlu0 %1710 }
0x12c5   :  { %5218 = vrcp.f32 %v1665_v19 }
0x12c6   :  { %v1677_v42 = vpack.c.bf16 %v1674_v25, %v1673_v21  ;;  %v2046_v21 = vpop.permute.xlu2 %2045 }
0x12c7   :  { %v2056_v25 = vsel %vm8041_vm14, %v2046_v21, 0 }
0x12c8   :  { %4945 = vmatmul.msk.bf16.vlgmr.msrb.gmra.mxu2 %vm403_vm1, %v1677_v42 }
0x12cb   :  { %v5219_v7 = vpop.eup %5218 }
0x12cc   :  { %v1668_v59 = vpop.xlane.xlu1 %1667  ;;  %v1675_v12 = vmul.f32 %v5219_v7, %v5211_v8  ;;  %v1891_v19 = vpop.permute.xlu0 %1890 }
0x12cd   :  { %5220 = vrcp.f32 %v1668_v59  ;;  %v1901_v42 = vsel %vm8041_vm14, %v1891_v19, 0 }
0x12ce   :  { %v1887_v59 = vpop.permute.xlu2 %1886 }
0x12d3   :  { %v5221_v35 = vpop.eup %5220 }
0x12d4   :  { %v1676_v49 = vmul.f32 %v5221_v35, %v5213_v45 }
0x12d6   :  { %v1678_v15 = vpack.c.bf16 %v1676_v49, %v1675_v12 }
0x12d8   :  { %4946 = vmatmul.msk.bf16.gmra.mxu2 %vm403_vm1, %v1678_v15 }
0x12e4   :  { %v1715_v34 = vpop.permute.xlu1 %1714 }
0x12e5   :  { %v1726_v36 = vsel %vm8041_vm14, %v1715_v34, 0 }
0x12e6   :  { %1734 = vmatpush.bf16.xpose.msrb.mxu3 %v1726_v36 }
0x12ec   :  { %v2048_v1 = vpop.permute.xlu1 %2047 }
0x12ed   :  { %v2059_v26 = vsel %vm8041_vm14, %v2048_v1, 0 }
0x12ee   :  { %1735 = vmatpush.bf16.xpose.msrb.mxu3 %v1723_v39  ;;  %2067 = vmatpush.bf16.xpose.msrb.mxu2 %v2059_v26 }
0x12f4   :  { %v1893_v8 = vpop.permute.xlu1 %1892 }
0x12f5   :  { %v1904_v45 = vsel %vm8041_vm14, %v1893_v8, 0  ;;  %4947 = vmatmul.msk.bf16.vlgmr.msrb.gmra.mxu3 %vm8041_vm14, %v1709_v41 }
0x12f6   :  { %1912 = vmatpush.bf16.xpose.msra.mxu3 %v1904_v45  ;;  %2068 = vmatpush.bf16.xpose.msrb.mxu2 %v2056_v25  ;;  %v2044_v45 = vpop.permute.xlu0 %2043 }
0x12fc   :  { %v2042_v7 = vpop.permute.xlu1 %2041 }
0x12fe   :  { %1913 = vmatpush.bf16.xpose.msra.mxu3 %v1901_v42 }
0x1304   :  { %v1889_v35 = vpop.permute.xlu1 %1888 }
0x1305   :  { %4948 = vmatmul.msk.bf16.gmra.mxu3 %vm8041_vm14, %v1711_v28 }
0x1315   :  { %4955 = vmatmul.msk.bf16.vlgmr.msra.gmra.mxu3 %vm8041_vm14, %v1887_v59 }
0x1325   :  { %4956 = vmatmul.msk.bf16.gmra.mxu3 %vm8041_vm14, %v1889_v35 }
0x134b   :  { %v1696_v12 = vpop.f32.mrf.mxu2 }
0x1353   :  { %v1698_v49 = vpop.f32.mrf.mxu2 }
0x1354   :  { %v1706_v15 = vpack.c.bf16 %v1698_v49, %v1696_v12 }
0x1356   :  { %4953 = vmatmul.msk.bf16.vlgmr.msra.gmra.mxu2 %vm8041_vm14, %v1706_v15 }
0x1357   :  { %2365 = vmatpush.bf16.msra.mxu2 %v6217_v33 }
0x135b   :  { %v1701_v34 = vpop.f32.mrf.mxu2  ;;  %2366 = vmatpush.bf16.msra.mxu2 %v6226_v51 }
0x135f   :  { %2367 = vmatpush.bf16.msra.mxu2 %v6235_v38 }
0x1363   :  { %v1703_v36 = vpop.f32.mrf.mxu2  ;;  %2368 = vmatpush.bf16.msra.mxu2 %v6244_v47 }
0x1364   :  { %v1707_v41 = vpack.c.bf16 %v1703_v36, %v1701_v34 }
0x1366   :  { %4954 = vmatmul.msk.bf16.gmra.mxu2 %vm8041_vm14, %v1707_v41 }
0x1367   :  { %2369 = vmatpush.bf16.msra.mxu2 %v6253_v63 }
0x136b   :  { %2370 = vmatpush.bf16.msra.mxu2 %v6262_v50 }
0x136f   :  { %2371 = vmatpush.bf16.msra.mxu2 %v6271_v6 }
0x1373   :  { %2372 = vmatpush.bf16.msra.mxu2 %v6280_v2 }
0x1376   :  { %4961 = vmatmul.msk.bf16.vlgmr.msrb.gmra.mxu2 %vm8041_vm14, %v2042_v7 }
0x1378   :  { %v1737_v37 = vpop.f32.mrf.mxu3 }
0x1379   :  { %v1747_v1 = vmul.f32 0.25, %v1737_v37 }
0x137b   :  { %v1751_v26 = vadd.f32 %v1747_v1, %v6642_v43 }
0x137d   :  { %v1755_v39 = vsel %vm403_vm1, %v1751_v26, -inf }
0x137e   :  { %1756 = vmax.xlane.f32.xlu2 %v1755_v39 }
0x1380   :  { %v1739_v28 = vpop.f32.mrf.mxu3 }
0x1381   :  { %v1748_v21 = vmul.f32 0.25, %v1739_v28 }
0x1383   :  { %v1752_v8 = vadd.f32 %v1748_v21, %v6649_v54 }
0x1385   :  { %v1758_v25 = vsel %vm403_vm1, %v1752_v8, -inf }
0x1386   :  { %1759 = vmax.xlane.f32.xlu0 %v1758_v25  ;;  %4962 = vmatmul.msk.bf16.gmra.mxu2 %vm8041_vm14, %v2044_v45 }
0x1388   :  { %v1742_v19 = vpop.f32.mrf.mxu3 }
0x1389   :  { %v1749_v42 = vmul.f32 0.25, %v1742_v19 }
0x138b   :  { %v1753_v59 = vadd.f32 %v1749_v42, %v6656_v16 }
0x138d   :  { %v1761_v7 = vsel %vm403_vm1, %v1753_v59, -inf }
0x138e   :  { %1762 = vmax.xlane.f32.xlu1 %v1761_v7 }
0x1390   :  { %v1744_v35 = vpop.f32.mrf.mxu3 }
0x1391   :  { %v1750_v12 = vmul.f32 0.25, %v1744_v35 }
0x1393   :  { %v6726_v49 = vadd.f32 %v1750_v12, %v6663_v44 }
0x1395   :  { %v1764_v15 = vsel %vm403_vm1, %v6726_v49, -inf }
0x1396   :  { %1765 = vmax.xlane.f32.xlu2 %v1764_v15 }
0x1398   :  { %v1915_v34 = vpop.f32.mrf.mxu3 }
0x1399   :  { %v1925_v36 = vmul.f32 0.25, %v1915_v34 }
0x139b   :  { %v1929_v41 = vadd.f32 %v1925_v36, %v6642_v43 }
0x139d   :  { %v1933_v37 = vsel %vm403_vm1, %v1929_v41, -inf }
0x139e   :  { %1934 = vmax.xlane.f32.xlu2 %v1933_v37 }
0x13a0   :  { %v1917_v1 = vpop.f32.mrf.mxu3 }
0x13a1   :  { %v1926_v39 = vmul.f32 0.25, %v1917_v1 }
0x13a3   :  { %v6733_v28 = vadd.f32 %v1926_v39, %v6649_v54 }
0x13a5   :  { %v1936_v21 = vsel %vm403_vm1, %v6733_v28, -inf }
0x13a6   :  { %1937 = vmax.xlane.f32.xlu0 %v1936_v21 }
0x13a8   :  { %v1920_v45 = vpop.f32.mrf.mxu3 }
0x13a9   :  { %v1927_v25 = vmul.f32 0.25, %v1920_v45 }
0x13ab   :  { %v6738_v19 = vadd.f32 %v1927_v25, %v6656_v16 }
0x13ad   :  { %v1939_v42 = vsel %vm403_vm1, %v6738_v19, -inf }
0x13ae   :  { %1940 = vmax.xlane.f32.xlu0 %v1939_v42 }
0x13b0   :  { %v1922_v7 = vpop.f32.mrf.mxu3 }
0x13b1   :  { %v1928_v35 = vmul.f32 0.25, %v1922_v7 }
0x13b3   :  { %v6743_v12 = vadd.f32 %v1928_v35, %v6663_v44 }
0x13b5   :  { %v1942_v15 = vsel %vm403_vm1, %v6743_v12, -inf }
0x13b6   :  { %1943 = vmax.xlane.f32.xlu1 %v1942_v15 }
0x13cf   :  { %1805 = vrot.lane.b32.xlu1 %v6613_v62, %s5577_s7 }
0x13d9   :  { %v6749_v34 = vpop.f32.mrf.mxu2 }
0x13e1   :  { %v6751_v36 = vpop.f32.mrf.mxu2 }
0x13e9   :  { %v6753_v37 = vpop.f32.mrf.mxu2 }
0x13f1   :  { %v6755_v1 = vpop.f32.mrf.mxu2  ;;  %v1757_v39 = vpop.xlane.xlu2 %1756 }
0x13f2   :  { %v1767_v21 = vsub.f32 %v1751_v26, %v1757_v39 }
0x13f4   :  { %v1771_v45 = vmul.f32 1.442695, %v1767_v21 }
0x13f6   :  { %5222 = vpow2.f32 %v1771_v45 }
0x13f9   :  { %v2070_v25 = vpop.f32.mrf.mxu2  ;;  %v1760_v42 = vpop.xlane.xlu0 %1759 }
0x13fa   :  { %v1768_v7 = vsub.f32 %v1752_v8, %v1760_v42 }
0x13fc   :  { %v6757_v35 = vpop.eup %5222  ;;  %v1773_v15 = vmul.f32 1.442695, %v1768_v7 }
0x13fd   :  { %v1779_v2 = vsel %vm403_vm1, %v6757_v35, 0.0 }
0x13fe   :  { %5224 = vpow2.f32 %v1773_v15  ;;  %1780 = vadd.xlane.f32.xlu2 %v1779_v2 }
0x1401   :  { %v2072_v6 = vpop.f32.mrf.mxu2  ;;  %v1763_v50 = vpop.xlane.xlu1 %1762 }
0x1402   :  { %v2081_v63 = vmul.f32 0.25, %v2072_v6  ;;  %v1769_v47 = vsub.f32 %v1753_v59, %v1763_v50 }
0x1404   :  { %v6761_v38 = vpop.eup %5224  ;;  %v1775_v26 = vmul.f32 1.442695, %v1769_v47  ;;  %v2085_v39 = vadd.f32 %v2081_v63, %v6649_v54 }
0x1405   :  { %v1782_v8 = vsel %vm403_vm1, %v6761_v38, 0.0 }
0x1406   :  { %5226 = vpow2.f32 %v1775_v26  ;;  %1783 = vadd.xlane.f32.xlu0 %v1782_v8  ;;  %v2091_v21 = vsel %vm403_vm1, %v2085_v39, -inf }
0x1407   :  { %2092 = vmax.xlane.f32.xlu1 %v2091_v21 }
0x1409   :  { %v2075_v45 = vpop.f32.mrf.mxu2  ;;  %v1766_v50 = vpop.xlane.xlu2 %1765 }
0x140a   :  { %v2082_v42 = vmul.f32 0.25, %v2075_v45  ;;  %v1770_v15 = vsub.f32 %v6726_v49, %v1766_v50 }
0x140c   :  { %v6767_v2 = vpop.eup %5226  ;;  %v6770_v6 = vadd.f32 %v2082_v42, %v6656_v16  ;;  %v1777_v21 = vmul.f32 1.442695, %v1770_v15 }
0x140d   :  { %v1785_v47 = vsel %vm403_vm1, %v6767_v2, 0.0 }
0x140e   :  { %1786 = vadd.xlane.f32.xlu0 %v1785_v47  ;;  %v2094_v63 = vsel %vm403_vm1, %v6770_v6, -inf }
0x140f   :  { %2095 = vmax.xlane.f32.xlu1 %v2094_v63 }
0x1411   :  { %v1935_v54 = vpop.xlane.xlu2 %1934  ;;  %v2077_v8 = vpop.f32.mrf.mxu2 }
0x1412   :  { %v1945_v59 = vsub.f32 %v1929_v41, %v1935_v54  ;;  %v2083_v45 = vmul.f32 0.25, %v2077_v8  ;;  %v2080_v8 = vmul.f32 0.25, %v2070_v25 }
0x1414   :  { %v1949_v7 = vmul.f32 1.442695, %v1945_v59  ;;  %v2087_v54 = vadd.f32 %v2083_v45, %v6663_v44 }
0x1416   :  { %1803 = vrot.lane.b32.xlu2 %v6617_v5, %s5577_s7  ;;  %5228 = vpow2.f32 %v1949_v7  ;;  %v2097_v49 = vsel %vm403_vm1, %v2087_v54, -inf }
0x1417   :  { %5230 = vpow2.f32 %v1777_v21 }
0x1419   :  { %v1938_v47 = vpop.xlane.xlu0 %1937 }
0x141a   :  { %v1946_v41 = vsub.f32 %v6733_v28, %v1938_v47  ;;  %v2084_v28 = vadd.f32 %v2080_v8, %v6642_v43 }
0x141c   :  { %v6783_v26 = vpop.eup %5228  ;;  %v1951_v59 = vmul.f32 1.442695, %v1946_v41  ;;  %v2088_v44 = vsel %vm403_vm1, %v2084_v28, -inf }
0x141d   :  { %v1957_v42 = vsel %vm403_vm1, %v6783_v26, 0.0  ;;  %v5231_v50 = vpop.eup %5230 }
0x141e   :  { %5232 = vpow2.f32 %v1951_v59  ;;  %v1788_v7 = vsel %vm403_vm1, %v5231_v50, 0.0 }
0x1421   :  { %v1941_v45 = vpop.xlane.xlu0 %1940 }
0x1422   :  { %2136 = vrot.lane.b32.xlu0 %v6613_v62, %s5581_s5 }
0x1424   :  { %v6791_v15 = vpop.eup %5232 }
0x1425   :  { %v1960_v21 = vsel %vm403_vm1, %v6791_v15, 0.0 }
0x1429   :  { %v6780_v16 = vpop.xlane.xlu1 %1943 }
0x143f   :  { %1958 = vadd.xlane.f32.xlu2 %v1957_v42 }
0x1441   :  { %v1806_v63 = vpop.permute.xlu1 %1805 }
0x1442   :  { %1821 = vmatpush.bf16.msra.mxu0 %v1806_v63 }
0x1447   :  { %2098 = vmax.xlane.f32.xlu2 %v2097_v49 }
0x144c   :  { %1789 = vadd.xlane.f32.xlu0 %v1788_v7 }
0x1454   :  { %1961 = vadd.xlane.f32.xlu0 %v1960_v21 }
0x145c   :  { %2089 = vmax.xlane.f32.xlu0 %v2088_v44 }
0x145f   :  { %1979 = vrot.lane.b32.xlu2 %v6617_v5, %s8089_s3 }
0x1471   :  { %v1781_v42 = vpop.xlane.xlu2 %1780 }
0x1472   :  { %5234 = vrcp.f32 %v1781_v42 }
0x1478   :  { %v5235_v49 = vpop.eup %5234 }
0x1479   :  { %v1804_v47 = vpop.permute.xlu2 %1803  ;;  %v1784_v63 = vpop.xlane.xlu0 %1783  ;;  %v1795_v43 = vmul.f32 %v5235_v49, %v6757_v35  ;;  %v1947_v35 = vsub.f32 %v6738_v19, %v1941_v45 }
0x147a   :  { %5236 = vrcp.f32 %v1784_v63  ;;  %1822 = vmatpush.bf16.msra.mxu0 %v1804_v47  ;;  %v2093_v25 = vpop.xlane.xlu1 %2092 }
0x147b   :  { %v2101_v41 = vsub.f32 %v2085_v39, %v2093_v25 }
0x147d   :  { %v2106_v59 = vmul.f32 1.442695, %v2101_v41 }
0x147f   :  { %5238 = vpow2.f32 %v2106_v59 }
0x1480   :  { %v5237_v7 = vpop.eup %5236 }
0x1481   :  { %v1796_v8 = vmul.f32 %v5237_v7, %v6761_v38  ;;  %v1787_v47 = vpop.xlane.xlu0 %1786  ;;  %v1953_v38 = vmul.f32 1.442695, %v1947_v35 }
0x1483   :  { %v1799_v21 = vpack.c.bf16 %v1796_v8, %v1795_v43  ;;  %5240 = vpow2.f32 %v1953_v38 }
0x1484   :  { %5242 = vrcp.f32 %v1787_v47 }
0x1485   :  { %v6801_v44 = vpop.eup %5238  ;;  %4949 = vmatmul.msk.bf16.vlgmr.msra.gmra.mxu0 %vm403_vm1, %v1799_v21 }
0x1486   :  { %v2115_v42 = vsel %vm403_vm1, %v6801_v44, 0.0 }
0x1487   :  { %2116 = vadd.xlane.f32.xlu1 %v2115_v42 }
0x1489   :  { %v6811_v7 = vpop.eup %5240 }
0x148a   :  { %v5243_v43 = vpop.eup %5242  ;;  %v1963_v42 = vsel %vm403_vm1, %v6811_v7, 0.0 }
0x148b   :  { %v1797_v45 = vmul.f32 %v5243_v43, %v6767_v2  ;;  %v2096_v2 = vpop.xlane.xlu1 %2095 }
0x1494   :  { %v2137_v63 = vpop.permute.xlu0 %2136 }
0x1495   :  { %2152 = vmatpush.bf16.msrb.mxu3 %v2137_v63 }
0x14a0   :  { %2134 = vrot.lane.b32.xlu1 %v6617_v5, %s5581_s5 }
0x14b2   :  { %v6808_v39 = vpop.xlane.xlu2 %1958 }
0x14ba   :  { %v2099_v25 = vpop.xlane.xlu2 %2098 }
0x14bb   :  { %v2103_v41 = vsub.f32 %v2087_v54, %v2099_v25 }
0x14bd   :  { %v2110_v59 = vmul.f32 1.442695, %v2103_v41 }
0x14bf   :  { %5244 = vpow2.f32 %v2110_v59  ;;  %v1790_v49 = vpop.xlane.xlu0 %1789  ;;  %v2102_v59 = vsub.f32 %v6770_v6, %v2096_v2 }
0x14c0   :  { %5246 = vrcp.f32 %v1790_v49 }
0x14c5   :  { %v6813_v8 = vpop.eup %5244 }
0x14c6   :  { %v5247_v21 = vpop.eup %5246  ;;  %v2121_v5 = vsel %vm403_vm1, %v6813_v8, 0.0 }
0x14c7   :  { %2122 = vadd.xlane.f32.xlu2 %v2121_v5  ;;  %v1962_v19 = vpop.xlane.xlu0 %1961  ;;  %v1798_v54 = vmul.f32 %v5247_v21, %v5231_v50  ;;  %v2108_v5 = vmul.f32 1.442695, %v2102_v59 }
0x14c9   :  { %v1800_v47 = vpack.c.bf16 %v1798_v54, %v1797_v45 }
0x14ca   :  { %1964 = vadd.xlane.f32.xlu1 %v1963_v42 }
0x14cb   :  { %4950 = vmatmul.msk.bf16.gmra.mxu0 %vm403_vm1, %v1800_v47 }
0x14cf   :  { %v2090_v63 = vpop.xlane.xlu0 %2089 }
0x14d0   :  { %v2100_v35 = vsub.f32 %v2084_v28, %v2090_v63  ;;  %v1948_v28 = vsub.f32 %v6743_v12, %v6780_v16 }
0x14d2   :  { %v2104_v38 = vmul.f32 1.442695, %v2100_v35 }
0x14d4   :  { %5248 = vpow2.f32 %v2104_v38 }
0x14d5   :  { %5250 = vpow2.f32 %v2108_v5 }
0x14da   :  { %v5249_v25 = vpop.eup %5248 }
0x14db   :  { %v2112_v41 = vsel %vm403_vm1, %v5249_v25, 0.0  ;;  %v5251_v54 = vpop.eup %5250 }
0x14dc   :  { %2113 = vadd.xlane.f32.xlu0 %v2112_v41  ;;  %v2118_v6 = vsel %vm403_vm1, %v5251_v54, 0.0 }
0x14f0   :  { %1981 = vrot.lane.b32.xlu0 %v6613_v62, %s8089_s3  ;;  %v1955_v62 = vmul.f32 1.442695, %v1948_v28 }
0x14f2   :  { %5252 = vpow2.f32 %v1955_v62 }
0x14f8   :  { %v5253_v42 = vpop.eup %5252 }
0x14f9   :  { %v1966_v47 = vsel %vm403_vm1, %v5253_v42, 0.0 }
0x14fa   :  { %v2117_v49 = vpop.xlane.xlu1 %2116 }
0x14fb   :  { %5254 = vrcp.f32 %v2117_v49 }
0x1501   :  { %v5255_v38 = vpop.eup %5254 }
0x1502   :  { %v1824_v50 = vpop.f32.mrf.mxu0  ;;  %v2129_v2 = vmul.f32 %v5255_v38, %v6801_v44 }
0x150a   :  { %v1826_v43 = vpop.f32.mrf.mxu0 }
0x150b   :  { %v1834_v21 = vpack.c.bf16 %v1826_v43, %v1824_v50 }
0x150d   :  { %4951 = vmatmul.msk.bf16.vlgmr.msra.gmra.mxu1 %vm8041_vm14, %v1834_v21 }
0x150e   :  { %2312 = vmatpush.bf16.msra.mxu1 %v6165_v27 }
0x1512   :  { %v2135_v45 = vpop.permute.xlu1 %2134  ;;  %2313 = vmatpush.bf16.msra.mxu1 %v6174_v57 }
0x1513   :  { %2153 = vmatpush.bf16.msrb.mxu3 %v2135_v45  ;;  %v1980_v45 = vpop.permute.xlu2 %1979 }
0x1516   :  { %2314 = vmatpush.bf16.msra.mxu1 %v6183_v61 }
0x151a   :  { %2119 = vadd.xlane.f32.xlu0 %v2118_v6  ;;  %2315 = vmatpush.bf16.msra.mxu1 %v6193_v53 }
0x1522   :  { %1967 = vadd.xlane.f32.xlu0 %v1966_v47 }
0x153a   :  { %v2123_v44 = vpop.xlane.xlu2 %2122 }
0x1548   :  { %v1829_v12 = vpop.f32.mrf.mxu0 }
0x154f   :  { %v2114_v16 = vpop.xlane.xlu0 %2113 }
0x1550   :  { %5256 = vrcp.f32 %v2114_v16  ;;  %v1831_v63 = vpop.f32.mrf.mxu0 }
0x1551   :  { %v1835_v35 = vpack.c.bf16 %v1831_v63, %v1829_v12  ;;  %5258 = vrcp.f32 %v1962_v19 }
0x1552   :  { %5260 = vrcp.f32 %v6808_v39 }
0x1553   :  { %4952 = vmatmul.msk.bf16.gmra.mxu1 %vm8041_vm14, %v1835_v35  ;;  %5262 = vrcp.f32 %v2123_v44 }
0x1556   :  { %v5257_v41 = vpop.eup %5256 }
0x1557   :  { %v2128_v50 = vmul.f32 %v5257_v41, %v5249_v25  ;;  %v5259_v43 = vpop.eup %5258 }
0x1558   :  { %v5261_v49 = vpop.eup %5260  ;;  %v1974_v5 = vmul.f32 %v5259_v43, %v6791_v15 }
0x1559   :  { %v2132_v59 = vpack.c.bf16 %v2129_v2, %v2128_v50  ;;  %v1973_v28 = vmul.f32 %v5261_v49, %v6783_v26  ;;  %v1965_v26 = vpop.xlane.xlu1 %1964  ;;  %v5263_v39 = vpop.eup %5262 }
0x155a   :  { %v2131_v25 = vmul.f32 %v5263_v39, %v6813_v8 }
0x155b   :  { %4963 = vmatmul.msk.bf16.vlgmr.msrb.gmra.mxu3 %vm403_vm1, %v2132_v59  ;;  %v1977_v62 = vpack.c.bf16 %v1974_v5, %v1973_v28 }
0x1562   :  { %v1982_v21 = vpop.permute.xlu0 %1981 }
0x1563   :  { %1997 = vmatpush.bf16.msrb.mxu0 %v1982_v21 }
0x1567   :  { %1998 = vmatpush.bf16.msrb.mxu0 %v1980_v45 }
0x156a   :  { %4957 = vmatmul.msk.bf16.vlgmr.msrb.gmra.mxu0 %vm403_vm1, %v1977_v62 }
0x156b   :  { %2180 = vmatpush.bf16.msra.mxu0 %v6085_v0 }
0x156f   :  { %2515 = vmatpush.bf16.msrb.mxu0 %v6338_v23 }
0x1573   :  { %2516 = vmatpush.bf16.msrb.mxu0 %v6344_v9 }
0x1577   :  { %2517 = vmatpush.bf16.msrb.mxu0 %v6353_v14 }
0x157b   :  { %2518 = vmatpush.bf16.msrb.mxu0 %v6396_v13 }
0x158a   :  { %v1851_v45 = vpop.f32.mrf.mxu1 }
0x158d   :  { %v2120_v15 = vpop.xlane.xlu0 %2119 }
0x158e   :  { %5264 = vrcp.f32 %v2120_v15 }
0x158f   :  { %5266 = vrcp.f32 %v1965_v26  ;;  %v1877_v26 = vadd.f32 %v6749_v34, %v1851_v45 }
0x1592   :  { %v1853_v62 = vpop.f32.mrf.mxu1 }
0x1594   :  { %v5265_v19 = vpop.eup %5264 }
0x1595   :  { %v2130_v6 = vmul.f32 %v5265_v19, %v5251_v54  ;;  %v1968_v47 = vpop.xlane.xlu0 %1967  ;;  %v5267_v16 = vpop.eup %5266 }
0x1596   :  { %5268 = vrcp.f32 %v1968_v47  ;;  %v1975_v35 = vmul.f32 %v5267_v16, %v6811_v7  ;;  %v5501_v16 = vld [vmem:[%s7954_s9] ss:$0 sm:$0xff] }
0x1597   :  { %v2133_v12 = vpack.c.bf16 %v2131_v25, %v2130_v6 }
0x1599   :  { %4964 = vmatmul.msk.bf16.gmra.mxu3 %vm403_vm1, %v2133_v12  ;;  %v1879_v12 = vadd.f32 %v6751_v36, %v1853_v62 }
0x159c   :  { %v5269_v63 = vpop.eup %5268 }
0x159d   :  { %v1976_v38 = vmul.f32 %v5269_v63, %v5253_v42 }
0x159f   :  { %v1978_v41 = vpack.c.bf16 %v1976_v38, %v1975_v35 }
0x15a1   :  { %4958 = vmatmul.msk.bf16.gmra.mxu0 %vm403_vm1, %v1978_v41 }
0x15d0   :  { %v1856_v44 = vpop.f32.mrf.mxu1 }
0x15d1   :  { %v1882_v36 = vadd.f32 %v6753_v37, %v1856_v44 }
0x15d8   :  { %v1858_v15 = vpop.f32.mrf.mxu1 }
0x15de   :  { %v2155_v2 = vpop.f32.mrf.mxu3 }
0x15e6   :  { %v2157_v50 = vpop.f32.mrf.mxu3 }
0x15e7   :  { %v2165_v59 = vpack.c.bf16 %v2157_v50, %v2155_v2  ;;  %v2000_v43 = vpop.f32.mrf.mxu0 }
0x15e9   :  { %4965 = vmatmul.msk.bf16.vlgmr.msra.gmra.mxu0 %vm8041_vm14, %v2165_v59 }
0x15ea   :  { %2714 = vmatpush.bf16.msra.mxu0 %v5774_v46 }
0x15ee   :  { %2715 = vmatpush.bf16.msra.mxu0 %v5792_v52 }
0x15ef   :  { %v2002_v8 = vpop.f32.mrf.mxu0 }
0x15f0   :  { %v2010_v54 = vpack.c.bf16 %v2002_v8, %v2000_v43 }
0x15f2   :  { %4959 = vmatmul.msk.bf16.vlgmr.msrb.gmra.mxu1 %vm8041_vm14, %v2010_v54  ;;  %2716 = vmatpush.bf16.msra.mxu0 %v5810_v58 }
0x15f3   :  { %2541 = vmatpush.bf16.msrb.mxu1 %v6417_v32 }
0x15f6   :  { %2717 = vmatpush.bf16.msra.mxu0 %v5830_v4 }
0x15f7   :  { %2542 = vmatpush.bf16.msrb.mxu1 %v6423_v20 }
0x15fb   :  { %2543 = vmatpush.bf16.msrb.mxu1 %v6432_v40 }
0x15ff   :  { %2544 = vmatpush.bf16.msrb.mxu1 %v6441_v30 }
0x1603   :  { %2545 = vmatpush.bf16.msrb.mxu1 %v6450_v18 }
0x1607   :  { %2546 = vmatpush.bf16.msrb.mxu1 %v6459_v60 }
0x160b   :  { %2547 = vmatpush.bf16.msrb.mxu1 %v6473_v29 }
0x160f   :  { %2548 = vmatpush.bf16.msrb.mxu1 %v6482_v3 }
0x161c   :  { %v2160_v7 = vpop.f32.mrf.mxu3 }
0x161e   :  { %v2005_v42 = vpop.f32.mrf.mxu0 }
0x1624   :  { %v2162_v21 = vpop.f32.mrf.mxu3 }
0x1625   :  { %v2166_v49 = vpack.c.bf16 %v2162_v21, %v2160_v7  ;;  %v1884_v21 = vadd.f32 %v6755_v1, %v1858_v15 }
0x1626   :  { %v2007_v5 = vpop.f32.mrf.mxu0 }
0x1627   :  { %v2011_v28 = vpack.c.bf16 %v2007_v5, %v2005_v42  ;;  %4966 = vmatmul.msk.bf16.gmra.mxu0 %vm8041_vm14, %v2166_v49 }
0x1629   :  { %4960 = vmatmul.msk.bf16.gmra.mxu1 %vm8041_vm14, %v2011_v28 }
0x1666   :  { %v2182_v39 = vpop.f32.mrf.mxu0 }
0x166e   :  { %v2184_v34 = vpop.f32.mrf.mxu0 }
0x166f   :  { %v2027_v19 = vpop.f32.mrf.mxu1 }
0x1670   :  { %v2037_v25 = vadd.f32 %v2027_v19, %v1877_v26 }
0x1672   :  { %v2192_v6 = vadd.f32 %v2182_v39, %v2037_v25 }
0x1674   :  { %v2196_v47 = vadd.f32 %v2192_v6, %v6525_v10 }
0x1676   :  { %v6872_v63 = vadd.f32 %v5501_v16, %v2196_v47 }
0x1677   :  { %v2029_v35 = vpop.f32.mrf.mxu1 }
0x1678   :  { %v2038_v38 = vadd.f32 %v2029_v35, %v1879_v12  ;;  %v2204_v41 = vsel %vm177_vm0, %v6872_v63, 0.0 }
0x1679   :  { %2205 = vadd.xlane.f32.xlu0 %v2204_v41 }
0x167a   :  { %v2193_v2 = vadd.f32 %v2184_v34, %v2038_v38 }
0x167c   :  { %v2197_v50 = vadd.f32 %v2193_v2, %v6538_v56 }
0x167e   :  { %v6877_v59 = vadd.f32 %v5501_v16, %v2197_v50 }
0x1680   :  { %v2207_v10 = vsel %vm177_vm0, %v6877_v59, 0.0 }
0x1681   :  { %2208 = vadd.xlane.f32.xlu0 %v2207_v10 }
0x16a4   :  { %v2187_v43 = vpop.f32.mrf.mxu0 }
0x16a6   :  { %v2032_v8 = vpop.f32.mrf.mxu1 }
0x16a7   :  { %v2039_v54 = vadd.f32 %v2032_v8, %v1882_v36 }
0x16a9   :  { %v2194_v7 = vadd.f32 %v2187_v43, %v2039_v54 }
0x16ab   :  { %v2198_v42 = vadd.f32 %v2194_v7, %v6551_v11 }
0x16ac   :  { %v2189_v45 = vpop.f32.mrf.mxu0 }
0x16ad   :  { %v6884_v49 = vadd.f32 %v5501_v16, %v2198_v42 }
0x16ae   :  { %v2034_v5 = vpop.f32.mrf.mxu1 }
0x16af   :  { %v2040_v56 = vadd.f32 %v2034_v5, %v1884_v21  ;;  %v2210_v28 = vsel %vm177_vm0, %v6884_v49, 0.0 }
0x16b0   :  { %2211 = vadd.xlane.f32.xlu2 %v2210_v28 }
0x16b1   :  { %v2195_v62 = vadd.f32 %v2189_v45, %v2040_v56 }
0x16b3   :  { %v2199_v37 = vadd.f32 %v2195_v62, %v6564_v31 }
0x16b5   :  { %v6889_v44 = vadd.f32 %v5501_v16, %v2199_v37 }
0x16b7   :  { %v2213_v26 = vsel %vm177_vm0, %v6889_v44, 0.0 }
0x16b8   :  { %2214 = vadd.xlane.f32.xlu0 %v2213_v26 }
0x16ec   :  { %v2206_v11 = vpop.xlane.xlu0 %2205 }
0x16ed   :  { %v2216_v1 = vmul.f32 %v2206_v11, %v5735_v22 }
0x16ef   :  { %v2220_v15 = vsub.f32 %v6872_v63, %v2216_v1 }
0x16f1   :  { %v2224_v39 = vmul.f32 %v2220_v15, %v2220_v15 }
0x16f3   :  { %v2228_v19 = vsel %vm177_vm0, %v2224_v39, 0.0 }
0x16f4   :  { %2229 = vadd.xlane.f32.xlu1 %v2228_v19  ;;  %v2209_v25 = vpop.xlane.xlu0 %2208 }
0x16f5   :  { %v2217_v6 = vmul.f32 %v2209_v25, %v5735_v22 }
0x16f7   :  { %v2221_v31 = vsub.f32 %v6877_v59, %v2217_v6 }
0x16f9   :  { %v2225_v47 = vmul.f32 %v2221_v31, %v2221_v31 }
0x16fb   :  { %v2231_v12 = vsel %vm177_vm0, %v2225_v47, 0.0 }
0x16fc   :  { %2232 = vadd.xlane.f32.xlu2 %v2231_v12 }
0x1723   :  { %v2212_v16 = vpop.xlane.xlu2 %2211 }
0x1724   :  { %v2218_v35 = vmul.f32 %v2212_v16, %v5735_v22 }
0x1726   :  { %v6901_v38 = vsub.f32 %v6884_v49, %v2218_v35  ;;  %v5502_v35 = vld [vmem:[%s7955_s10] ss:$0 sm:$0xff] }
0x1728   :  { %v2226_v41 = vmul.f32 %v6901_v38, %v6901_v38 }
0x172a   :  { %v2234_v34 = vsel %vm177_vm0, %v2226_v41, 0.0 }
0x172b   :  { %2235 = vadd.xlane.f32.xlu0 %v2234_v34  ;;  %v2215_v2 = vpop.xlane.xlu0 %2214 }
0x172c   :  { %v2219_v50 = vmul.f32 %v2215_v2, %v5735_v22 }
0x172e   :  { %v6908_v10 = vsub.f32 %v6889_v44, %v2219_v50  ;;  %v5503_v50 = vld [vmem:[%s7956_s11] ss:$0 sm:$0xff] }
0x1730   :  { %v2227_v36 = vmul.f32 %v6908_v10, %v6908_v10 }
0x1732   :  { %v2237_v43 = vsel %vm177_vm0, %v2227_v36, 0.0 }
0x1733   :  { %2238 = vadd.xlane.f32.xlu1 %v2237_v43 }
0x1767   :  { %v2230_v8 = vpop.xlane.xlu1 %2229 }
0x1768   :  { %v2240_v54 = vmul.f32 %v2230_v8, %v5735_v22 }
0x176a   :  { %v2244_v7 = vadd.f32 1e-05, %v2240_v54  ;;  %v8091_v54 = vld [vmem:[#allocation6_spill] sm:$0xff] }
0x176c   :  { %5270 = vrsqrt.f32 %v2244_v7  ;;  %vm2254_vm4 = vweird.f32 %v2244_v7 }
0x176f   :  { %v2233_v42 = vpop.xlane.xlu2 %2232 }
0x1770   :  { %v2241_v21 = vmul.f32 %v2233_v42, %v5735_v22 }
0x1772   :  { %v5271_v5 = vpop.eup %5270  ;;  %v2245_v56 = vadd.f32 1e-05, %v2241_v21 }
0x1773   :  { %v2249_v28 = vmul.f32 %v5271_v5, %v2244_v7  ;;  %vm2255_vm3 = vweird.f32 %v5271_v5  ;;  %v8092_v7 = vld [vmem:[#allocation7_spill] sm:$0xff] }
0x1774   :  { %5272 = vrsqrt.f32 %v2245_v56  ;;  %vm2256_vm5 = vmor %vm2254_vm4, %vm2255_vm3  ;;  %vm2264_vm7 = vweird.f32 %v2245_v56 }
0x1775   :  { %v2250_v45 = vmul.f32 %v5271_v5, %v2249_v28 }
0x1777   :  { %v2251_v62 = vmul.f32 0.5, %v2250_v45 }
0x1779   :  { %v2252_v37 = vsub.f32 1.5, %v2251_v62 }
0x177a   :  { %v5273_v26 = vpop.eup %5272 }
0x177b   :  { %v2253_v11 = vmul.f32 %v5271_v5, %v2252_v37  ;;  %v2259_v1 = vmul.f32 %v5273_v26, %v2245_v56  ;;  %vm2265_vm6 = vweird.f32 %v5273_v26 }
0x177c   :  { %vm2266_vm10 = vmor %vm2264_vm7, %vm2265_vm6 }
0x177d   :  { %v2260_v39 = vmul.f32 %v5273_v26, %v2259_v1  ;;  %v2257_v19 = vsel %vm2256_vm5, %v5271_v5, %v2253_v11 }
0x177e   :  { %v2288_v47 = vmul.f32 %v2257_v19, %v2220_v15  ;;  %v8090_v15 = vld [vmem:[#allocation5_spill] sm:$0xff] }
0x177f   :  { %v2261_v25 = vmul.f32 0.5, %v2260_v39 }
0x1780   :  { %v2292_v41 = vmul.f32 %v5502_v35, %v2288_v47 }
0x1781   :  { %v2262_v6 = vsub.f32 1.5, %v2261_v25 }
0x1782   :  { %v2296_v36 = vadd.f32 %v5503_v50, %v2292_v41 }
0x1783   :  { %v2263_v12 = vmul.f32 %v5273_v26, %v2262_v6 }
0x1785   :  { %v2267_v16 = vsel %vm2266_vm10, %v5273_v26, %v2263_v12 }
0x1786   :  { %v2289_v34 = vmul.f32 %v2267_v16, %v2221_v31 }
0x1788   :  { %v2293_v2 = vmul.f32 %v5502_v35, %v2289_v34 }
0x178a   :  { %v2297_v43 = vadd.f32 %v5503_v50, %v2293_v2 }
0x178c   :  { %v2300_v8 = vpack.c.bf16 %v2297_v43, %v2296_v36 }
0x178e   :  { %4967 = vmatmul.msk.bf16.vlgmr.msra.gmra.mxu1 %vm177_vm0, %v2300_v8 }
0x178f   :  { %2733 = vmatpush.bf16.msra.mxu1 %v5779_v48 }
0x1793   :  { %2734 = vmatpush.bf16.msra.mxu1 %v8090_v15 }
0x1797   :  { %2735 = vmatpush.bf16.msra.mxu1 %v8091_v54 }
0x179b   :  { %2736 = vmatpush.bf16.msra.mxu1 %v8092_v7 }
0x179e   :  { %v2236_v42 = vpop.xlane.xlu0 %2235 }
0x179f   :  { %v2242_v31 = vmul.f32 %v2236_v42, %v5735_v22 }
0x17a1   :  { %v2246_v21 = vadd.f32 1e-05, %v2242_v31 }
0x17a3   :  { %5274 = vrsqrt.f32 %v2246_v21  ;;  %vm2274_vm12 = vweird.f32 %v2246_v21 }
0x17a6   :  { %v2239_v5 = vpop.xlane.xlu1 %2238 }
0x17a7   :  { %v2243_v56 = vmul.f32 %v2239_v5, %v5735_v22  ;;  %v5504_v5 = vld [vmem:[%s7958_s13] ss:$0 sm:$0xff] }
0x17a9   :  { %v5275_v28 = vpop.eup %5274  ;;  %v2247_v45 = vadd.f32 1e-05, %v2243_v56 }
0x17aa   :  { %v2269_v62 = vmul.f32 %v5275_v28, %v2246_v21  ;;  %vm2275_vm11 = vweird.f32 %v5275_v28 }
0x17ab   :  { %5276 = vrsqrt.f32 %v2247_v45  ;;  %vm2276_vm13 = vmor %vm2274_vm12, %vm2275_vm11  ;;  %vm2284_vm3 = vweird.f32 %v2247_v45 }
0x17ac   :  { %v2270_v37 = vmul.f32 %v5275_v28, %v2269_v62 }
0x17ae   :  { %v2271_v26 = vmul.f32 0.5, %v2270_v37 }
0x17b0   :  { %v2272_v11 = vsub.f32 1.5, %v2271_v26 }
0x17b1   :  { %v5277_v1 = vpop.eup %5276 }
0x17b2   :  { %v2273_v39 = vmul.f32 %v5275_v28, %v2272_v11  ;;  %v2279_v19 = vmul.f32 %v5277_v1, %v2247_v45  ;;  %vm2285_vm2 = vweird.f32 %v5277_v1 }
0x17b3   :  { %vm2286_vm4 = vmor %vm2284_vm3, %vm2285_vm2 }
0x17b4   :  { %v2280_v25 = vmul.f32 %v5277_v1, %v2279_v19  ;;  %v2277_v6 = vsel %vm2276_vm13, %v5275_v28, %v2273_v39 }
0x17b5   :  { %v2290_v16 = vmul.f32 %v2277_v6, %v6901_v38 }
0x17b6   :  { %v2281_v47 = vmul.f32 0.5, %v2280_v25 }
0x17b7   :  { %v2294_v36 = vmul.f32 %v5502_v35, %v2290_v16 }
0x17b8   :  { %v2282_v12 = vsub.f32 1.5, %v2281_v47 }
0x17b9   :  { %v2298_v8 = vadd.f32 %v5503_v50, %v2294_v36 }
0x17ba   :  { %v2283_v41 = vmul.f32 %v5277_v1, %v2282_v12 }
0x17bc   :  { %v2287_v34 = vsel %vm2286_vm4, %v5277_v1, %v2283_v41 }
0x17bd   :  { %v2291_v2 = vmul.f32 %v2287_v34, %v6908_v10 }
0x17bf   :  { %v2295_v43 = vmul.f32 %v5502_v35, %v2291_v2 }
0x17c1   :  { %v2299_v42 = vadd.f32 %v5503_v50, %v2295_v43 }
0x17c3   :  { %v2301_v31 = vpack.c.bf16 %v2299_v42, %v2298_v8 }
0x17c5   :  { %4968 = vmatmul.msk.bf16.gmra.mxu1 %vm177_vm0, %v2301_v31 }
0x180b   :  { %v2317_v21 = vpop.f32.mrf.mxu1 }
0x180c   :  { %v2318_v56 = vadd.f32 %v5504_v5, %v2317_v21 }
0x180e   :  { %v2331_v38 = vmul.f32 0.044715, %v2318_v56  ;;  %v2327_v47 = vmul.f32 0.5, %v2318_v56 }
0x1810   :  { %v2335_v28 = vmul.f32 %v2331_v38, %v2318_v56 }
0x1812   :  { %v2339_v45 = vmul.f32 %v2335_v28, %v2318_v56 }
0x1813   :  { %v2319_v62 = vpop.f32.mrf.mxu1 }
0x1814   :  { %v2343_v37 = vadd.f32 %v2339_v45, %v2318_v56  ;;  %v2320_v26 = vadd.f32 %v5504_v5, %v2319_v62 }
0x1816   :  { %v2332_v10 = vmul.f32 0.044715, %v2320_v26  ;;  %v2347_v11 = vmul.f32 0.7978846, %v2343_v37  ;;  %v2328_v12 = vmul.f32 0.5, %v2320_v26 }
0x1818   :  { %v2336_v35 = vmul.f32 %v2332_v10, %v2320_v26  ;;  %5278 = vtanh.f32 %v2347_v11 }
0x181a   :  { %v2340_v1 = vmul.f32 %v2336_v35, %v2320_v26 }
0x181c   :  { %v2344_v50 = vadd.f32 %v2340_v1, %v2320_v26 }
0x181e   :  { %v2348_v39 = vmul.f32 0.7978846, %v2344_v50  ;;  %v5279_v19 = vpop.eup %5278 }
0x181f   :  { %v2355_v25 = vadd.f32 1.0, %v5279_v19 }
0x1820   :  { %5280 = vtanh.f32 %v2348_v39 }
0x1821   :  { %v2359_v41 = vmul.f32 %v2355_v25, %v2327_v47 }
0x1826   :  { %v5281_v6 = vpop.eup %5280 }
0x1827   :  { %v2356_v16 = vadd.f32 1.0, %v5281_v6 }
0x1829   :  { %v2360_v34 = vmul.f32 %v2356_v16, %v2328_v12  ;;  %v5505_v12 = vld [vmem:[%s7960_s15] ss:$0 sm:$0xff] }
0x182b   :  { %v2363_v2 = vpack.c.bf16 %v2360_v34, %v2359_v41 }
0x182d   :  { %2373 = vmatmul.bf16.vlgmr.msra.gmra.mxu2 %v2363_v2 }
0x1842   :  { %v2322_v36 = vpop.f32.mrf.mxu1 }
0x1843   :  { %v2323_v43 = vadd.f32 %v5504_v5, %v2322_v36 }
0x1845   :  { %v2333_v8 = vmul.f32 0.044715, %v2323_v43  ;;  %v2329_v50 = vmul.f32 0.5, %v2323_v43 }
0x1847   :  { %v2337_v42 = vmul.f32 %v2333_v8, %v2323_v43 }
0x1849   :  { %v2341_v31 = vmul.f32 %v2337_v42, %v2323_v43 }
0x184a   :  { %v2324_v21 = vpop.f32.mrf.mxu1 }
0x184b   :  { %v2325_v38 = vadd.f32 %v5504_v5, %v2324_v21  ;;  %v2345_v28 = vadd.f32 %v2341_v31, %v2323_v43 }
0x184d   :  { %v2334_v45 = vmul.f32 0.044715, %v2325_v38  ;;  %v2349_v37 = vmul.f32 0.7978846, %v2345_v28  ;;  %v2330_v39 = vmul.f32 0.5, %v2325_v38 }
0x184f   :  { %v2338_v62 = vmul.f32 %v2334_v45, %v2325_v38  ;;  %5282 = vtanh.f32 %v2349_v37 }
0x1851   :  { %v2342_v10 = vmul.f32 %v2338_v62, %v2325_v38 }
0x1853   :  { %v2346_v11 = vadd.f32 %v2342_v10, %v2325_v38 }
0x1855   :  { %v2350_v56 = vmul.f32 0.7978846, %v2346_v11  ;;  %v5283_v26 = vpop.eup %5282 }
0x1856   :  { %v2357_v35 = vadd.f32 1.0, %v5283_v26 }
0x1857   :  { %5284 = vtanh.f32 %v2350_v56 }
0x1858   :  { %v2361_v25 = vmul.f32 %v2357_v35, %v2329_v50 }
0x185d   :  { %v5285_v1 = vpop.eup %5284 }
0x185e   :  { %v2358_v19 = vadd.f32 1.0, %v5285_v1 }
0x1860   :  { %v2362_v6 = vmul.f32 %v2358_v19, %v2330_v39 }
0x1862   :  { %v2364_v47 = vpack.c.bf16 %v2362_v6, %v2361_v25 }
0x1864   :  { %2378 = vmatmul.bf16.gmra.mxu2 %v2364_v47 }
0x18b0   :  { %v2374_v5 = vpop.f32.mrf.mxu2 }
0x18b1   :  { %v2375_v16 = vadd.f32 %v5505_v12, %v2374_v5 }
0x18b3   :  { %v2384_v41 = vadd.f32 %v2375_v16, %v6872_v63 }
0x18b5   :  { %v2388_v34 = vsel %vm177_vm0, %v2384_v41, 0.0 }
0x18b6   :  { %2389 = vadd.xlane.f32.xlu1 %v2388_v34 }
0x18b8   :  { %v2376_v2 = vpop.f32.mrf.mxu2 }
0x18b9   :  { %v2377_v42 = vadd.f32 %v5505_v12, %v2376_v2 }
0x18bb   :  { %v2385_v28 = vadd.f32 %v2377_v42, %v6877_v59 }
0x18bd   :  { %v2391_v62 = vsel %vm177_vm0, %v2385_v28, 0.0 }
0x18e7   :  { %v2379_v36 = vpop.f32.mrf.mxu2 }
0x18e8   :  { %v2380_v43 = vadd.f32 %v5505_v12, %v2379_v36 }
0x18ea   :  { %v2386_v8 = vadd.f32 %v2380_v43, %v6884_v49 }
0x18ec   :  { %v2394_v31 = vsel %vm177_vm0, %v2386_v8, 0.0 }
0x18ed   :  { %2395 = vadd.xlane.f32.xlu2 %v2394_v31 }
0x18ef   :  { %v2381_v21 = vpop.f32.mrf.mxu2 }
0x18f0   :  { %v2382_v38 = vadd.f32 %v5505_v12, %v2381_v21 }
0x18f2   :  { %v2387_v45 = vadd.f32 %v2382_v38, %v6889_v44 }
0x18f4   :  { %v2397_v63 = vsel %vm177_vm0, %v2387_v45, 0.0 }
0x18f5   :  { %2398 = vadd.xlane.f32.xlu0 %v2397_v63  ;;  %2392 = vadd.xlane.f32.xlu2 %v2391_v62 }
0x1929   :  { %v2390_v37 = vpop.xlane.xlu1 %2389 }
0x192a   :  { %v2400_v10 = vmul.f32 %v2390_v37, %v5735_v22 }
0x192c   :  { %v6946_v49 = vsub.f32 %v2384_v41, %v2400_v10 }
0x192e   :  { %v2408_v11 = vmul.f32 %v6946_v49, %v6946_v49 }
0x1930   :  { %v2412_v56 = vsel %vm177_vm0, %v2408_v11, 0.0 }
0x1931   :  { %2413 = vadd.xlane.f32.xlu2 %v2412_v56 }
0x1960   :  { %v2396_v59 = vpop.xlane.xlu2 %2395 }
0x1961   :  { %v2402_v44 = vmul.f32 %v2396_v59, %v5735_v22 }
0x1963   :  { %v2406_v26 = vsub.f32 %v2386_v8, %v2402_v44 }
0x1965   :  { %v2410_v35 = vmul.f32 %v2406_v26, %v2406_v26 }
0x1967   :  { %v2418_v1 = vsel %vm177_vm0, %v2410_v35, 0.0 }
0x1968   :  { %v2399_v50 = vpop.xlane.xlu0 %2398  ;;  %2419 = vadd.xlane.f32.xlu0 %v2418_v1  ;;  %v2393_v39 = vpop.xlane.xlu2 %2392 }
0x1969   :  { %v2403_v19 = vmul.f32 %v2399_v50, %v5735_v22  ;;  %v2401_v25 = vmul.f32 %v2393_v39, %v5735_v22 }
0x196b   :  { %v6955_v6 = vsub.f32 %v2387_v45, %v2403_v19  ;;  %v6957_v47 = vsub.f32 %v2385_v28, %v2401_v25 }
0x196d   :  { %v2411_v5 = vmul.f32 %v6955_v6, %v6955_v6  ;;  %v2409_v12 = vmul.f32 %v6957_v47, %v6957_v47 }
0x196f   :  { %v2421_v16 = vsel %vm177_vm0, %v2411_v5, 0.0  ;;  %v2415_v41 = vsel %vm177_vm0, %v2409_v12, 0.0 }
0x1970   :  { %2422 = vadd.xlane.f32.xlu1 %v2421_v16  ;;  %2416 = vadd.xlane.f32.xlu0 %v2415_v41 }
0x19a4   :  { %v2414_v34 = vpop.xlane.xlu2 %2413 }
0x19a5   :  { %v2424_v2 = vmul.f32 %v2414_v34, %v5735_v22 }
0x19a7   :  { %v2428_v36 = vadd.f32 1e-05, %v2424_v2 }
0x19a9   :  { %5286 = vrsqrt.f32 %v2428_v36  ;;  %vm2438_vm11 = vweird.f32 %v2428_v36 }
0x19af   :  { %v5287_v31 = vpop.eup %5286 }
0x19b0   :  { %v2433_v21 = vmul.f32 %v5287_v31, %v2428_v36  ;;  %vm2439_vm10 = vweird.f32 %v5287_v31 }
0x19b1   :  { %vm6969_vm13 = vmor %vm2438_vm11, %vm2439_vm10 }
0x19b2   :  { %v2434_v11 = vmul.f32 %v5287_v31, %v2433_v21 }
0x19b4   :  { %v2435_v44 = vmul.f32 0.5, %v2434_v11 }
0x19b6   :  { %v2436_v19 = vsub.f32 1.5, %v2435_v44 }
0x19b8   :  { %v2437_v34 = vmul.f32 %v5287_v31, %v2436_v19 }
0x19db   :  { %v2420_v43 = vpop.xlane.xlu0 %2419 }
0x19dc   :  { %v2426_v8 = vmul.f32 %v2420_v43, %v5735_v22 }
0x19de   :  { %v2430_v42 = vadd.f32 1e-05, %v2426_v8 }
0x19e0   :  { %5288 = vrsqrt.f32 %v2430_v42  ;;  %vm2458_vm6 = vweird.f32 %v2430_v42 }
0x19e3   :  { %v2423_v38 = vpop.xlane.xlu1 %2422  ;;  %v2417_v28 = vpop.xlane.xlu0 %2416 }
0x19e4   :  { %v2427_v45 = vmul.f32 %v2423_v38, %v5735_v22  ;;  %v2425_v63 = vmul.f32 %v2417_v28, %v5735_v22  ;;  %v5508_v38 = vld [vmem:[%s7964_s19] ss:$0 sm:$0xff] }
0x19e6   :  { %v5289_v62 = vpop.eup %5288  ;;  %v2431_v37 = vadd.f32 1e-05, %v2427_v45  ;;  %v2429_v10 = vadd.f32 1e-05, %v2425_v63 }
0x19e7   :  { %v2453_v56 = vmul.f32 %v5289_v62, %v2430_v42  ;;  %vm2459_vm5 = vweird.f32 %v5289_v62  ;;  %v2441_v42 = vsel %vm6969_vm13, %v5287_v31, %v2437_v34  ;;  %v8095_v31 = vld [vmem:[#allocation22_spill] sm:$0xff] }
0x19e8   :  { %5290 = vrsqrt.f32 %v2431_v37  ;;  %vm2460_vm7 = vmor %vm2458_vm6, %vm2459_vm5  ;;  %vm2468_vm3 = vweird.f32 %v2431_v37  ;;  %vm2448_vm5 = vweird.f32 %v2429_v10  ;;  %v2472_v44 = vmul.f32 %v2441_v42, %v6946_v49 }
0x19e9   :  { %v2454_v59 = vmul.f32 %v5289_v62, %v2453_v56  ;;  %5292 = vrsqrt.f32 %v2429_v10  ;;  %v8097_v49 = vmov 0.0  }
0x19eb   :  { %v2455_v35 = vmul.f32 0.5, %v2454_v59  ;;  %v5506_v59 = vld [vmem:[%s8075_s8] ss:$0 sm:$0xff] }
0x19ed   :  { %v2456_v1 = vsub.f32 1.5, %v2455_v35 }
0x19ee   :  { %v5291_v50 = vpop.eup %5290 }
0x19ef   :  { %v5293_v39 = vpop.eup %5292  ;;  %v2457_v25 = vmul.f32 %v5289_v62, %v2456_v1  ;;  %v2463_v5 = vmul.f32 %v5291_v50, %v2431_v37  ;;  %vm2469_vm12 = vweird.f32 %v5291_v50  ;;  %v2484_v1 = vadd.s32 12, %v8095_v31 }
0x19f0   :  { %v2443_v12 = vmul.f32 %v5293_v39, %v2429_v10  ;;  %vm2449_vm2 = vweird.f32 %v5293_v39  ;;  %vm2470_vm4 = vmor %vm2468_vm3, %vm2469_vm12  ;;  %v5507_v10 = vld [vmem:[%s7962_s17] ss:$0 sm:$0xff] }
0x19f1   :  { %v2464_v16 = vmul.f32 %v5291_v50, %v2463_v5  ;;  %v2461_v2 = vsel %vm2460_vm7, %v5289_v62, %v2457_v25  ;;  %vm2450_vm6 = vmor %vm2448_vm5, %vm2449_vm2  ;;  %v8096_v25 = vld [vmem:[#allocation23_spill] sm:$0xff] }
0x19f2   :  { %v2444_v41 = vmul.f32 %v5293_v39, %v2443_v12  ;;  %v2474_v28 = vmul.f32 %v2461_v2, %v2406_v26  ;;  %vm2485_vm7 = vcmp.eq.s32.totalorder %v8096_v25, %v2484_v1  ;;  %vm1351_vm12 = vcmp.eq.s32.totalorder %v8096_v25, 0  ;;  %v8099_v1 = vld [vmem:[#allocation25_spill] sm:$0xff] }
0x19f3   :  { %v2465_v43 = vmul.f32 0.5, %v2464_v16  ;;  %vm2533_vm13 = vcmp.eq.s32.totalorder %v8096_v25, 1 }
0x19f4   :  { %v2445_v8 = vmul.f32 0.5, %v2444_v41  ;;  %v2478_v26 = vmul.f32 %v5506_v59, %v2474_v28  ;;  %v4969_v41 = vsel %vm2485_vm7, 1.0, %v8097_v49 }
0x19f5   :  { %v2466_v21 = vsub.f32 1.5, %v2465_v43  ;;  %v2488_v34 = vpack.c.bf16 %v4969_v41, %v4969_v41 }
0x19f6   :  { %v2446_v45 = vsub.f32 1.5, %v2445_v8 }
0x19f7   :  { %v2467_v63 = vmul.f32 %v5291_v50, %v2466_v21 }
0x19f8   :  { %v2447_v11 = vmul.f32 %v5293_v39, %v2446_v45 }
0x19f9   :  { %v2471_v62 = vsel %vm2470_vm4, %v5291_v50, %v2467_v63  ;;  %v2482_v50 = vadd.f32 %v5507_v10, %v2478_v26 }
0x19fa   :  { %v2475_v36 = vmul.f32 %v2471_v62, %v6955_v6  ;;  %v2451_v56 = vsel %vm2450_vm6, %v5293_v39, %v2447_v11  ;;  %v2476_v39 = vmul.f32 %v5506_v59, %v2472_v44  ;;  %v8098_v11 = vld [vmem:[#allocation24_spill] sm:$0xff] }
0x19fb   :  { %v2473_v35 = vmul.f32 %v2451_v56, %v6957_v47 }
0x19fc   :  { %v2479_v37 = vmul.f32 %v5506_v59, %v2475_v36  ;;  %v2480_v16 = vadd.f32 %v5507_v10, %v2476_v39 }
0x19fd   :  { %v2477_v19 = vmul.f32 %v5506_v59, %v2473_v35 }
0x19fe   :  { %v2483_v6 = vadd.f32 %v5507_v10, %v2479_v37  ;;  %v8100_v37 = vcvt.f32.s32 %v8099_v1 }
0x19ff   :  { %v2481_v12 = vadd.f32 %v5507_v10, %v2477_v19 }
0x1a00   :  { %v2490_v5 = vpack.c.bf16 %v2483_v6, %v2482_v50  ;;  %v1354_v19 = vsel %vm1351_vm12, %v8100_v37, 0  ;;  %v8102_v50 = vmov 1.0|1.0   ;;  %v8103_v6 = vld [vmem:[#allocation26_spill] sm:$0xff] }
0x1a01   :  { %v2489_v47 = vpack.c.bf16 %v2481_v12, %v2480_v16  ;;  %v2554_v39 = vadd.s32 13, %v8103_v6  ;;  %v8105_v12 = vld [vmem:[#allocation27_spill] sm:$0xff]  ;;  %v5510_v37 = vld [vmem:[%s8049_s26 + $0x8] sm:$0xff] }
0x1a02   :  { %2500 = vmatpush.bf16.msra.mxu3 %v2490_v5  ;;  %v8104_v5 = vld [vmem:[#allocation21_spill] sm:$0xff] }
0x1a03   :  { %vm2555_vm4 = vcmp.eq.s32.totalorder %v8104_v5, %v2554_v39  ;;  %vm2556_vm5 = vcmp.eq.s32.totalorder %v8105_v12, %v2554_v39 }
0x1a04   :  { %v4975_v41 = vsel %vm2555_vm4, 1.0, %v8097_v49 }
0x1a06   :  { %2501 = vmatpush.bf16.msra.mxu3 %v2489_v47  ;;  %v4976_v47 = vsel %vm2556_vm5, 1.0, %v8097_v49 }
0x1a09   :  { %4970 = vmatmul.msk.bf16.vlgmr.msra.gmra.mxu3 %vm403_vm1, %v2488_v34 }
0x1a8c   :  { %v2503_v2 = vpop.f32.mrf.mxu3 }
0x1a8d   :  { %v2507_v43 = vpack.c.bf16 %v2503_v2, %v2503_v2 }
0x1a8f   :  { %4971 = vmatmul.msk.bf16.vlgmr.msrb.gmra.mxu0 %vm177_vm0, %v2507_v43  ;;  %v2567_v43 = vpack.c.bf16 %v4976_v47, %v4975_v41  ;;  %v8112_v41 = vld [vmem:[#allocation32_spill] sm:$0xff] }
0x1a94   :  { %v2505_v8 = vpop.f32.mrf.mxu3 }
0x1b0c   :  { %v2520_v21 = vpop.f32.mrf.mxu0 }
0x1b0d   :  { %v2521_v28 = vadd.f32 %v5508_v38, %v2520_v21  ;;  %v8106_v21 = vld [vmem:[#allocation28_spill] sm:$0xff]  ;;  %v8107_v38 = vld [vmem:[#allocation29_spill] sm:$0xff] }
0x1b0e   :  { %vm2557_vm6 = vcmp.eq.s32.totalorder %v8106_v21, %v2554_v39  ;;  %vm2558_vm7 = vcmp.eq.s32.totalorder %v8107_v38, %v2554_v39 }
0x1b0f   :  { %v2524_v45 = vsel %vm1340_vm15, %v2521_v28, -inf }
0x1b10   :  { %2525 = vmax.xlane.f32.xlu1 %v2524_v45  ;;  %v4978_v45 = vsel %vm2558_vm7, 1.0, %v8097_v49 }
0x1b14   :  { %v2522_v42 = vpop.f32.mrf.mxu0 }
0x1b83   :  { %v2526_v63 = vpop.xlane.xlu1 %2525 }
0x1b84   :  { %vm2527_vm10 = vcmp.ge.f32.partialorder %v2521_v28, %v2526_v63  ;;  %v4977_v28 = vsel %vm2557_vm6, 1.0, %v8097_v49 }
0x1b85   :  { %v2528_v62 = vsel %vm2527_vm10, %v8098_v11, 128.0  ;;  %v2568_v42 = vpack.c.bf16 %v4978_v45, %v4977_v28  ;;  %v8114_v28 = vld [vmem:[#allocation33_spill] sm:$0xff] }
0x1b86   :  { %v2529_v36 = vsel %vm1340_vm15, %v2528_v62, inf  ;;  %v8108_v62 = vld [vmem:[#allocation30_spill] sm:$0xff] }
0x1b87   :  { %2530 = vmin.xlane.f32.xlu2 %v2529_v36 }
0x1bfa   :  { %v2531_v56 = vpop.xlane.xlu2 %2530 }
0x1bfb   :  { %vm5063_vm11 = vcmp.lt.s32.totalorder %v2531_v56, 0  ;;  %v5064_v59 = vceil.f32 %v2531_v56  ;;  %v5065_v26 = vfloor.f32 %v2531_v56  ;;  %v5509_v56 = vld [vmem:[%s8049_s26] sm:$0xff] }
0x1bfd   :  { %v5066_v44 = vsel %vm5063_vm11, %v5064_v59, %v5065_v26 }
0x1bfe   :  { %v5067_v35 = vcvt.f32.s32 %v5066_v44 }
0x1c00   :  { %vm2537_vm2 = vcmp.eq.s32.totalorder %v8096_v25, %v5067_v35  ;;  %v7000_v10 = vsel %vm2533_vm13, %v5067_v35, %v1354_v19  ;;  %v8110_v35 = vld [vmem:[#allocation31_spill] sm:$0xff] }
0x1c01   :  { %8101 = vst [vmem:[#allocation5_spill] sm:$0xff] %v7000_v10  ;;  %vm4973_vm3 = vmpackc.low %vm2537_vm2, %vm2537_vm2 }
0x1c02   :  { %4974 = vmatmul.msk.bf16.vlgmr.msrb.gmra.mxu1 %vm4973_vm3, %v8102_v50 }
0x1c7f   :  { %v2550_v16 = vpop.f32.mrf.mxu1 }
0x1c80   :  { %v2569_v34 = vpack.c.bf16 %v2550_v16, %v2550_v16 }
0x1c82   :  { %v2577_v2 = vsel %vm1404_vm8, %v2569_v34, 0  ;;  %v5511_v34 = vld [vmem:[%s8049_s26 + $0x10] sm:$0xff] }
0x1c83   :  { %2586 = vmatpush.bf16.msrb.mxu3 %v2577_v2 }
0x1c86   :  { %4979 = vmatmul.msk.bf16.vlgmr.msrb.gmra.mxu3 %vm1397_vm9, %v2567_v43 }
0x1c87   :  { %v2552_v8 = vpop.f32.mrf.mxu1 }
0x1c96   :  { %4980 = vmatmul.msk.bf16.gmra.mxu3 %vm1397_vm9, %v2568_v42  ;;  %v5512_v42 = vld [vmem:[%s8049_s26 + $0x18] sm:$0xff] }
0x1d09   :  { %v2588_v63 = vpop.f32.mrf.mxu3 }
0x1d0a   :  { %v7016_v36 = vadd.f32 %v2588_v63, %v8108_v62 }
0x1d0c   :  { %8109 = vst [vmem:[#allocation6_spill] sm:$0xff] %v7016_v36  ;;  %v7022_v59 = vadd.f32 %v5509_v56, %v7016_v36 }
0x1d0e   :  { %v2606_v26 = vsel %vm177_vm0, %v7022_v59, 0.0 }
0x1d0f   :  { %2607 = vadd.xlane.f32.xlu0 %v2606_v26 }
0x1d11   :  { %v2590_v44 = vpop.f32.mrf.mxu3 }
0x1d12   :  { %v7027_v1 = vadd.f32 %v2590_v44, %v8110_v35 }
0x1d14   :  { %8111 = vst [vmem:[#allocation7_spill] sm:$0xff] %v7027_v1  ;;  %v7033_v19 = vadd.f32 %v5510_v37, %v7027_v1 }
0x1d16   :  { %v2609_v39 = vsel %vm177_vm0, %v7033_v19, 0.0 }
0x1d17   :  { %2610 = vadd.xlane.f32.xlu1 %v2609_v39 }
0x1d19   :  { %v2593_v16 = vpop.f32.mrf.mxu3 }
0x1d1a   :  { %v7038_v47 = vadd.f32 %v2593_v16, %v8112_v41 }
0x1d1c   :  { %8113 = vst [vmem:[#allocation22_spill] sm:$0xff] %v7038_v47  ;;  %v7044_v2 = vadd.f32 %v5511_v34, %v7038_v47 }
0x1d1e   :  { %v2612_v43 = vsel %vm177_vm0, %v7044_v2, 0.0 }
0x1d1f   :  { %2613 = vadd.xlane.f32.xlu2 %v2612_v43 }
0x1d21   :  { %v2595_v8 = vpop.f32.mrf.mxu3 }
0x1d22   :  { %v7049_v45 = vadd.f32 %v2595_v8, %v8114_v28 }
0x1d24   :  { %8115 = vst [vmem:[#allocation25_spill] sm:$0xff] %v7049_v45  ;;  %v7055_v63 = vadd.f32 %v5512_v42, %v7049_v45 }
0x1d26   :  { %v2615_v62 = vsel %vm177_vm0, %v7055_v63, 0.0 }
0x1d27   :  { %2616 = vadd.xlane.f32.xlu0 %v2615_v62 }
0x1d82   :  { %v2608_v56 = vpop.xlane.xlu0 %2607 }
0x1d83   :  { %v2618_v26 = vmul.f32 %v2608_v56, %v5735_v22 }
0x1d85   :  { %v2622_v44 = vsub.f32 %v7022_v59, %v2618_v26 }
0x1d87   :  { %v2626_v35 = vmul.f32 %v2622_v44, %v2622_v44 }
0x1d89   :  { %v2630_v37 = vsel %vm177_vm0, %v2626_v35, 0.0 }
0x1d8a   :  { %2631 = vadd.xlane.f32.xlu1 %v2630_v37  ;;  %v2611_v39 = vpop.xlane.xlu1 %2610 }
0x1d8b   :  { %v2619_v16 = vmul.f32 %v2611_v39, %v5735_v22 }
0x1d8d   :  { %v2623_v41 = vsub.f32 %v7033_v19, %v2619_v16 }
0x1d8f   :  { %v2627_v34 = vmul.f32 %v2623_v41, %v2623_v41 }
0x1d91   :  { %v2633_v43 = vsel %vm177_vm0, %v2627_v34, 0.0 }
0x1d92   :  { %2634 = vadd.xlane.f32.xlu2 %v2633_v43  ;;  %v2614_v8 = vpop.xlane.xlu2 %2613 }
0x1d93   :  { %v2620_v28 = vmul.f32 %v2614_v8, %v5735_v22 }
0x1d95   :  { %v7067_v42 = vsub.f32 %v7044_v2, %v2620_v28 }
0x1d97   :  { %v2628_v62 = vmul.f32 %v7067_v42, %v7067_v42 }
0x1d99   :  { %v2636_v56 = vsel %vm177_vm0, %v2628_v62, 0.0 }
0x1d9a   :  { %2637 = vadd.xlane.f32.xlu0 %v2636_v56  ;;  %v2617_v26 = vpop.xlane.xlu0 %2616 }
0x1d9b   :  { %v2621_v35 = vmul.f32 %v2617_v26, %v5735_v22 }
0x1d9d   :  { %v7074_v37 = vsub.f32 %v7055_v63, %v2621_v35 }
0x1d9f   :  { %v2629_v39 = vmul.f32 %v7074_v37, %v7074_v37 }
0x1da1   :  { %v2639_v16 = vsel %vm177_vm0, %v2629_v39, 0.0 }
0x1da2   :  { %2640 = vadd.xlane.f32.xlu1 %v2639_v16 }
0x1dfd   :  { %v2632_v34 = vpop.xlane.xlu1 %2631 }
0x1dfe   :  { %v2642_v43 = vmul.f32 %v2632_v34, %v5735_v22 }
0x1e00   :  { %v2646_v8 = vadd.f32 1e-05, %v2642_v43 }
0x1e02   :  { %5294 = vrsqrt.f32 %v2646_v8  ;;  %vm2656_vm11 = vweird.f32 %v2646_v8 }
0x1e05   :  { %v2635_v28 = vpop.xlane.xlu2 %2634 }
0x1e06   :  { %v2643_v62 = vmul.f32 %v2635_v28, %v5735_v22 }
0x1e08   :  { %v5295_v56 = vpop.eup %5294  ;;  %v2647_v45 = vadd.f32 1e-05, %v2643_v62 }
0x1e09   :  { %v2651_v26 = vmul.f32 %v5295_v56, %v2646_v8  ;;  %vm2657_vm10 = vweird.f32 %v5295_v56 }
0x1e0a   :  { %5296 = vrsqrt.f32 %v2647_v45  ;;  %vm2658_vm12 = vmor %vm2656_vm11, %vm2657_vm10  ;;  %vm2666_vm2 = vweird.f32 %v2647_v45 }
0x1e0b   :  { %v2652_v35 = vmul.f32 %v5295_v56, %v2651_v26 }
0x1e0d   :  { %v2653_v47 = vmul.f32 0.5, %v2652_v35  ;;  %v2638_v1 = vpop.xlane.xlu0 %2637 }
0x1e0e   :  { %v2644_v36 = vmul.f32 %v2638_v1, %v5735_v22 }
0x1e0f   :  { %v2654_v38 = vsub.f32 1.5, %v2653_v47 }
0x1e10   :  { %v5297_v39 = vpop.eup %5296  ;;  %v2648_v16 = vadd.f32 1e-05, %v2644_v36 }
0x1e11   :  { %v2655_v21 = vmul.f32 %v5295_v56, %v2654_v38  ;;  %v2661_v34 = vmul.f32 %v5297_v39, %v2647_v45  ;;  %vm2667_vm13 = vweird.f32 %v5297_v39 }
0x1e12   :  { %5298 = vrsqrt.f32 %v2648_v16  ;;  %vm2668_vm3 = vmor %vm2666_vm2, %vm2667_vm13  ;;  %vm2676_vm5 = vweird.f32 %v2648_v16 }
0x1e13   :  { %v2662_v43 = vmul.f32 %v5297_v39, %v2661_v34  ;;  %v2659_v28 = vsel %vm2658_vm12, %v5295_v56, %v2655_v21  ;;  %v5513_v21 = vld [vmem:[%s8054_s4] ss:$0 sm:$0xff] }
0x1e14   :  { %v2690_v6 = vmul.f32 %v2659_v28, %v2622_v44 }
0x1e15   :  { %v2663_v12 = vmul.f32 0.5, %v2662_v43  ;;  %v2641_v62 = vpop.xlane.xlu1 %2640 }
0x1e16   :  { %v2645_v5 = vmul.f32 %v2641_v62, %v5735_v22  ;;  %v2694_v8 = vmul.f32 %v5513_v21, %v2690_v6 }
0x1e17   :  { %v2664_v26 = vsub.f32 1.5, %v2663_v12 }
0x1e18   :  { %v5299_v35 = vpop.eup %5298  ;;  %v2649_v1 = vadd.f32 1e-05, %v2645_v5  ;;  %v5514_v5 = vld [vmem:[%s8055_s22] ss:$0 sm:$0xff] }
0x1e19   :  { %v2665_v47 = vmul.f32 %v5297_v39, %v2664_v26  ;;  %v2671_v36 = vmul.f32 %v5299_v35, %v2648_v16  ;;  %v2698_v45 = vadd.f32 %v5514_v5, %v2694_v8  ;;  %vm2677_vm4 = vweird.f32 %v5299_v35 }
0x1e1a   :  { %5300 = vrsqrt.f32 %v2649_v1  ;;  %vm2678_vm6 = vmor %vm2676_vm5, %vm2677_vm4  ;;  %vm2686_vm10 = vweird.f32 %v2649_v1 }
0x1e1b   :  { %v2669_v38 = vsel %vm2668_vm3, %v5297_v39, %v2665_v47  ;;  %v2672_v50 = vmul.f32 %v5299_v35, %v2671_v36 }
0x1e1c   :  { %v2691_v56 = vmul.f32 %v2669_v38, %v2623_v41 }
0x1e1d   :  { %v2673_v34 = vmul.f32 0.5, %v2672_v50 }
0x1e1e   :  { %v2695_v43 = vmul.f32 %v5513_v21, %v2691_v56 }
0x1e1f   :  { %v2674_v12 = vsub.f32 1.5, %v2673_v34 }
0x1e20   :  { %v5301_v62 = vpop.eup %5300  ;;  %v2699_v44 = vadd.f32 %v5514_v5, %v2695_v43 }
0x1e21   :  { %v2675_v28 = vmul.f32 %v5299_v35, %v2674_v12  ;;  %v2681_v39 = vmul.f32 %v5301_v62, %v2649_v1  ;;  %vm2687_vm7 = vweird.f32 %v5301_v62 }
0x1e22   :  { %v2702_v26 = vpack.c.bf16 %v2699_v44, %v2698_v45  ;;  %vm2688_vm11 = vmor %vm2686_vm10, %vm2687_vm7 }
0x1e23   :  { %v2682_v47 = vmul.f32 %v5301_v62, %v2681_v39  ;;  %v2679_v50 = vsel %vm2678_vm6, %v5299_v35, %v2675_v28 }
0x1e24   :  { %4981 = vmatmul.msk.bf16.vlgmr.msra.gmra.mxu0 %vm177_vm0, %v2702_v26  ;;  %4983 = vmatmul.msk.bf16.vlgmr.msra.gmra.mxu1 %vm177_vm0, %v2702_v26  ;;  %v2692_v36 = vmul.f32 %v2679_v50, %v7067_v42 }
0x1e25   :  { %v2683_v6 = vmul.f32 0.5, %v2682_v47 }
0x1e26   :  { %v2696_v34 = vmul.f32 %v5513_v21, %v2692_v36 }
0x1e27   :  { %v2684_v41 = vsub.f32 1.5, %v2683_v6 }
0x1e28   :  { %v2700_v43 = vadd.f32 %v5514_v5, %v2696_v34 }
0x1e29   :  { %v2685_v38 = vmul.f32 %v5301_v62, %v2684_v41 }
0x1e2b   :  { %v2689_v8 = vsel %vm2688_vm11, %v5301_v62, %v2685_v38 }
0x1e2c   :  { %v2693_v56 = vmul.f32 %v2689_v8, %v7074_v37 }
0x1e2e   :  { %v2697_v16 = vmul.f32 %v5513_v21, %v2693_v56 }
0x1e30   :  { %v2701_v12 = vadd.f32 %v5514_v5, %v2697_v16 }
0x1e32   :  { %v2703_v45 = vpack.c.bf16 %v2701_v12, %v2700_v43 }
0x1e34   :  { %4982 = vmatmul.msk.bf16.gmra.mxu0 %vm177_vm0, %v2703_v45  ;;  %4984 = vmatmul.msk.bf16.gmra.mxu1 %vm177_vm0, %v2703_v45 }
0x1ea1   :  { %v2719_v35 = vpop.f32.mrf.mxu0  ;;  %v2738_v44 = vpop.f32.mrf.mxu1 }
0x1ea2   :  { %v2720_v42 = vadd.f32 %v2719_v35, %v5858_v17  ;;  %v2739_v56 = vadd.f32 %v2738_v44, %v5866_v24  ;;  %v8116_v35 = vld [vmem:[#allocation11_spill] sm:$0xff]  ;;  %v8117_v44 = vld [vmem:[#allocation12_spill] sm:$0xff] }
0x1ea9   :  { %v2721_v28 = vpop.f32.mrf.mxu0  ;;  %v2740_v39 = vpop.f32.mrf.mxu1 }
0x1eaa   :  { %v2722_v1 = vadd.f32 %v2721_v28, %v5858_v17  ;;  %v2741_v36 = vadd.f32 %v2740_v39, %v5866_v24  ;;  %v5515_v28 = vld [vmem:[%s8058_s25] sm:$0x1]  ;;  %v8118_v39 = vmov -1e+09  }
0x1eab   :  { %vm2748_vm12 = vcmp.lt.s32.totalorder %v5515_v28, 14 }
0x1eac   :  { %v7097_v62 = vpack.c.bf16 %v2722_v1, %v2720_v42  ;;  %v7114_v34 = vpack.c.bf16 %v2741_v36, %v2739_v56  ;;  %v2749_v42 = vsel %vm2748_vm12, 0.0, %v8118_v39 }
0x1ead   :  { %v2751_v1 = vperm.slane %v2749_v42, 0 }
0x1eae   :  { %2761 = vrot.lane.b32.xlu0 %v7097_v62, %s5574_s24 }
0x1eb1   :  { %v2724_v37 = vpop.f32.mrf.mxu0  ;;  %v2743_v21 = vpop.f32.mrf.mxu1 }
0x1eb2   :  { %v2725_v47 = vadd.f32 %v2724_v37, %v5858_v17  ;;  %v2744_v50 = vadd.f32 %v2743_v21, %v5866_v24  ;;  %v5516_v37 = vld [vmem:[%s8059_s28] sm:$0xff] }
0x1eb3   :  { %v7133_v21 = vadd.f32 %v5516_v37, %v2751_v1 }
0x1eb9   :  { %v2726_v5 = vpop.f32.mrf.mxu0  ;;  %v2745_v26 = vpop.f32.mrf.mxu1 }
0x1eba   :  { %v2727_v6 = vadd.f32 %v2726_v5, %v5858_v17  ;;  %v2746_v41 = vadd.f32 %v2745_v26, %v5866_v24 }
0x1ebc   :  { %v7106_v38 = vpack.c.bf16 %v2727_v6, %v2725_v47  ;;  %v7108_v8 = vpack.c.bf16 %v2746_v41, %v2744_v50  ;;  %v5517_v6 = vld [vmem:[%s8059_s28 + $0x8] sm:$0xff] }
0x1ebd   :  { %v7140_v41 = vadd.f32 %v5517_v6, %v2751_v1 }
0x1ebe   :  { %2864 = vmatpush.bf16.msra.mxu3 %v7108_v8  ;;  %2763 = vrot.lane.b32.xlu2 %v7106_v38, %s5574_s24 }
0x1ec2   :  { %2865 = vmatpush.bf16.msra.mxu3 %v7114_v34 }
0x1ec6   :  { %3045 = vmatpush.bf16.msrb.mxu3 %v5946_v55 }
0x1f18   :  { %v2764_v16 = vpop.permute.xlu2 %2763 }
0x1f19   :  { %v2775_v43 = vsel %vm8041_vm14, %v2764_v16, 0 }
0x1f1a   :  { %2783 = vmatpush.bf16.xpose.msrb.mxu2 %v2775_v43 }
0x1f20   :  { %v2762_v12 = vpop.permute.xlu0 %2761 }
0x1f21   :  { %v2772_v45 = vsel %vm8041_vm14, %v2762_v12, 0  ;;  %v5518_v12 = vld [vmem:[%s8059_s28 + $0x10] sm:$0xff] }
0x1f22   :  { %2784 = vmatpush.bf16.xpose.msrb.mxu2 %v2772_v45  ;;  %v7147_v45 = vadd.f32 %v5518_v12, %v2751_v1 }
0x1f29   :  { %4985 = vmatmul.msk.bf16.vlgmr.msrb.gmra.mxu2 %vm8041_vm14, %v7097_v62 }
0x1f2a   :  { %3020 = vmatpush.bf16.msra.mxu2 %v8116_v35 }
0x1f2e   :  { %3196 = vmatpush.bf16.msrb.mxu2 %v8117_v44 }
0x1f39   :  { %4986 = vmatmul.msk.bf16.gmra.mxu2 %vm8041_vm14, %v7106_v38 }
0x1fac   :  { %v2786_v5 = vpop.f32.mrf.mxu2 }
0x1fad   :  { %v2796_v26 = vmul.f32 0.25, %v2786_v5 }
0x1faf   :  { %v2800_v47 = vadd.f32 %v2796_v26, %v7133_v21  ;;  %v5519_v26 = vld [vmem:[%s8059_s28 + $0x18] sm:$0xff] }
0x1fb1   :  { %v2804_v50 = vsel %vm403_vm1, %v2800_v47, -inf }
0x1fb2   :  { %2805 = vmax.xlane.f32.xlu1 %v2804_v50  ;;  %v7154_v50 = vadd.f32 %v5519_v26, %v2751_v1 }
0x1fb4   :  { %v2788_v36 = vpop.f32.mrf.mxu2 }
0x1fb5   :  { %v2797_v56 = vmul.f32 0.25, %v2788_v36 }
0x1fb7   :  { %v2801_v16 = vadd.f32 %v2797_v56, %v7140_v41 }
0x1fb9   :  { %v2807_v43 = vsel %vm403_vm1, %v2801_v16, -inf }
0x1fba   :  { %2808 = vmax.xlane.f32.xlu1 %v2807_v43 }
0x1fbc   :  { %v2791_v28 = vpop.f32.mrf.mxu2 }
0x1fbd   :  { %v2798_v42 = vmul.f32 0.25, %v2791_v28 }
0x1fbf   :  { %v2802_v37 = vadd.f32 %v2798_v42, %v7147_v45 }
0x1fc1   :  { %v2810_v5 = vsel %vm403_vm1, %v2802_v37, -inf }
0x1fc2   :  { %2811 = vmax.xlane.f32.xlu1 %v2810_v5 }
0x1fc4   :  { %v2793_v6 = vpop.f32.mrf.mxu2 }
0x1fc5   :  { %v2799_v36 = vmul.f32 0.25, %v2793_v6 }
0x1fc7   :  { %v2803_v56 = vadd.f32 %v2799_v36, %v7154_v50 }
0x1fc9   :  { %v2813_v43 = vsel %vm403_vm1, %v2803_v56, -inf }
0x1fca   :  { %2814 = vmax.xlane.f32.xlu0 %v2813_v43 }
0x1fde   :  { %2883 = vrot.lane.b32.xlu0 %v7097_v62, %s5576_s1 }
0x1fe6   :  { %3218 = vrot.lane.b32.xlu0 %v7106_v38, %s8088_s23 }
0x1fee   :  { %3057 = vrot.lane.b32.xlu0 %v7097_v62, %s8089_s3 }
0x1ff6   :  { %3214 = vrot.lane.b32.xlu0 %v7106_v38, %s5581_s5 }
0x2025   :  { %v2806_v1 = vpop.xlane.xlu1 %2805 }
0x2026   :  { %v2816_v12 = vsub.f32 %v2800_v47, %v2806_v1 }
0x2028   :  { %v2820_v28 = vmul.f32 1.442695, %v2816_v12 }
0x202a   :  { %5302 = vpow2.f32 %v2820_v28 }
0x202d   :  { %v2809_v42 = vpop.xlane.xlu1 %2808 }
0x202e   :  { %v2817_v5 = vsub.f32 %v2801_v16, %v2809_v42 }
0x2030   :  { %v5303_v26 = vpop.eup %5302  ;;  %v2822_v6 = vmul.f32 1.442695, %v2817_v5 }
0x2031   :  { %v2828_v36 = vsel %vm403_vm1, %v5303_v26, 0.0 }
0x2032   :  { %5304 = vpow2.f32 %v2822_v6  ;;  %2829 = vadd.xlane.f32.xlu2 %v2828_v36 }
0x2035   :  { %v2812_v43 = vpop.xlane.xlu1 %2811 }
0x2036   :  { %v2818_v39 = vsub.f32 %v2802_v37, %v2812_v43 }
0x2038   :  { %v5305_v44 = vpop.eup %5304  ;;  %v2824_v35 = vmul.f32 1.442695, %v2818_v39 }
0x2039   :  { %v2831_v55 = vsel %vm403_vm1, %v5305_v44, 0.0 }
0x203a   :  { %5306 = vpow2.f32 %v2824_v35  ;;  %2832 = vadd.xlane.f32.xlu1 %v2831_v55 }
0x203d   :  { %v2815_v24 = vpop.xlane.xlu0 %2814 }
0x203e   :  { %v2819_v47 = vsub.f32 %v2803_v56, %v2815_v24 }
0x2040   :  { %v5307_v1 = vpop.eup %5306  ;;  %v2826_v12 = vmul.f32 1.442695, %v2819_v47 }
0x2041   :  { %v2834_v16 = vsel %vm403_vm1, %v5307_v1, 0.0 }
0x2042   :  { %5308 = vpow2.f32 %v2826_v12  ;;  %2835 = vadd.xlane.f32.xlu1 %v2834_v16 }
0x2048   :  { %v5309_v28 = vpop.eup %5308 }
0x2049   :  { %v2837_v42 = vsel %vm403_vm1, %v5309_v28, 0.0 }
0x204a   :  { %2879 = vrot.lane.b32.xlu2 %v7097_v62, %s5577_s7  ;;  %2838 = vadd.xlane.f32.xlu1 %v2837_v42 }
0x2050   :  { %v2884_v55 = vpop.permute.xlu0 %2883 }
0x2052   :  { %3061 = vrot.lane.b32.xlu2 %v7097_v62, %s5579_s27 }
0x2058   :  { %v3219_v36 = vpop.permute.xlu0 %3218 }
0x2059   :  { %v3230_v47 = vsel %vm8041_vm14, %v3219_v36, 0 }
0x205a   :  { %3212 = vrot.lane.b32.xlu2 %v7097_v62, %s5581_s5 }
0x2063   :  { %2885 = vrot.lane.b32.xlu1 %v7106_v38, %s5576_s1 }
0x206b   :  { %2881 = vrot.lane.b32.xlu1 %v7106_v38, %s5577_s7 }
0x2073   :  { %3063 = vrot.lane.b32.xlu1 %v7106_v38, %s5579_s27 }
0x207b   :  { %3216 = vrot.lane.b32.xlu1 %v7097_v62, %s8088_s23 }
0x2083   :  { %3059 = vrot.lane.b32.xlu1 %v7106_v38, %s8089_s3 }
0x20a5   :  { %v2830_v24 = vpop.xlane.xlu2 %2829 }
0x20a6   :  { %5310 = vrcp.f32 %v2830_v24 }
0x20ac   :  { %v5311_v39 = vpop.eup %5310 }
0x20ad   :  { %v2833_v35 = vpop.xlane.xlu1 %2832  ;;  %v2844_v56 = vmul.f32 %v5311_v39, %v5303_v26  ;;  %v2894_v39 = vsel %vm8041_vm14, %v2884_v55, 0 }
0x20ae   :  { %5312 = vrcp.f32 %v2833_v35 }
0x20b4   :  { %v5313_v37 = vpop.eup %5312 }
0x20b5   :  { %v2845_v5 = vmul.f32 %v5313_v37, %v5305_v44  ;;  %v2836_v6 = vpop.xlane.xlu1 %2835  ;;  %v2880_v37 = vpop.permute.xlu2 %2879 }
0x20b6   :  { %5314 = vrcp.f32 %v2836_v6 }
0x20b7   :  { %v2848_v43 = vpack.c.bf16 %v2845_v5, %v2844_v56 }
0x20b9   :  { %4987 = vmatmul.msk.bf16.vlgmr.msra.gmra.mxu3 %vm403_vm1, %v2848_v43  ;;  %v3058_v43 = vpop.permute.xlu0 %3057 }
0x20ba   :  { %3238 = vmatpush.bf16.xpose.msra.mxu3 %v3230_v47 }
0x20bc   :  { %v5315_v38 = vpop.eup %5314 }
0x20bd   :  { %v2839_v62 = vpop.xlane.xlu1 %2838  ;;  %v2846_v16 = vmul.f32 %v5315_v38, %v5307_v1  ;;  %v3062_v1 = vpop.permute.xlu2 %3061 }
0x20be   :  { %5316 = vrcp.f32 %v2839_v62  ;;  %v3072_v36 = vsel %vm8041_vm14, %v3062_v1, 0 }
0x20c4   :  { %v5317_v12 = vpop.eup %5316 }
0x20c5   :  { %v2847_v42 = vmul.f32 %v5317_v12, %v5309_v28  ;;  %v3213_v1 = vpop.permute.xlu2 %3212 }
0x20c7   :  { %v2849_v24 = vpack.c.bf16 %v2847_v42, %v2846_v16  ;;  %v8119_v16 = vld [vmem:[#allocation15_spill] sm:$0xff] }
0x20c9   :  { %4988 = vmatmul.msk.bf16.gmra.mxu3 %vm403_vm1, %v2849_v24  ;;  %v8120_v24 = vld [vmem:[#allocation16_spill] sm:$0xff] }
0x20d5   :  { %v2886_v26 = vpop.permute.xlu1 %2885 }
0x20d6   :  { %v2897_v44 = vsel %vm8041_vm14, %v2886_v26, 0 }
0x20d7   :  { %2905 = vmatpush.bf16.xpose.msrb.mxu0 %v2897_v44  ;;  %v8121_v44 = vld [vmem:[#allocation17_spill] sm:$0xff] }
0x20dd   :  { %v2882_v35 = vpop.permute.xlu1 %2881 }
0x20df   :  { %2906 = vmatpush.bf16.xpose.msrb.mxu0 %v2894_v39  ;;  %v8123_v39 = vld [vmem:[#allocation19_spill] sm:$0xff] }
0x20e5   :  { %v3064_v56 = vpop.permute.xlu1 %3063 }
0x20e6   :  { %v3075_v5 = vsel %vm8041_vm14, %v3064_v56, 0  ;;  %4989 = vmatmul.msk.bf16.vlgmr.msrb.gmra.mxu0 %vm8041_vm14, %v2880_v37 }
0x20e7   :  { %3083 = vmatpush.bf16.xpose.msra.mxu0 %v3075_v5  ;;  %v8124_v5 = vld [vmem:[#allocation20_spill] sm:$0xff] }
0x20ed   :  { %v3217_v28 = vpop.permute.xlu1 %3216 }
0x20ee   :  { %v3227_v6 = vsel %vm8041_vm14, %v3217_v28, 0 }
0x20ef   :  { %3084 = vmatpush.bf16.xpose.msra.mxu0 %v3072_v36  ;;  %3239 = vmatpush.bf16.xpose.msra.mxu3 %v3227_v6 }
0x20f5   :  { %v3060_v55 = vpop.permute.xlu1 %3059 }
0x20f6   :  { %4990 = vmatmul.msk.bf16.gmra.mxu0 %vm8041_vm14, %v2882_v35  ;;  %v8122_v35 = vld [vmem:[#allocation18_spill] sm:$0xff] }
0x2106   :  { %4997 = vmatmul.msk.bf16.vlgmr.msra.gmra.mxu0 %vm8041_vm14, %v3058_v43 }
0x2116   :  { %4998 = vmatmul.msk.bf16.gmra.mxu0 %vm8041_vm14, %v3060_v55 }
0x213c   :  { %v2867_v47 = vpop.f32.mrf.mxu3 }
0x2144   :  { %v2869_v62 = vpop.f32.mrf.mxu3 }
0x2145   :  { %v2877_v38 = vpack.c.bf16 %v2869_v62, %v2867_v47 }
0x2147   :  { %4995 = vmatmul.msk.bf16.vlgmr.msrb.gmra.mxu3 %vm8041_vm14, %v2877_v38 }
0x2148   :  { %3536 = vmatpush.bf16.msrb.mxu3 %v6217_v33 }
0x214c   :  { %v2872_v12 = vpop.f32.mrf.mxu3  ;;  %3537 = vmatpush.bf16.msrb.mxu3 %v6226_v51 }
0x2150   :  { %3538 = vmatpush.bf16.msrb.mxu3 %v8119_v16 }
0x2154   :  { %v2874_v42 = vpop.f32.mrf.mxu3  ;;  %3539 = vmatpush.bf16.msrb.mxu3 %v8120_v24 }
0x2155   :  { %v2878_v26 = vpack.c.bf16 %v2874_v42, %v2872_v12  ;;  %v3215_v12 = vpop.permute.xlu0 %3214 }
0x2157   :  { %4996 = vmatmul.msk.bf16.gmra.mxu3 %vm8041_vm14, %v2878_v26 }
0x2158   :  { %3540 = vmatpush.bf16.msrb.mxu3 %v8121_v44 }
0x215c   :  { %3541 = vmatpush.bf16.msrb.mxu3 %v8122_v35 }
0x2160   :  { %3542 = vmatpush.bf16.msrb.mxu3 %v8123_v39 }
0x2163   :  { %v2908_v37 = vpop.f32.mrf.mxu0 }
0x2164   :  { %v2918_v56 = vmul.f32 0.25, %v2908_v37  ;;  %3543 = vmatpush.bf16.msrb.mxu3 %v8124_v5 }
0x2166   :  { %v2922_v28 = vadd.f32 %v2918_v56, %v7133_v21 }
0x2167   :  { %5003 = vmatmul.msk.bf16.vlgmr.msra.gmra.mxu3 %vm8041_vm14, %v3213_v1 }
0x2168   :  { %v2926_v6 = vsel %vm403_vm1, %v2922_v28, -inf }
0x2169   :  { %2927 = vmax.xlane.f32.xlu2 %v2926_v6 }
0x216b   :  { %v2910_v36 = vpop.f32.mrf.mxu0 }
0x216c   :  { %v2919_v43 = vmul.f32 0.25, %v2910_v36 }
0x216e   :  { %v2923_v55 = vadd.f32 %v2919_v43, %v7140_v41 }
0x2170   :  { %v2929_v47 = vsel %vm403_vm1, %v2923_v55, -inf }
0x2171   :  { %2930 = vmax.xlane.f32.xlu1 %v2929_v47 }
0x2173   :  { %v2913_v62 = vpop.f32.mrf.mxu0 }
0x2174   :  { %v2920_v38 = vmul.f32 0.25, %v2913_v62 }
0x2176   :  { %v2924_v42 = vadd.f32 %v2920_v38, %v7147_v45 }
0x2177   :  { %5004 = vmatmul.msk.bf16.gmra.mxu3 %vm8041_vm14, %v3215_v12 }
0x2178   :  { %v2932_v26 = vsel %vm403_vm1, %v2924_v42, -inf }
0x2179   :  { %2933 = vmax.xlane.f32.xlu0 %v2932_v26 }
0x217b   :  { %v2915_v37 = vpop.f32.mrf.mxu0 }
0x217c   :  { %v2921_v56 = vmul.f32 0.25, %v2915_v37 }
0x217e   :  { %v2925_v1 = vadd.f32 %v2921_v56, %v7154_v50 }
0x2180   :  { %v2935_v6 = vsel %vm403_vm1, %v2925_v1, -inf }
0x2181   :  { %2936 = vmax.xlane.f32.xlu2 %v2935_v6 }
0x2183   :  { %v3086_v36 = vpop.f32.mrf.mxu0 }
0x2184   :  { %v3096_v43 = vmul.f32 0.25, %v3086_v36 }
0x2186   :  { %v7219_v47 = vadd.f32 %v3096_v43, %v7133_v21 }
0x2188   :  { %v3104_v62 = vsel %vm403_vm1, %v7219_v47, -inf }
0x2189   :  { %3105 = vmax.xlane.f32.xlu1 %v3104_v62 }
0x218b   :  { %v3088_v38 = vpop.f32.mrf.mxu0 }
0x218c   :  { %v3097_v12 = vmul.f32 0.25, %v3088_v38 }
0x218e   :  { %v3101_v26 = vadd.f32 %v3097_v12, %v7140_v41 }
0x2190   :  { %v3107_v37 = vsel %vm403_vm1, %v3101_v26, -inf }
0x2191   :  { %3108 = vmax.xlane.f32.xlu0 %v3107_v37 }
0x2193   :  { %v3091_v56 = vpop.f32.mrf.mxu0 }
0x2194   :  { %v3098_v5 = vmul.f32 0.25, %v3091_v56 }
0x2196   :  { %v7226_v6 = vadd.f32 %v3098_v5, %v7147_v45 }
0x2198   :  { %v3110_v36 = vsel %vm403_vm1, %v7226_v6, -inf }
0x2199   :  { %3111 = vmax.xlane.f32.xlu0 %v3110_v36 }
0x219b   :  { %v3093_v43 = vpop.f32.mrf.mxu0 }
0x219c   :  { %v3099_v39 = vmul.f32 0.25, %v3093_v43 }
0x219e   :  { %v7231_v62 = vadd.f32 %v3099_v39, %v7154_v50 }
0x21a0   :  { %v3113_v38 = vsel %vm403_vm1, %v7231_v62, -inf }
0x21a1   :  { %3114 = vmax.xlane.f32.xlu2 %v3113_v38 }
0x21b9   :  { %2974 = vrot.lane.b32.xlu2 %v7114_v34, %s5577_s7 }
0x21ca   :  { %v7237_v12 = vpop.f32.mrf.mxu3 }
0x21d2   :  { %v7239_v5 = vpop.f32.mrf.mxu3 }
0x21da   :  { %v7241_v37 = vpop.f32.mrf.mxu3 }
0x21dc   :  { %v2928_v56 = vpop.xlane.xlu2 %2927 }
0x21dd   :  { %v2938_v36 = vsub.f32 %v2922_v28, %v2928_v56 }
0x21df   :  { %v2942_v35 = vmul.f32 1.442695, %v2938_v36 }
0x21e1   :  { %5318 = vpow2.f32 %v2942_v35 }
0x21e2   :  { %v7243_v43 = vpop.f32.mrf.mxu3 }
0x21e4   :  { %v2931_v39 = vpop.xlane.xlu1 %2930 }
0x21e5   :  { %v2939_v44 = vsub.f32 %v2923_v55, %v2931_v39 }
0x21e7   :  { %v7245_v24 = vpop.eup %5318  ;;  %v2944_v38 = vmul.f32 1.442695, %v2939_v44 }
0x21e8   :  { %v2950_v16 = vsel %vm403_vm1, %v7245_v24, 0.0 }
0x21e9   :  { %5320 = vpow2.f32 %v2944_v38  ;;  %2951 = vadd.xlane.f32.xlu1 %v2950_v16 }
0x21ea   :  { %v3241_v51 = vpop.f32.mrf.mxu3 }
0x21eb   :  { %v3251_v33 = vmul.f32 0.25, %v3241_v51 }
0x21ec   :  { %v2934_v17 = vpop.xlane.xlu0 %2933 }
0x21ed   :  { %v3255_v10 = vadd.f32 %v3251_v33, %v7133_v21  ;;  %v2940_v28 = vsub.f32 %v2924_v42, %v2934_v17 }
0x21ef   :  { %v7250_v56 = vpop.eup %5320  ;;  %v2946_v35 = vmul.f32 1.442695, %v2940_v28  ;;  %v3259_v36 = vsel %vm403_vm1, %v3255_v10, -inf }
0x21f0   :  { %3260 = vmax.xlane.f32.xlu2 %v3259_v36  ;;  %v2953_v44 = vsel %vm403_vm1, %v7250_v56, 0.0 }
0x21f1   :  { %5322 = vpow2.f32 %v2946_v35  ;;  %2954 = vadd.xlane.f32.xlu0 %v2953_v44 }
0x21f2   :  { %v3243_v55 = vpop.f32.mrf.mxu3 }
0x21f4   :  { %v2937_v39 = vpop.xlane.xlu2 %2936 }
0x21f5   :  { %v2941_v16 = vsub.f32 %v2925_v1, %v2937_v39 }
0x21f7   :  { %v7255_v38 = vpop.eup %5322  ;;  %v2948_v51 = vmul.f32 1.442695, %v2941_v16 }
0x21f8   :  { %v2956_v17 = vsel %vm403_vm1, %v7255_v38, 0.0 }
0x21f9   :  { %5324 = vpow2.f32 %v2948_v51  ;;  %2957 = vadd.xlane.f32.xlu1 %v2956_v17 }
0x21fa   :  { %v3246_v33 = vpop.f32.mrf.mxu3 }
0x21fb   :  { %v3253_v21 = vmul.f32 0.25, %v3246_v33 }
0x21fd   :  { %v7260_v42 = vadd.f32 %v3253_v21, %v7147_v45  ;;  %v3252_v45 = vmul.f32 0.25, %v3243_v55 }
0x21ff   :  { %v7262_v28 = vpop.eup %5324  ;;  %v3265_v35 = vsel %vm403_vm1, %v7260_v42, -inf  ;;  %v7275_v17 = vadd.f32 %v3252_v45, %v7140_v41 }
0x2200   :  { %3266 = vmax.xlane.f32.xlu2 %v3265_v35  ;;  %v2959_v1 = vsel %vm403_vm1, %v7262_v28, 0.0  ;;  %v3106_v35 = vpop.xlane.xlu1 %3105 }
0x2201   :  { %2960 = vadd.xlane.f32.xlu1 %v2959_v1  ;;  %v3116_v55 = vsub.f32 %v7219_v47, %v3106_v35 }
0x2202   :  { %v3248_v33 = vpop.f32.mrf.mxu3 }
0x2203   :  { %v3254_v21 = vmul.f32 0.25, %v3248_v33  ;;  %v3120_v41 = vmul.f32 1.442695, %v3116_v55 }
0x2204   :  { %v3109_v36 = vpop.xlane.xlu0 %3108 }
0x2205   :  { %v3117_v44 = vsub.f32 %v3101_v26, %v3109_v36  ;;  %2976 = vrot.lane.b32.xlu0 %v7108_v8, %s5577_s7  ;;  %v3262_v26 = vsel %vm403_vm1, %v7275_v17, -inf  ;;  %v7282_v1 = vadd.f32 %v3254_v21, %v7154_v50 }
0x2207   :  { %v3122_v39 = vmul.f32 1.442695, %v3117_v44  ;;  %v3268_v36 = vsel %vm403_vm1, %v7282_v1, -inf }
0x2209   :  { %5326 = vpow2.f32 %v3122_v39 }
0x220a   :  { %5328 = vpow2.f32 %v3120_v41 }
0x220c   :  { %v3112_v45 = vpop.xlane.xlu0 %3111 }
0x220d   :  { %v3118_v21 = vsub.f32 %v7226_v6, %v3112_v45 }
0x220f   :  { %v7270_v16 = vpop.eup %5326  ;;  %v3124_v35 = vmul.f32 1.442695, %v3118_v21 }
0x2210   :  { %v3131_v51 = vsel %vm403_vm1, %v7270_v16, 0.0  ;;  %v7287_v44 = vpop.eup %5328 }
0x2211   :  { %3132 = vadd.xlane.f32.xlu1 %v3131_v51  ;;  %v3128_v39 = vsel %vm403_vm1, %v7287_v44, 0.0 }
0x2214   :  { %v3115_v50 = vpop.xlane.xlu2 %3114 }
0x2218   :  { %3152 = vrot.lane.b32.xlu2 %v7108_v8, %s8089_s3 }
0x2219   :  { %3263 = vmax.xlane.f32.xlu1 %v3262_v26 }
0x221c   :  { %v2975_v47 = vpop.permute.xlu2 %2974 }
0x2221   :  { %3269 = vmax.xlane.f32.xlu1 %v3268_v36 }
0x222f   :  { %3129 = vadd.xlane.f32.xlu0 %v3128_v39 }
0x223a   :  { %3150 = vrot.lane.b32.xlu1 %v7114_v34, %s8089_s3 }
0x2243   :  { %3307 = vrot.lane.b32.xlu0 %v7108_v8, %s5581_s5 }
0x224b   :  { %3305 = vrot.lane.b32.xlu0 %v7114_v34, %s5581_s5 }
0x225c   :  { %v2952_v55 = vpop.xlane.xlu1 %2951 }
0x2263   :  { %v3261_v51 = vpop.xlane.xlu2 %3260 }
0x2264   :  { %v3271_v33 = vsub.f32 %v3255_v10, %v3261_v51  ;;  %v2955_v36 = vpop.xlane.xlu0 %2954 }
0x2266   :  { %v3275_v26 = vmul.f32 1.442695, %v3271_v33 }
0x2268   :  { %5330 = vpow2.f32 %v3275_v26 }
0x2269   :  { %5332 = vpow2.f32 %v3124_v35 }
0x226a   :  { %5334 = vrcp.f32 %v2955_v36 }
0x226b   :  { %5336 = vrcp.f32 %v2952_v55 }
0x226c   :  { %v2958_v34 = vpop.xlane.xlu1 %2957 }
0x226e   :  { %v7298_v41 = vpop.eup %5330 }
0x226f   :  { %v3283_v8 = vsel %vm403_vm1, %v7298_v41, 0.0  ;;  %v7302_v11 = vpop.eup %5332 }
0x2270   :  { %3284 = vadd.xlane.f32.xlu1 %v3283_v8  ;;  %v5335_v10 = vpop.eup %5334  ;;  %v3134_v45 = vsel %vm403_vm1, %v7302_v11, 0.0 }
0x2271   :  { %v5337_v51 = vpop.eup %5336  ;;  %v2967_v33 = vmul.f32 %v5335_v10, %v7250_v56  ;;  %v3119_v10 = vsub.f32 %v7231_v62, %v3115_v50 }
0x2272   :  { %v2966_v21 = vmul.f32 %v5337_v51, %v7245_v24 }
0x2273   :  { %v3267_v39 = vpop.xlane.xlu2 %3266  ;;  %v3126_v51 = vmul.f32 1.442695, %v3119_v10 }
0x2274   :  { %v2961_v35 = vpop.xlane.xlu1 %2960  ;;  %v2970_v55 = vpack.c.bf16 %v2967_v33, %v2966_v21 }
0x2275   :  { %5338 = vrcp.f32 %v2961_v35 }
0x2276   :  { %5340 = vrcp.f32 %v2958_v34 }
0x2277   :  { %v2977_v6 = vpop.permute.xlu0 %2976 }
0x2278   :  { %3135 = vadd.xlane.f32.xlu1 %v3134_v45  ;;  %2992 = vmatpush.bf16.msrb.mxu1 %v2977_v6 }
0x227b   :  { %v3153_v26 = vpop.permute.xlu2 %3152  ;;  %v5339_v8 = vpop.eup %5338 }
0x227c   :  { %2993 = vmatpush.bf16.msrb.mxu1 %v2975_v47  ;;  %v5341_v49 = vpop.eup %5340  ;;  %v2969_v25 = vmul.f32 %v5339_v8, %v7262_v28  ;;  %v3273_v28 = vsub.f32 %v7260_v42, %v3267_v39 }
0x227d   :  { %v2968_v6 = vmul.f32 %v5341_v49, %v7255_v38 }
0x227f   :  { %4991 = vmatmul.msk.bf16.vlgmr.msrb.gmra.mxu1 %vm403_vm1, %v2970_v55  ;;  %v2971_v24 = vpack.c.bf16 %v2969_v25, %v2968_v6  ;;  %v3279_v25 = vmul.f32 1.442695, %v3273_v28 }
0x2280   :  { %3168 = vmatpush.bf16.msra.mxu1 %v3153_v26 }
0x2284   :  { %v3133_v36 = vpop.xlane.xlu1 %3132 }
0x228c   :  { %v3264_v45 = vpop.xlane.xlu1 %3263 }
0x228d   :  { %v3272_v56 = vsub.f32 %v7275_v17, %v3264_v45 }
0x228f   :  { %v3277_v47 = vmul.f32 1.442695, %v3272_v56  ;;  %4992 = vmatmul.msk.bf16.gmra.mxu1 %vm403_vm1, %v2971_v24 }
0x2291   :  { %5342 = vpow2.f32 %v3277_v47 }
0x2292   :  { %5344 = vpow2.f32 %v3126_v51 }
0x2294   :  { %v3270_v33 = vpop.xlane.xlu1 %3269 }
0x2295   :  { %v3274_v34 = vsub.f32 %v7282_v1, %v3270_v33 }
0x2297   :  { %v5343_v21 = vpop.eup %5342  ;;  %v3281_v26 = vmul.f32 1.442695, %v3274_v34 }
0x2298   :  { %v3286_v49 = vsel %vm403_vm1, %v5343_v21, 0.0  ;;  %v5345_v38 = vpop.eup %5344 }
0x2299   :  { %5346 = vpow2.f32 %v3281_v26  ;;  %3287 = vadd.xlane.f32.xlu2 %v3286_v49  ;;  %v3137_v17 = vsel %vm403_vm1, %v5345_v38, 0.0 }
0x229a   :  { %5348 = vpow2.f32 %v3279_v25 }
0x229b   :  { %5350 = vrcp.f32 %v3133_v36 }
0x229f   :  { %v7317_v62 = vpop.eup %5346 }
0x22a0   :  { %v3292_v50 = vsel %vm403_vm1, %v7317_v62, 0.0  ;;  %v5349_v42 = vpop.eup %5348 }
0x22a1   :  { %3138 = vadd.xlane.f32.xlu2 %v3137_v17  ;;  %3293 = vadd.xlane.f32.xlu0 %v3292_v50  ;;  %v5351_v39 = vpop.eup %5350  ;;  %v3289_v35 = vsel %vm403_vm1, %v5349_v42, 0.0 }
0x22a2   :  { %v3130_v1 = vpop.xlane.xlu0 %3129  ;;  %v3145_v6 = vmul.f32 %v5351_v39, %v7270_v16 }
0x22a3   :  { %5352 = vrcp.f32 %v3130_v1 }
0x22a9   :  { %v5353_v55 = vpop.eup %5352  ;;  %3290 = vadd.xlane.f32.xlu2 %v3289_v35 }
0x22aa   :  { %v3144_v8 = vmul.f32 %v5353_v55, %v7287_v44 }
0x22ac   :  { %v3151_v45 = vpop.permute.xlu1 %3150  ;;  %v3148_v56 = vpack.c.bf16 %v3145_v6, %v3144_v8 }
0x22ad   :  { %3169 = vmatpush.bf16.msra.mxu1 %v3151_v45 }
0x22b0   :  { %4999 = vmatmul.msk.bf16.vlgmr.msra.gmra.mxu1 %vm403_vm1, %v3148_v56 }
0x22b1   :  { %3351 = vmatpush.bf16.msrb.mxu1 %v6085_v0 }
0x22b5   :  { %3686 = vmatpush.bf16.msra.mxu1 %v6338_v23  ;;  %v3308_v36 = vpop.permute.xlu0 %3307 }
0x22b6   :  { %3323 = vmatpush.bf16.msrb.mxu0 %v3308_v36 }
0x22b9   :  { %3687 = vmatpush.bf16.msra.mxu1 %v6344_v9 }
0x22bd   :  { %3688 = vmatpush.bf16.msra.mxu1 %v6353_v14  ;;  %v3306_v24 = vpop.permute.xlu0 %3305 }
0x22be   :  { %3324 = vmatpush.bf16.msrb.mxu0 %v3306_v24 }
0x22c1   :  { %3689 = vmatpush.bf16.msra.mxu1 %v6396_v13 }
0x22e3   :  { %v3285_v47 = vpop.xlane.xlu1 %3284 }
0x22e4   :  { %5354 = vrcp.f32 %v3285_v47 }
0x22ea   :  { %v5355_v28 = vpop.eup %5354 }
0x22eb   :  { %v3136_v34 = vpop.xlane.xlu1 %3135  ;;  %v3299_v49 = vmul.f32 %v5355_v28, %v7298_v41 }
0x22fc   :  { %v2995_v16 = vpop.f32.mrf.mxu1 }
0x2304   :  { %v2997_v44 = vpop.f32.mrf.mxu1 }
0x2305   :  { %v3005_v10 = vpack.c.bf16 %v2997_v44, %v2995_v16 }
0x2307   :  { %4993 = vmatmul.msk.bf16.vlgmr.msra.gmra.mxu2 %vm8041_vm14, %v3005_v10 }
0x2308   :  { %3483 = vmatpush.bf16.msra.mxu2 %v6165_v27 }
0x230c   :  { %v3288_v51 = vpop.xlane.xlu2 %3287  ;;  %v3000_v33 = vpop.f32.mrf.mxu1  ;;  %3484 = vmatpush.bf16.msra.mxu2 %v6174_v57 }
0x230d   :  { %5356 = vrcp.f32 %v3288_v51 }
0x230e   :  { %5358 = vrcp.f32 %v3136_v34 }
0x2310   :  { %3485 = vmatpush.bf16.msra.mxu2 %v6183_v61 }
0x2313   :  { %v5357_v26 = vpop.eup %5356 }
0x2314   :  { %v3300_v25 = vmul.f32 %v5357_v26, %v5343_v21  ;;  %v3139_v17 = vpop.xlane.xlu2 %3138  ;;  %v3002_v50 = vpop.f32.mrf.mxu1  ;;  %3486 = vmatpush.bf16.msra.mxu2 %v6193_v53 }
0x2315   :  { %5360 = vrcp.f32 %v3139_v17  ;;  %v3006_v1 = vpack.c.bf16 %v3002_v50, %v3000_v33  ;;  %v3294_v35 = vpop.xlane.xlu0 %3293  ;;  %v5359_v55 = vpop.eup %5358 }
0x2316   :  { %v3303_v39 = vpack.c.bf16 %v3300_v25, %v3299_v49  ;;  %5362 = vrcp.f32 %v3294_v35  ;;  %v3146_v6 = vmul.f32 %v5359_v55, %v7302_v11 }
0x2317   :  { %4994 = vmatmul.msk.bf16.gmra.mxu2 %vm8041_vm14, %v3006_v1 }
0x2318   :  { %5005 = vmatmul.msk.bf16.vlgmr.msrb.gmra.mxu0 %vm403_vm1, %v3303_v39 }
0x231b   :  { %v5361_v8 = vpop.eup %5360 }
0x231c   :  { %v3147_v45 = vmul.f32 %v5361_v8, %v5345_v38  ;;  %v3291_v41 = vpop.xlane.xlu2 %3290  ;;  %v5363_v56 = vpop.eup %5362 }
0x231d   :  { %5364 = vrcp.f32 %v3291_v41  ;;  %v3302_v24 = vmul.f32 %v5363_v56, %v7317_v62 }
0x231e   :  { %v3149_v21 = vpack.c.bf16 %v3147_v45, %v3146_v6 }
0x2320   :  { %5000 = vmatmul.msk.bf16.gmra.mxu1 %vm403_vm1, %v3149_v21 }
0x2323   :  { %v5365_v36 = vpop.eup %5364 }
0x2324   :  { %v3301_v16 = vmul.f32 %v5365_v36, %v5349_v42 }
0x2326   :  { %v3304_v44 = vpack.c.bf16 %v3302_v24, %v3301_v16 }
0x2328   :  { %5006 = vmatmul.msk.bf16.gmra.mxu0 %vm403_vm1, %v3304_v44 }
0x232d   :  { %v3171_v10 = vpop.f32.mrf.mxu1 }
0x2335   :  { %v3173_v47 = vpop.f32.mrf.mxu1 }
0x2336   :  { %v3181_v51 = vpack.c.bf16 %v3173_v47, %v3171_v10 }
0x2338   :  { %5001 = vmatmul.msk.bf16.vlgmr.msrb.gmra.mxu2 %vm8041_vm14, %v3181_v51 }
0x2339   :  { %3712 = vmatpush.bf16.msrb.mxu2 %v6417_v32 }
0x233d   :  { %3713 = vmatpush.bf16.msrb.mxu2 %v6423_v20 }
0x2341   :  { %3714 = vmatpush.bf16.msrb.mxu2 %v6432_v40 }
0x2345   :  { %3715 = vmatpush.bf16.msrb.mxu2 %v6441_v30 }
0x2349   :  { %3716 = vmatpush.bf16.msrb.mxu2 %v6450_v18 }
0x234d   :  { %3717 = vmatpush.bf16.msrb.mxu2 %v6459_v60 }
0x2351   :  { %3718 = vmatpush.bf16.msrb.mxu2 %v6473_v29 }
0x2355   :  { %3719 = vmatpush.bf16.msrb.mxu2 %v6482_v3 }
0x238a   :  { %v3022_v60 = vpop.f32.mrf.mxu2 }
0x238b   :  { %v3048_v34 = vadd.f32 %v7237_v12, %v3022_v60 }
0x2392   :  { %v3024_v29 = vpop.f32.mrf.mxu2 }
0x2395   :  { %v3326_v11 = vpop.f32.mrf.mxu0 }
0x239a   :  { %v3027_v3 = vpop.f32.mrf.mxu2 }
0x239d   :  { %v3176_v38 = vpop.f32.mrf.mxu1  ;;  %v3328_v62 = vpop.f32.mrf.mxu0 }
0x239e   :  { %v3336_v42 = vpack.c.bf16 %v3328_v62, %v3326_v11 }
0x23a0   :  { %5007 = vmatmul.msk.bf16.vlgmr.msrb.gmra.mxu1 %vm8041_vm14, %v3336_v42 }
0x23a1   :  { %3885 = vmatpush.bf16.msrb.mxu1 %v5774_v46 }
0x23a2   :  { %v3029_v33 = vpop.f32.mrf.mxu2 }
0x23a3   :  { %v3055_v56 = vadd.f32 %v7243_v43, %v3029_v33 }
0x23a5   :  { %v3178_v32 = vpop.f32.mrf.mxu1  ;;  %v3331_v20 = vpop.f32.mrf.mxu0  ;;  %3886 = vmatpush.bf16.msrb.mxu1 %v5792_v52 }
0x23a6   :  { %v3182_v40 = vpack.c.bf16 %v3178_v32, %v3176_v38 }
0x23a8   :  { %5002 = vmatmul.msk.bf16.gmra.mxu2 %vm8041_vm14, %v3182_v40 }
0x23a9   :  { %3887 = vmatpush.bf16.msrb.mxu1 %v5810_v58  ;;  %v3050_v58 = vadd.f32 %v7239_v5, %v3024_v29 }
0x23ad   :  { %v3333_v30 = vpop.f32.mrf.mxu0  ;;  %3888 = vmatpush.bf16.msrb.mxu1 %v5830_v4  ;;  %v5520_v4 = vld [vmem:[%s7954_s9] ss:$0 sm:$0xff] }
0x23ae   :  { %v3337_v18 = vpack.c.bf16 %v3333_v30, %v3331_v20 }
0x23b0   :  { %5008 = vmatmul.msk.bf16.gmra.mxu1 %vm8041_vm14, %v3337_v18 }
0x23bb   :  { %v3198_v46 = vpop.f32.mrf.mxu2 }
0x23bc   :  { %v3208_v28 = vadd.f32 %v3198_v46, %v3048_v34 }
0x23c3   :  { %v3200_v25 = vpop.f32.mrf.mxu2 }
0x23c4   :  { %v3209_v50 = vadd.f32 %v3200_v25, %v3050_v58 }
0x241d   :  { %v3353_v52 = vpop.f32.mrf.mxu1 }
0x241e   :  { %v3363_v26 = vadd.f32 %v3353_v52, %v3208_v28 }
0x2420   :  { %v3367_v49 = vadd.f32 %v3363_v26, %v7022_v59  ;;  %v3053_v59 = vadd.f32 %v7241_v37, %v3027_v3 }
0x2422   :  { %v7365_v17 = vadd.f32 %v5520_v4, %v3367_v49 }
0x2424   :  { %v3375_v1 = vsel %vm177_vm0, %v7365_v17, 0.0 }
0x2425   :  { %3376 = vadd.xlane.f32.xlu2 %v3375_v1  ;;  %v3355_v12 = vpop.f32.mrf.mxu1 }
0x2426   :  { %v3364_v39 = vadd.f32 %v3355_v12, %v3209_v50 }
0x2428   :  { %v3368_v35 = vadd.f32 %v3364_v39, %v7033_v19 }
0x242a   :  { %v7371_v55 = vadd.f32 %v5520_v4, %v3368_v35 }
0x242b   :  { %v3203_v5 = vpop.f32.mrf.mxu2 }
0x242c   :  { %v3210_v8 = vadd.f32 %v3203_v5, %v3053_v59  ;;  %v3378_v6 = vsel %vm177_vm0, %v7371_v55, 0.0 }
0x242d   :  { %3379 = vadd.xlane.f32.xlu2 %v3378_v6  ;;  %v3358_v45 = vpop.f32.mrf.mxu1 }
0x242e   :  { %v3365_v41 = vadd.f32 %v3358_v45, %v3210_v8 }
0x2430   :  { %v3369_v21 = vadd.f32 %v3365_v41, %v7044_v2 }
0x2432   :  { %v7377_v36 = vadd.f32 %v5520_v4, %v3369_v21 }
0x2433   :  { %v3205_v24 = vpop.f32.mrf.mxu2 }
0x2434   :  { %v3211_v19 = vadd.f32 %v3205_v24, %v3055_v56  ;;  %v3381_v37 = vsel %vm177_vm0, %v7377_v36, 0.0 }
0x2435   :  { %3382 = vadd.xlane.f32.xlu1 %v3381_v37  ;;  %v3360_v16 = vpop.f32.mrf.mxu1 }
0x2436   :  { %v3366_v44 = vadd.f32 %v3360_v16, %v3211_v19 }
0x2438   :  { %v3370_v10 = vadd.f32 %v3366_v44, %v7055_v63 }
0x243a   :  { %v7382_v47 = vadd.f32 %v5520_v4, %v3370_v10 }
0x243c   :  { %v3384_v51 = vsel %vm177_vm0, %v7382_v47, 0.0 }
0x243d   :  { %3385 = vadd.xlane.f32.xlu2 %v3384_v51 }
0x2498   :  { %v3377_v2 = vpop.xlane.xlu2 %3376 }
0x2499   :  { %v3387_v43 = vmul.f32 %v3377_v2, %v5735_v22 }
0x249b   :  { %v3391_v11 = vsub.f32 %v7365_v17, %v3387_v43 }
0x249d   :  { %v3395_v38 = vmul.f32 %v3391_v11, %v3391_v11 }
0x249f   :  { %v3399_v62 = vsel %vm177_vm0, %v3395_v38, 0.0 }
0x24a0   :  { %v3380_v42 = vpop.xlane.xlu2 %3379  ;;  %3400 = vadd.xlane.f32.xlu1 %v3399_v62 }
0x24a1   :  { %v3388_v32 = vmul.f32 %v3380_v42, %v5735_v22 }
0x24a3   :  { %v3392_v63 = vsub.f32 %v7371_v55, %v3388_v32  ;;  %v5521_v32 = vld [vmem:[%s7955_s10] ss:$0 sm:$0xff] }
0x24a5   :  { %v3396_v20 = vmul.f32 %v3392_v63, %v3392_v63 }
0x24a7   :  { %v3402_v40 = vsel %vm177_vm0, %v3396_v20, 0.0 }
0x24a8   :  { %v3383_v30 = vpop.xlane.xlu1 %3382  ;;  %3403 = vadd.xlane.f32.xlu2 %v3402_v40 }
0x24a9   :  { %v3389_v18 = vmul.f32 %v3383_v30, %v5735_v22 }
0x24ab   :  { %v7394_v60 = vsub.f32 %v7377_v36, %v3389_v18 }
0x24ad   :  { %v3397_v29 = vmul.f32 %v7394_v60, %v7394_v60 }
0x24af   :  { %v3405_v3 = vsel %vm177_vm0, %v3397_v29, 0.0 }
0x24b0   :  { %3406 = vadd.xlane.f32.xlu1 %v3405_v3  ;;  %v3386_v33 = vpop.xlane.xlu2 %3385 }
0x24b1   :  { %v3390_v46 = vmul.f32 %v3386_v33, %v5735_v22 }
0x24b3   :  { %v7401_v34 = vsub.f32 %v7382_v47, %v3390_v46 }
0x24b5   :  { %v3398_v28 = vmul.f32 %v7401_v34, %v7401_v34 }
0x24b7   :  { %v3408_v52 = vsel %vm177_vm0, %v3398_v28, 0.0 }
0x24b8   :  { %3409 = vadd.xlane.f32.xlu2 %v3408_v52 }
0x2513   :  { %v3401_v26 = vpop.xlane.xlu1 %3400 }
0x2514   :  { %v3411_v49 = vmul.f32 %v3401_v26, %v5735_v22 }
0x2516   :  { %v3415_v25 = vadd.f32 1e-05, %v3411_v49 }
0x2518   :  { %5366 = vrsqrt.f32 %v3415_v25  ;;  %vm3425_vm2 = vweird.f32 %v3415_v25 }
0x251b   :  { %v3404_v58 = vpop.xlane.xlu2 %3403 }
0x251c   :  { %v3412_v4 = vmul.f32 %v3404_v58, %v5735_v22 }
0x251e   :  { %v5367_v50 = vpop.eup %5366  ;;  %v3416_v1 = vadd.f32 1e-05, %v3412_v4 }
0x251f   :  { %v3420_v12 = vmul.f32 %v5367_v50, %v3415_v25  ;;  %vm3426_vm13 = vweird.f32 %v5367_v50 }
0x2520   :  { %5368 = vrsqrt.f32 %v3416_v1  ;;  %vm3427_vm3 = vmor %vm3425_vm2, %vm3426_vm13  ;;  %vm3435_vm5 = vweird.f32 %v3416_v1 }
0x2521   :  { %v3421_v39 = vmul.f32 %v5367_v50, %v3420_v12 }
0x2523   :  { %v3422_v35 = vmul.f32 0.5, %v3421_v39  ;;  %v3407_v59 = vpop.xlane.xlu1 %3406 }
0x2524   :  { %v3413_v5 = vmul.f32 %v3407_v59, %v5735_v22 }
0x2525   :  { %v3423_v8 = vsub.f32 1.5, %v3422_v35 }
0x2526   :  { %v5369_v6 = vpop.eup %5368  ;;  %v3417_v45 = vadd.f32 1e-05, %v3413_v5 }
0x2527   :  { %v3424_v41 = vmul.f32 %v5367_v50, %v3423_v8  ;;  %v3430_v21 = vmul.f32 %v5369_v6, %v3416_v1  ;;  %vm3436_vm4 = vweird.f32 %v5369_v6 }
0x2528   :  { %5370 = vrsqrt.f32 %v3417_v45  ;;  %vm3437_vm6 = vmor %vm3435_vm5, %vm3436_vm4  ;;  %vm3445_vm10 = vweird.f32 %v3417_v45 }
0x2529   :  { %v3431_v56 = vmul.f32 %v5369_v6, %v3430_v21  ;;  %v3428_v24 = vsel %vm3427_vm3, %v5367_v50, %v3424_v41 }
0x252a   :  { %v3459_v51 = vmul.f32 %v3428_v24, %v3391_v11  ;;  %v5522_v11 = vld [vmem:[%s7956_s11] ss:$0 sm:$0xff] }
0x252b   :  { %v3432_v19 = vmul.f32 0.5, %v3431_v56  ;;  %v3410_v37 = vpop.xlane.xlu2 %3409 }
0x252c   :  { %v3414_v16 = vmul.f32 %v3410_v37, %v5735_v22  ;;  %v3463_v20 = vmul.f32 %v5521_v32, %v3459_v51 }
0x252d   :  { %v3433_v44 = vsub.f32 1.5, %v3432_v19 }
0x252e   :  { %v5371_v10 = vpop.eup %5370  ;;  %v3418_v2 = vadd.f32 1e-05, %v3414_v16  ;;  %v3467_v33 = vadd.f32 %v5522_v11, %v3463_v20 }
0x252f   :  { %v3434_v43 = vmul.f32 %v5369_v6, %v3433_v44  ;;  %v3440_v38 = vmul.f32 %v5371_v10, %v3417_v45  ;;  %vm3446_vm7 = vweird.f32 %v5371_v10 }
0x2530   :  { %5372 = vrsqrt.f32 %v3418_v2  ;;  %vm3447_vm11 = vmor %vm3445_vm10, %vm3446_vm7  ;;  %vm3455_vm13 = vweird.f32 %v3418_v2 }
0x2531   :  { %v3438_v62 = vsel %vm3437_vm6, %v5369_v6, %v3434_v43  ;;  %v3441_v42 = vmul.f32 %v5371_v10, %v3440_v38 }
0x2532   :  { %v3460_v40 = vmul.f32 %v3438_v62, %v3392_v63 }
0x2533   :  { %v3442_v30 = vmul.f32 0.5, %v3441_v42 }
0x2534   :  { %v3464_v18 = vmul.f32 %v5521_v32, %v3460_v40 }
0x2535   :  { %v3443_v29 = vsub.f32 1.5, %v3442_v30 }
0x2536   :  { %v5373_v3 = vpop.eup %5372  ;;  %v3468_v46 = vadd.f32 %v5522_v11, %v3464_v18 }
0x2537   :  { %v3444_v28 = vmul.f32 %v5371_v10, %v3443_v29  ;;  %v3450_v52 = vmul.f32 %v5373_v3, %v3418_v2  ;;  %vm3456_vm12 = vweird.f32 %v5373_v3 }
0x2538   :  { %v3471_v26 = vpack.c.bf16 %v3468_v46, %v3467_v33  ;;  %vm3457_vm2 = vmor %vm3455_vm13, %vm3456_vm12 }
0x2539   :  { %v3451_v49 = vmul.f32 %v5373_v3, %v3450_v52  ;;  %v3448_v63 = vsel %vm3447_vm11, %v5371_v10, %v3444_v28 }
0x253a   :  { %5009 = vmatmul.msk.bf16.vlgmr.msra.gmra.mxu2 %vm177_vm0, %v3471_v26  ;;  %v3461_v4 = vmul.f32 %v3448_v63, %v7394_v60 }
0x253b   :  { %v3452_v25 = vmul.f32 0.5, %v3451_v49  ;;  %3904 = vmatpush.bf16.msra.mxu2 %v5779_v48 }
0x253c   :  { %v3465_v39 = vmul.f32 %v5521_v32, %v3461_v4 }
0x253d   :  { %v3453_v58 = vsub.f32 1.5, %v3452_v25 }
0x253e   :  { %v3469_v59 = vadd.f32 %v5522_v11, %v3465_v39 }
0x253f   :  { %v3454_v50 = vmul.f32 %v5373_v3, %v3453_v58  ;;  %3905 = vmatpush.bf16.msra.mxu2 %v8090_v15  ;;  %v5523_v15 = vld [vmem:[%s7958_s13] ss:$0 sm:$0xff] }
0x2541   :  { %v3458_v1 = vsel %vm3457_vm2, %v5373_v3, %v3454_v50 }
0x2542   :  { %v3462_v12 = vmul.f32 %v3458_v1, %v7401_v34 }
0x2543   :  { %3906 = vmatpush.bf16.msra.mxu2 %v8091_v54 }
0x2544   :  { %v3466_v35 = vmul.f32 %v5521_v32, %v3462_v12 }
0x2546   :  { %v3470_v5 = vadd.f32 %v5522_v11, %v3466_v35 }
0x2547   :  { %3907 = vmatpush.bf16.msra.mxu2 %v8092_v7 }
0x2548   :  { %v3472_v48 = vpack.c.bf16 %v3470_v5, %v3469_v59 }
0x254a   :  { %5010 = vmatmul.msk.bf16.gmra.mxu2 %vm177_vm0, %v3472_v48  ;;  %v5524_v48 = vld [vmem:[%s7960_s15] ss:$0 sm:$0xff] }
0x25bd   :  { %v3488_v60 = vpop.f32.mrf.mxu2 }
0x25be   :  { %v3489_v8 = vadd.f32 %v5523_v15, %v3488_v60 }
0x25c0   :  { %v3502_v6 = vmul.f32 0.044715, %v3489_v8  ;;  %v3498_v18 = vmul.f32 0.5, %v3489_v8 }
0x25c2   :  { %v3506_v45 = vmul.f32 %v3502_v6, %v3489_v8 }
0x25c4   :  { %v3510_v34 = vmul.f32 %v3506_v45, %v3489_v8 }
0x25c5   :  { %v3490_v41 = vpop.f32.mrf.mxu2 }
0x25c6   :  { %v3514_v21 = vadd.f32 %v3510_v34, %v3489_v8  ;;  %v3491_v54 = vadd.f32 %v5523_v15, %v3490_v41 }
0x25c8   :  { %v3503_v56 = vmul.f32 0.044715, %v3491_v54  ;;  %v3518_v24 = vmul.f32 0.7978846, %v3514_v21  ;;  %v3499_v29 = vmul.f32 0.5, %v3491_v54 }
0x25ca   :  { %v3507_v19 = vmul.f32 %v3503_v56, %v3491_v54  ;;  %5374 = vtanh.f32 %v3518_v24 }
0x25cc   :  { %v3511_v37 = vmul.f32 %v3507_v19, %v3491_v54 }
0x25cd   :  { %v3493_v7 = vpop.f32.mrf.mxu2 }
0x25ce   :  { %v3515_v16 = vadd.f32 %v3511_v37, %v3491_v54  ;;  %v3494_v44 = vadd.f32 %v5523_v15, %v3493_v7 }
0x25d0   :  { %v3519_v10 = vmul.f32 0.7978846, %v3515_v16  ;;  %v3504_v51 = vmul.f32 0.044715, %v3494_v44  ;;  %v5375_v43 = vpop.eup %5374  ;;  %v3500_v50 = vmul.f32 0.5, %v3494_v44 }
0x25d1   :  { %v3526_v20 = vadd.f32 1.0, %v5375_v43 }
0x25d2   :  { %5376 = vtanh.f32 %v3519_v10  ;;  %v3508_v2 = vmul.f32 %v3504_v51, %v3494_v44 }
0x25d3   :  { %v3530_v46 = vmul.f32 %v3526_v20, %v3498_v18 }
0x25d4   :  { %v3512_v38 = vmul.f32 %v3508_v2, %v3494_v44 }
0x25d5   :  { %v3495_v62 = vpop.f32.mrf.mxu2 }
0x25d6   :  { %v3496_v42 = vadd.f32 %v5523_v15, %v3495_v62  ;;  %v3516_v32 = vadd.f32 %v3512_v38, %v3494_v44 }
0x25d8   :  { %v5377_v40 = vpop.eup %5376  ;;  %v3505_v30 = vmul.f32 0.044715, %v3496_v42  ;;  %v3520_v33 = vmul.f32 0.7978846, %v3516_v32  ;;  %v3501_v1 = vmul.f32 0.5, %v3496_v42 }
0x25d9   :  { %v3527_v3 = vadd.f32 1.0, %v5377_v40 }
0x25da   :  { %v3509_v11 = vmul.f32 %v3505_v30, %v3496_v42  ;;  %5378 = vtanh.f32 %v3520_v33 }
0x25db   :  { %v3531_v28 = vmul.f32 %v3527_v3, %v3499_v29 }
0x25dc   :  { %v3513_v52 = vmul.f32 %v3509_v11, %v3496_v42 }
0x25dd   :  { %v3534_v26 = vpack.c.bf16 %v3531_v28, %v3530_v46 }
0x25de   :  { %v3517_v49 = vadd.f32 %v3513_v52, %v3496_v42 }
0x25df   :  { %3544 = vmatmul.bf16.vlgmr.msrb.gmra.mxu3 %v3534_v26 }
0x25e0   :  { %v3521_v63 = vmul.f32 0.7978846, %v3517_v49  ;;  %v5379_v25 = vpop.eup %5378 }
0x25e1   :  { %v3528_v58 = vadd.f32 1.0, %v5379_v25 }
0x25e2   :  { %5380 = vtanh.f32 %v3521_v63 }
0x25e3   :  { %v3532_v39 = vmul.f32 %v3528_v58, %v3500_v50 }
0x25e8   :  { %v5381_v4 = vpop.eup %5380 }
0x25e9   :  { %v3529_v12 = vadd.f32 1.0, %v5381_v4 }
0x25eb   :  { %v3533_v35 = vmul.f32 %v3529_v12, %v3501_v1 }
0x25ed   :  { %v3535_v59 = vpack.c.bf16 %v3533_v35, %v3532_v39 }
0x25ef   :  { %3549 = vmatmul.bf16.gmra.mxu3 %v3535_v59 }
0x2662   :  { %v3545_v5 = vpop.f32.mrf.mxu3 }
0x2663   :  { %v3546_v60 = vadd.f32 %v5524_v48, %v3545_v5 }
0x2665   :  { %v3555_v15 = vadd.f32 %v3546_v60, %v7365_v17 }
0x2667   :  { %v3559_v8 = vsel %vm177_vm0, %v3555_v15, 0.0 }
0x2668   :  { %3560 = vadd.xlane.f32.xlu2 %v3559_v8 }
0x266a   :  { %v3547_v6 = vpop.f32.mrf.mxu3 }
0x266b   :  { %v3548_v21 = vadd.f32 %v5524_v48, %v3547_v6 }
0x266d   :  { %v3556_v24 = vadd.f32 %v3548_v21, %v7371_v55 }
0x266f   :  { %v3562_v7 = vsel %vm177_vm0, %v3556_v24, 0.0 }
0x2672   :  { %v3550_v45 = vpop.f32.mrf.mxu3 }
0x2673   :  { %v3551_v34 = vadd.f32 %v5524_v48, %v3550_v45 }
0x2675   :  { %v3557_v41 = vadd.f32 %v3551_v34, %v7377_v36 }
0x2677   :  { %v3565_v54 = vsel %vm177_vm0, %v3557_v41, 0.0 }
0x2678   :  { %3566 = vadd.xlane.f32.xlu1 %v3565_v54 }
0x267a   :  { %v3552_v56 = vpop.f32.mrf.mxu3 }
0x267b   :  { %v3553_v19 = vadd.f32 %v5524_v48, %v3552_v56 }
0x267d   :  { %v3558_v37 = vadd.f32 %v3553_v19, %v7382_v47 }
0x267f   :  { %v3568_v17 = vsel %vm177_vm0, %v3558_v37, 0.0 }
0x2680   :  { %3569 = vadd.xlane.f32.xlu0 %v3568_v17  ;;  %3563 = vadd.xlane.f32.xlu1 %v3562_v7 }
0x26db   :  { %v3561_v16 = vpop.xlane.xlu2 %3560 }
0x26dc   :  { %v3571_v44 = vmul.f32 %v3561_v16, %v5735_v22 }
0x26de   :  { %v7439_v36 = vsub.f32 %v3555_v15, %v3571_v44 }
0x26e0   :  { %v3579_v10 = vmul.f32 %v7439_v36, %v7439_v36 }
0x26e2   :  { %v3583_v51 = vsel %vm177_vm0, %v3579_v10, 0.0 }
0x26e3   :  { %3584 = vadd.xlane.f32.xlu1 %v3583_v51 }
0x26eb   :  { %v3567_v55 = vpop.xlane.xlu1 %3566 }
0x26ec   :  { %v3573_v47 = vmul.f32 %v3567_v55, %v5735_v22 }
0x26ee   :  { %v7445_v2 = vsub.f32 %v3557_v41, %v3573_v47 }
0x26f0   :  { %v3581_v43 = vmul.f32 %v7445_v2, %v7445_v2 }
0x26f2   :  { %v3589_v38 = vsel %vm177_vm0, %v3581_v43, 0.0 }
0x26f3   :  { %v3570_v62 = vpop.xlane.xlu0 %3569  ;;  %3590 = vadd.xlane.f32.xlu0 %v3589_v38  ;;  %v3564_v42 = vpop.xlane.xlu1 %3563 }
0x26f4   :  { %v3574_v32 = vmul.f32 %v3570_v62, %v5735_v22  ;;  %v3572_v20 = vmul.f32 %v3564_v42, %v5735_v22 }
0x26f6   :  { %v7452_v40 = vsub.f32 %v3558_v37, %v3574_v32  ;;  %v7454_v30 = vsub.f32 %v3556_v24, %v3572_v20  ;;  %v5525_v20 = vld [vmem:[%s8075_s8] ss:$0 sm:$0xff] }
0x26f8   :  { %v3582_v18 = vmul.f32 %v7452_v40, %v7452_v40  ;;  %v3580_v29 = vmul.f32 %v7454_v30, %v7454_v30 }
0x26fa   :  { %v3592_v3 = vsel %vm177_vm0, %v3582_v18, 0.0  ;;  %v3586_v11 = vsel %vm177_vm0, %v3580_v29, 0.0  ;;  %v3655_v18 = vadd.s32 13, %v8095_v31 }
0x26fb   :  { %3593 = vadd.xlane.f32.xlu2 %v3592_v3  ;;  %3587 = vadd.xlane.f32.xlu0 %v3586_v11  ;;  %v5526_v11 = vld [vmem:[%s7962_s17] ss:$0 sm:$0xff] }
0x2756   :  { %v3585_v33 = vpop.xlane.xlu1 %3584 }
0x2757   :  { %v3595_v46 = vmul.f32 %v3585_v33, %v5735_v22 }
0x2759   :  { %v3599_v28 = vadd.f32 1e-05, %v3595_v46 }
0x275b   :  { %5382 = vrsqrt.f32 %v3599_v28  ;;  %vm3609_vm10 = vweird.f32 %v3599_v28 }
0x2761   :  { %v5383_v63 = vpop.eup %5382 }
0x2762   :  { %v3604_v4 = vmul.f32 %v5383_v63, %v3599_v28  ;;  %vm3610_vm6 = vweird.f32 %v5383_v63  ;;  %v8125_v28 = vld [vmem:[#allocation23_spill] sm:$0xff] }
0x2763   :  { %vm3611_vm12 = vmor %vm3609_vm10, %vm3610_vm6  ;;  %vm3704_vm6 = vcmp.eq.s32.totalorder %v8125_v28, 2 }
0x2764   :  { %v3605_v5 = vmul.f32 %v5383_v63, %v3604_v4 }
0x2766   :  { %v3591_v52 = vpop.xlane.xlu0 %3590  ;;  %v3606_v15 = vmul.f32 0.5, %v3605_v5 }
0x2767   :  { %v3597_v26 = vmul.f32 %v3591_v52, %v5735_v22 }
0x2768   :  { %v3607_v41 = vsub.f32 1.5, %v3606_v15 }
0x2769   :  { %v3601_v49 = vadd.f32 1e-05, %v3597_v26  ;;  %v8126_v26 = vmov 0.0  }
0x276a   :  { %v3608_v37 = vmul.f32 %v5383_v63, %v3607_v41 }
0x276b   :  { %5384 = vrsqrt.f32 %v3601_v49  ;;  %vm3629_vm4 = vweird.f32 %v3601_v49 }
0x276c   :  { %v3612_v55 = vsel %vm3611_vm12, %v5383_v63, %v3608_v37  ;;  %v8131_v37 = vld [vmem:[#allocation21_spill] sm:$0xff] }
0x276d   :  { %v3643_v42 = vmul.f32 %v3612_v55, %v7439_v36 }
0x276e   :  { %v3588_v25 = vpop.xlane.xlu0 %3587  ;;  %v3594_v58 = vpop.xlane.xlu2 %3593 }
0x276f   :  { %v3596_v50 = vmul.f32 %v3588_v25, %v5735_v22  ;;  %v3598_v1 = vmul.f32 %v3594_v58, %v5735_v22  ;;  %v3647_v46 = vmul.f32 %v5525_v20, %v3643_v42 }
0x2771   :  { %v5385_v12 = vpop.eup %5384  ;;  %v3600_v39 = vadd.f32 1e-05, %v3596_v50  ;;  %v3602_v35 = vadd.f32 1e-05, %v3598_v1  ;;  %v3651_v52 = vadd.f32 %v5526_v11, %v3647_v46 }
0x2772   :  { %v3624_v59 = vmul.f32 %v5385_v12, %v3601_v49  ;;  %vm3630_vm3 = vweird.f32 %v5385_v12 }
0x2773   :  { %5386 = vrsqrt.f32 %v3600_v39  ;;  %vm3631_vm5 = vmor %vm3629_vm4, %vm3630_vm3  ;;  %vm3619_vm13 = vweird.f32 %v3600_v39  ;;  %vm3639_vm14 = vweird.f32 %v3602_v35 }
0x2774   :  { %v3625_v48 = vmul.f32 %v5385_v12, %v3624_v59  ;;  %5388 = vrsqrt.f32 %v3602_v35 }
0x2776   :  { %v3626_v60 = vmul.f32 0.5, %v3625_v48  ;;  %v8127_v48 = vld [vmem:[#allocation24_spill] sm:$0xff] }
0x2778   :  { %v3627_v8 = vsub.f32 1.5, %v3626_v60 }
0x2779   :  { %v5387_v6 = vpop.eup %5386 }
0x277a   :  { %v5389_v45 = vpop.eup %5388  ;;  %v3614_v34 = vmul.f32 %v5387_v6, %v3600_v39  ;;  %v3628_v21 = vmul.f32 %v5385_v12, %v3627_v8  ;;  %vm3620_vm7 = vweird.f32 %v5387_v6 }
0x277b   :  { %v3634_v54 = vmul.f32 %v5389_v45, %v3602_v35  ;;  %vm3640_vm11 = vweird.f32 %v5389_v45  ;;  %vm3621_vm2 = vmor %vm3619_vm13, %vm3620_vm7 }
0x277c   :  { %v3615_v56 = vmul.f32 %v5387_v6, %v3614_v34  ;;  %v3632_v17 = vsel %vm3631_vm5, %v5385_v12, %v3628_v21  ;;  %vm3641_vm3 = vmor %vm3639_vm14, %vm3640_vm11  ;;  %vm3656_vm14 = vcmp.eq.s32.totalorder %v8125_v28, %v3655_v18  ;;  %v5527_v12 = vld [vmem:[%s7964_s19] ss:$0 sm:$0xff]  ;;  %v8128_v21 = vld [vmem:[#allocation5_spill] sm:$0xff] }
0x277d   :  { %v3635_v24 = vmul.f32 %v5389_v45, %v3634_v54  ;;  %v3645_v10 = vmul.f32 %v3632_v17, %v7445_v2  ;;  %v5011_v49 = vsel %vm3656_vm14, 1.0, %v8126_v26  ;;  %v8132_v17 = vld [vmem:[#allocation27_spill] sm:$0xff] }
0x277e   :  { %v3616_v19 = vmul.f32 0.5, %v3615_v56  ;;  %v3659_v25 = vpack.c.bf16 %v5011_v49, %v5011_v49  ;;  %v8129_v56 = vmov 1.0|1.0  }
0x277f   :  { %v3636_v7 = vmul.f32 0.5, %v3635_v24  ;;  %v3649_v2 = vmul.f32 %v5525_v20, %v3645_v10  ;;  %v8130_v24 = vld [vmem:[#allocation26_spill] sm:$0xff] }
0x2780   :  { %v3617_v16 = vsub.f32 1.5, %v3616_v19  ;;  %v3725_v19 = vadd.s32 14, %v8130_v24 }
0x2781   :  { %v3637_v44 = vsub.f32 1.5, %v3636_v7  ;;  %v3653_v33 = vadd.f32 %v5526_v11, %v3649_v2  ;;  %v8135_v2 = vld [vmem:[#allocation6_spill] sm:$0xff] }
0x2782   :  { %v3618_v51 = vmul.f32 %v5387_v6, %v3617_v16  ;;  %vm3726_vm11 = vcmp.eq.s32.totalorder %v8131_v37, %v3725_v19  ;;  %vm3727_vm12 = vcmp.eq.s32.totalorder %v8132_v17, %v3725_v19 }
0x2783   :  { %v3638_v47 = vmul.f32 %v5389_v45, %v3637_v44  ;;  %v5017_v16 = vsel %vm3726_vm11, 1.0, %v8126_v26  ;;  %v5018_v44 = vsel %vm3727_vm12, 1.0, %v8126_v26 }
0x2784   :  { %v3622_v43 = vsel %vm3621_vm2, %v5387_v6, %v3618_v51  ;;  %v3738_v55 = vpack.c.bf16 %v5018_v44, %v5017_v16 }
0x2785   :  { %v3644_v38 = vmul.f32 %v3622_v43, %v7454_v30  ;;  %v3642_v62 = vsel %vm3641_vm3, %v5389_v45, %v3638_v47  ;;  %v8133_v43 = vld [vmem:[#allocation28_spill] sm:$0xff] }
0x2786   :  { %v3646_v32 = vmul.f32 %v3642_v62, %v7452_v40  ;;  %vm3728_vm13 = vcmp.eq.s32.totalorder %v8133_v43, %v3725_v19 }
0x2787   :  { %v3648_v3 = vmul.f32 %v5525_v20, %v3644_v38  ;;  %v8134_v38 = vld [vmem:[#allocation29_spill] sm:$0xff]  ;;  %v5019_v62 = vsel %vm3728_vm13, 1.0, %v8126_v26 }
0x2788   :  { %v3650_v29 = vmul.f32 %v5525_v20, %v3646_v32  ;;  %vm3729_vm2 = vcmp.eq.s32.totalorder %v8134_v38, %v3725_v19 }
0x2789   :  { %v3652_v40 = vadd.f32 %v5526_v11, %v3648_v3  ;;  %v5020_v42 = vsel %vm3729_vm2, 1.0, %v8126_v26  ;;  %vm8142_vm2 = vcmask 130048  }
0x278a   :  { %v3654_v30 = vadd.f32 %v5526_v11, %v3650_v29  ;;  %v3739_v32 = vpack.c.bf16 %v5020_v42, %v5019_v62  ;;  %v5528_v29 = vld [vmem:[%s8049_s26] sm:$0xff] }
0x278b   :  { %v3660_v63 = vpack.c.bf16 %v3652_v40, %v3651_v52 }
0x278c   :  { %v3661_v36 = vpack.c.bf16 %v3654_v30, %v3653_v33  ;;  %v8136_v30 = vld [vmem:[#allocation7_spill] sm:$0xff] }
0x278e   :  { %3671 = vmatpush.bf16.msra.mxu0 %v3661_v36  ;;  %v5529_v36 = vld [vmem:[%s8049_s26 + $0x8] sm:$0xff] }
0x2792   :  { %3672 = vmatpush.bf16.msra.mxu0 %v3660_v63  ;;  %v8137_v63 = vld [vmem:[#allocation22_spill] sm:$0xff] }
0x2795   :  { %5012 = vmatmul.msk.bf16.vlgmr.msra.gmra.mxu0 %vm403_vm1, %v3659_v25 }
0x2812   :  { %v3674_v58 = vpop.f32.mrf.mxu0 }
0x2813   :  { %v3678_v4 = vpack.c.bf16 %v3674_v58, %v3674_v58  ;;  %v5530_v58 = vld [vmem:[%s8049_s26 + $0x10] sm:$0xff] }
0x2815   :  { %5013 = vmatmul.msk.bf16.vlgmr.msra.gmra.mxu1 %vm177_vm0, %v3678_v4 }
0x281a   :  { %v3676_v50 = vpop.f32.mrf.mxu0 }
0x2892   :  { %v3691_v1 = vpop.f32.mrf.mxu1 }
0x2893   :  { %v3692_v39 = vadd.f32 %v5527_v12, %v3691_v1  ;;  %v8138_v12 = vld [vmem:[#allocation25_spill] sm:$0xff] }
0x2895   :  { %v3695_v35 = vsel %vm1340_vm15, %v3692_v39, -inf }
0x2896   :  { %3696 = vmax.xlane.f32.xlu2 %v3695_v35  ;;  %v5531_v35 = vld [vmem:[%s8049_s26 + $0x18] sm:$0xff] }
0x289a   :  { %v3693_v59 = vpop.f32.mrf.mxu1 }
0x2909   :  { %v3697_v5 = vpop.xlane.xlu2 %3696 }
0x290a   :  { %vm3698_vm4 = vcmp.ge.f32.partialorder %v3692_v39, %v3697_v5 }
0x290b   :  { %v3699_v60 = vsel %vm3698_vm4, %v8127_v48, 128.0 }
0x290c   :  { %v3700_v15 = vsel %vm1340_vm15, %v3699_v60, inf }
0x290d   :  { %3701 = vmin.xlane.f32.xlu1 %v3700_v15 }
0x2980   :  { %v3702_v8 = vpop.xlane.xlu1 %3701 }
0x2981   :  { %vm5068_vm5 = vcmp.lt.s32.totalorder %v3702_v8, 0  ;;  %v5069_v6 = vceil.f32 %v3702_v8  ;;  %v5070_v45 = vfloor.f32 %v3702_v8 }
0x2983   :  { %v5071_v34 = vsel %vm5068_vm5, %v5069_v6, %v5070_v45 }
0x2984   :  { %v5072_v41 = vcvt.f32.s32 %v5071_v34 }
0x2986   :  { %vm3708_vm7 = vcmp.eq.s32.totalorder %v8125_v28, %v5072_v41  ;;  %v7490_v54 = vsel %vm3704_vm6, %v5072_v41, %v8128_v21 }
0x2987   :  { %vm5015_vm10 = vmpackc.low %vm3708_vm7, %vm3708_vm7 }
0x2988   :  { %5016 = vmatmul.msk.bf16.vlgmr.msrb.gmra.mxu2 %vm5015_vm10, %v8129_v56 }
0x2a0b   :  { %v3721_v7 = vpop.f32.mrf.mxu2 }
0x2a0c   :  { %v3740_v10 = vpack.c.bf16 %v3721_v7, %v3721_v7 }
0x2a0e   :  { %v3748_v51 = vsel %vm1404_vm8, %v3740_v10, 0 }
0x2a0f   :  { %3757 = vmatpush.bf16.msrb.mxu0 %v3748_v51 }
0x2a12   :  { %5021 = vmatmul.msk.bf16.vlgmr.msrb.gmra.mxu0 %vm1397_vm9, %v3738_v55 }
0x2a13   :  { %v3723_v47 = vpop.f32.mrf.mxu2 }
0x2a22   :  { %5022 = vmatmul.msk.bf16.gmra.mxu0 %vm1397_vm9, %v3739_v32 }
0x2a8f   :  { %v3759_v20 = vpop.f32.mrf.mxu0 }
0x2a90   :  { %v3769_v18 = vadd.f32 %v3759_v20, %v8135_v2 }
0x2a92   :  { %v7509_v3 = vadd.f32 %v5528_v29, %v3769_v18 }
0x2a94   :  { %v3777_v11 = vsel %vm177_vm0, %v7509_v3, 0.0 }
0x2a95   :  { %3778 = vadd.xlane.f32.xlu0 %v3777_v11 }
0x2a97   :  { %v3761_v33 = vpop.f32.mrf.mxu0 }
0x2a98   :  { %v3770_v46 = vadd.f32 %v3761_v33, %v8136_v30 }
0x2a9a   :  { %v7517_v40 = vadd.f32 %v5529_v36, %v3770_v46 }
0x2a9c   :  { %v3780_v52 = vsel %vm177_vm0, %v7517_v40, 0.0 }
0x2a9d   :  { %3781 = vadd.xlane.f32.xlu2 %v3780_v52 }
0x2a9f   :  { %v3764_v49 = vpop.f32.mrf.mxu0 }
0x2aa0   :  { %v3771_v25 = vadd.f32 %v3764_v49, %v8137_v63 }
0x2aa2   :  { %v7525_v4 = vadd.f32 %v5530_v58, %v3771_v25 }
0x2aa4   :  { %v3783_v50 = vsel %vm177_vm0, %v7525_v4, 0.0 }
0x2aa5   :  { %3784 = vadd.xlane.f32.xlu1 %v3783_v50 }
0x2aa7   :  { %v3766_v1 = vpop.f32.mrf.mxu0 }
0x2aa8   :  { %v3772_v39 = vadd.f32 %v3766_v1, %v8138_v12 }
0x2aaa   :  { %v7533_v59 = vadd.f32 %v5531_v35, %v3772_v39 }
0x2aac   :  { %v3786_v5 = vsel %vm177_vm0, %v7533_v59, 0.0 }
0x2aad   :  { %3787 = vadd.xlane.f32.xlu0 %v3786_v5 }
0x2b08   :  { %v3779_v60 = vpop.xlane.xlu0 %3778 }
0x2b09   :  { %v3789_v15 = vmul.f32 %v3779_v60, %v5735_v22 }
0x2b0b   :  { %v3793_v8 = vsub.f32 %v7509_v3, %v3789_v15 }
0x2b0d   :  { %v3797_v6 = vmul.f32 %v3793_v8, %v3793_v8 }
0x2b0f   :  { %v3801_v45 = vsel %vm177_vm0, %v3797_v6, 0.0 }
0x2b10   :  { %3802 = vadd.xlane.f32.xlu2 %v3801_v45  ;;  %v3782_v34 = vpop.xlane.xlu2 %3781 }
0x2b11   :  { %v3790_v41 = vmul.f32 %v3782_v34, %v5735_v22 }
0x2b13   :  { %v3794_v21 = vsub.f32 %v7517_v40, %v3790_v41  ;;  %v5532_v41 = vld [vmem:[%s8054_s4] ss:$0 sm:$0xff]  ;;  %s4888_s4 = sshll.u32 %s7966_s21, 4  ;;  %s4889_s4 = int_to_ptr.hbm [resolvable:$true] %s4888_s4 }
0x2b15   :  { %v3798_v56 = vmul.f32 %v3794_v21, %v3794_v21 }
0x2b17   :  { %v3804_v24 = vsel %vm177_vm0, %v3798_v56, 0.0 }
0x2b18   :  { %3805 = vadd.xlane.f32.xlu1 %v3804_v24  ;;  %v3785_v19 = vpop.xlane.xlu1 %3784 }
0x2b19   :  { %v3791_v37 = vmul.f32 %v3785_v19, %v5735_v22 }
0x2b1b   :  { %v7545_v17 = vsub.f32 %v7525_v4, %v3791_v37 }
0x2b1d   :  { %v3799_v7 = vmul.f32 %v7545_v17, %v7545_v17 }
0x2b1f   :  { %v3807_v16 = vsel %vm177_vm0, %v3799_v7, 0.0 }
0x2b20   :  { %3808 = vadd.xlane.f32.xlu0 %v3807_v16  ;;  %v3788_v44 = vpop.xlane.xlu0 %3787 }
0x2b21   :  { %v3792_v10 = vmul.f32 %v3788_v44, %v5735_v22 }
0x2b23   :  { %v7552_v51 = vsub.f32 %v7533_v59, %v3792_v10 }
0x2b25   :  { %v3800_v55 = vmul.f32 %v7552_v51, %v7552_v51 }
0x2b27   :  { %v3810_v47 = vsel %vm177_vm0, %v3800_v55, 0.0 }
0x2b28   :  { %3811 = vadd.xlane.f32.xlu2 %v3810_v47 }
0x2b83   :  { %v3803_v43 = vpop.xlane.xlu2 %3802 }
0x2b84   :  { %v3813_v38 = vmul.f32 %v3803_v43, %v5735_v22 }
0x2b86   :  { %v3817_v62 = vadd.f32 1e-05, %v3813_v38 }
0x2b88   :  { %5390 = vrsqrt.f32 %v3817_v62  ;;  %vm3827_vm9 = vweird.f32 %v3817_v62 }
0x2b8b   :  { %v3806_v42 = vpop.xlane.xlu1 %3805 }
0x2b8c   :  { %v3814_v32 = vmul.f32 %v3806_v42, %v5735_v22 }
0x2b8e   :  { %v5391_v20 = vpop.eup %5390  ;;  %v3818_v2 = vadd.f32 1e-05, %v3814_v32 }
0x2b8f   :  { %v3822_v18 = vmul.f32 %v5391_v20, %v3817_v62  ;;  %vm3828_vm8 = vweird.f32 %v5391_v20 }
0x2b90   :  { %5392 = vrsqrt.f32 %v3818_v2  ;;  %vm3829_vm3 = vmor %vm3827_vm9, %vm3828_vm8  ;;  %vm3837_vm4 = vweird.f32 %v3818_v2 }
0x2b91   :  { %v3823_v29 = vmul.f32 %v5391_v20, %v3822_v18  ;;  %vm8143_vm8 = vmmov %vm8142_vm2 }
0x2b92   :  { %vm8145_vm9 = vmmov %vm8142_vm2 }
0x2b93   :  { %v3824_v11 = vmul.f32 0.5, %v3823_v29  ;;  %v3809_v33 = vpop.xlane.xlu0 %3808 }
0x2b94   :  { %v3815_v30 = vmul.f32 %v3809_v33, %v5735_v22 }
0x2b95   :  { %v3825_v46 = vsub.f32 1.5, %v3824_v11 }
0x2b96   :  { %v5393_v36 = vpop.eup %5392  ;;  %v3819_v52 = vadd.f32 1e-05, %v3815_v30 }
0x2b97   :  { %v3826_v49 = vmul.f32 %v5391_v20, %v3825_v46  ;;  %v3832_v63 = vmul.f32 %v5393_v36, %v3818_v2  ;;  %vm3838_vm14 = vweird.f32 %v5393_v36 }
0x2b98   :  { %5394 = vrsqrt.f32 %v3819_v52  ;;  %vm3839_vm5 = vmor %vm3837_vm4, %vm3838_vm14  ;;  %vm3847_vm7 = vweird.f32 %v3819_v52 }
0x2b99   :  { %v3833_v25 = vmul.f32 %v5393_v36, %v3832_v63  ;;  %v3830_v58 = vsel %vm3829_vm3, %v5391_v20, %v3826_v49  ;;  %v8139_v63 = vld [vmem:[#allocation8_spill] sm:$0xff]  ;;  %vm8147_vm3 = vmmov %vm8142_vm2 }
0x2b9a   :  { %v3861_v5 = vmul.f32 %v3830_v58, %v3793_v8  ;;  %v5533_v8 = vld [vmem:[%s8055_s22] ss:$0 sm:$0xff]  ;;  %vm8149_vm4 = vmmov %vm8142_vm2 }
0x2b9b   :  { %v3834_v50 = vmul.f32 0.5, %v3833_v25  ;;  %v3812_v1 = vpop.xlane.xlu2 %3811 }
0x2b9c   :  { %v3816_v12 = vmul.f32 %v3812_v1, %v5735_v22  ;;  %v3865_v56 = vmul.f32 %v5532_v41, %v3861_v5 }
0x2b9d   :  { %v3835_v39 = vsub.f32 1.5, %v3834_v50 }
0x2b9e   :  { %v5395_v35 = vpop.eup %5394  ;;  %v3820_v60 = vadd.f32 1e-05, %v3816_v12  ;;  %v3869_v44 = vadd.f32 %v5533_v8, %v3865_v56 }
0x2b9f   :  { %v3836_v15 = vmul.f32 %v5393_v36, %v3835_v39  ;;  %v3842_v6 = vmul.f32 %v5395_v35, %v3819_v52  ;;  %vm3848_vm6 = vweird.f32 %v5395_v35 }
0x2ba0   :  { %5396 = vrsqrt.f32 %v3820_v60  ;;  %vm3849_vm10 = vmor %vm3847_vm7, %vm3848_vm6  ;;  %vm3857_vm12 = vweird.f32 %v3820_v60 }
0x2ba1   :  { %v3840_v45 = vsel %vm3839_vm5, %v5393_v36, %v3836_v15  ;;  %v3843_v34 = vmul.f32 %v5395_v35, %v3842_v6  ;;  %v8140_v15 = vld [vmem:[#allocation9_spill] sm:$0xff]  ;;  %vm8150_vm5 = vmmov %vm8142_vm2 }
0x2ba2   :  { %v3862_v24 = vmul.f32 %v3840_v45, %v3794_v21  ;;  %vm8151_vm6 = vmmov %vm8142_vm2 }
0x2ba3   :  { %v3844_v19 = vmul.f32 0.5, %v3843_v34  ;;  %vm8152_vm7 = vmmov %vm8142_vm2 }
0x2ba4   :  { %v3866_v37 = vmul.f32 %v5532_v41, %v3862_v24 }
0x2ba5   :  { %v3845_v7 = vsub.f32 1.5, %v3844_v19  ;;  %v8141_v19 = vld [vmem:[#allocation10_spill] sm:$0xff] }
0x2ba6   :  { %v5397_v16 = vpop.eup %5396  ;;  %v3870_v10 = vadd.f32 %v5533_v8, %v3866_v37 }
0x2ba7   :  { %v3846_v55 = vmul.f32 %v5395_v35, %v3845_v7  ;;  %v3852_v47 = vmul.f32 %v5397_v16, %v3820_v60  ;;  %vm3858_vm11 = vweird.f32 %v5397_v16 }
0x2ba8   :  { %v3873_v43 = vpack.c.bf16 %v3870_v10, %v3869_v44  ;;  %vm3859_vm13 = vmor %vm3857_vm12, %vm3858_vm11  ;;  %v8144_v44 = vld [vmem:[#allocation11_spill] sm:$0xff]  ;;  %v8146_v10 = vld [vmem:[#allocation12_spill] sm:$0xff] }
0x2ba9   :  { %v3853_v38 = vmul.f32 %v5397_v16, %v3852_v47  ;;  %v3850_v21 = vsel %vm3849_vm10, %v5395_v35, %v3846_v55  ;;  %v5534_v55 = vld [vmem:[%s8058_s25] sm:$0x1]  ;;  %v8148_v47 = vmov -1e+09   ;;  %vm8153_vm10 = vmmov %vm8142_vm2 }
0x2baa   :  { %5023 = vmatmul.msk.bf16.vlgmr.msrb.gmra.mxu1 %vm177_vm0, %v3873_v43  ;;  %5025 = vmatmul.msk.bf16.vlgmr.msra.gmra.mxu2 %vm177_vm0, %v3873_v43  ;;  %v3863_v32 = vmul.f32 %v3850_v21, %v7545_v17  ;;  %vm3919_vm14 = vcmp.lt.s32.totalorder %v5534_v55, 15  ;;  %v5535_v21 = vld [vmem:[%s8059_s28] sm:$0xff]  ;;  %vm8154_vm11 = vmmov %vm8142_vm2 }
0x2bab   :  { %v3854_v62 = vmul.f32 0.5, %v3853_v38  ;;  %v3920_v43 = vsel %vm3919_vm14, 0.0, %v8148_v47  ;;  %vm8155_vm12 = vmmov %vm8142_vm2 }
0x2bac   :  { %v3867_v29 = vmul.f32 %v5532_v41, %v3863_v32  ;;  %v3922_v38 = vperm.slane %v3920_v43, 0  ;;  %vm8168_vm14 = vmmov %vm8142_vm2 }
0x2bad   :  { %v3855_v42 = vsub.f32 1.5, %v3854_v62 }
0x2bae   :  { %v3871_v33 = vadd.f32 %v5533_v8, %v3867_v29  ;;  %v7611_v62 = vadd.f32 %v5535_v21, %v3922_v38 }
0x2baf   :  { %v3856_v20 = vmul.f32 %v5397_v16, %v3855_v42 }
0x2bb1   :  { %v3860_v2 = vsel %vm3859_vm13, %v5397_v16, %v3856_v20  ;;  %vm8156_vm13 = vmmov %vm8142_vm2 }
0x2bb2   :  { %v3864_v18 = vmul.f32 %v3860_v2, %v7552_v51 }
0x2bb4   :  { %v3868_v11 = vmul.f32 %v5532_v41, %v3864_v18  ;;  %v5536_v18 = vld [vmem:[%s8059_s28 + $0x8] sm:$0xff] }
0x2bb5   :  { %v7618_v29 = vadd.f32 %v5536_v18, %v3922_v38 }
0x2bb6   :  { %v3872_v30 = vadd.f32 %v5533_v8, %v3868_v11 }
0x2bb8   :  { %v3874_v46 = vpack.c.bf16 %v3872_v30, %v3871_v33 }
0x2bba   :  { %5024 = vmatmul.msk.bf16.gmra.mxu1 %vm177_vm0, %v3874_v46  ;;  %5026 = vmatmul.msk.bf16.gmra.mxu2 %vm177_vm0, %v3874_v46 }
0x2c27   :  { %v3890_v36 = vpop.f32.mrf.mxu1 }
0x2c28   :  { %v3891_v17 = vadd.f32 %v3890_v36, %v8139_v63  ;;  %v5537_v36 = vld [vmem:[%s8059_s28 + $0x10] sm:$0xff] }
0x2c2d   :  { %v3909_v52 = vpop.f32.mrf.mxu2 }
0x2c2e   :  { %v3910_v56 = vadd.f32 %v3909_v52, %v8140_v15  ;;  %v7625_v52 = vadd.f32 %v5537_v36, %v3922_v38 }
0x2c2f   :  { %v3892_v49 = vpop.f32.mrf.mxu1 }
0x2c30   :  { %v3893_v25 = vadd.f32 %v3892_v49, %v8139_v63 }
0x2c32   :  { %v7575_v58 = vpack.c.bf16 %v3893_v25, %v3891_v17 }
0x2c34   :  { %3932 = vrot.lane.b32.xlu0 %v7575_v58, %s5574_s24 }
0x2c35   :  { %v3911_v51 = vpop.f32.mrf.mxu2 }
0x2c36   :  { %v3912_v34 = vadd.f32 %v3911_v51, %v8140_v15  ;;  %v5538_v51 = vld [vmem:[%s8059_s28 + $0x18] sm:$0xff] }
0x2c37   :  { %v3895_v50 = vpop.f32.mrf.mxu1 }
0x2c38   :  { %v3896_v39 = vadd.f32 %v3895_v50, %v8139_v63  ;;  %v7592_v24 = vpack.c.bf16 %v3912_v34, %v3910_v56  ;;  %v7632_v50 = vadd.f32 %v5538_v51, %v3922_v38 }
0x2c3d   :  { %v3914_v1 = vpop.f32.mrf.mxu2 }
0x2c3e   :  { %v3915_v6 = vadd.f32 %v3914_v1, %v8140_v15 }
0x2c3f   :  { %v3897_v12 = vpop.f32.mrf.mxu1 }
0x2c40   :  { %v3898_v35 = vadd.f32 %v3897_v12, %v8139_v63 }
0x2c42   :  { %v7581_v5 = vpack.c.bf16 %v3898_v35, %v3896_v39 }
0x2c44   :  { %3934 = vrot.lane.b32.xlu1 %v7581_v5, %s5574_s24 }
0x2c45   :  { %v3916_v60 = vpop.f32.mrf.mxu2 }
0x2c46   :  { %v3917_v45 = vadd.f32 %v3916_v60, %v8140_v15 }
0x2c48   :  { %v7588_v41 = vpack.c.bf16 %v3917_v45, %v3915_v6 }
0x2c4a   :  { %4035 = vmatpush.bf16.msra.mxu0 %v7588_v41 }
0x2c4e   :  { %4036 = vmatpush.bf16.msra.mxu0 %v7592_v24 }
0x2c52   :  { %4216 = vmatpush.bf16.msrb.mxu0 %v8141_v19 }
0x2ca6   :  { %v3933_v16 = vpop.permute.xlu0 %3932 }
0x2ca7   :  { %v3943_v8 = vsel %vm8143_vm8, %v3933_v16, 0  ;;  %vm8157_vm8 = vmmov %vm8142_vm2 }
0x2cb6   :  { %v3935_v37 = vpop.permute.xlu1 %3934 }
0x2cb7   :  { %v3946_v7 = vsel %vm8142_vm2, %v3935_v37, 0 }
0x2cb8   :  { %3954 = vmatpush.bf16.xpose.msra.mxu3 %v3946_v7 }
0x2cc0   :  { %3955 = vmatpush.bf16.xpose.msra.mxu3 %v3943_v8 }
0x2cc7   :  { %5027 = vmatmul.msk.bf16.vlgmr.msra.gmra.mxu3 %vm8145_vm9, %v7575_v58  ;;  %vm8158_vm9 = vmmov %vm8142_vm2 }
0x2cc8   :  { %4191 = vmatpush.bf16.msrb.mxu3 %v8144_v44 }
0x2ccc   :  { %4367 = vmatpush.bf16.msra.mxu3 %v8146_v10 }
0x2cd7   :  { %5028 = vmatmul.msk.bf16.gmra.mxu3 %vm8147_vm3, %v7581_v5  ;;  %vm8163_vm3 = vmmov %vm8142_vm2 }
0x2d4a   :  { %v3957_v42 = vpop.f32.mrf.mxu3 }
0x2d4b   :  { %v3967_v32 = vmul.f32 0.25, %v3957_v42 }
0x2d4d   :  { %v3971_v20 = vadd.f32 %v3967_v32, %v7611_v62 }
0x2d4f   :  { %v3975_v2 = vsel %vm403_vm1, %v3971_v20, -inf }
0x2d50   :  { %3976 = vmax.xlane.f32.xlu2 %v3975_v2 }
0x2d52   :  { %v3959_v11 = vpop.f32.mrf.mxu3 }
0x2d53   :  { %v3968_v33 = vmul.f32 0.25, %v3959_v11 }
0x2d55   :  { %v3972_v30 = vadd.f32 %v3968_v33, %v7618_v29 }
0x2d57   :  { %v3978_v46 = vsel %vm403_vm1, %v3972_v30, -inf }
0x2d58   :  { %3979 = vmax.xlane.f32.xlu2 %v3978_v46 }
0x2d5a   :  { %v3962_v49 = vpop.f32.mrf.mxu3 }
0x2d5b   :  { %v3969_v63 = vmul.f32 0.25, %v3962_v49 }
0x2d5d   :  { %v3973_v17 = vadd.f32 %v3969_v63, %v7625_v52 }
0x2d5f   :  { %v3981_v25 = vsel %vm403_vm1, %v3973_v17, -inf }
0x2d60   :  { %3982 = vmax.xlane.f32.xlu2 %v3981_v25 }
0x2d62   :  { %v3964_v1 = vpop.f32.mrf.mxu3 }
0x2d63   :  { %v3970_v12 = vmul.f32 0.25, %v3964_v1 }
0x2d65   :  { %v3974_v39 = vadd.f32 %v3970_v12, %v7632_v50 }
0x2d67   :  { %v3984_v35 = vsel %vm403_vm1, %v3974_v39, -inf }
0x2d68   :  { %3985 = vmax.xlane.f32.xlu0 %v3984_v35 }
0x2d7c   :  { %4054 = vrot.lane.b32.xlu0 %v7575_v58, %s5576_s1 }
0x2d84   :  { %4232 = vrot.lane.b32.xlu0 %v7575_v58, %s5579_s27 }
0x2d8c   :  { %4228 = vrot.lane.b32.xlu0 %v7575_v58, %s8089_s3 }
0x2d94   :  { %4230 = vrot.lane.b32.xlu0 %v7581_v5, %s8089_s3 }
0x2dc3   :  { %v3977_v60 = vpop.xlane.xlu2 %3976 }
0x2dc4   :  { %v3987_v15 = vsub.f32 %v3971_v20, %v3977_v60 }
0x2dc6   :  { %v3991_v6 = vmul.f32 1.442695, %v3987_v15 }
0x2dc8   :  { %5398 = vpow2.f32 %v3991_v6 }
0x2dcb   :  { %v3980_v45 = vpop.xlane.xlu2 %3979 }
0x2dcc   :  { %v3988_v34 = vsub.f32 %v3972_v30, %v3980_v45 }
0x2dce   :  { %v5399_v56 = vpop.eup %5398  ;;  %v3993_v19 = vmul.f32 1.442695, %v3988_v34 }
0x2dcf   :  { %v3999_v37 = vsel %vm403_vm1, %v5399_v56, 0.0 }
0x2dd0   :  { %5400 = vpow2.f32 %v3993_v19  ;;  %4000 = vadd.xlane.f32.xlu1 %v3999_v37 }
0x2dd3   :  { %v3983_v7 = vpop.xlane.xlu2 %3982 }
0x2dd4   :  { %v3989_v16 = vsub.f32 %v3973_v17, %v3983_v7 }
0x2dd6   :  { %v5401_v8 = vpop.eup %5400  ;;  %v3995_v44 = vmul.f32 1.442695, %v3989_v16 }
0x2dd7   :  { %v4002_v10 = vsel %vm403_vm1, %v5401_v8, 0.0 }
0x2dd8   :  { %5402 = vpow2.f32 %v3995_v44  ;;  %4003 = vadd.xlane.f32.xlu2 %v4002_v10 }
0x2ddb   :  { %v3986_v55 = vpop.xlane.xlu0 %3985 }
0x2ddc   :  { %v3990_v47 = vsub.f32 %v3974_v39, %v3986_v55 }
0x2dde   :  { %v5403_v43 = vpop.eup %5402  ;;  %v3997_v38 = vmul.f32 1.442695, %v3990_v47  ;;  %v8159_v47 = vld [vmem:[#allocation13_spill] sm:$0xff] }
0x2ddf   :  { %v4005_v21 = vsel %vm403_vm1, %v5403_v43, 0.0 }
0x2de0   :  { %5404 = vpow2.f32 %v3997_v38  ;;  %4006 = vadd.xlane.f32.xlu2 %v4005_v21  ;;  %v8160_v38 = vld [vmem:[#allocation14_spill] sm:$0xff]  ;;  %v8161_v21 = vld [vmem:[#allocation15_spill] sm:$0xff] }
0x2de6   :  { %v5405_v42 = vpop.eup %5404 }
0x2de7   :  { %v4008_v32 = vsel %vm403_vm1, %v5405_v42, 0.0 }
0x2de8   :  { %4009 = vadd.xlane.f32.xlu2 %v4008_v32  ;;  %v8162_v32 = vld [vmem:[#allocation16_spill] sm:$0xff] }
0x2de9   :  { %4050 = vrot.lane.b32.xlu1 %v7575_v58, %s5577_s7 }
0x2dee   :  { %v4055_v12 = vpop.permute.xlu0 %4054 }
0x2def   :  { %v4065_v35 = vsel %vm8150_vm5, %v4055_v12, 0  ;;  %vm8170_vm5 = vmmov %vm8142_vm2 }
0x2df1   :  { %4387 = vrot.lane.b32.xlu1 %v7575_v58, %s8088_s23 }
0x2df6   :  { %v4233_v45 = vpop.permute.xlu0 %4232 }
0x2df9   :  { %4385 = vrot.lane.b32.xlu1 %v7581_v5, %s5581_s5 }
0x2dfe   :  { %v4229_v16 = vpop.permute.xlu0 %4228 }
0x2e00   :  { %4056 = vrot.lane.b32.xlu2 %v7581_v5, %s5576_s1 }
0x2e08   :  { %4052 = vrot.lane.b32.xlu2 %v7581_v5, %s5577_s7 }
0x2e10   :  { %4234 = vrot.lane.b32.xlu2 %v7581_v5, %s5579_s27 }
0x2e18   :  { %4389 = vrot.lane.b32.xlu2 %v7581_v5, %s8088_s23 }
0x2e20   :  { %4383 = vrot.lane.b32.xlu2 %v7575_v58, %s5581_s5 }
0x2e43   :  { %v4001_v20 = vpop.xlane.xlu1 %4000 }
0x2e44   :  { %5406 = vrcp.f32 %v4001_v20 }
0x2e4a   :  { %v5407_v18 = vpop.eup %5406 }
0x2e4b   :  { %v4004_v2 = vpop.xlane.xlu2 %4003  ;;  %v4015_v33 = vmul.f32 %v5407_v18, %v5399_v56  ;;  %v4243_v56 = vsel %vm8153_vm10, %v4233_v45, 0  ;;  %vm8173_vm10 = vmmov %vm8142_vm2 }
0x2e4c   :  { %5408 = vrcp.f32 %v4004_v2  ;;  %v8164_v2 = vld [vmem:[#allocation17_spill] sm:$0xff] }
0x2e52   :  { %v5409_v11 = vpop.eup %5408 }
0x2e53   :  { %v4016_v30 = vmul.f32 %v5409_v11, %v5401_v8  ;;  %v4007_v46 = vpop.xlane.xlu2 %4006  ;;  %v4231_v8 = vpop.permute.xlu0 %4230 }
0x2e54   :  { %5410 = vrcp.f32 %v4007_v46 }
0x2e55   :  { %v4019_v36 = vpack.c.bf16 %v4016_v30, %v4015_v33  ;;  %v8165_v30 = vld [vmem:[#allocation18_spill] sm:$0xff] }
0x2e57   :  { %5029 = vmatmul.msk.bf16.vlgmr.msra.gmra.mxu0 %vm403_vm1, %v4019_v36  ;;  %v8166_v36 = vld [vmem:[#allocation19_spill] sm:$0xff] }
0x2e5a   :  { %v5411_v63 = vpop.eup %5410 }
0x2e5b   :  { %v4010_v49 = vpop.xlane.xlu2 %4009  ;;  %v4017_v17 = vmul.f32 %v5411_v63, %v5403_v43  ;;  %v4051_v60 = vpop.permute.xlu1 %4050 }
0x2e5c   :  { %5412 = vrcp.f32 %v4010_v49 }
0x2e62   :  { %v5413_v5 = vpop.eup %5412 }
0x2e63   :  { %v4018_v25 = vmul.f32 %v5413_v5, %v5405_v42  ;;  %v4057_v58 = vpop.permute.xlu2 %4056  ;;  %v4388_v37 = vpop.permute.xlu1 %4387 }
0x2e64   :  { %v4068_v51 = vsel %vm8149_vm4, %v4057_v58, 0  ;;  %v4398_v7 = vsel %vm8155_vm12, %v4388_v37, 0  ;;  %vm8169_vm4 = vmmov %vm8142_vm2 }
0x2e65   :  { %4076 = vmatpush.bf16.xpose.msra.mxu1 %v4068_v51  ;;  %v4020_v1 = vpack.c.bf16 %v4018_v25, %v4017_v17  ;;  %v8167_v17 = vld [vmem:[#allocation20_spill] sm:$0xff]  ;;  %vm8175_vm12 = vmmov %vm8142_vm2 }
0x2e67   :  { %5030 = vmatmul.msk.bf16.gmra.mxu0 %vm403_vm1, %v4020_v1 }
0x2e6b   :  { %v4053_v39 = vpop.permute.xlu2 %4052 }
0x2e6d   :  { %4077 = vmatpush.bf16.xpose.msra.mxu1 %v4065_v35 }
0x2e73   :  { %v4235_v15 = vpop.permute.xlu2 %4234 }
0x2e74   :  { %v4246_v6 = vsel %vm8151_vm6, %v4235_v15, 0  ;;  %5031 = vmatmul.msk.bf16.vlgmr.msra.gmra.mxu1 %vm8152_vm7, %v4051_v60  ;;  %vm8171_vm6 = vmmov %vm8142_vm2 }
0x2e75   :  { %4254 = vmatpush.bf16.xpose.msrb.mxu1 %v4246_v6  ;;  %v4386_v6 = vpop.permute.xlu1 %4385  ;;  %vm8172_vm7 = vmmov %vm8142_vm2 }
0x2e7b   :  { %v4390_v34 = vpop.permute.xlu2 %4389 }
0x2e7c   :  { %v4401_v19 = vsel %vm8154_vm11, %v4390_v34, 0  ;;  %vm8174_vm11 = vmmov %vm8142_vm2 }
0x2e7d   :  { %4255 = vmatpush.bf16.xpose.msrb.mxu1 %v4243_v56  ;;  %4409 = vmatpush.bf16.xpose.msra.mxu0 %v4401_v19 }
0x2e83   :  { %v4384_v25 = vpop.permute.xlu2 %4383 }
0x2e84   :  { %5032 = vmatmul.msk.bf16.gmra.mxu1 %vm8156_vm13, %v4053_v39 }
0x2e85   :  { %4410 = vmatpush.bf16.xpose.msra.mxu0 %v4398_v7 }
0x2e94   :  { %5039 = vmatmul.msk.bf16.vlgmr.msrb.gmra.mxu1 %vm8142_vm2, %v4229_v16 }
0x2ea4   :  { %5040 = vmatmul.msk.bf16.gmra.mxu1 %vm8157_vm8, %v4231_v8 }
0x2ed4   :  { %v4038_v44 = vpop.f32.mrf.mxu0 }
0x2edc   :  { %v4040_v10 = vpop.f32.mrf.mxu0 }
0x2edd   :  { %v4048_v55 = vpack.c.bf16 %v4040_v10, %v4038_v44 }
0x2edf   :  { %5037 = vmatmul.msk.bf16.vlgmr.msrb.gmra.mxu0 %vm8158_vm9, %v4048_v55 }
0x2ee0   :  { %4707 = vmatpush.bf16.msrb.mxu0 %v8159_v47 }
0x2ee4   :  { %v4043_v43 = vpop.f32.mrf.mxu0  ;;  %4708 = vmatpush.bf16.msrb.mxu0 %v8160_v38 }
0x2ee8   :  { %4709 = vmatpush.bf16.msrb.mxu0 %v8161_v21 }
0x2eec   :  { %v4045_v42 = vpop.f32.mrf.mxu0  ;;  %4710 = vmatpush.bf16.msrb.mxu0 %v8162_v32 }
0x2eed   :  { %v4049_v20 = vpack.c.bf16 %v4045_v42, %v4043_v43 }
0x2eef   :  { %5038 = vmatmul.msk.bf16.gmra.mxu0 %vm8163_vm3, %v4049_v20 }
0x2ef0   :  { %4711 = vmatpush.bf16.msrb.mxu0 %v8164_v2 }
0x2ef1   :  { %v4079_v18 = vpop.f32.mrf.mxu1 }
0x2ef2   :  { %v4089_v11 = vmul.f32 0.25, %v4079_v18 }
0x2ef4   :  { %v4093_v33 = vadd.f32 %v4089_v11, %v7611_v62  ;;  %4712 = vmatpush.bf16.msrb.mxu0 %v8165_v30 }
0x2ef6   :  { %v4097_v46 = vsel %vm403_vm1, %v4093_v33, -inf }
0x2ef7   :  { %4098 = vmax.xlane.f32.xlu2 %v4097_v46 }
0x2ef8   :  { %4713 = vmatpush.bf16.msrb.mxu0 %v8166_v36 }
0x2ef9   :  { %v4081_v49 = vpop.f32.mrf.mxu1 }
0x2efa   :  { %v4090_v63 = vmul.f32 0.25, %v4081_v49 }
0x2efc   :  { %v4094_v5 = vadd.f32 %v4090_v63, %v7618_v29  ;;  %4714 = vmatpush.bf16.msrb.mxu0 %v8167_v17 }
0x2efe   :  { %v4100_v58 = vsel %vm403_vm1, %v4094_v5, -inf }
0x2eff   :  { %5045 = vmatmul.msk.bf16.vlgmr.msra.gmra.mxu0 %vm8168_vm14, %v4384_v25  ;;  %4101 = vmax.xlane.f32.xlu0 %v4100_v58 }
0x2f01   :  { %v4084_v51 = vpop.f32.mrf.mxu1 }
0x2f02   :  { %v4091_v1 = vmul.f32 0.25, %v4084_v51 }
0x2f04   :  { %v4095_v12 = vadd.f32 %v4091_v1, %v7625_v52 }
0x2f06   :  { %v4103_v39 = vsel %vm403_vm1, %v4095_v12, -inf }
0x2f07   :  { %4104 = vmax.xlane.f32.xlu1 %v4103_v39 }
0x2f09   :  { %v4086_v35 = vpop.f32.mrf.mxu1 }
0x2f0a   :  { %v4092_v60 = vmul.f32 0.25, %v4086_v35 }
0x2f0c   :  { %v4096_v15 = vadd.f32 %v4092_v60, %v7632_v50 }
0x2f0e   :  { %v4106_v45 = vsel %vm403_vm1, %v4096_v15, -inf }
0x2f0f   :  { %5046 = vmatmul.msk.bf16.gmra.mxu0 %vm8169_vm4, %v4386_v6  ;;  %4107 = vmax.xlane.f32.xlu2 %v4106_v45 }
0x2f11   :  { %v4257_v34 = vpop.f32.mrf.mxu1 }
0x2f12   :  { %v4267_v56 = vmul.f32 0.25, %v4257_v34 }
0x2f14   :  { %v4271_v19 = vadd.f32 %v4267_v56, %v7611_v62 }
0x2f16   :  { %v4275_v37 = vsel %vm403_vm1, %v4271_v19, -inf }
0x2f17   :  { %4276 = vmax.xlane.f32.xlu0 %v4275_v37 }
0x2f19   :  { %v4259_v7 = vpop.f32.mrf.mxu1 }
0x2f1a   :  { %v4268_v16 = vmul.f32 0.25, %v4259_v7 }
0x2f1c   :  { %v7699_v8 = vadd.f32 %v4268_v16, %v7618_v29 }
0x2f1e   :  { %v4278_v44 = vsel %vm403_vm1, %v7699_v8, -inf }
0x2f1f   :  { %4279 = vmax.xlane.f32.xlu1 %v4278_v44 }
0x2f21   :  { %v4262_v10 = vpop.f32.mrf.mxu1 }
0x2f22   :  { %v4269_v55 = vmul.f32 0.25, %v4262_v10 }
0x2f24   :  { %v7704_v47 = vadd.f32 %v4269_v55, %v7625_v52 }
0x2f26   :  { %v4281_v43 = vsel %vm403_vm1, %v7704_v47, -inf }
0x2f27   :  { %4282 = vmax.xlane.f32.xlu1 %v4281_v43 }
0x2f29   :  { %v4264_v38 = vpop.f32.mrf.mxu1 }
0x2f2a   :  { %v4270_v21 = vmul.f32 0.25, %v4264_v38 }
0x2f2c   :  { %v7709_v42 = vadd.f32 %v4270_v21, %v7632_v50 }
0x2f2e   :  { %v4284_v32 = vsel %vm403_vm1, %v7709_v42, -inf }
0x2f2f   :  { %4285 = vmax.xlane.f32.xlu2 %v4284_v32 }
0x2f47   :  { %4145 = vrot.lane.b32.xlu2 %v7592_v24, %s5577_s7 }
0x2f5c   :  { %v7715_v20 = vpop.f32.mrf.mxu0 }
0x2f64   :  { %v7717_v2 = vpop.f32.mrf.mxu0 }
0x2f6a   :  { %v4099_v18 = vpop.xlane.xlu2 %4098 }
0x2f6b   :  { %v4109_v11 = vsub.f32 %v4093_v33, %v4099_v18 }
0x2f6c   :  { %v7719_v30 = vpop.f32.mrf.mxu0 }
0x2f6d   :  { %v4113_v46 = vmul.f32 1.442695, %v4109_v11 }
0x2f6f   :  { %5414 = vpow2.f32 %v4113_v46 }
0x2f72   :  { %v4102_v36 = vpop.xlane.xlu0 %4101 }
0x2f73   :  { %v4110_v49 = vsub.f32 %v4094_v5, %v4102_v36 }
0x2f74   :  { %v7721_v63 = vpop.f32.mrf.mxu0 }
0x2f75   :  { %v7723_v17 = vpop.eup %5414  ;;  %v4115_v25 = vmul.f32 1.442695, %v4110_v49 }
0x2f76   :  { %v4121_v58 = vsel %vm403_vm1, %v7723_v17, 0.0 }
0x2f77   :  { %5416 = vpow2.f32 %v4115_v25  ;;  %4122 = vadd.xlane.f32.xlu0 %v4121_v58 }
0x2f7a   :  { %v4105_v51 = vpop.xlane.xlu1 %4104 }
0x2f7b   :  { %v4111_v1 = vsub.f32 %v4095_v12, %v4105_v51 }
0x2f7c   :  { %v4412_v39 = vpop.f32.mrf.mxu0 }
0x2f7d   :  { %v7727_v33 = vpop.eup %5416  ;;  %v4117_v35 = vmul.f32 1.442695, %v4111_v1  ;;  %v4422_v60 = vmul.f32 0.25, %v4412_v39 }
0x2f7e   :  { %v4124_v5 = vsel %vm403_vm1, %v7727_v33, 0.0 }
0x2f7f   :  { %5418 = vpow2.f32 %v4117_v35  ;;  %v7732_v6 = vadd.f32 %v4422_v60, %v7611_v62  ;;  %4125 = vadd.xlane.f32.xlu1 %v4124_v5 }
0x2f81   :  { %v4430_v45 = vsel %vm403_vm1, %v7732_v6, -inf }
0x2f82   :  { %v4108_v34 = vpop.xlane.xlu2 %4107  ;;  %4431 = vmax.xlane.f32.xlu2 %v4430_v45 }
0x2f83   :  { %v4112_v56 = vsub.f32 %v4096_v15, %v4108_v34 }
0x2f84   :  { %v4414_v12 = vpop.f32.mrf.mxu0 }
0x2f85   :  { %v7736_v37 = vpop.eup %5418  ;;  %v4119_v7 = vmul.f32 1.442695, %v4112_v56 }
0x2f86   :  { %v4127_v16 = vsel %vm403_vm1, %v7736_v37, 0.0 }
0x2f87   :  { %5420 = vpow2.f32 %v4119_v7  ;;  %4128 = vadd.xlane.f32.xlu0 %v4127_v16 }
0x2f8a   :  { %v4277_v44 = vpop.xlane.xlu0 %4276 }
0x2f8b   :  { %v4287_v10 = vsub.f32 %v4271_v19, %v4277_v44  ;;  %v4423_v19 = vmul.f32 0.25, %v4414_v12 }
0x2f8c   :  { %v4417_v62 = vpop.f32.mrf.mxu0 }
0x2f8d   :  { %v7740_v55 = vpop.eup %5420  ;;  %v4291_v43 = vmul.f32 1.442695, %v4287_v10  ;;  %v4424_v38 = vmul.f32 0.25, %v4417_v62  ;;  %v4427_v46 = vadd.f32 %v4423_v19, %v7618_v29 }
0x2f8e   :  { %v4130_v21 = vsel %vm403_vm1, %v7740_v55, 0.0 }
0x2f8f   :  { %5422 = vpow2.f32 %v4291_v43  ;;  %v7745_v15 = vadd.f32 %v4424_v38, %v7625_v52  ;;  %4131 = vadd.xlane.f32.xlu0 %v4130_v21  ;;  %v4433_v52 = vsel %vm403_vm1, %v4427_v46, -inf }
0x2f91   :  { %v4436_v32 = vsel %vm403_vm1, %v7745_v15, -inf }
0x2f92   :  { %4437 = vmax.xlane.f32.xlu2 %v4436_v32  ;;  %v4280_v36 = vpop.xlane.xlu1 %4279 }
0x2f93   :  { %v4288_v49 = vsub.f32 %v7699_v8, %v4280_v36 }
0x2f94   :  { %v4419_v60 = vpop.f32.mrf.mxu0 }
0x2f95   :  { %v7749_v18 = vpop.eup %5422  ;;  %v4293_v25 = vmul.f32 1.442695, %v4288_v49  ;;  %v4425_v5 = vmul.f32 0.25, %v4419_v60 }
0x2f96   :  { %v4299_v11 = vsel %vm403_vm1, %v7749_v18, 0.0 }
0x2f97   :  { %4300 = vadd.xlane.f32.xlu0 %v4299_v11  ;;  %5424 = vpow2.f32 %v4293_v25  ;;  %v7772_v45 = vadd.f32 %v4425_v5, %v7632_v50 }
0x2f98   :  { %4147 = vrot.lane.b32.xlu1 %v7588_v41, %s5577_s7 }
0x2f9a   :  { %v4283_v58 = vpop.xlane.xlu1 %4282 }
0x2f9b   :  { %v4289_v51 = vsub.f32 %v7704_v47, %v4283_v58  ;;  %v4439_v47 = vsel %vm403_vm1, %v7772_v45, -inf }
0x2f9d   :  { %v4295_v1 = vmul.f32 1.442695, %v4289_v51  ;;  %v7763_v39 = vpop.eup %5424 }
0x2f9e   :  { %v4302_v29 = vsel %vm403_vm1, %v7763_v39, 0.0 }
0x2f9f   :  { %4434 = vmax.xlane.f32.xlu0 %v4433_v52  ;;  %5426 = vpow2.f32 %v4295_v1 }
0x2fa2   :  { %v4286_v34 = vpop.xlane.xlu2 %4285 }
0x2fa3   :  { %v4290_v36 = vsub.f32 %v7709_v42, %v4286_v34 }
0x2fa5   :  { %v7767_v35 = vpop.eup %5426  ;;  %v4297_v25 = vmul.f32 1.442695, %v4290_v36 }
0x2fa6   :  { %v4305_v8 = vsel %vm403_vm1, %v7767_v35, 0.0 }
0x2faa   :  { %4323 = vrot.lane.b32.xlu2 %v7588_v41, %s8089_s3  ;;  %v4146_v12 = vpop.permute.xlu2 %4145 }
0x2fb3   :  { %4321 = vrot.lane.b32.xlu0 %v7592_v24, %s8089_s3 }
0x2fc2   :  { %4303 = vadd.xlane.f32.xlu1 %v4302_v29 }
0x2fca   :  { %4306 = vadd.xlane.f32.xlu1 %v4305_v8 }
0x2fdd   :  { %4440 = vmax.xlane.f32.xlu0 %v4439_v47 }
0x2fe3   :  { %4476 = vrot.lane.b32.xlu1 %v7592_v24, %s5581_s5 }
0x2fea   :  { %v4123_v56 = vpop.xlane.xlu0 %4122 }
0x2ff1   :  { %4478 = vrot.lane.b32.xlu0 %v7588_v41, %s5581_s5 }
0x2ff2   :  { %v4126_v44 = vpop.xlane.xlu1 %4125 }
0x2ff3   :  { %5428 = vrcp.f32 %v4126_v44 }
0x2ff4   :  { %5430 = vrcp.f32 %v4123_v56 }
0x2ff5   :  { %v4432_v16 = vpop.xlane.xlu2 %4431 }
0x2ff6   :  { %v4442_v43 = vsub.f32 %v7732_v6, %v4432_v16 }
0x2ff8   :  { %v4446_v19 = vmul.f32 1.442695, %v4442_v43 }
0x2ff9   :  { %v5429_v62 = vpop.eup %5428 }
0x2ffa   :  { %v4129_v7 = vpop.xlane.xlu0 %4128  ;;  %v5431_v32 = vpop.eup %5430  ;;  %v4138_v24 = vmul.f32 %v5429_v62, %v7727_v33  ;;  %5432 = vpow2.f32 %v4446_v19 }
0x2ffb   :  { %v4137_v41 = vmul.f32 %v5431_v32, %v7723_v17 }
0x2ffd   :  { %v4141_v52 = vpack.c.bf16 %v4138_v24, %v4137_v41 }
0x3000   :  { %v5433_v51 = vpop.eup %5432 }
0x3001   :  { %v4454_v29 = vsel %vm403_vm1, %v5433_v51, 0.0 }
0x3002   :  { %v4132_v10 = vpop.xlane.xlu0 %4131 }
0x3003   :  { %5434 = vrcp.f32 %v4132_v10 }
0x3004   :  { %5436 = vrcp.f32 %v4129_v7 }
0x3005   :  { %v4438_v50 = vpop.xlane.xlu2 %4437 }
0x3006   :  { %v4444_v58 = vsub.f32 %v7745_v15, %v4438_v50 }
0x3008   :  { %v4450_v1 = vmul.f32 1.442695, %v4444_v58 }
0x3009   :  { %v5435_v17 = vpop.eup %5434 }
0x300a   :  { %v4148_v38 = vpop.permute.xlu1 %4147  ;;  %v4301_v21 = vpop.xlane.xlu0 %4300  ;;  %v4140_v42 = vmul.f32 %v5435_v17, %v7740_v55 }
0x300b   :  { %4163 = vmatpush.bf16.msrb.mxu2 %v4148_v38  ;;  %v5437_v8 = vpop.eup %5436 }
0x300d   :  { %v4324_v11 = vpop.permute.xlu2 %4323 }
0x300f   :  { %4164 = vmatpush.bf16.msrb.mxu2 %v4146_v12 }
0x3012   :  { %5033 = vmatmul.msk.bf16.vlgmr.msrb.gmra.mxu2 %vm403_vm1, %v4141_v52  ;;  %v4435_v49 = vpop.xlane.xlu0 %4434 }
0x3013   :  { %4339 = vmatpush.bf16.msra.mxu2 %v4324_v11  ;;  %v4443_v6 = vsub.f32 %v4427_v46, %v4435_v49  ;;  %v4139_v46 = vmul.f32 %v5437_v8, %v7736_v37 }
0x3015   :  { %v4448_v33 = vmul.f32 1.442695, %v4443_v6  ;;  %v4142_v15 = vpack.c.bf16 %v4140_v42, %v4139_v46 }
0x3017   :  { %5438 = vpow2.f32 %v4448_v33 }
0x3018   :  { %5440 = vpow2.f32 %v4297_v25 }
0x3019   :  { %5442 = vpow2.f32 %v4450_v1 }
0x301a   :  { %5444 = vrcp.f32 %v4301_v21 }
0x301b   :  { %4455 = vadd.xlane.f32.xlu0 %v4454_v29 }
0x301d   :  { %v5439_v60 = vpop.eup %5438 }
0x301e   :  { %v4457_v5 = vsel %vm403_vm1, %v5439_v60, 0.0  ;;  %v5441_v47 = vpop.eup %5440 }
0x301f   :  { %4458 = vadd.xlane.f32.xlu2 %v4457_v5  ;;  %v4308_v34 = vsel %vm403_vm1, %v5441_v47, 0.0  ;;  %v7792_v56 = vpop.eup %5442 }
0x3020   :  { %v4460_v55 = vsel %vm403_vm1, %v7792_v56, 0.0  ;;  %v5445_v7 = vpop.eup %5444 }
0x3021   :  { %v4315_v44 = vmul.f32 %v5445_v7, %v7749_v18 }
0x3022   :  { %5034 = vmatmul.msk.bf16.gmra.mxu2 %vm403_vm1, %v4142_v15 }
0x3023   :  { %4309 = vadd.xlane.f32.xlu0 %v4308_v34 }
0x3025   :  { %v4322_v12 = vpop.permute.xlu0 %4321 }
0x3026   :  { %4340 = vmatpush.bf16.msra.mxu2 %v4322_v12 }
0x3027   :  { %4461 = vadd.xlane.f32.xlu2 %v4460_v55 }
0x302a   :  { %4522 = vmatpush.bf16.msrb.mxu2 %v6085_v0 }
0x3035   :  { %v4304_v37 = vpop.xlane.xlu1 %4303 }
0x3036   :  { %5446 = vrcp.f32 %v4304_v37 }
0x303c   :  { %v5447_v16 = vpop.eup %5446 }
0x303d   :  { %v4316_v10 = vmul.f32 %v5447_v16, %v7763_v39  ;;  %v4307_v39 = vpop.xlane.xlu1 %4306 }
0x303f   :  { %v4319_v50 = vpack.c.bf16 %v4316_v10, %v4315_v44 }
0x3041   :  { %5041 = vmatmul.msk.bf16.vlgmr.msra.gmra.mxu2 %vm403_vm1, %v4319_v50 }
0x3042   :  { %4857 = vmatpush.bf16.msra.mxu2 %v6338_v23 }
0x3046   :  { %4858 = vmatpush.bf16.msra.mxu2 %v6344_v9 }
0x304a   :  { %4859 = vmatpush.bf16.msra.mxu2 %v6353_v14 }
0x304e   :  { %4860 = vmatpush.bf16.msra.mxu2 %v6396_v13 }
0x3050   :  { %v4441_v0 = vpop.xlane.xlu0 %4440 }
0x3051   :  { %v4445_v62 = vsub.f32 %v7772_v45, %v4441_v0 }
0x3053   :  { %v4452_v43 = vmul.f32 1.442695, %v4445_v62 }
0x3055   :  { %5448 = vpow2.f32 %v4452_v43  ;;  %v4477_v32 = vpop.permute.xlu1 %4476 }
0x305b   :  { %v5449_v38 = vpop.eup %5448 }
0x305c   :  { %v4463_v18 = vsel %vm403_vm1, %v5449_v38, 0.0 }
0x305d   :  { %4464 = vadd.xlane.f32.xlu2 %v4463_v18 }
0x3063   :  { %v4479_v21 = vpop.permute.xlu0 %4478 }
0x3064   :  { %4494 = vmatpush.bf16.msra.mxu1 %v4479_v21 }
0x3068   :  { %4495 = vmatpush.bf16.msra.mxu1 %v4477_v32 }
0x308e   :  { %v4456_v23 = vpop.xlane.xlu0 %4455 }
0x308f   :  { %5450 = vrcp.f32 %v4456_v23  ;;  %v5539_v23 = vld [vmem:[%s7954_s9] ss:$0 sm:$0xff] }
0x3092   :  { %v4459_v9 = vpop.xlane.xlu2 %4458 }
0x3093   :  { %5452 = vrcp.f32 %v4459_v9 }
0x3094   :  { %5454 = vrcp.f32 %v4307_v39 }
0x3095   :  { %v4166_v14 = vpop.f32.mrf.mxu2  ;;  %v5451_v24 = vpop.eup %5450 }
0x3096   :  { %v4310_v13 = vpop.xlane.xlu0 %4309  ;;  %v4470_v19 = vmul.f32 %v5451_v24, %v5433_v51 }
0x3097   :  { %5456 = vrcp.f32 %v4310_v13 }
0x3099   :  { %v5453_v45 = vpop.eup %5452 }
0x309a   :  { %v4471_v41 = vmul.f32 %v5453_v45, %v5439_v60  ;;  %v5455_v11 = vpop.eup %5454  ;;  %v4462_v29 = vpop.xlane.xlu2 %4461 }
0x309b   :  { %v4317_v6 = vmul.f32 %v5455_v11, %v7767_v35  ;;  %5458 = vrcp.f32 %v4462_v29 }
0x309c   :  { %v4474_v52 = vpack.c.bf16 %v4471_v41, %v4470_v19 }
0x309d   :  { %v5457_v36 = vpop.eup %5456  ;;  %v4168_v49 = vpop.f32.mrf.mxu2 }
0x309e   :  { %v4318_v25 = vmul.f32 %v5457_v36, %v5441_v47  ;;  %v4176_v58 = vpack.c.bf16 %v4168_v49, %v4166_v14  ;;  %5047 = vmatmul.msk.bf16.vlgmr.msra.gmra.mxu1 %vm403_vm1, %v4474_v52 }
0x30a0   :  { %5035 = vmatmul.msk.bf16.vlgmr.msrb.gmra.mxu3 %vm8170_vm5, %v4176_v58  ;;  %v4320_v33 = vpack.c.bf16 %v4318_v25, %v4317_v6 }
0x30a1   :  { %4654 = vmatpush.bf16.msrb.mxu3 %v6165_v27  ;;  %v5459_v60 = vpop.eup %5458 }
0x30a2   :  { %5042 = vmatmul.msk.bf16.gmra.mxu2 %vm403_vm1, %v4320_v33 }
0x30a5   :  { %v4171_v17 = vpop.f32.mrf.mxu2  ;;  %4655 = vmatpush.bf16.msrb.mxu3 %v6174_v57  ;;  %v4472_v57 = vmul.f32 %v5459_v60, %v7792_v56 }
0x30a9   :  { %4656 = vmatpush.bf16.msrb.mxu3 %v6183_v61 }
0x30ad   :  { %v4173_v51 = vpop.f32.mrf.mxu2  ;;  %4657 = vmatpush.bf16.msrb.mxu3 %v6193_v53 }
0x30ae   :  { %v4177_v35 = vpack.c.bf16 %v4173_v51, %v4171_v17 }
0x30b0   :  { %5036 = vmatmul.msk.bf16.gmra.mxu3 %vm8171_vm6, %v4177_v35 }
0x30c4   :  { %v4342_v1 = vpop.f32.mrf.mxu2 }
0x30cc   :  { %v4344_v8 = vpop.f32.mrf.mxu2 }
0x30cd   :  { %v4352_v42 = vpack.c.bf16 %v4344_v8, %v4342_v1 }
0x30cf   :  { %5043 = vmatmul.msk.bf16.vlgmr.msra.gmra.mxu3 %vm8172_vm7, %v4352_v42 }
0x30d0   :  { %v4465_v27 = vpop.xlane.xlu2 %4464 }
0x30d1   :  { %5460 = vrcp.f32 %v4465_v27 }
0x30d7   :  { %v5461_v46 = vpop.eup %5460 }
0x30d8   :  { %v4473_v61 = vmul.f32 %v5461_v46, %v5449_v38 }
0x30da   :  { %v4475_v5 = vpack.c.bf16 %v4473_v61, %v4472_v57 }
0x30dc   :  { %5048 = vmatmul.msk.bf16.gmra.mxu1 %vm403_vm1, %v4475_v5 }
0x311b   :  { %v4497_v53 = vpop.f32.mrf.mxu1 }
0x3123   :  { %v4499_v47 = vpop.f32.mrf.mxu1  ;;  %v4193_v56 = vpop.f32.mrf.mxu3 }
0x3124   :  { %v4507_v15 = vpack.c.bf16 %v4499_v47, %v4497_v53  ;;  %v4219_v62 = vadd.f32 %v7715_v20, %v4193_v56 }
0x3125   :  { %v4347_v34 = vpop.f32.mrf.mxu2 }
0x3126   :  { %5049 = vmatmul.msk.bf16.vlgmr.msrb.gmra.mxu2 %vm8173_vm10, %v4507_v15 }
0x312b   :  { %v4195_v44 = vpop.f32.mrf.mxu3 }
0x312c   :  { %v4221_v32 = vadd.f32 %v7717_v2, %v4195_v44 }
0x312d   :  { %v4349_v12 = vpop.f32.mrf.mxu2 }
0x312e   :  { %v4353_v55 = vpack.c.bf16 %v4349_v12, %v4347_v34 }
0x3130   :  { %5044 = vmatmul.msk.bf16.gmra.mxu3 %vm8174_vm11, %v4353_v55 }
0x3133   :  { %v4198_v10 = vpop.f32.mrf.mxu3 }
0x3134   :  { %v4224_v41 = vadd.f32 %v7719_v30, %v4198_v10 }
0x313b   :  { %v4200_v50 = vpop.f32.mrf.mxu3 }
0x313c   :  { %v4226_v25 = vadd.f32 %v7721_v63, %v4200_v50 }
0x3152   :  { %v4369_v0 = vpop.f32.mrf.mxu3 }
0x3153   :  { %v4379_v43 = vadd.f32 %v4369_v0, %v4219_v62 }
0x3159   :  { %v4502_v37 = vpop.f32.mrf.mxu1 }
0x315a   :  { %v4371_v21 = vpop.f32.mrf.mxu3 }
0x315b   :  { %v4380_v14 = vadd.f32 %v4371_v21, %v4221_v32 }
0x3161   :  { %v4504_v7 = vpop.f32.mrf.mxu1 }
0x3162   :  { %v4508_v16 = vpack.c.bf16 %v4504_v7, %v4502_v37 }
0x3164   :  { %5050 = vmatmul.msk.bf16.gmra.mxu2 %vm8175_vm12, %v4508_v16 }
0x31a9   :  { %v4524_v38 = vpop.f32.mrf.mxu2 }
0x31aa   :  { %v4534_v18 = vadd.f32 %v4524_v38, %v4379_v43 }
0x31ac   :  { %v4538_v39 = vadd.f32 %v4534_v18, %v7509_v3 }
0x31ae   :  { %v7827_v9 = vadd.f32 %v5539_v23, %v4538_v39 }
0x31b0   :  { %v4546_v13 = vsel %vm177_vm0, %v7827_v9, 0.0 }
0x31b1   :  { %4547 = vadd.xlane.f32.xlu2 %v4546_v13  ;;  %v4526_v20 = vpop.f32.mrf.mxu2 }
0x31b2   :  { %v4535_v24 = vadd.f32 %v4526_v20, %v4380_v14 }
0x31b3   :  { %v4374_v2 = vpop.f32.mrf.mxu3 }
0x31b4   :  { %v4539_v45 = vadd.f32 %v4535_v24, %v7517_v40  ;;  %v4381_v11 = vadd.f32 %v4374_v2, %v4224_v41  ;;  %v5540_v41 = vld [vmem:[%s7955_s10] ss:$0 sm:$0xff] }
0x31b6   :  { %v7832_v19 = vadd.f32 %v5539_v23, %v4539_v45 }
0x31b8   :  { %v4549_v3 = vsel %vm177_vm0, %v7832_v19, 0.0 }
0x31b9   :  { %4550 = vadd.xlane.f32.xlu1 %v4549_v3 }
0x31bb   :  { %v4376_v6 = vpop.f32.mrf.mxu3 }
0x31bc   :  { %v4382_v40 = vadd.f32 %v4376_v6, %v4226_v25 }
0x31e7   :  { %v4529_v52 = vpop.f32.mrf.mxu2 }
0x31e8   :  { %v4536_v36 = vadd.f32 %v4529_v52, %v4381_v11 }
0x31ea   :  { %v4540_v49 = vadd.f32 %v4536_v36, %v7525_v4 }
0x31ec   :  { %v7839_v58 = vadd.f32 %v5539_v23, %v4540_v49  ;;  %v5541_v49 = vld [vmem:[%s7956_s11] ss:$0 sm:$0xff] }
0x31ee   :  { %v4552_v33 = vsel %vm177_vm0, %v7839_v58, 0.0 }
0x31ef   :  { %v4531_v17 = vpop.f32.mrf.mxu2  ;;  %4553 = vadd.xlane.f32.xlu2 %v4552_v33 }
0x31f0   :  { %v4537_v51 = vadd.f32 %v4531_v17, %v4382_v40 }
0x31f2   :  { %v4541_v35 = vadd.f32 %v4537_v51, %v7533_v59 }
0x31f4   :  { %v7844_v30 = vadd.f32 %v5539_v23, %v4541_v35 }
0x31f6   :  { %v4555_v1 = vsel %vm177_vm0, %v7844_v30, 0.0 }
0x31f7   :  { %4556 = vadd.xlane.f32.xlu0 %v4555_v1 }
0x3224   :  { %v4548_v4 = vpop.xlane.xlu2 %4547 }
0x3225   :  { %v4558_v63 = vmul.f32 %v4548_v4, %v5735_v22 }
0x3227   :  { %v4562_v29 = vsub.f32 %v7827_v9, %v4558_v63 }
0x3229   :  { %v4566_v8 = vmul.f32 %v4562_v29, %v4562_v29 }
0x322b   :  { %v4570_v42 = vsel %vm177_vm0, %v4566_v8, 0.0 }
0x322c   :  { %v4551_v27 = vpop.xlane.xlu1 %4550  ;;  %4571 = vadd.xlane.f32.xlu2 %v4570_v42 }
0x322d   :  { %v4559_v60 = vmul.f32 %v4551_v27, %v5735_v22 }
0x322f   :  { %v4563_v59 = vsub.f32 %v7832_v19, %v4559_v60 }
0x3231   :  { %v4567_v46 = vmul.f32 %v4563_v59, %v4563_v59 }
0x3233   :  { %v4573_v57 = vsel %vm177_vm0, %v4567_v46, 0.0 }
0x3234   :  { %4574 = vadd.xlane.f32.xlu0 %v4573_v57 }
0x3262   :  { %v4554_v61 = vpop.xlane.xlu2 %4553 }
0x3263   :  { %v4560_v5 = vmul.f32 %v4554_v61, %v5735_v22 }
0x3265   :  { %v7856_v53 = vsub.f32 %v7839_v58, %v4560_v5 }
0x3267   :  { %v4568_v47 = vmul.f32 %v7856_v53, %v7856_v53 }
0x3269   :  { %v4576_v15 = vsel %vm177_vm0, %v4568_v47, 0.0 }
0x326a   :  { %4577 = vadd.xlane.f32.xlu2 %v4576_v15  ;;  %v4557_v34 = vpop.xlane.xlu0 %4556 }
0x326b   :  { %v4561_v12 = vmul.f32 %v4557_v34, %v5735_v22 }
0x326d   :  { %v7863_v55 = vsub.f32 %v7844_v30, %v4561_v12 }
0x326f   :  { %v4569_v37 = vmul.f32 %v7863_v55, %v7863_v55 }
0x3271   :  { %v4579_v7 = vsel %vm177_vm0, %v4569_v37, 0.0 }
0x3272   :  { %4580 = vadd.xlane.f32.xlu0 %v4579_v7 }
0x329f   :  { %v4572_v16 = vpop.xlane.xlu2 %4571 }
0x32a0   :  { %v4582_v56 = vmul.f32 %v4572_v16, %v5735_v22 }
0x32a2   :  { %v4586_v44 = vadd.f32 1e-05, %v4582_v56 }
0x32a4   :  { %5462 = vrsqrt.f32 %v4586_v44  ;;  %vm4596_vm2 = vweird.f32 %v4586_v44 }
0x32a7   :  { %v4575_v10 = vpop.xlane.xlu0 %4574 }
0x32a8   :  { %v4583_v50 = vmul.f32 %v4575_v10, %v5735_v22 }
0x32aa   :  { %v5463_v0 = vpop.eup %5462  ;;  %v4587_v62 = vadd.f32 1e-05, %v4583_v50 }
0x32ab   :  { %v4591_v43 = vmul.f32 %v5463_v0, %v4586_v44  ;;  %vm4597_vm13 = vweird.f32 %v5463_v0 }
0x32ac   :  { %5464 = vrsqrt.f32 %v4587_v62  ;;  %vm4598_vm8 = vmor %vm4596_vm2, %vm4597_vm13  ;;  %vm4606_vm3 = vweird.f32 %v4587_v62 }
0x32ad   :  { %v4592_v38 = vmul.f32 %v5463_v0, %v4591_v43 }
0x32af   :  { %v4593_v18 = vmul.f32 0.5, %v4592_v38 }
0x32b1   :  { %v4594_v39 = vsub.f32 1.5, %v4593_v18 }
0x32b2   :  { %v5465_v21 = vpop.eup %5464 }
0x32b3   :  { %v4595_v32 = vmul.f32 %v5463_v0, %v4594_v39  ;;  %v4601_v23 = vmul.f32 %v5465_v21, %v4587_v62  ;;  %vm4607_vm9 = vweird.f32 %v5465_v21 }
0x32b4   :  { %vm4608_vm14 = vmor %vm4606_vm3, %vm4607_vm9 }
0x32b5   :  { %v4602_v14 = vmul.f32 %v5465_v21, %v4601_v23  ;;  %v4599_v13 = vsel %vm4598_vm8, %v5463_v0, %v4595_v32  ;;  %v5542_v0 = vld [vmem:[%s7958_s13] ss:$0 sm:$0xff] }
0x32b6   :  { %v4630_v45 = vmul.f32 %v4599_v13, %v4562_v29 }
0x32b7   :  { %v4603_v20 = vmul.f32 0.5, %v4602_v14 }
0x32b8   :  { %v4634_v11 = vmul.f32 %v5540_v41, %v4630_v45 }
0x32b9   :  { %v4604_v24 = vsub.f32 1.5, %v4603_v20 }
0x32ba   :  { %v4638_v6 = vadd.f32 %v5541_v49, %v4634_v11 }
0x32bb   :  { %v4605_v3 = vmul.f32 %v5465_v21, %v4604_v24 }
0x32bd   :  { %v4609_v2 = vsel %vm4608_vm14, %v5465_v21, %v4605_v3 }
0x32be   :  { %v4631_v52 = vmul.f32 %v4609_v2, %v4563_v59 }
0x32c0   :  { %v4635_v36 = vmul.f32 %v5540_v41, %v4631_v52 }
0x32c2   :  { %v4639_v25 = vadd.f32 %v5541_v49, %v4635_v36 }
0x32c4   :  { %v4642_v40 = vpack.c.bf16 %v4639_v25, %v4638_v6 }
0x32c6   :  { %5051 = vmatmul.msk.bf16.vlgmr.msrb.gmra.mxu3 %vm177_vm0, %v4642_v40 }
0x32dd   :  { %v4578_v33 = vpop.xlane.xlu2 %4577 }
0x32de   :  { %v4584_v17 = vmul.f32 %v4578_v33, %v5735_v22 }
0x32e0   :  { %v4588_v51 = vadd.f32 1e-05, %v4584_v17 }
0x32e2   :  { %5466 = vrsqrt.f32 %v4588_v51  ;;  %vm4616_vm5 = vweird.f32 %v4588_v51 }
0x32e5   :  { %v4581_v35 = vpop.xlane.xlu0 %4580 }
0x32e6   :  { %v4585_v1 = vmul.f32 %v4581_v35, %v5735_v22 }
0x32e8   :  { %v5467_v4 = vpop.eup %5466  ;;  %v4589_v63 = vadd.f32 1e-05, %v4585_v1 }
0x32e9   :  { %v4611_v29 = vmul.f32 %v5467_v4, %v4588_v51  ;;  %vm4617_vm4 = vweird.f32 %v5467_v4 }
0x32ea   :  { %5468 = vrsqrt.f32 %v4589_v63  ;;  %vm4618_vm6 = vmor %vm4616_vm5, %vm4617_vm4  ;;  %vm4626_vm10 = vweird.f32 %v4589_v63 }
0x32eb   :  { %v4612_v8 = vmul.f32 %v5467_v4, %v4611_v29 }
0x32ed   :  { %v4613_v42 = vmul.f32 0.5, %v4612_v8 }
0x32ef   :  { %v4614_v27 = vsub.f32 1.5, %v4613_v42 }
0x32f0   :  { %v5469_v60 = vpop.eup %5468 }
0x32f1   :  { %v4615_v59 = vmul.f32 %v5467_v4, %v4614_v27  ;;  %v4621_v46 = vmul.f32 %v5469_v60, %v4589_v63  ;;  %vm4627_vm7 = vweird.f32 %v5469_v60 }
0x32f2   :  { %vm4628_vm11 = vmor %vm4626_vm10, %vm4627_vm7 }
0x32f3   :  { %v4622_v57 = vmul.f32 %v5469_v60, %v4621_v46  ;;  %v4619_v61 = vsel %vm4618_vm6, %v5467_v4, %v4615_v59 }
0x32f4   :  { %v4632_v15 = vmul.f32 %v4619_v61, %v7856_v53 }
0x32f5   :  { %v4623_v5 = vmul.f32 0.5, %v4622_v57 }
0x32f6   :  { %v4636_v7 = vmul.f32 %v5540_v41, %v4632_v15 }
0x32f7   :  { %v4624_v47 = vsub.f32 1.5, %v4623_v5 }
0x32f8   :  { %v4640_v56 = vadd.f32 %v5541_v49, %v4636_v7 }
0x32f9   :  { %v4625_v34 = vmul.f32 %v5469_v60, %v4624_v47 }
0x32fb   :  { %v4629_v12 = vsel %vm4628_vm11, %v5469_v60, %v4625_v34 }
0x32fc   :  { %v4633_v37 = vmul.f32 %v4629_v12, %v7863_v55 }
0x32fe   :  { %v4637_v16 = vmul.f32 %v5540_v41, %v4633_v37 }
0x3300   :  { %v4641_v44 = vadd.f32 %v5541_v49, %v4637_v16  ;;  %v5543_v16 = vld [vmem:[%s7960_s15] ss:$0 sm:$0xff] }
0x3302   :  { %v4643_v10 = vpack.c.bf16 %v4641_v44, %v4640_v56 }
0x3304   :  { %5052 = vmatmul.msk.bf16.gmra.mxu3 %vm177_vm0, %v4643_v10 }
0x3349   :  { %v4659_v50 = vpop.f32.mrf.mxu3 }
0x334a   :  { %v4660_v62 = vadd.f32 %v5542_v0, %v4659_v50 }
0x334c   :  { %v4673_v53 = vmul.f32 0.044715, %v4660_v62  ;;  %v4669_v2 = vmul.f32 0.5, %v4660_v62 }
0x334e   :  { %v4677_v43 = vmul.f32 %v4673_v53, %v4660_v62 }
0x3350   :  { %v4681_v38 = vmul.f32 %v4677_v43, %v4660_v62 }
0x3351   :  { %v4661_v18 = vpop.f32.mrf.mxu3 }
0x3352   :  { %v4685_v39 = vadd.f32 %v4681_v38, %v4660_v62  ;;  %v4662_v21 = vadd.f32 %v5542_v0, %v4661_v18 }
0x3354   :  { %v4674_v55 = vmul.f32 0.044715, %v4662_v21  ;;  %v4689_v32 = vmul.f32 0.7978846, %v4685_v39  ;;  %v4670_v41 = vmul.f32 0.5, %v4662_v21 }
0x3356   :  { %v4678_v23 = vmul.f32 %v4674_v55, %v4662_v21  ;;  %5470 = vtanh.f32 %v4689_v32 }
0x3358   :  { %v4682_v14 = vmul.f32 %v4678_v23, %v4662_v21 }
0x335a   :  { %v4686_v13 = vadd.f32 %v4682_v14, %v4662_v21 }
0x335c   :  { %v4690_v20 = vmul.f32 0.7978846, %v4686_v13  ;;  %v5471_v24 = vpop.eup %5470 }
0x335d   :  { %v4697_v45 = vadd.f32 1.0, %v5471_v24 }
0x335e   :  { %5472 = vtanh.f32 %v4690_v20 }
0x335f   :  { %v4701_v52 = vmul.f32 %v4697_v45, %v4669_v2 }
0x3364   :  { %v5473_v3 = vpop.eup %5472 }
0x3365   :  { %v4698_v11 = vadd.f32 1.0, %v5473_v3 }
0x3367   :  { %v4702_v36 = vmul.f32 %v4698_v11, %v4670_v41 }
0x3369   :  { %v4705_v49 = vpack.c.bf16 %v4702_v36, %v4701_v52 }
0x336b   :  { %4715 = vmatmul.bf16.vlgmr.msrb.gmra.mxu0 %v4705_v49 }
0x3387   :  { %v4664_v6 = vpop.f32.mrf.mxu3 }
0x3388   :  { %v4665_v25 = vadd.f32 %v5542_v0, %v4664_v6 }
0x338a   :  { %v4675_v40 = vmul.f32 0.044715, %v4665_v25  ;;  %v4671_v57 = vmul.f32 0.5, %v4665_v25 }
0x338c   :  { %v4679_v33 = vmul.f32 %v4675_v40, %v4665_v25 }
0x338e   :  { %v4683_v17 = vmul.f32 %v4679_v33, %v4665_v25 }
0x338f   :  { %v4666_v51 = vpop.f32.mrf.mxu3 }
0x3390   :  { %v4667_v35 = vadd.f32 %v5542_v0, %v4666_v51  ;;  %v4687_v1 = vadd.f32 %v4683_v17, %v4665_v25 }
0x3392   :  { %v4676_v4 = vmul.f32 0.044715, %v4667_v35  ;;  %v4691_v29 = vmul.f32 0.7978846, %v4687_v1  ;;  %v4672_v61 = vmul.f32 0.5, %v4667_v35 }
0x3394   :  { %v4680_v63 = vmul.f32 %v4676_v4, %v4667_v35  ;;  %5474 = vtanh.f32 %v4691_v29 }
0x3396   :  { %v4684_v8 = vmul.f32 %v4680_v63, %v4667_v35 }
0x3398   :  { %v4688_v42 = vadd.f32 %v4684_v8, %v4667_v35 }
0x339a   :  { %v4692_v27 = vmul.f32 0.7978846, %v4688_v42  ;;  %v5475_v60 = vpop.eup %5474 }
0x339b   :  { %v4699_v59 = vadd.f32 1.0, %v5475_v60 }
0x339c   :  { %5476 = vtanh.f32 %v4692_v27 }
0x339d   :  { %v4703_v47 = vmul.f32 %v4699_v59, %v4671_v57 }
0x33a2   :  { %v5477_v46 = vpop.eup %5476 }
0x33a3   :  { %v4700_v5 = vadd.f32 1.0, %v5477_v46 }
0x33a5   :  { %v4704_v15 = vmul.f32 %v4700_v5, %v4672_v61 }
0x33a7   :  { %v4706_v34 = vpack.c.bf16 %v4704_v15, %v4703_v47 }
0x33a9   :  { %4720 = vmatmul.bf16.gmra.mxu0 %v4706_v34 }
0x33e8   :  { %v4716_v12 = vpop.f32.mrf.mxu0 }
0x33e9   :  { %v4717_v10 = vadd.f32 %v5543_v16, %v4716_v12 }
0x33eb   :  { %v4726_v62 = vadd.f32 %v4717_v10, %v7827_v9 }
0x33ed   :  { %v4730_v39 = vsel %vm177_vm0, %v4726_v62, 0.0 }
0x33f0   :  { %v4718_v37 = vpop.f32.mrf.mxu0 }
0x33f1   :  { %v4719_v38 = vadd.f32 %v5543_v16, %v4718_v37 }
0x33f3   :  { %v4727_v21 = vadd.f32 %v4719_v38, %v7832_v19 }
0x3426   :  { %v4721_v7 = vpop.f32.mrf.mxu0 }
0x3427   :  { %v4722_v56 = vadd.f32 %v5543_v16, %v4721_v7 }
0x3429   :  { %v4728_v44 = vadd.f32 %v4722_v56, %v7839_v58  ;;  %v4733_v58 = vsel %vm177_vm0, %v4727_v21, 0.0 }
0x342b   :  { %v4736_v50 = vsel %vm177_vm0, %v4728_v44, 0.0 }
0x342c   :  { %4737 = vadd.xlane.f32.xlu2 %v4736_v50 }
0x342e   :  { %v4723_v0 = vpop.f32.mrf.mxu0 }
0x342f   :  { %v4724_v53 = vadd.f32 %v5543_v16, %v4723_v0 }
0x3431   :  { %v4729_v43 = vadd.f32 %v4724_v53, %v7844_v30 }
0x3433   :  { %v4739_v18 = vsel %vm177_vm0, %v4729_v43, 0.0 }
0x3434   :  { %4740 = vadd.xlane.f32.xlu0 %v4739_v18  ;;  %4731 = vadd.xlane.f32.xlu2 %v4730_v39 }
0x343c   :  { %4734 = vadd.xlane.f32.xlu0 %v4733_v58 }
0x349f   :  { %v4738_v55 = vpop.xlane.xlu2 %4737 }
0x34a0   :  { %v4744_v32 = vmul.f32 %v4738_v55, %v5735_v22  ;;  %v5544_v55 = vld [vmem:[%s8075_s8] ss:$0 sm:$0xff] }
0x34a2   :  { %v4748_v23 = vsub.f32 %v4728_v44, %v4744_v32 }
0x34a4   :  { %v4752_v9 = vmul.f32 %v4748_v23, %v4748_v23 }
0x34a6   :  { %v4760_v14 = vsel %vm177_vm0, %v4752_v9, 0.0 }
0x34a7   :  { %v4741_v30 = vpop.xlane.xlu0 %4740  ;;  %4761 = vadd.xlane.f32.xlu1 %v4760_v14  ;;  %v4732_v13 = vpop.xlane.xlu2 %4731 }
0x34a8   :  { %v4745_v20 = vmul.f32 %v4741_v30, %v5735_v22  ;;  %v4742_v24 = vmul.f32 %v4732_v13, %v5735_v22  ;;  %v4826_v30 = vadd.s32 14, %v8095_v31 }
0x34aa   :  { %v7900_v45 = vsub.f32 %v4729_v43, %v4745_v20  ;;  %v7902_v19 = vsub.f32 %v4726_v62, %v4742_v24  ;;  %v5545_v20 = vld [vmem:[%s7962_s17] ss:$0 sm:$0xff]  ;;  %vm4827_vm11 = vcmp.eq.s32.totalorder %v8125_v28, %v4826_v30 }
0x34ac   :  { %v4753_v3 = vmul.f32 %v7900_v45, %v7900_v45  ;;  %v4750_v2 = vmul.f32 %v7902_v19, %v7902_v19 }
0x34ae   :  { %v4763_v41 = vsel %vm177_vm0, %v4753_v3, 0.0  ;;  %v4754_v11 = vsel %vm177_vm0, %v4750_v2, 0.0 }
0x34af   :  { %v4735_v52 = vpop.xlane.xlu0 %4734  ;;  %4764 = vadd.xlane.f32.xlu2 %v4763_v41  ;;  %4755 = vadd.xlane.f32.xlu0 %v4754_v11 }
0x34b0   :  { %v4743_v36 = vmul.f32 %v4735_v52, %v5735_v22 }
0x34b2   :  { %v7911_v49 = vsub.f32 %v4727_v21, %v4743_v36  ;;  %v5053_v36 = vsel %vm4827_vm11, 1.0, %v8126_v26 }
0x34b4   :  { %v4751_v6 = vmul.f32 %v7911_v49, %v7911_v49 }
0x34b6   :  { %v4757_v25 = vsel %vm177_vm0, %v4751_v6, 0.0 }
0x34b7   :  { %4758 = vadd.xlane.f32.xlu1 %v4757_v25  ;;  %v4830_v25 = vpack.c.bf16 %v5053_v36, %v5053_v36 }
0x351a   :  { %v4762_v40 = vpop.xlane.xlu1 %4761 }
0x351b   :  { %v4768_v33 = vmul.f32 %v4762_v40, %v5735_v22 }
0x351d   :  { %v4772_v17 = vadd.f32 1e-05, %v4768_v33 }
0x351f   :  { %5478 = vrsqrt.f32 %v4772_v17  ;;  %vm4800_vm13 = vweird.f32 %v4772_v17 }
0x3522   :  { %v4756_v51 = vpop.xlane.xlu0 %4755  ;;  %v4765_v35 = vpop.xlane.xlu2 %4764 }
0x3523   :  { %v4766_v1 = vmul.f32 %v4756_v51, %v5735_v22  ;;  %v4769_v4 = vmul.f32 %v4765_v35, %v5735_v22  ;;  %v5546_v51 = vld [vmem:[%s7964_s19] ss:$0 sm:$0xff] }
0x3525   :  { %v5479_v63 = vpop.eup %5478  ;;  %v4770_v29 = vadd.f32 1e-05, %v4766_v1  ;;  %v4773_v8 = vadd.f32 1e-05, %v4769_v4 }
0x3526   :  { %v4795_v42 = vmul.f32 %v5479_v63, %v4772_v17  ;;  %vm4801_vm12 = vweird.f32 %v5479_v63 }
0x3527   :  { %5480 = vrsqrt.f32 %v4770_v29  ;;  %vm4802_vm2 = vmor %vm4800_vm13, %vm4801_vm12  ;;  %vm4810_vm3 = vweird.f32 %v4773_v8  ;;  %vm4780_vm14 = vweird.f32 %v4770_v29  ;;  %vm4879_vm13 = vcmask 25600  }
0x3528   :  { %v4796_v27 = vmul.f32 %v5479_v63, %v4795_v42  ;;  %5482 = vrsqrt.f32 %v4773_v8 }
0x352a   :  { %v4797_v60 = vmul.f32 0.5, %v4796_v27  ;;  %v4759_v59 = vpop.xlane.xlu1 %4758 }
0x352b   :  { %v4767_v46 = vmul.f32 %v4759_v59, %v5735_v22 }
0x352c   :  { %v4798_v57 = vsub.f32 1.5, %v4797_v60 }
0x352d   :  { %v5481_v61 = vpop.eup %5480  ;;  %v4771_v5 = vadd.f32 1e-05, %v4767_v46 }
0x352e   :  { %v5483_v47 = vpop.eup %5482  ;;  %v4775_v15 = vmul.f32 %v5481_v61, %v4770_v29  ;;  %v4799_v34 = vmul.f32 %v5479_v63, %v4798_v57  ;;  %vm4781_vm9 = vweird.f32 %v5481_v61 }
0x352f   :  { %v4805_v12 = vmul.f32 %v5483_v47, %v4773_v8  ;;  %5484 = vrsqrt.f32 %v4771_v5  ;;  %vm4811_vm8 = vweird.f32 %v5483_v47  ;;  %vm4782_vm5 = vmor %vm4780_vm14, %vm4781_vm9  ;;  %vm4790_vm7 = vweird.f32 %v4771_v5 }
0x3530   :  { %v4776_v37 = vmul.f32 %v5481_v61, %v4775_v15  ;;  %v4803_v56 = vsel %vm4802_vm2, %v5479_v63, %v4799_v34  ;;  %vm4812_vm4 = vmor %vm4810_vm3, %vm4811_vm8 }
0x3531   :  { %v4806_v7 = vmul.f32 %v5483_v47, %v4805_v12  ;;  %v4816_v22 = vmul.f32 %v4803_v56, %v4748_v23 }
0x3532   :  { %v4777_v16 = vmul.f32 0.5, %v4776_v37 }
0x3533   :  { %v4807_v44 = vmul.f32 0.5, %v4806_v7  ;;  %v4820_v32 = vmul.f32 %v5544_v55, %v4816_v22 }
0x3534   :  { %v4778_v10 = vsub.f32 1.5, %v4777_v16 }
0x3535   :  { %v5485_v50 = vpop.eup %5484  ;;  %v4808_v0 = vsub.f32 1.5, %v4807_v44  ;;  %v4824_v24 = vadd.f32 %v5545_v20, %v4820_v32 }
0x3536   :  { %v4779_v62 = vmul.f32 %v5481_v61, %v4778_v10  ;;  %v4785_v53 = vmul.f32 %v5485_v50, %v4771_v5  ;;  %vm4791_vm6 = vweird.f32 %v5485_v50 }
0x3537   :  { %v4809_v43 = vmul.f32 %v5483_v47, %v4808_v0  ;;  %vm4792_vm10 = vmor %vm4790_vm7, %vm4791_vm6 }
0x3538   :  { %v4786_v38 = vmul.f32 %v5485_v50, %v4785_v53  ;;  %v4783_v39 = vsel %vm4782_vm5, %v5481_v61, %v4779_v62 }
0x3539   :  { %v4813_v18 = vsel %vm4812_vm4, %v5483_v47, %v4809_v43  ;;  %v4814_v14 = vmul.f32 %v4783_v39, %v7902_v19 }
0x353a   :  { %v4817_v21 = vmul.f32 %v4813_v18, %v7900_v45  ;;  %v4787_v58 = vmul.f32 0.5, %v4786_v38 }
0x353b   :  { %v4818_v11 = vmul.f32 %v5544_v55, %v4814_v14 }
0x353c   :  { %v4788_v23 = vsub.f32 1.5, %v4787_v58  ;;  %v4821_v9 = vmul.f32 %v5544_v55, %v4817_v21 }
0x353d   :  { %v4822_v52 = vadd.f32 %v5545_v20, %v4818_v11 }
0x353e   :  { %v4789_v13 = vmul.f32 %v5485_v50, %v4788_v23  ;;  %v4825_v45 = vadd.f32 %v5545_v20, %v4821_v9 }
0x3540   :  { %v4793_v3 = vsel %vm4792_vm10, %v5485_v50, %v4789_v13  ;;  %v4832_v2 = vpack.c.bf16 %v4825_v45, %v4824_v24 }
0x3541   :  { %v4815_v41 = vmul.f32 %v4793_v3, %v7911_v49 }
0x3542   :  { %4842 = vmatpush.bf16.msrb.mxu1 %v4832_v2 }
0x3543   :  { %v4819_v19 = vmul.f32 %v5544_v55, %v4815_v41 }
0x3545   :  { %v4823_v31 = vadd.f32 %v5545_v20, %v4819_v19 }
0x3547   :  { %v4831_v6 = vpack.c.bf16 %v4823_v31, %v4822_v52 }
0x3549   :  { %4843 = vmatpush.bf16.msrb.mxu1 %v4831_v6 }
0x354c   :  { %5054 = vmatmul.msk.bf16.vlgmr.msrb.gmra.mxu1 %vm403_vm1, %v4830_v25  ;;  %vm4875_vm1 = vcmp.eq.s32.totalorder %v8125_v28, 3 }
0x35c9   :  { %v4845_v40 = vpop.f32.mrf.mxu1 }
0x35ca   :  { %v4849_v33 = vpack.c.bf16 %v4845_v40, %v4845_v40 }
0x35cc   :  { %5055 = vmatmul.msk.bf16.vlgmr.msra.gmra.mxu2 %vm177_vm0, %v4849_v33 }
0x35d1   :  { %v4847_v17 = vpop.f32.mrf.mxu1 }
0x364f   :  { %v4862_v49 = vpop.f32.mrf.mxu2 }
0x3650   :  { %v4863_v35 = vadd.f32 %v5546_v51, %v4862_v49 }
0x3652   :  { %v4866_v1 = vsel %vm1340_vm15, %v4863_v35, -inf }
0x3653   :  { %4867 = vmax.xlane.f32.xlu2 %v4866_v1 }
0x3657   :  { %v4864_v26 = vpop.f32.mrf.mxu2 }
0x36c6   :  { %v4868_v4 = vpop.xlane.xlu2 %4867 }
0x36c7   :  { %vm4869_vm12 = vcmp.ge.f32.partialorder %v4863_v35, %v4868_v4 }
0x36c8   :  { %v4870_v63 = vsel %vm4869_vm12, %v8127_v48, 128.0 }
0x36c9   :  { %v4871_v29 = vsel %vm1340_vm15, %v4870_v63, inf }
0x36ca   :  { %4872 = vmin.xlane.f32.xlu0 %v4871_v29 }
0x373d   :  { %v4873_v8 = vpop.xlane.xlu0 %4872 }
0x373e   :  { %vm5073_vm0 = vcmp.lt.s32.totalorder %v4873_v8, 0  ;;  %v5074_v42 = vceil.f32 %v4873_v8  ;;  %v5075_v27 = vfloor.f32 %v4873_v8 }
0x3740   :  { %v5076_v60 = vsel %vm5073_vm0, %v5074_v42, %v5075_v27 }
0x3741   :  { %v5077_v59 = vcvt.f32.s32 %v5076_v60 }
0x3743   :  { %v4878_v48 = vsel %vm4875_vm1, %v5077_v59, %v7490_v54 }
0x3744   :  { %4880 = vst.msk [vmem:[#allocation2] sm:$0x3] %vm4879_vm13, %v4878_v48 }
0x3745   :  { %4891 = dma.vmem_to_hbm [thread:$0]  %s4887_s20, 32, %s4889_s4, [#allocation3]  }
0x3746   :  { %5571 = dma.done.wait [#allocation3], 32  }
0x3747   :  { %5572 = vsyncadd [#allocation3], 4294967264 }
0x3748   :  { %4896 = vsyncpa [#allocation3], 1 }

</bundles_post_ra>
